<compile_context>
chip_gen: v6e
topology: v6e:2x2x1
jax: 0.10.0
libtpu: 0.0.40
codegen_flags: <defaults>
</compile_context>

<pallas_src>
import functools
import math

import jax
import jax.numpy as jnp
from jax.experimental import pallas as pl
from jax.experimental.pallas import tpu as pltpu

_GROUPS = 32
_EPS = 1e-6
_ACT_DTYPE = jnp.bfloat16            # inter-layer activation storage dtype
_CIN_PAD = 16                        # conv_in channel padding (bf16 sublane tile)
_VMEM_LIMIT = 32 * 1024 * 1024


# -----------------------------------------------------------------------------
# Small helpers (used inside kernels)
# -----------------------------------------------------------------------------
def _silu(v):
    # exp(-v) -> inf for very negative v still yields 0 after the divide.
    return v * (1.0 / (1.0 + jnp.exp(-v)))


def _group_avg_matrix(c, groups):
    cpg = c // groups
    gid = jnp.arange(c) // cpg
    return (gid[:, None] == gid[None, :]).astype(jnp.float32) / float(cpg)


def _shift_flat(a, s):
    """out[:, i] = a[:, i + s] for 0 <= i + s < HW, else 0 (s is a static int).

    Implemented as an aligned lane concat with a zero block plus a static
    slice, so no roll-direction ambiguity and no unaligned concat operands.
    """
    if s == 0:
        return a
    c, hw = a.shape
    zw = max(128, -(-abs(s) // 128) * 128)
    z = jnp.zeros((c, zw), a.dtype)
    if s > 0:
        buf = jnp.concatenate([a, z], axis=1)
        return buf[:, s:s + hw]
    buf = jnp.concatenate([z, a], axis=1)
    return buf[:, zw + s:zw + s + hw]


def _group_norm_t(x, gamma, beta, gmat, eps):
    """GroupNorm on x of shape (C, HW): channels on sublanes, spatial on lanes."""
    gm = jnp.mean(jnp.dot(gmat, x, preferred_element_type=jnp.float32),
                  axis=1, keepdims=True)                       # per-channel group mean
    xc = x - gm
    gv = jnp.mean(jnp.dot(gmat, xc * xc, preferred_element_type=jnp.float32),
                  axis=1, keepdims=True)                       # per-channel group var
    return xc * jax.lax.rsqrt(gv + eps) * gamma + beta


def _conv3x3_t(a, w_ref, bias, w_px, mask0, mask_last):
    """3x3 'same' conv on an activated input `a` of shape (Cin, HW), f32.

    w_ref : (3, Cout, 3*Cin) bf16, index 0/1/2 <-> dh = -1/0/+1; within the
            last dim the three Cin blocks are dw = -1/0/+1.
    mask0 / mask_last: (1, HW) f32 masks zeroing columns w == 0 / w == W-1.
    """
    a_bf = a.astype(jnp.bfloat16)
    # column (+-1) taps: mask the wrap-around column, then lane-shift.
    a_p1 = _shift_flat((a * mask0).astype(jnp.bfloat16), 1)        # dw = +1
    a_m1 = _shift_flat((a * mask_last).astype(jnp.bfloat16), -1)   # dw = -1
    x3 = jnp.concatenate([a_m1, a_bf, a_p1], axis=0)               # (3*Cin, HW)
    y = None
    for i, dh in enumerate((-1, 0, 1)):
        ydh = jnp.dot(w_ref[i], x3, preferred_element_type=jnp.float32)
        ydh = _shift_flat(ydh, dh * w_px)                          # row (+-1) taps
        y = ydh if y is None else y + ydh
    return y + bias


# -----------------------------------------------------------------------------
# Kernel 1: single [GroupNorm -> SiLU ->] 3x3 conv     (conv_in / conv_out)
# -----------------------------------------------------------------------------
def _single_conv_kernel(*refs, eps, w_px, apply_gn):
    if apply_gn:
        x_ref, m_ref, w_ref, b_ref, g_ref, be_ref, gmat_ref, o_ref = refs
    else:
        x_ref, m_ref, w_ref, b_ref, o_ref = refs

    x = x_ref[0].astype(jnp.float32)                 # (Cin, HW)
    mask0, mask_last = m_ref[0], m_ref[1]            # (1, HW) each
    if apply_gn:
        x = _silu(_group_norm_t(x, g_ref[...], be_ref[...], gmat_ref[...], eps))
    y = _conv3x3_t(x, w_ref, b_ref[...], w_px, mask0, mask_last)
    o_ref[0] = y.astype(o_ref.dtype)


# -----------------------------------------------------------------------------
# Kernel 2: fully fused ResnetBlock2D
#           GN -> SiLU -> conv1 -> GN -> SiLU -> conv2 -> + residual
# -----------------------------------------------------------------------------
def _resnet_kernel(x_ref, m_ref, w1_ref, b1_ref, g1_ref, be1_ref,
                   w2_ref, b2_ref, g2_ref, be2_ref, gmat_ref, o_ref,
                   *, eps, w_px):
    x = x_ref[0].astype(jnp.float32)                 # (C, HW), also the residual
    mask0, mask_last = m_ref[0], m_ref[1]
    gmat = gmat_ref[...]
    h = _silu(_group_norm_t(x, g1_ref[...], be1_ref[...], gmat, eps))
    t = _conv3x3_t(h, w1_ref, b1_ref[...], w_px, mask0, mask_last)
    h2 = _silu(_group_norm_t(t, g2_ref[...], be2_ref[...], gmat, eps))
    y = _conv3x3_t(h2, w2_ref, b2_ref[...], w_px, mask0, mask_last) + x
    o_ref[0] = y.astype(o_ref.dtype)


# -----------------------------------------------------------------------------
# Kernel 3: AttentionBlock (GroupNorm + single-head attention + proj + residual)
# -----------------------------------------------------------------------------
def _attention_kernel(x_ref, g_ref, be_ref, gmat_ref,
                      wq_ref, bq_ref, wk_ref, bk_ref, wv_ref, bv_ref,
                      wp_ref, bp_ref, o_ref, *, eps, scale):
    f32 = jnp.float32
    bf16 = jnp.bfloat16
    x = x_ref[0].astype(f32)                                         # (C, HW)
    hn = _group_norm_t(x, g_ref[...], be_ref[...], gmat_ref[...], eps)
    hb = jnp.transpose(hn).astype(bf16)                              # (HW, C) tokens

    q = jnp.dot(hb, wq_ref[...], preferred_element_type=f32) + bq_ref[...]
    k = jnp.dot(hb, wk_ref[...], preferred_element_type=f32) + bk_ref[...]
    v = jnp.dot(hb, wv_ref[...], preferred_element_type=f32) + bv_ref[...]

    scores = jax.lax.dot_general(
        q.astype(bf16), k.astype(bf16), (((1,), (1,)), ((), ())),
        preferred_element_type=f32) * scale                          # (HW, HW)
    m = jnp.max(scores, axis=-1, keepdims=True)
    p = jnp.exp(scores - m)
    probs = p * pl.reciprocal(jnp.sum(p, axis=-1, keepdims=True), approx=True)

    attn = jnp.dot(probs.astype(bf16), v.astype(bf16),
                   preferred_element_type=f32)                       # (HW, C)
    out_tok = jnp.dot(attn.astype(bf16), wp_ref[...],
                      preferred_element_type=f32) + bp_ref[...]      # (HW, C)
    out = jnp.transpose(out_tok) + x                                 # residual
    o_ref[0] = out.astype(o_ref.dtype)


# -----------------------------------------------------------------------------
# Wrappers
# -----------------------------------------------------------------------------
def _bcast_spec(shape):
    nd = len(shape)
    return pl.BlockSpec(shape, lambda n, _nd=nd: (0,) * _nd)


def _compiler_params():
    return pltpu.CompilerParams(dimension_semantics=("parallel",),
                                vmem_limit_bytes=_VMEM_LIMIT)


def _pack_conv_w(w_oihw, cin_pad=None):
    """(Cout, Cin, 3, 3) -> (3, Cout, 3*Cin) bf16: packed[kh][co, kw*Cin+ci]."""
    co, ci = w_oihw.shape[0], w_oihw.shape[1]
    if cin_pad is not None and cin_pad > ci:
        w_oihw = jnp.pad(w_oihw, ((0, 0), (0, cin_pad - ci), (0, 0), (0, 0)))
        ci = cin_pad
    w = jnp.transpose(w_oihw, (2, 0, 3, 1))          # (kh, Cout, kw, Cin)
    return w.reshape(3, co, 3 * ci).astype(jnp.bfloat16)


def _col_mask_array(h, w):
    """(2, 1, H*W) f32: row 0 zeroes columns w==0, row 1 zeroes columns w==W-1."""
    w_idx = jnp.tile(jnp.arange(w), (h,))
    mask0 = (w_idx != 0)
    mask_last = (w_idx != w - 1)
    return jnp.stack([mask0, mask_last]).astype(jnp.float32).reshape(2, 1, h * w)


def _single_conv(x, masks, w_pack, b, gamma=None, beta=None, gmat=None, *,
                 w_px, out_dtype, eps=_EPS):
    n, cin, hw = x.shape
    cout = w_pack.shape[1]
    apply_gn = gamma is not None
    kernel = functools.partial(_single_conv_kernel, eps=float(eps),
                               w_px=w_px, apply_gn=apply_gn)

    in_specs = [pl.BlockSpec((1, cin, hw), lambda n_: (n_, 0, 0)),
                _bcast_spec(masks.shape),
                _bcast_spec(w_pack.shape),
                _bcast_spec((cout, 1))]
    args = [x, masks, w_pack, b.reshape(cout, 1).astype(jnp.float32)]
    if apply_gn:
        in_specs += [_bcast_spec((cin, 1)), _bcast_spec((cin, 1)),
                     _bcast_spec((cin, cin))]
        args += [gamma.reshape(cin, 1).astype(jnp.float32),
                 beta.reshape(cin, 1).astype(jnp.float32), gmat]

    return pl.pallas_call(
        kernel,
        out_shape=jax.ShapeDtypeStruct((n, cout, hw), out_dtype),
        grid_spec=pltpu.PrefetchScalarGridSpec(
            num_scalar_prefetch=0, grid=(n,),
            in_specs=in_specs,
            out_specs=pl.BlockSpec((1, cout, hw), lambda n_: (n_, 0, 0))),
        compiler_params=_compiler_params(),
    )(*args)


def _resnet_block(x, masks, p, gmat, *, w_px, eps=_EPS):
    n, c, hw = x.shape
    kernel = functools.partial(_resnet_kernel, eps=float(eps), w_px=w_px)
    vec = lambda a: a.reshape(c, 1).astype(jnp.float32)
    w1 = _pack_conv_w(p["conv1_w"])
    w2 = _pack_conv_w(p["conv2_w"])

    in_specs = [pl.BlockSpec((1, c, hw), lambda n_: (n_, 0, 0)),
                _bcast_spec(masks.shape),
                _bcast_spec(w1.shape), _bcast_spec((c, 1)),
                _bcast_spec((c, 1)), _bcast_spec((c, 1)),
                _bcast_spec(w2.shape), _bcast_spec((c, 1)),
                _bcast_spec((c, 1)), _bcast_spec((c, 1)),
                _bcast_spec((c, c))]
    args = [x, masks,
            w1, vec(p["conv1_b"]), vec(p["norm1_g"]), vec(p["norm1_b"]),
            w2, vec(p["conv2_b"]), vec(p["norm2_g"]), vec(p["norm2_b"]), gmat]

    return pl.pallas_call(
        kernel,
        out_shape=jax.ShapeDtypeStruct((n, c, hw), _ACT_DTYPE),
        grid_spec=pltpu.PrefetchScalarGridSpec(
            num_scalar_prefetch=0, grid=(n,),
            in_specs=in_specs,
            out_specs=pl.BlockSpec((1, c, hw), lambda n_: (n_, 0, 0))),
        compiler_params=_compiler_params(),
    )(*args)


def _attention_block(x, p, gmat, *, eps=_EPS):
    n, c, hw = x.shape
    kernel = functools.partial(_attention_kernel, eps=float(eps),
                               scale=1.0 / math.sqrt(c))
    colv = lambda a: a.reshape(c, 1).astype(jnp.float32)      # GN params (C, 1)
    rowv = lambda a: a.reshape(1, c).astype(jnp.float32)      # biases    (1, C)
    mat = lambda a: jnp.transpose(a).astype(jnp.bfloat16)     # (out,in) -> (in,out)

    in_specs = [pl.BlockSpec((1, c, hw), lambda n_: (n_, 0, 0)),
                _bcast_spec((c, 1)), _bcast_spec((c, 1)), _bcast_spec((c, c)),
                _bcast_spec((c, c)), _bcast_spec((1, c)),
                _bcast_spec((c, c)), _bcast_spec((1, c)),
                _bcast_spec((c, c)), _bcast_spec((1, c)),
                _bcast_spec((c, c)), _bcast_spec((1, c))]
    args = [x, colv(p["gn_g"]), colv(p["gn_b"]), gmat,
            mat(p["wq"]), rowv(p["bq"]), mat(p["wk"]), rowv(p["bk"]),
            mat(p["wv"]), rowv(p["bv"]), mat(p["wp"]), rowv(p["bp"])]

    return pl.pallas_call(
        kernel,
        out_shape=jax.ShapeDtypeStruct((n, c, hw), _ACT_DTYPE),
        grid_spec=pltpu.PrefetchScalarGridSpec(
            num_scalar_prefetch=0, grid=(n,),
            in_specs=in_specs,
            out_specs=pl.BlockSpec((1, c, hw), lambda n_: (n_, 0, 0))),
        compiler_params=_compiler_params(),
    )(*args)


# -----------------------------------------------------------------------------
# Encoder forward (composition of the three kernels)
# -----------------------------------------------------------------------------
def encoder_forward(x_nchw, params, *, groups=_GROUPS, eps=_EPS):
    """Encoder.forward (default config).  NCHW in / NCHW out, like PyTorch."""
    n, cin, h, w = x_nchw.shape
    hw = h * w
    c = params["conv_in_w"].shape[0]
    gmat = _group_avg_matrix(c, groups)
    masks = _col_mask_array(h, w)

    # NCHW -> (N, C, H*W): free reshape, the kernels run entirely in this layout.
    x = x_nchw.reshape(n, cin, hw).astype(jnp.float32)
    x = jnp.pad(x, ((0, 0), (0, _CIN_PAD - cin), (0, 0)))

    w_in = _pack_conv_w(params["conv_in_w"], cin_pad=_CIN_PAD)
    hdn = _single_conv(x, masks, w_in, params["conv_in_b"],
                       w_px=w, out_dtype=_ACT_DTYPE, eps=eps)     # conv_in 3->64

    for rp in params["down_resnets"]:                             # DownEncoderBlock2D
        hdn = _resnet_block(hdn, masks, rp, gmat, w_px=w, eps=eps)
    hdn = _resnet_block(hdn, masks, params["mid_resnet1"], gmat, w_px=w, eps=eps)
    hdn = _attention_block(hdn, params["attn"], gmat, eps=eps)
    hdn = _resnet_block(hdn, masks, params["mid_resnet2"], gmat, w_px=w, eps=eps)

    w_out = _pack_conv_w(params["conv_out_w"])
    out = _single_conv(hdn, masks, w_out, params["conv_out_b"],
                       gamma=params["norm_out_g"], beta=params["norm_out_b"],
                       gmat=gmat, w_px=w, out_dtype=jnp.float32, eps=eps)
    cout = params["conv_out_w"].shape[0]
    return out.reshape(n, cout, h, w)                             # NCHW, free reshape


# -----------------------------------------------------------------------------
# Pure-JAX reference (mirrors the PyTorch module, NCHW) for the sanity check
# -----------------------------------------------------------------------------
def _ref_groupnorm(x, gamma, beta, groups, eps):
    n, c, h, w = x.shape
    xg = x.reshape(n, groups, c // groups, h, w)
    mean = jnp.mean(xg, axis=(2, 3, 4), keepdims=True)
    var = jnp.mean(jnp.square(xg - mean), axis=(2, 3, 4), keepdims=True)
    xn = ((xg - mean) * jax.lax.rsqrt(var + eps)).reshape(n, c, h, w)
    return xn * gamma[None, :, None, None] + beta[None, :, None, None]


def _ref_conv3x3(x, w, b):
    y = jax.lax.conv_general_dilated(
        x, w, window_strides=(1, 1), padding=((1, 1), (1, 1)),
        dimension_numbers=("NCHW", "OIHW", "NCHW"))
    return y + b[None, :, None, None]


def _ref_resnet(x, p, groups, eps):
    h = _silu(_ref_groupnorm(x, p["norm1_g"], p["norm1_b"], groups, eps))
    h = _ref_conv3x3(h, p["conv1_w"], p["conv1_b"])
    h = _silu(_ref_groupnorm(h, p["norm2_g"], p["norm2_b"], groups, eps))
    h = _ref_conv3x3(h, p["conv2_w"], p["conv2_b"])
    return x + h


def _ref_attention(x, p, groups, eps):
    n, c, h, w = x.shape
    res = x
    hs = _ref_groupnorm(x, p["gn_g"], p["gn_b"], groups, eps)
    hs = hs.reshape(n, c, h * w).transpose(0, 2, 1)
    q = jnp.einsum("nlc,oc->nlo", hs, p["wq"]) + p["bq"]
    k = jnp.einsum("nlc,oc->nlo", hs, p["wk"]) + p["bk"]
    v = jnp.einsum("nlc,oc->nlo", hs, p["wv"]) + p["bv"]
    scores = jnp.einsum("nqc,nkc->nqk", q, k) * (1.0 / math.sqrt(c))
    probs = jax.nn.softmax(scores, axis=-1)
    o = jnp.einsum("nqk,nkc->nqc", probs, v)
    o = jnp.einsum("nlc,oc->nlo", o, p["wp"]) + p["bp"]
    o = o.transpose(0, 2, 1).reshape(n, c, h, w)
    return o + res


def encoder_reference(x, params, *, groups=_GROUPS, eps=_EPS):
    h = _ref_conv3x3(x, params["conv_in_w"], params["conv_in_b"])
    for rp in params["down_resnets"]:
        h = _ref_resnet(h, rp, groups, eps)
    h = _ref_resnet(h, params["mid_resnet1"], groups, eps)
    h = _ref_attention(h, params["attn"], groups, eps)
    h = _ref_resnet(h, params["mid_resnet2"], groups, eps)
    h = _silu(_ref_groupnorm(h, params["norm_out_g"], params["norm_out_b"],
                             groups, eps))
    return _ref_conv3x3(h, params["conv_out_w"], params["conv_out_b"])


# -----------------------------------------------------------------------------
# Deterministic synthetic parameters (matching the default Encoder config)
# -----------------------------------------------------------------------------
def init_encoder_params(key, in_channels=3, block_channels=64, out_channels=3,
                        layers_per_block=2, double_z=True):
    it = iter(jax.random.split(key, 64))

    def nrm(shape, s):
        return jax.random.normal(next(it), shape, jnp.float32) * s

    def conv_p(ci, co):
        return nrm((co, ci, 3, 3), 0.1), nrm((co,), 0.05)

    def gn_p(c):
        return 1.0 + nrm((c,), 0.1), nrm((c,), 0.05)

    def resnet_p(c):
        g1, b1 = gn_p(c)
        w1, cb1 = conv_p(c, c)
        g2, b2 = gn_p(c)
        w2, cb2 = conv_p(c, c)
        return dict(norm1_g=g1, norm1_b=b1, conv1_w=w1, conv1_b=cb1,
                    norm2_g=g2, norm2_b=b2, conv2_w=w2, conv2_b=cb2)

    c = block_channels
    conv_in_w, conv_in_b = conv_p(in_channels, c)
    down_resnets = [resnet_p(c) for _ in range(layers_per_block)]
    mid_resnet1 = resnet_p(c)
    attn_g, attn_b = gn_p(c)
    attn = dict(gn_g=attn_g, gn_b=attn_b,
                wq=nrm((c, c), 0.1), bq=nrm((c,), 0.05),
                wk=nrm((c, c), 0.1), bk=nrm((c,), 0.05),
                wv=nrm((c, c), 0.1), bv=nrm((c,), 0.05),
                wp=nrm((c, c), 0.1), bp=nrm((c,), 0.05))
    mid_resnet2 = resnet_p(c)
    norm_out_g, norm_out_b = gn_p(c)
    co = 2 * out_channels if double_z else out_channels
    conv_out_w, conv_out_b = conv_p(c, co)
    return dict(conv_in_w=conv_in_w, conv_in_b=conv_in_b,
                down_resnets=down_resnets,
                mid_resnet1=mid_resnet1, attn=attn, mid_resnet2=mid_resnet2,
                norm_out_g=norm_out_g, norm_out_b=norm_out_b,
                conv_out_w=conv_out_w, conv_out_b=conv_out_b)


if __name__ == "__main__":
    N, Cin, H, W = 2, 3, 16, 16
    key = jax.random.PRNGKey(0)
    kx, kp = jax.random.split(key)
    x = jax.random.normal(kx, (N, Cin, H, W), dtype=jnp.float32)
    params = init_encoder_params(kp)

    fwd = jax.jit(encoder_forward)
    out = jax.block_until_ready(fwd(x, params))
    assert out.shape == (N, 6, H, W), out.shape

    ref = encoder_reference(x, params)
    rel_err = float(jnp.linalg.norm(out - ref) / jnp.linalg.norm(ref))
    # bf16 activations / bf16 matmul operands through ~12 layers: expect <~1%.
    assert rel_err < 5e-2, f"relative L2 error too high: {rel_err}"

    print("KERNEL_OK")
</pallas_src>

<mosaic_0001>
module attributes {stable_mosaic.version = 11 : i64} {
  func.func @_single_conv_kernel(%arg0: i32, %arg1: memref<1x16x256xf32, #tpu.memory_space<vmem>>, %arg2: memref<2x1x256xf32, #tpu.memory_space<vmem>>, %arg3: memref<3x64x48xbf16, #tpu.memory_space<vmem>>, %arg4: memref<64x1xf32, #tpu.memory_space<vmem>>, %arg5: memref<1x64x256xbf16, #tpu.memory_space<vmem>>) attributes {dimension_semantics = [#tpu.dimension_semantics<parallel>], iteration_bounds = array<i64: 2>, scalar_prefetch = 0 : i64, scratch_operands = 0 : i64, tpu.core_type = #tpu.core_type<tc>, window_params = [{transform_indices = @transform_0, window_bounds = array<i64: 1, 16, 256>}, {pipeline_mode = #tpu.pipeline_mode<synchronous>, transform_indices = @transform_1, window_bounds = array<i64: 2, 1, 256>}, {pipeline_mode = #tpu.pipeline_mode<synchronous>, transform_indices = @transform_2, window_bounds = array<i64: 3, 64, 48>}, {pipeline_mode = #tpu.pipeline_mode<synchronous>, transform_indices = @transform_3, window_bounds = array<i64: 64, 1>}, {transform_indices = @transform_4, window_bounds = array<i64: 1, 64, 256>}]} {
    %c0 = arith.constant 0 : index
    %c0_0 = arith.constant 0 : index
    %c0_1 = arith.constant 0 : index
    %0 = vector.load %arg1[%c0, %c0_0, %c0_1] : memref<1x16x256xf32, #tpu.memory_space<vmem>>, vector<1x16x256xf32>
    %1 = vector.shape_cast %0 : vector<1x16x256xf32> to vector<16x256xf32>
    %c0_2 = arith.constant 0 : index
    %c0_3 = arith.constant 0 : index
    %c0_4 = arith.constant 0 : index
    %2 = vector.load %arg2[%c0_2, %c0_3, %c0_4] : memref<2x1x256xf32, #tpu.memory_space<vmem>>, vector<1x1x256xf32>
    %3 = vector.shape_cast %2 : vector<1x1x256xf32> to vector<1x256xf32>
    %c1 = arith.constant 1 : index
    %c0_5 = arith.constant 0 : index
    %c0_6 = arith.constant 0 : index
    %4 = vector.load %arg2[%c1, %c0_5, %c0_6] : memref<2x1x256xf32, #tpu.memory_space<vmem>>, vector<1x1x256xf32>
    %5 = vector.shape_cast %4 : vector<1x1x256xf32> to vector<1x256xf32>
    %c0_7 = arith.constant 0 : index
    %c0_8 = arith.constant 0 : index
    %6 = vector.load %arg4[%c0_7, %c0_8] : memref<64x1xf32, #tpu.memory_space<vmem>>, vector<64x1xf32>
    %7 = arith.truncf %1 : vector<16x256xf32> to vector<16x256xbf16>
    %8 = vector.broadcast %3 : vector<1x256xf32> to vector<16x256xf32>
    %9 = arith.mulf %1, %8 : vector<16x256xf32>
    %10 = arith.truncf %9 : vector<16x256xf32> to vector<16x256xbf16>
    %cst = arith.constant 0.000000e+00 : bf16
    %11 = vector.broadcast %cst : bf16 to vector<16x128xbf16>
    %12 = tpu.concatenate %10, %11 in 1 : vector<16x256xbf16>, vector<16x128xbf16> -> vector<16x384xbf16>
    %13 = vector.extract_strided_slice %12 {offsets = [0, 1], sizes = [16, 256], strides = [1, 1]} : vector<16x384xbf16> to vector<16x256xbf16>
    %14 = vector.broadcast %5 : vector<1x256xf32> to vector<16x256xf32>
    %15 = arith.mulf %1, %14 : vector<16x256xf32>
    %16 = arith.truncf %15 : vector<16x256xf32> to vector<16x256xbf16>
    %cst_9 = arith.constant 0.000000e+00 : bf16
    %17 = vector.broadcast %cst_9 : bf16 to vector<16x128xbf16>
    %18 = tpu.concatenate %17, %16 in 1 : vector<16x128xbf16>, vector<16x256xbf16> -> vector<16x384xbf16>
    %19 = vector.extract_strided_slice %18 {offsets = [0, 127], sizes = [16, 256], strides = [1, 1]} : vector<16x384xbf16> to vector<16x256xbf16>
    %20 = tpu.concatenate %19, %7, %13 in 0 : vector<16x256xbf16>, vector<16x256xbf16>, vector<16x256xbf16> -> vector<48x256xbf16>
    %c0_10 = arith.constant 0 : index
    %c0_11 = arith.constant 0 : index
    %c0_12 = arith.constant 0 : index
    %21 = vector.load %arg3[%c0_10, %c0_11, %c0_12] : memref<3x64x48xbf16, #tpu.memory_space<vmem>>, vector<1x64x48xbf16>
    %22 = vector.shape_cast %21 : vector<1x64x48xbf16> to vector<64x48xbf16>
    %cst_13 = arith.constant dense<0.000000e+00> : vector<64x256xf32>
    %23 = tpu.matmul %22, %20, %cst_13 {dimension_numbers = #tpu.dot_dimension_numbers<[1], [0], [0], [1], [0, 0, 1, 1], [], []>} : vector<64x48xbf16>, vector<48x256xbf16>, vector<64x256xf32> -> vector<64x256xf32>
    %cst_14 = arith.constant 0.000000e+00 : f32
    %24 = vector.broadcast %cst_14 : f32 to vector<64x128xf32>
    %25 = tpu.concatenate %24, %23 in 1 : vector<64x128xf32>, vector<64x256xf32> -> vector<64x384xf32>
    %26 = vector.extract_strided_slice %25 {offsets = [0, 112], sizes = [64, 256], strides = [1, 1]} : vector<64x384xf32> to vector<64x256xf32>
    %c1_15 = arith.constant 1 : index
    %c0_16 = arith.constant 0 : index
    %c0_17 = arith.constant 0 : index
    %27 = vector.load %arg3[%c1_15, %c0_16, %c0_17] : memref<3x64x48xbf16, #tpu.memory_space<vmem>>, vector<1x64x48xbf16>
    %28 = vector.shape_cast %27 : vector<1x64x48xbf16> to vector<64x48xbf16>
    %cst_18 = arith.constant dense<0.000000e+00> : vector<64x256xf32>
    %29 = tpu.matmul %28, %20, %cst_18 {dimension_numbers = #tpu.dot_dimension_numbers<[1], [0], [0], [1], [0, 0, 1, 1], [], []>} : vector<64x48xbf16>, vector<48x256xbf16>, vector<64x256xf32> -> vector<64x256xf32>
    %30 = arith.addf %26, %29 : vector<64x256xf32>
    %c2 = arith.constant 2 : index
    %c0_19 = arith.constant 0 : index
    %c0_20 = arith.constant 0 : index
    %31 = vector.load %arg3[%c2, %c0_19, %c0_20] : memref<3x64x48xbf16, #tpu.memory_space<vmem>>, vector<1x64x48xbf16>
    %32 = vector.shape_cast %31 : vector<1x64x48xbf16> to vector<64x48xbf16>
    %cst_21 = arith.constant dense<0.000000e+00> : vector<64x256xf32>
    %33 = tpu.matmul %32, %20, %cst_21 {dimension_numbers = #tpu.dot_dimension_numbers<[1], [0], [0], [1], [0, 0, 1, 1], [], []>} : vector<64x48xbf16>, vector<48x256xbf16>, vector<64x256xf32> -> vector<64x256xf32>
    %cst_22 = arith.constant 0.000000e+00 : f32
    %34 = vector.broadcast %cst_22 : f32 to vector<64x128xf32>
    %35 = tpu.concatenate %33, %34 in 1 : vector<64x256xf32>, vector<64x128xf32> -> vector<64x384xf32>
    %36 = vector.extract_strided_slice %35 {offsets = [0, 16], sizes = [64, 256], strides = [1, 1]} : vector<64x384xf32> to vector<64x256xf32>
    %37 = arith.addf %30, %36 : vector<64x256xf32>
    %38 = vector.broadcast %6 : vector<64x1xf32> to vector<64x256xf32>
    %39 = arith.addf %37, %38 : vector<64x256xf32>
    %40 = arith.truncf %39 : vector<64x256xf32> to vector<64x256xbf16>
    %c0_23 = arith.constant 0 : index
    %c0_24 = arith.constant 0 : index
    %c0_25 = arith.constant 0 : index
    %41 = vector.load %arg5[%c0_23, %c0_24, %c0_25] : memref<1x64x256xbf16, #tpu.memory_space<vmem>>, vector<1x64x256xbf16>
    %42 = vector.shape_cast %41 : vector<1x64x256xbf16> to vector<64x256xbf16>
    %43 = vector.shape_cast %40 : vector<64x256xbf16> to vector<1x64x256xbf16>
    tpu.vector_store %arg5[%c0_23, %c0_24, %c0_25], %43 {strides = array<i32>} : memref<1x64x256xbf16, #tpu.memory_space<vmem>>, vector<1x64x256xbf16>,
    return
  }
  func.func @transform_0(%arg0: i32) -> (i32, i32, i32) {
    %c0_i32 = arith.constant 0 : i32
    %c0_i32_0 = arith.constant 0 : i32
    %c0_i32_1 = arith.constant 0 : i32
    return %arg0, %c0_i32, %c0_i32_0 : i32, i32, i32
  }
  func.func @transform_1(%arg0: i32) -> (i32, i32, i32) {
    %c0_i32 = arith.constant 0 : i32
    %c0_i32_0 = arith.constant 0 : i32
    %c0_i32_1 = arith.constant 0 : i32
    %c0_i32_2 = arith.constant 0 : i32
    return %c0_i32, %c0_i32_0, %c0_i32_1 : i32, i32, i32
  }
  func.func @transform_2(%arg0: i32) -> (i32, i32, i32) {
    %c0_i32 = arith.constant 0 : i32
    %c0_i32_0 = arith.constant 0 : i32
    %c0_i32_1 = arith.constant 0 : i32
    %c0_i32_2 = arith.constant 0 : i32
    return %c0_i32, %c0_i32_0, %c0_i32_1 : i32, i32, i32
  }
  func.func @transform_3(%arg0: i32) -> (i32, i32) {
    %c0_i32 = arith.constant 0 : i32
    %c0_i32_0 = arith.constant 0 : i32
    %c0_i32_1 = arith.constant 0 : i32
    return %c0_i32, %c0_i32_0 : i32, i32
  }
  func.func @transform_4(%arg0: i32) -> (i32, i32, i32) {
    %c0_i32 = arith.constant 0 : i32
    %c0_i32_0 = arith.constant 0 : i32
    %c0_i32_1 = arith.constant 0 : i32
    return %arg0, %c0_i32, %c0_i32_0 : i32, i32, i32
  }
}

module attributes {stable_mosaic.version = 11 : i64} {
  func.func @_resnet_kernel(%arg0: i32, %arg1: memref<1x64x256xbf16, #tpu.memory_space<vmem>>, %arg2: memref<2x1x256xf32, #tpu.memory_space<vmem>>, %arg3: memref<3x64x192xbf16, #tpu.memory_space<vmem>>, %arg4: memref<64x1xf32, #tpu.memory_space<vmem>>, %arg5: memref<64x1xf32, #tpu.memory_space<vmem>>, %arg6: memref<64x1xf32, #tpu.memory_space<vmem>>, %arg7: memref<3x64x192xbf16, #tpu.memory_space<vmem>>, %arg8: memref<64x1xf32, #tpu.memory_space<vmem>>, %arg9: memref<64x1xf32, #tpu.memory_space<vmem>>, %arg10: memref<64x1xf32, #tpu.memory_space<vmem>>, %arg11: memref<64x64xf32, #tpu.memory_space<vmem>>, %arg12: memref<1x64x256xbf16, #tpu.memory_space<vmem>>) attributes {dimension_semantics = [#tpu.dimension_semantics<parallel>], iteration_bounds = array<i64: 2>, scalar_prefetch = 0 : i64, scratch_operands = 0 : i64, tpu.core_type = #tpu.core_type<tc>, window_params = [{transform_indices = @transform_0, window_bounds = array<i64: 1, 64, 256>}, {pipeline_mode = #tpu.pipeline_mode<synchronous>, transform_indices = @transform_1, window_bounds = array<i64: 2, 1, 256>}, {pipeline_mode = #tpu.pipeline_mode<synchronous>, transform_indices = @transform_2, window_bounds = array<i64: 3, 64, 192>}, {pipeline_mode = #tpu.pipeline_mode<synchronous>, transform_indices = @transform_3, window_bounds = array<i64: 64, 1>}, {pipeline_mode = #tpu.pipeline_mode<synchronous>, transform_indices = @transform_4, window_bounds = array<i64: 64, 1>}, {pipeline_mode = #tpu.pipeline_mode<synchronous>, transform_indices = @transform_5, window_bounds = array<i64: 64, 1>}, {pipeline_mode = #tpu.pipeline_mode<synchronous>, transform_indices = @transform_6, window_bounds = array<i64: 3, 64, 192>}, {pipeline_mode = #tpu.pipeline_mode<synchronous>, transform_indices = @transform_7, window_bounds = array<i64: 64, 1>}, {pipeline_mode = #tpu.pipeline_mode<synchronous>, transform_indices = @transform_8, window_bounds = array<i64: 64, 1>}, {pipeline_mode = #tpu.pipeline_mode<synchronous>, transform_indices = @transform_9, window_bounds = array<i64: 64, 1>}, {pipeline_mode = #tpu.pipeline_mode<synchronous>, transform_indices = @transform_10, window_bounds = array<i64: 64, 64>}, {transform_indices = @transform_11, window_bounds = array<i64: 1, 64, 256>}]} {
    %c0 = arith.constant 0 : index
    %c0_0 = arith.constant 0 : index
    %c0_1 = arith.constant 0 : index
    %0 = vector.load %arg1[%c0, %c0_0, %c0_1] : memref<1x64x256xbf16, #tpu.memory_space<vmem>>, vector<1x64x256xbf16>
    %1 = vector.shape_cast %0 : vector<1x64x256xbf16> to vector<64x256xbf16>
    %2 = arith.extf %1 : vector<64x256xbf16> to vector<64x256xf32>
    %c0_2 = arith.constant 0 : index
    %c0_3 = arith.constant 0 : index
    %c0_4 = arith.constant 0 : index
    %3 = vector.load %arg2[%c0_2, %c0_3, %c0_4] : memref<2x1x256xf32, #tpu.memory_space<vmem>>, vector<1x1x256xf32>
    %4 = vector.shape_cast %3 : vector<1x1x256xf32> to vector<1x256xf32>
    %c1 = arith.constant 1 : index
    %c0_5 = arith.constant 0 : index
    %c0_6 = arith.constant 0 : index
    %5 = vector.load %arg2[%c1, %c0_5, %c0_6] : memref<2x1x256xf32, #tpu.memory_space<vmem>>, vector<1x1x256xf32>
    %6 = vector.shape_cast %5 : vector<1x1x256xf32> to vector<1x256xf32>
    %c0_7 = arith.constant 0 : index
    %c0_8 = arith.constant 0 : index
    %7 = vector.load %arg11[%c0_7, %c0_8] : memref<64x64xf32, #tpu.memory_space<vmem>>, vector<64x64xf32>
    %c0_9 = arith.constant 0 : index
    %c0_10 = arith.constant 0 : index
    %8 = vector.load %arg5[%c0_9, %c0_10] : memref<64x1xf32, #tpu.memory_space<vmem>>, vector<64x1xf32>
    %c0_11 = arith.constant 0 : index
    %c0_12 = arith.constant 0 : index
    %9 = vector.load %arg6[%c0_11, %c0_12] : memref<64x1xf32, #tpu.memory_space<vmem>>, vector<64x1xf32>
    %cst = arith.constant dense<0.000000e+00> : vector<64x256xf32>
    %10 = tpu.matmul %7, %2, %cst {dimension_numbers = #tpu.dot_dimension_numbers<[1], [0], [0], [1], [0, 0, 1, 1], [], []>} : vector<64x64xf32>, vector<64x256xf32>, vector<64x256xf32> -> vector<64x256xf32>
    %cst_13 = arith.constant dense<0.000000e+00> : vector<64xf32>
    %11 = vector.multi_reduction <add>, %10, %cst_13 [1] : vector<64x256xf32> to vector<64xf32>
    %12 = vector.shape_cast %11 : vector<64xf32> to vector<64x1xf32>
    %cst_14 = arith.constant 2.560000e+02 : f32
    %13 = vector.broadcast %cst_14 : f32 to vector<64x1xf32>
    %14 = arith.divf %12, %13 : vector<64x1xf32>
    %15 = vector.broadcast %14 : vector<64x1xf32> to vector<64x256xf32>
    %16 = arith.subf %2, %15 : vector<64x256xf32>
    %17 = arith.mulf %16, %16 : vector<64x256xf32>
    %cst_15 = arith.constant dense<0.000000e+00> : vector<64x256xf32>
    %18 = tpu.matmul %7, %17, %cst_15 {dimension_numbers = #tpu.dot_dimension_numbers<[1], [0], [0], [1], [0, 0, 1, 1], [], []>} : vector<64x64xf32>, vector<64x256xf32>, vector<64x256xf32> -> vector<64x256xf32>
    %cst_16 = arith.constant dense<0.000000e+00> : vector<64xf32>
    %19 = vector.multi_reduction <add>, %18, %cst_16 [1] : vector<64x256xf32> to vector<64xf32>
    %20 = vector.shape_cast %19 : vector<64xf32> to vector<64x1xf32>
    %cst_17 = arith.constant 2.560000e+02 : f32
    %21 = vector.broadcast %cst_17 : f32 to vector<64x1xf32>
    %22 = arith.divf %20, %21 : vector<64x1xf32>
    %cst_18 = arith.constant 9.99999997E-7 : f32
    %23 = vector.broadcast %cst_18 : f32 to vector<64x1xf32>
    %24 = arith.addf %22, %23 : vector<64x1xf32>
    %25 = math.rsqrt %24 : vector<64x1xf32>
    %26 = vector.broadcast %25 : vector<64x1xf32> to vector<64x256xf32>
    %27 = arith.mulf %16, %26 : vector<64x256xf32>
    %28 = vector.broadcast %8 : vector<64x1xf32> to vector<64x256xf32>
    %29 = arith.mulf %27, %28 : vector<64x256xf32>
    %30 = vector.broadcast %9 : vector<64x1xf32> to vector<64x256xf32>
    %31 = arith.addf %29, %30 : vector<64x256xf32>
    %cst_19 = arith.constant 0.000000e+00 : f32
    %32 = vector.broadcast %cst_19 : f32 to vector<64x256xf32>
    %33 = arith.subf %32, %31 : vector<64x256xf32>
    %34 = math.exp %33 : vector<64x256xf32>
    %cst_20 = arith.constant 1.000000e+00 : f32
    %35 = vector.broadcast %cst_20 : f32 to vector<64x256xf32>
    %36 = arith.addf %35, %34 : vector<64x256xf32>
    %cst_21 = arith.constant 1.000000e+00 : f32
    %37 = vector.broadcast %cst_21 : f32 to vector<64x256xf32>
    %38 = arith.divf %37, %36 : vector<64x256xf32>
    %39 = arith.mulf %31, %38 : vector<64x256xf32>
    %c0_22 = arith.constant 0 : index
    %c0_23 = arith.constant 0 : index
    %40 = vector.load %arg4[%c0_22, %c0_23] : memref<64x1xf32, #tpu.memory_space<vmem>>, vector<64x1xf32>
    %41 = arith.truncf %39 : vector<64x256xf32> to vector<64x256xbf16>
    %42 = vector.broadcast %4 : vector<1x256xf32> to vector<64x256xf32>
    %43 = arith.mulf %39, %42 : vector<64x256xf32>
    %44 = arith.truncf %43 : vector<64x256xf32> to vector<64x256xbf16>
    %cst_24 = arith.constant 0.000000e+00 : bf16
    %45 = vector.broadcast %cst_24 : bf16 to vector<64x128xbf16>
    %46 = tpu.concatenate %44, %45 in 1 : vector<64x256xbf16>, vector<64x128xbf16> -> vector<64x384xbf16>
    %47 = vector.extract_strided_slice %46 {offsets = [0, 1], sizes = [64, 256], strides = [1, 1]} : vector<64x384xbf16> to vector<64x256xbf16>
    %48 = vector.broadcast %6 : vector<1x256xf32> to vector<64x256xf32>
    %49 = arith.mulf %39, %48 : vector<64x256xf32>
    %50 = arith.truncf %49 : vector<64x256xf32> to vector<64x256xbf16>
    %cst_25 = arith.constant 0.000000e+00 : bf16
    %51 = vector.broadcast %cst_25 : bf16 to vector<64x128xbf16>
    %52 = tpu.concatenate %51, %50 in 1 : vector<64x128xbf16>, vector<64x256xbf16> -> vector<64x384xbf16>
    %53 = vector.extract_strided_slice %52 {offsets = [0, 127], sizes = [64, 256], strides = [1, 1]} : vector<64x384xbf16> to vector<64x256xbf16>
    %54 = tpu.concatenate %53, %41, %47 in 0 : vector<64x256xbf16>, vector<64x256xbf16>, vector<64x256xbf16> -> vector<192x256xbf16>
    %c0_26 = arith.constant 0 : index
    %c0_27 = arith.constant 0 : index
    %c0_28 = arith.constant 0 : index
    %55 = vector.load %arg3[%c0_26, %c0_27, %c0_28] : memref<3x64x192xbf16, #tpu.memory_space<vmem>>, vector<1x64x192xbf16>
    %56 = vector.shape_cast %55 : vector<1x64x192xbf16> to vector<64x192xbf16>
    %cst_29 = arith.constant dense<0.000000e+00> : vector<64x256xf32>
    %57 = tpu.matmul %56, %54, %cst_29 {dimension_numbers = #tpu.dot_dimension_numbers<[1], [0], [0], [1], [0, 0, 1, 1], [], []>} : vector<64x192xbf16>, vector<192x256xbf16>, vector<64x256xf32> -> vector<64x256xf32>
    %cst_30 = arith.constant 0.000000e+00 : f32
    %58 = vector.broadcast %cst_30 : f32 to vector<64x128xf32>
    %59 = tpu.concatenate %58, %57 in 1 : vector<64x128xf32>, vector<64x256xf32> -> vector<64x384xf32>
    %60 = vector.extract_strided_slice %59 {offsets = [0, 112], sizes = [64, 256], strides = [1, 1]} : vector<64x384xf32> to vector<64x256xf32>
    %c1_31 = arith.constant 1 : index
    %c0_32 = arith.constant 0 : index
    %c0_33 = arith.constant 0 : index
    %61 = vector.load %arg3[%c1_31, %c0_32, %c0_33] : memref<3x64x192xbf16, #tpu.memory_space<vmem>>, vector<1x64x192xbf16>
    %62 = vector.shape_cast %61 : vector<1x64x192xbf16> to vector<64x192xbf16>
    %cst_34 = arith.constant dense<0.000000e+00> : vector<64x256xf32>
    %63 = tpu.matmul %62, %54, %cst_34 {dimension_numbers = #tpu.dot_dimension_numbers<[1], [0], [0], [1], [0, 0, 1, 1], [], []>} : vector<64x192xbf16>, vector<192x256xbf16>, vector<64x256xf32> -> vector<64x256xf32>
    %64 = arith.addf %60, %63 : vector<64x256xf32>
    %c2 = arith.constant 2 : index
    %c0_35 = arith.constant 0 : index
    %c0_36 = arith.constant 0 : index
    %65 = vector.load %arg3[%c2, %c0_35, %c0_36] : memref<3x64x192xbf16, #tpu.memory_space<vmem>>, vector<1x64x192xbf16>
    %66 = vector.shape_cast %65 : vector<1x64x192xbf16> to vector<64x192xbf16>
    %cst_37 = arith.constant dense<0.000000e+00> : vector<64x256xf32>
    %67 = tpu.matmul %66, %54, %cst_37 {dimension_numbers = #tpu.dot_dimension_numbers<[1], [0], [0], [1], [0, 0, 1, 1], [], []>} : vector<64x192xbf16>, vector<192x256xbf16>, vector<64x256xf32> -> vector<64x256xf32>
    %cst_38 = arith.constant 0.000000e+00 : f32
    %68 = vector.broadcast %cst_38 : f32 to vector<64x128xf32>
    %69 = tpu.concatenate %67, %68 in 1 : vector<64x256xf32>, vector<64x128xf32> -> vector<64x384xf32>
    %70 = vector.extract_strided_slice %69 {offsets = [0, 16], sizes = [64, 256], strides = [1, 1]} : vector<64x384xf32> to vector<64x256xf32>
    %71 = arith.addf %64, %70 : vector<64x256xf32>
    %72 = vector.broadcast %40 : vector<64x1xf32> to vector<64x256xf32>
    %73 = arith.addf %71, %72 : vector<64x256xf32>
    %c0_39 = arith.constant 0 : index
    %c0_40 = arith.constant 0 : index
    %74 = vector.load %arg9[%c0_39, %c0_40] : memref<64x1xf32, #tpu.memory_space<vmem>>, vector<64x1xf32>
    %c0_41 = arith.constant 0 : index
    %c0_42 = arith.constant 0 : index
    %75 = vector.load %arg10[%c0_41, %c0_42] : memref<64x1xf32, #tpu.memory_space<vmem>>, vector<64x1xf32>
    %cst_43 = arith.constant dense<0.000000e+00> : vector<64x256xf32>
    %76 = tpu.matmul %7, %73, %cst_43 {dimension_numbers = #tpu.dot_dimension_numbers<[1], [0], [0], [1], [0, 0, 1, 1], [], []>} : vector<64x64xf32>, vector<64x256xf32>, vector<64x256xf32> -> vector<64x256xf32>
    %cst_44 = arith.constant dense<0.000000e+00> : vector<64xf32>
    %77 = vector.multi_reduction <add>, %76, %cst_44 [1] : vector<64x256xf32> to vector<64xf32>
    %78 = vector.shape_cast %77 : vector<64xf32> to vector<64x1xf32>
    %cst_45 = arith.constant 2.560000e+02 : f32
    %79 = vector.broadcast %cst_45 : f32 to vector<64x1xf32>
    %80 = arith.divf %78, %79 : vector<64x1xf32>
    %81 = vector.broadcast %80 : vector<64x1xf32> to vector<64x256xf32>
    %82 = arith.subf %73, %81 : vector<64x256xf32>
    %83 = arith.mulf %82, %82 : vector<64x256xf32>
    %cst_46 = arith.constant dense<0.000000e+00> : vector<64x256xf32>
    %84 = tpu.matmul %7, %83, %cst_46 {dimension_numbers = #tpu.dot_dimension_numbers<[1], [0], [0], [1], [0, 0, 1, 1], [], []>} : vector<64x64xf32>, vector<64x256xf32>, vector<64x256xf32> -> vector<64x256xf32>
    %cst_47 = arith.constant dense<0.000000e+00> : vector<64xf32>
    %85 = vector.multi_reduction <add>, %84, %cst_47 [1] : vector<64x256xf32> to vector<64xf32>
    %86 = vector.shape_cast %85 : vector<64xf32> to vector<64x1xf32>
    %cst_48 = arith.constant 2.560000e+02 : f32
    %87 = vector.broadcast %cst_48 : f32 to vector<64x1xf32>
    %88 = arith.divf %86, %87 : vector<64x1xf32>
    %cst_49 = arith.constant 9.99999997E-7 : f32
    %89 = vector.broadcast %cst_49 : f32 to vector<64x1xf32>
    %90 = arith.addf %88, %89 : vector<64x1xf32>
    %91 = math.rsqrt %90 : vector<64x1xf32>
    %92 = vector.broadcast %91 : vector<64x1xf32> to vector<64x256xf32>
    %93 = arith.mulf %82, %92 : vector<64x256xf32>
    %94 = vector.broadcast %74 : vector<64x1xf32> to vector<64x256xf32>
    %95 = arith.mulf %93, %94 : vector<64x256xf32>
    %96 = vector.broadcast %75 : vector<64x1xf32> to vector<64x256xf32>
    %97 = arith.addf %95, %96 : vector<64x256xf32>
    %cst_50 = arith.constant 0.000000e+00 : f32
    %98 = vector.broadcast %cst_50 : f32 to vector<64x256xf32>
    %99 = arith.subf %98, %97 : vector<64x256xf32>
    %100 = math.exp %99 : vector<64x256xf32>
    %cst_51 = arith.constant 1.000000e+00 : f32
    %101 = vector.broadcast %cst_51 : f32 to vector<64x256xf32>
    %102 = arith.addf %101, %100 : vector<64x256xf32>
    %cst_52 = arith.constant 1.000000e+00 : f32
    %103 = vector.broadcast %cst_52 : f32 to vector<64x256xf32>
    %104 = arith.divf %103, %102 : vector<64x256xf32>
    %105 = arith.mulf %97, %104 : vector<64x256xf32>
    %c0_53 = arith.constant 0 : index
    %c0_54 = arith.constant 0 : index
    %106 = vector.load %arg8[%c0_53, %c0_54] : memref<64x1xf32, #tpu.memory_space<vmem>>, vector<64x1xf32>
    %107 = arith.truncf %105 : vector<64x256xf32> to vector<64x256xbf16>
    %108 = vector.broadcast %4 : vector<1x256xf32> to vector<64x256xf32>
    %109 = arith.mulf %105, %108 : vector<64x256xf32>
    %110 = arith.truncf %109 : vector<64x256xf32> to vector<64x256xbf16>
    %cst_55 = arith.constant 0.000000e+00 : bf16
    %111 = vector.broadcast %cst_55 : bf16 to vector<64x128xbf16>
    %112 = tpu.concatenate %110, %111 in 1 : vector<64x256xbf16>, vector<64x128xbf16> -> vector<64x384xbf16>
    %113 = vector.extract_strided_slice %112 {offsets = [0, 1], sizes = [64, 256], strides = [1, 1]} : vector<64x384xbf16> to vector<64x256xbf16>
    %114 = vector.broadcast %6 : vector<1x256xf32> to vector<64x256xf32>
    %115 = arith.mulf %105, %114 : vector<64x256xf32>
    %116 = arith.truncf %115 : vector<64x256xf32> to vector<64x256xbf16>
    %cst_56 = arith.constant 0.000000e+00 : bf16
    %117 = vector.broadcast %cst_56 : bf16 to vector<64x128xbf16>
    %118 = tpu.concatenate %117, %116 in 1 : vector<64x128xbf16>, vector<64x256xbf16> -> vector<64x384xbf16>
    %119 = vector.extract_strided_slice %118 {offsets = [0, 127], sizes = [64, 256], strides = [1, 1]} : vector<64x384xbf16> to vector<64x256xbf16>
    %120 = tpu.concatenate %119, %107, %113 in 0 : vector<64x256xbf16>, vector<64x256xbf16>, vector<64x256xbf16> -> vector<192x256xbf16>
    %c0_57 = arith.constant 0 : index
    %c0_58 = arith.constant 0 : index
    %c0_59 = arith.constant 0 : index
    %121 = vector.load %arg7[%c0_57, %c0_58, %c0_59] : memref<3x64x192xbf16, #tpu.memory_space<vmem>>, vector<1x64x192xbf16>
    %122 = vector.shape_cast %121 : vector<1x64x192xbf16> to vector<64x192xbf16>
    %cst_60 = arith.constant dense<0.000000e+00> : vector<64x256xf32>
    %123 = tpu.matmul %122, %120, %cst_60 {dimension_numbers = #tpu.dot_dimension_numbers<[1], [0], [0], [1], [0, 0, 1, 1], [], []>} : vector<64x192xbf16>, vector<192x256xbf16>, vector<64x256xf32> -> vector<64x256xf32>
    %cst_61 = arith.constant 0.000000e+00 : f32
    %124 = vector.broadcast %cst_61 : f32 to vector<64x128xf32>
    %125 = tpu.concatenate %124, %123 in 1 : vector<64x128xf32>, vector<64x256xf32> -> vector<64x384xf32>
    %126 = vector.extract_strided_slice %125 {offsets = [0, 112], sizes = [64, 256], strides = [1, 1]} : vector<64x384xf32> to vector<64x256xf32>
    %c1_62 = arith.constant 1 : index
    %c0_63 = arith.constant 0 : index
    %c0_64 = arith.constant 0 : index
    %127 = vector.load %arg7[%c1_62, %c0_63, %c0_64] : memref<3x64x192xbf16, #tpu.memory_space<vmem>>, vector<1x64x192xbf16>
    %128 = vector.shape_cast %127 : vector<1x64x192xbf16> to vector<64x192xbf16>
    %cst_65 = arith.constant dense<0.000000e+00> : vector<64x256xf32>
    %129 = tpu.matmul %128, %120, %cst_65 {dimension_numbers = #tpu.dot_dimension_numbers<[1], [0], [0], [1], [0, 0, 1, 1], [], []>} : vector<64x192xbf16>, vector<192x256xbf16>, vector<64x256xf32> -> vector<64x256xf32>
    %130 = arith.addf %126, %129 : vector<64x256xf32>
    %c2_66 = arith.constant 2 : index
    %c0_67 = arith.constant 0 : index
    %c0_68 = arith.constant 0 : index
    %131 = vector.load %arg7[%c2_66, %c0_67, %c0_68] : memref<3x64x192xbf16, #tpu.memory_space<vmem>>, vector<1x64x192xbf16>
    %132 = vector.shape_cast %131 : vector<1x64x192xbf16> to vector<64x192xbf16>
    %cst_69 = arith.constant dense<0.000000e+00> : vector<64x256xf32>
    %133 = tpu.matmul %132, %120, %cst_69 {dimension_numbers = #tpu.dot_dimension_numbers<[1], [0], [0], [1], [0, 0, 1, 1], [], []>} : vector<64x192xbf16>, vector<192x256xbf16>, vector<64x256xf32> -> vector<64x256xf32>
    %cst_70 = arith.constant 0.000000e+00 : f32
    %134 = vector.broadcast %cst_70 : f32 to vector<64x128xf32>
    %135 = tpu.concatenate %133, %134 in 1 : vector<64x256xf32>, vector<64x128xf32> -> vector<64x384xf32>
    %136 = vector.extract_strided_slice %135 {offsets = [0, 16], sizes = [64, 256], strides = [1, 1]} : vector<64x384xf32> to vector<64x256xf32>
    %137 = arith.addf %130, %136 : vector<64x256xf32>
    %138 = vector.broadcast %106 : vector<64x1xf32> to vector<64x256xf32>
    %139 = arith.addf %137, %138 : vector<64x256xf32>
    %140 = arith.addf %139, %2 : vector<64x256xf32>
    %141 = arith.truncf %140 : vector<64x256xf32> to vector<64x256xbf16>
    %c0_71 = arith.constant 0 : index
    %c0_72 = arith.constant 0 : index
    %c0_73 = arith.constant 0 : index
    %142 = vector.load %arg12[%c0_71, %c0_72, %c0_73] : memref<1x64x256xbf16, #tpu.memory_space<vmem>>, vector<1x64x256xbf16>
    %143 = vector.shape_cast %142 : vector<1x64x256xbf16> to vector<64x256xbf16>
    %144 = vector.shape_cast %141 : vector<64x256xbf16> to vector<1x64x256xbf16>
    tpu.vector_store %arg12[%c0_71, %c0_72, %c0_73], %144 {strides = array<i32>} : memref<1x64x256xbf16, #tpu.memory_space<vmem>>, vector<1x64x256xbf16>,
    return
  }
  func.func @transform_0(%arg0: i32) -> (i32, i32, i32) {
    %c0_i32 = arith.constant 0 : i32
    %c0_i32_0 = arith.constant 0 : i32
    %c0_i32_1 = arith.constant 0 : i32
    return %arg0, %c0_i32, %c0_i32_0 : i32, i32, i32
  }
  func.func @transform_1(%arg0: i32) -> (i32, i32, i32) {
    %c0_i32 = arith.constant 0 : i32
    %c0_i32_0 = arith.constant 0 : i32
    %c0_i32_1 = arith.constant 0 : i32
    %c0_i32_2 = arith.constant 0 : i32
    return %c0_i32, %c0_i32_0, %c0_i32_1 : i32, i32, i32
  }
  func.func @transform_2(%arg0: i32) -> (i32, i32, i32) {
    %c0_i32 = arith.constant 0 : i32
    %c0_i32_0 = arith.constant 0 : i32
    %c0_i32_1 = arith.constant 0 : i32
    %c0_i32_2 = arith.constant 0 : i32
    return %c0_i32, %c0_i32_0, %c0_i32_1 : i32, i32, i32
  }
  func.func @transform_3(%arg0: i32) -> (i32, i32) {
    %c0_i32 = arith.constant 0 : i32
    %c0_i32_0 = arith.constant 0 : i32
    %c0_i32_1 = arith.constant 0 : i32
    return %c0_i32, %c0_i32_0 : i32, i32
  }
  func.func @transform_4(%arg0: i32) -> (i32, i32) {
    %c0_i32 = arith.constant 0 : i32
    %c0_i32_0 = arith.constant 0 : i32
    %c0_i32_1 = arith.constant 0 : i32
    return %c0_i32, %c0_i32_0 : i32, i32
  }
  func.func @transform_5(%arg0: i32) -> (i32, i32) {
    %c0_i32 = arith.constant 0 : i32
    %c0_i32_0 = arith.constant 0 : i32
    %c0_i32_1 = arith.constant 0 : i32
    return %c0_i32, %c0_i32_0 : i32, i32
  }
  func.func @transform_6(%arg0: i32) -> (i32, i32, i32) {
    %c0_i32 = arith.constant 0 : i32
    %c0_i32_0 = arith.constant 0 : i32
    %c0_i32_1 = arith.constant 0 : i32
    %c0_i32_2 = arith.constant 0 : i32
    return %c0_i32, %c0_i32_0, %c0_i32_1 : i32, i32, i32
  }
  func.func @transform_7(%arg0: i32) -> (i32, i32) {
    %c0_i32 = arith.constant 0 : i32
    %c0_i32_0 = arith.constant 0 : i32
    %c0_i32_1 = arith.constant 0 : i32
    return %c0_i32, %c0_i32_0 : i32, i32
  }
  func.func @transform_8(%arg0: i32) -> (i32, i32) {
    %c0_i32 = arith.constant 0 : i32
    %c0_i32_0 = arith.constant 0 : i32
    %c0_i32_1 = arith.constant 0 : i32
    return %c0_i32, %c0_i32_0 : i32, i32
  }
  func.func @transform_9(%arg0: i32) -> (i32, i32) {
    %c0_i32 = arith.constant 0 : i32
    %c0_i32_0 = arith.constant 0 : i32
    %c0_i32_1 = arith.constant 0 : i32
    return %c0_i32, %c0_i32_0 : i32, i32
  }
  func.func @transform_10(%arg0: i32) -> (i32, i32) {
    %c0_i32 = arith.constant 0 : i32
    %c0_i32_0 = arith.constant 0 : i32
    %c0_i32_1 = arith.constant 0 : i32
    return %c0_i32, %c0_i32_0 : i32, i32
  }
  func.func @transform_11(%arg0: i32) -> (i32, i32, i32) {
    %c0_i32 = arith.constant 0 : i32
    %c0_i32_0 = arith.constant 0 : i32
    %c0_i32_1 = arith.constant 0 : i32
    return %arg0, %c0_i32, %c0_i32_0 : i32, i32, i32
  }
}

module attributes {stable_mosaic.version = 11 : i64} {
  func.func @_attention_kernel(%arg0: i32, %arg1: memref<1x64x256xbf16, #tpu.memory_space<vmem>>, %arg2: memref<64x1xf32, #tpu.memory_space<vmem>>, %arg3: memref<64x1xf32, #tpu.memory_space<vmem>>, %arg4: memref<64x64xf32, #tpu.memory_space<vmem>>, %arg5: memref<64x64xbf16, #tpu.memory_space<vmem>>, %arg6: memref<1x64xf32, #tpu.memory_space<vmem>>, %arg7: memref<64x64xbf16, #tpu.memory_space<vmem>>, %arg8: memref<1x64xf32, #tpu.memory_space<vmem>>, %arg9: memref<64x64xbf16, #tpu.memory_space<vmem>>, %arg10: memref<1x64xf32, #tpu.memory_space<vmem>>, %arg11: memref<64x64xbf16, #tpu.memory_space<vmem>>, %arg12: memref<1x64xf32, #tpu.memory_space<vmem>>, %arg13: memref<1x64x256xbf16, #tpu.memory_space<vmem>>) attributes {dimension_semantics = [#tpu.dimension_semantics<parallel>], iteration_bounds = array<i64: 2>, scalar_prefetch = 0 : i64, scratch_operands = 0 : i64, tpu.core_type = #tpu.core_type<tc>, window_params = [{transform_indices = @transform_0, window_bounds = array<i64: 1, 64, 256>}, {pipeline_mode = #tpu.pipeline_mode<synchronous>, transform_indices = @transform_1, window_bounds = array<i64: 64, 1>}, {pipeline_mode = #tpu.pipeline_mode<synchronous>, transform_indices = @transform_2, window_bounds = array<i64: 64, 1>}, {pipeline_mode = #tpu.pipeline_mode<synchronous>, transform_indices = @transform_3, window_bounds = array<i64: 64, 64>}, {pipeline_mode = #tpu.pipeline_mode<synchronous>, transform_indices = @transform_4, window_bounds = array<i64: 64, 64>}, {pipeline_mode = #tpu.pipeline_mode<synchronous>, transform_indices = @transform_5, window_bounds = array<i64: 1, 64>}, {pipeline_mode = #tpu.pipeline_mode<synchronous>, transform_indices = @transform_6, window_bounds = array<i64: 64, 64>}, {pipeline_mode = #tpu.pipeline_mode<synchronous>, transform_indices = @transform_7, window_bounds = array<i64: 1, 64>}, {pipeline_mode = #tpu.pipeline_mode<synchronous>, transform_indices = @transform_8, window_bounds = array<i64: 64, 64>}, {pipeline_mode = #tpu.pipeline_mode<synchronous>, transform_indices = @transform_9, window_bounds = array<i64: 1, 64>}, {pipeline_mode = #tpu.pipeline_mode<synchronous>, transform_indices = @transform_10, window_bounds = array<i64: 64, 64>}, {pipeline_mode = #tpu.pipeline_mode<synchronous>, transform_indices = @transform_11, window_bounds = array<i64: 1, 64>}, {transform_indices = @transform_12, window_bounds = array<i64: 1, 64, 256>}]} {
    %c0 = arith.constant 0 : index
    %c0_0 = arith.constant 0 : index
    %c0_1 = arith.constant 0 : index
    %0 = vector.load %arg1[%c0, %c0_0, %c0_1] : memref<1x64x256xbf16, #tpu.memory_space<vmem>>, vector<1x64x256xbf16>
    %1 = vector.shape_cast %0 : vector<1x64x256xbf16> to vector<64x256xbf16>
    %2 = arith.extf %1 : vector<64x256xbf16> to vector<64x256xf32>
    %c0_2 = arith.constant 0 : index
    %c0_3 = arith.constant 0 : index
    %3 = vector.load %arg2[%c0_2, %c0_3] : memref<64x1xf32, #tpu.memory_space<vmem>>, vector<64x1xf32>
    %c0_4 = arith.constant 0 : index
    %c0_5 = arith.constant 0 : index
    %4 = vector.load %arg3[%c0_4, %c0_5] : memref<64x1xf32, #tpu.memory_space<vmem>>, vector<64x1xf32>
    %c0_6 = arith.constant 0 : index
    %c0_7 = arith.constant 0 : index
    %5 = vector.load %arg4[%c0_6, %c0_7] : memref<64x64xf32, #tpu.memory_space<vmem>>, vector<64x64xf32>
    %cst = arith.constant dense<0.000000e+00> : vector<64x256xf32>
    %6 = tpu.matmul %5, %2, %cst {dimension_numbers = #tpu.dot_dimension_numbers<[1], [0], [0], [1], [0, 0, 1, 1], [], []>} : vector<64x64xf32>, vector<64x256xf32>, vector<64x256xf32> -> vector<64x256xf32>
    %cst_8 = arith.constant dense<0.000000e+00> : vector<64xf32>
    %7 = vector.multi_reduction <add>, %6, %cst_8 [1] : vector<64x256xf32> to vector<64xf32>
    %8 = vector.shape_cast %7 : vector<64xf32> to vector<64x1xf32>
    %cst_9 = arith.constant 2.560000e+02 : f32
    %9 = vector.broadcast %cst_9 : f32 to vector<64x1xf32>
    %10 = arith.divf %8, %9 : vector<64x1xf32>
    %11 = vector.broadcast %10 : vector<64x1xf32> to vector<64x256xf32>
    %12 = arith.subf %2, %11 : vector<64x256xf32>
    %13 = arith.mulf %12, %12 : vector<64x256xf32>
    %cst_10 = arith.constant dense<0.000000e+00> : vector<64x256xf32>
    %14 = tpu.matmul %5, %13, %cst_10 {dimension_numbers = #tpu.dot_dimension_numbers<[1], [0], [0], [1], [0, 0, 1, 1], [], []>} : vector<64x64xf32>, vector<64x256xf32>, vector<64x256xf32> -> vector<64x256xf32>
    %cst_11 = arith.constant dense<0.000000e+00> : vector<64xf32>
    %15 = vector.multi_reduction <add>, %14, %cst_11 [1] : vector<64x256xf32> to vector<64xf32>
    %16 = vector.shape_cast %15 : vector<64xf32> to vector<64x1xf32>
    %cst_12 = arith.constant 2.560000e+02 : f32
    %17 = vector.broadcast %cst_12 : f32 to vector<64x1xf32>
    %18 = arith.divf %16, %17 : vector<64x1xf32>
    %cst_13 = arith.constant 9.99999997E-7 : f32
    %19 = vector.broadcast %cst_13 : f32 to vector<64x1xf32>
    %20 = arith.addf %18, %19 : vector<64x1xf32>
    %21 = math.rsqrt %20 : vector<64x1xf32>
    %22 = vector.broadcast %21 : vector<64x1xf32> to vector<64x256xf32>
    %23 = arith.mulf %12, %22 : vector<64x256xf32>
    %24 = vector.broadcast %3 : vector<64x1xf32> to vector<64x256xf32>
    %25 = arith.mulf %23, %24 : vector<64x256xf32>
    %26 = vector.broadcast %4 : vector<64x1xf32> to vector<64x256xf32>
    %27 = arith.addf %25, %26 : vector<64x256xf32>
    %28 = tpu.transpose %27, [1, 0] : vector<64x256xf32> -> vector<256x64xf32>
    %29 = arith.truncf %28 : vector<256x64xf32> to vector<256x64xbf16>
    %c0_14 = arith.constant 0 : index
    %c0_15 = arith.constant 0 : index
    %30 = vector.load %arg5[%c0_14, %c0_15] : memref<64x64xbf16, #tpu.memory_space<vmem>>, vector<64x64xbf16>
    %cst_16 = arith.constant dense<0.000000e+00> : vector<256x64xf32>
    %31 = tpu.matmul %29, %30, %cst_16 {dimension_numbers = #tpu.dot_dimension_numbers<[1], [0], [0], [1], [0, 0, 1, 1], [], []>} : vector<256x64xbf16>, vector<64x64xbf16>, vector<256x64xf32> -> vector<256x64xf32>
    %c0_17 = arith.constant 0 : index
    %c0_18 = arith.constant 0 : index
    %32 = vector.load %arg6[%c0_17, %c0_18] : memref<1x64xf32, #tpu.memory_space<vmem>>, vector<1x64xf32>
    %33 = vector.broadcast %32 : vector<1x64xf32> to vector<256x64xf32>
    %34 = arith.addf %31, %33 : vector<256x64xf32>
    %c0_19 = arith.constant 0 : index
    %c0_20 = arith.constant 0 : index
    %35 = vector.load %arg7[%c0_19, %c0_20] : memref<64x64xbf16, #tpu.memory_space<vmem>>, vector<64x64xbf16>
    %cst_21 = arith.constant dense<0.000000e+00> : vector<256x64xf32>
    %36 = tpu.matmul %29, %35, %cst_21 {dimension_numbers = #tpu.dot_dimension_numbers<[1], [0], [0], [1], [0, 0, 1, 1], [], []>} : vector<256x64xbf16>, vector<64x64xbf16>, vector<256x64xf32> -> vector<256x64xf32>
    %c0_22 = arith.constant 0 : index
    %c0_23 = arith.constant 0 : index
    %37 = vector.load %arg8[%c0_22, %c0_23] : memref<1x64xf32, #tpu.memory_space<vmem>>, vector<1x64xf32>
    %38 = vector.broadcast %37 : vector<1x64xf32> to vector<256x64xf32>
    %39 = arith.addf %36, %38 : vector<256x64xf32>
    %c0_24 = arith.constant 0 : index
    %c0_25 = arith.constant 0 : index
    %40 = vector.load %arg9[%c0_24, %c0_25] : memref<64x64xbf16, #tpu.memory_space<vmem>>, vector<64x64xbf16>
    %cst_26 = arith.constant dense<0.000000e+00> : vector<256x64xf32>
    %41 = tpu.matmul %29, %40, %cst_26 {dimension_numbers = #tpu.dot_dimension_numbers<[1], [0], [0], [1], [0, 0, 1, 1], [], []>} : vector<256x64xbf16>, vector<64x64xbf16>, vector<256x64xf32> -> vector<256x64xf32>
    %c0_27 = arith.constant 0 : index
    %c0_28 = arith.constant 0 : index
    %42 = vector.load %arg10[%c0_27, %c0_28] : memref<1x64xf32, #tpu.memory_space<vmem>>, vector<1x64xf32>
    %43 = vector.broadcast %42 : vector<1x64xf32> to vector<256x64xf32>
    %44 = arith.addf %41, %43 : vector<256x64xf32>
    %45 = arith.truncf %34 : vector<256x64xf32> to vector<256x64xbf16>
    %46 = arith.truncf %39 : vector<256x64xf32> to vector<256x64xbf16>
    %cst_29 = arith.constant dense<0.000000e+00> : vector<256x256xf32>
    %47 = tpu.matmul %45, %46, %cst_29 {dimension_numbers = #tpu.dot_dimension_numbers<[1], [1], [0], [0], [0, 0, 1, 0], [], []>} : vector<256x64xbf16>, vector<256x64xbf16>, vector<256x256xf32> -> vector<256x256xf32>
    %cst_30 = arith.constant 1.250000e-01 : f32
    %48 = vector.broadcast %cst_30 : f32 to vector<256x256xf32>
    %49 = arith.mulf %47, %48 : vector<256x256xf32>
    %cst_31 = arith.constant dense<0xFF800000> : vector<256xf32>
    %50 = vector.multi_reduction <maximumf>, %49, %cst_31 [1] : vector<256x256xf32> to vector<256xf32>
    %51 = vector.shape_cast %50 : vector<256xf32> to vector<256x1xf32>
    %52 = vector.broadcast %51 : vector<256x1xf32> to vector<256x256xf32>
    %53 = arith.subf %49, %52 : vector<256x256xf32>
    %54 = math.exp %53 : vector<256x256xf32>
    %cst_32 = arith.constant dense<0.000000e+00> : vector<256xf32>
    %55 = vector.multi_reduction <add>, %54, %cst_32 [1] : vector<256x256xf32> to vector<256xf32>
    %56 = vector.shape_cast %55 : vector<256xf32> to vector<256x1xf32>
    %57 = tpu.reciprocal %56 {approx = true} : vector<256x1xf32> -> vector<256x1xf32>
    %58 = vector.broadcast %57 : vector<256x1xf32> to vector<256x256xf32>
    %59 = arith.mulf %54, %58 : vector<256x256xf32>
    %60 = arith.truncf %59 : vector<256x256xf32> to vector<256x256xbf16>
    %61 = arith.truncf %44 : vector<256x64xf32> to vector<256x64xbf16>
    %cst_33 = arith.constant dense<0.000000e+00> : vector<256x64xf32>
    %62 = tpu.matmul %60, %61, %cst_33 {dimension_numbers = #tpu.dot_dimension_numbers<[1], [0], [0], [1], [0, 0, 1, 1], [], []>} : vector<256x256xbf16>, vector<256x64xbf16>, vector<256x64xf32> -> vector<256x64xf32>
    %63 = arith.truncf %62 : vector<256x64xf32> to vector<256x64xbf16>
    %c0_34 = arith.constant 0 : index
    %c0_35 = arith.constant 0 : index
    %64 = vector.load %arg11[%c0_34, %c0_35] : memref<64x64xbf16, #tpu.memory_space<vmem>>, vector<64x64xbf16>
    %cst_36 = arith.constant dense<0.000000e+00> : vector<256x64xf32>
    %65 = tpu.matmul %63, %64, %cst_36 {dimension_numbers = #tpu.dot_dimension_numbers<[1], [0], [0], [1], [0, 0, 1, 1], [], []>} : vector<256x64xbf16>, vector<64x64xbf16>, vector<256x64xf32> -> vector<256x64xf32>
    %c0_37 = arith.constant 0 : index
    %c0_38 = arith.constant 0 : index
    %66 = vector.load %arg12[%c0_37, %c0_38] : memref<1x64xf32, #tpu.memory_space<vmem>>, vector<1x64xf32>
    %67 = vector.broadcast %66 : vector<1x64xf32> to vector<256x64xf32>
    %68 = arith.addf %65, %67 : vector<256x64xf32>
    %69 = tpu.transpose %68, [1, 0] : vector<256x64xf32> -> vector<64x256xf32>
    %70 = arith.addf %69, %2 : vector<64x256xf32>
    %71 = arith.truncf %70 : vector<64x256xf32> to vector<64x256xbf16>
    %c0_39 = arith.constant 0 : index
    %c0_40 = arith.constant 0 : index
    %c0_41 = arith.constant 0 : index
    %72 = vector.load %arg13[%c0_39, %c0_40, %c0_41] : memref<1x64x256xbf16, #tpu.memory_space<vmem>>, vector<1x64x256xbf16>
    %73 = vector.shape_cast %72 : vector<1x64x256xbf16> to vector<64x256xbf16>
    %74 = vector.shape_cast %71 : vector<64x256xbf16> to vector<1x64x256xbf16>
    tpu.vector_store %arg13[%c0_39, %c0_40, %c0_41], %74 {strides = array<i32>} : memref<1x64x256xbf16, #tpu.memory_space<vmem>>, vector<1x64x256xbf16>,
    return
  }
  func.func @transform_0(%arg0: i32) -> (i32, i32, i32) {
    %c0_i32 = arith.constant 0 : i32
    %c0_i32_0 = arith.constant 0 : i32
    %c0_i32_1 = arith.constant 0 : i32
    return %arg0, %c0_i32, %c0_i32_0 : i32, i32, i32
  }
  func.func @transform_1(%arg0: i32) -> (i32, i32) {
    %c0_i32 = arith.constant 0 : i32
    %c0_i32_0 = arith.constant 0 : i32
    %c0_i32_1 = arith.constant 0 : i32
    return %c0_i32, %c0_i32_0 : i32, i32
  }
  func.func @transform_2(%arg0: i32) -> (i32, i32) {
    %c0_i32 = arith.constant 0 : i32
    %c0_i32_0 = arith.constant 0 : i32
    %c0_i32_1 = arith.constant 0 : i32
    return %c0_i32, %c0_i32_0 : i32, i32
  }
  func.func @transform_3(%arg0: i32) -> (i32, i32) {
    %c0_i32 = arith.constant 0 : i32
    %c0_i32_0 = arith.constant 0 : i32
    %c0_i32_1 = arith.constant 0 : i32
    return %c0_i32, %c0_i32_0 : i32, i32
  }
  func.func @transform_4(%arg0: i32) -> (i32, i32) {
    %c0_i32 = arith.constant 0 : i32
    %c0_i32_0 = arith.constant 0 : i32
    %c0_i32_1 = arith.constant 0 : i32
    return %c0_i32, %c0_i32_0 : i32, i32
  }
  func.func @transform_5(%arg0: i32) -> (i32, i32) {
    %c0_i32 = arith.constant 0 : i32
    %c0_i32_0 = arith.constant 0 : i32
    %c0_i32_1 = arith.constant 0 : i32
    return %c0_i32, %c0_i32_0 : i32, i32
  }
  func.func @transform_6(%arg0: i32) -> (i32, i32) {
    %c0_i32 = arith.constant 0 : i32
    %c0_i32_0 = arith.constant 0 : i32
    %c0_i32_1 = arith.constant 0 : i32
    return %c0_i32, %c0_i32_0 : i32, i32
  }
  func.func @transform_7(%arg0: i32) -> (i32, i32) {
    %c0_i32 = arith.constant 0 : i32
    %c0_i32_0 = arith.constant 0 : i32
    %c0_i32_1 = arith.constant 0 : i32
    return %c0_i32, %c0_i32_0 : i32, i32
  }
  func.func @transform_8(%arg0: i32) -> (i32, i32) {
    %c0_i32 = arith.constant 0 : i32
    %c0_i32_0 = arith.constant 0 : i32
    %c0_i32_1 = arith.constant 0 : i32
    return %c0_i32, %c0_i32_0 : i32, i32
  }
  func.func @transform_9(%arg0: i32) -> (i32, i32) {
    %c0_i32 = arith.constant 0 : i32
    %c0_i32_0 = arith.constant 0 : i32
    %c0_i32_1 = arith.constant 0 : i32
    return %c0_i32, %c0_i32_0 : i32, i32
  }
  func.func @transform_10(%arg0: i32) -> (i32, i32) {
    %c0_i32 = arith.constant 0 : i32
    %c0_i32_0 = arith.constant 0 : i32
    %c0_i32_1 = arith.constant 0 : i32
    return %c0_i32, %c0_i32_0 : i32, i32
  }
  func.func @transform_11(%arg0: i32) -> (i32, i32) {
    %c0_i32 = arith.constant 0 : i32
    %c0_i32_0 = arith.constant 0 : i32
    %c0_i32_1 = arith.constant 0 : i32
    return %c0_i32, %c0_i32_0 : i32, i32
  }
  func.func @transform_12(%arg0: i32) -> (i32, i32, i32) {
    %c0_i32 = arith.constant 0 : i32
    %c0_i32_0 = arith.constant 0 : i32
    %c0_i32_1 = arith.constant 0 : i32
    return %arg0, %c0_i32, %c0_i32_0 : i32, i32, i32
  }
}

module attributes {stable_mosaic.version = 11 : i64} {
  func.func @_single_conv_kernel(%arg0: i32, %arg1: memref<1x64x256xbf16, #tpu.memory_space<vmem>>, %arg2: memref<2x1x256xf32, #tpu.memory_space<vmem>>, %arg3: memref<3x6x192xbf16, #tpu.memory_space<vmem>>, %arg4: memref<6x1xf32, #tpu.memory_space<vmem>>, %arg5: memref<64x1xf32, #tpu.memory_space<vmem>>, %arg6: memref<64x1xf32, #tpu.memory_space<vmem>>, %arg7: memref<64x64xf32, #tpu.memory_space<vmem>>, %arg8: memref<1x6x256xf32, #tpu.memory_space<vmem>>) attributes {dimension_semantics = [#tpu.dimension_semantics<parallel>], iteration_bounds = array<i64: 2>, scalar_prefetch = 0 : i64, scratch_operands = 0 : i64, tpu.core_type = #tpu.core_type<tc>, window_params = [{transform_indices = @transform_0, window_bounds = array<i64: 1, 64, 256>}, {pipeline_mode = #tpu.pipeline_mode<synchronous>, transform_indices = @transform_1, window_bounds = array<i64: 2, 1, 256>}, {pipeline_mode = #tpu.pipeline_mode<synchronous>, transform_indices = @transform_2, window_bounds = array<i64: 3, 6, 192>}, {pipeline_mode = #tpu.pipeline_mode<synchronous>, transform_indices = @transform_3, window_bounds = array<i64: 6, 1>}, {pipeline_mode = #tpu.pipeline_mode<synchronous>, transform_indices = @transform_4, window_bounds = array<i64: 64, 1>}, {pipeline_mode = #tpu.pipeline_mode<synchronous>, transform_indices = @transform_5, window_bounds = array<i64: 64, 1>}, {pipeline_mode = #tpu.pipeline_mode<synchronous>, transform_indices = @transform_6, window_bounds = array<i64: 64, 64>}, {transform_indices = @transform_7, window_bounds = array<i64: 1, 6, 256>}]} {
    %c0 = arith.constant 0 : index
    %c0_0 = arith.constant 0 : index
    %c0_1 = arith.constant 0 : index
    %0 = vector.load %arg1[%c0, %c0_0, %c0_1] : memref<1x64x256xbf16, #tpu.memory_space<vmem>>, vector<1x64x256xbf16>
    %1 = vector.shape_cast %0 : vector<1x64x256xbf16> to vector<64x256xbf16>
    %2 = arith.extf %1 : vector<64x256xbf16> to vector<64x256xf32>
    %c0_2 = arith.constant 0 : index
    %c0_3 = arith.constant 0 : index
    %c0_4 = arith.constant 0 : index
    %3 = vector.load %arg2[%c0_2, %c0_3, %c0_4] : memref<2x1x256xf32, #tpu.memory_space<vmem>>, vector<1x1x256xf32>
    %4 = vector.shape_cast %3 : vector<1x1x256xf32> to vector<1x256xf32>
    %c1 = arith.constant 1 : index
    %c0_5 = arith.constant 0 : index
    %c0_6 = arith.constant 0 : index
    %5 = vector.load %arg2[%c1, %c0_5, %c0_6] : memref<2x1x256xf32, #tpu.memory_space<vmem>>, vector<1x1x256xf32>
    %6 = vector.shape_cast %5 : vector<1x1x256xf32> to vector<1x256xf32>
    %c0_7 = arith.constant 0 : index
    %c0_8 = arith.constant 0 : index
    %7 = vector.load %arg5[%c0_7, %c0_8] : memref<64x1xf32, #tpu.memory_space<vmem>>, vector<64x1xf32>
    %c0_9 = arith.constant 0 : index
    %c0_10 = arith.constant 0 : index
    %8 = vector.load %arg6[%c0_9, %c0_10] : memref<64x1xf32, #tpu.memory_space<vmem>>, vector<64x1xf32>
    %c0_11 = arith.constant 0 : index
    %c0_12 = arith.constant 0 : index
    %9 = vector.load %arg7[%c0_11, %c0_12] : memref<64x64xf32, #tpu.memory_space<vmem>>, vector<64x64xf32>
    %cst = arith.constant dense<0.000000e+00> : vector<64x256xf32>
    %10 = tpu.matmul %9, %2, %cst {dimension_numbers = #tpu.dot_dimension_numbers<[1], [0], [0], [1], [0, 0, 1, 1], [], []>} : vector<64x64xf32>, vector<64x256xf32>, vector<64x256xf32> -> vector<64x256xf32>
    %cst_13 = arith.constant dense<0.000000e+00> : vector<64xf32>
    %11 = vector.multi_reduction <add>, %10, %cst_13 [1] : vector<64x256xf32> to vector<64xf32>
    %12 = vector.shape_cast %11 : vector<64xf32> to vector<64x1xf32>
    %cst_14 = arith.constant 2.560000e+02 : f32
    %13 = vector.broadcast %cst_14 : f32 to vector<64x1xf32>
    %14 = arith.divf %12, %13 : vector<64x1xf32>
    %15 = vector.broadcast %14 : vector<64x1xf32> to vector<64x256xf32>
    %16 = arith.subf %2, %15 : vector<64x256xf32>
    %17 = arith.mulf %16, %16 : vector<64x256xf32>
    %cst_15 = arith.constant dense<0.000000e+00> : vector<64x256xf32>
    %18 = tpu.matmul %9, %17, %cst_15 {dimension_numbers = #tpu.dot_dimension_numbers<[1], [0], [0], [1], [0, 0, 1, 1], [], []>} : vector<64x64xf32>, vector<64x256xf32>, vector<64x256xf32> -> vector<64x256xf32>
    %cst_16 = arith.constant dense<0.000000e+00> : vector<64xf32>
    %19 = vector.multi_reduction <add>, %18, %cst_16 [1] : vector<64x256xf32> to vector<64xf32>
    %20 = vector.shape_cast %19 : vector<64xf32> to vector<64x1xf32>
    %cst_17 = arith.constant 2.560000e+02 : f32
    %21 = vector.broadcast %cst_17 : f32 to vector<64x1xf32>
    %22 = arith.divf %20, %21 : vector<64x1xf32>
    %cst_18 = arith.constant 9.99999997E-7 : f32
    %23 = vector.broadcast %cst_18 : f32 to vector<64x1xf32>
    %24 = arith.addf %22, %23 : vector<64x1xf32>
    %25 = math.rsqrt %24 : vector<64x1xf32>
    %26 = vector.broadcast %25 : vector<64x1xf32> to vector<64x256xf32>
    %27 = arith.mulf %16, %26 : vector<64x256xf32>
    %28 = vector.broadcast %7 : vector<64x1xf32> to vector<64x256xf32>
    %29 = arith.mulf %27, %28 : vector<64x256xf32>
    %30 = vector.broadcast %8 : vector<64x1xf32> to vector<64x256xf32>
    %31 = arith.addf %29, %30 : vector<64x256xf32>
    %cst_19 = arith.constant 0.000000e+00 : f32
    %32 = vector.broadcast %cst_19 : f32 to vector<64x256xf32>
    %33 = arith.subf %32, %31 : vector<64x256xf32>
    %34 = math.exp %33 : vector<64x256xf32>
    %cst_20 = arith.constant 1.000000e+00 : f32
    %35 = vector.broadcast %cst_20 : f32 to vector<64x256xf32>
    %36 = arith.addf %35, %34 : vector<64x256xf32>
    %cst_21 = arith.constant 1.000000e+00 : f32
    %37 = vector.broadcast %cst_21 : f32 to vector<64x256xf32>
    %38 = arith.divf %37, %36 : vector<64x256xf32>
    %39 = arith.mulf %31, %38 : vector<64x256xf32>
    %c0_22 = arith.constant 0 : index
    %c0_23 = arith.constant 0 : index
    %40 = vector.load %arg4[%c0_22, %c0_23] : memref<6x1xf32, #tpu.memory_space<vmem>>, vector<6x1xf32>
    %41 = arith.truncf %39 : vector<64x256xf32> to vector<64x256xbf16>
    %42 = vector.broadcast %4 : vector<1x256xf32> to vector<64x256xf32>
    %43 = arith.mulf %39, %42 : vector<64x256xf32>
    %44 = arith.truncf %43 : vector<64x256xf32> to vector<64x256xbf16>
    %cst_24 = arith.constant 0.000000e+00 : bf16
    %45 = vector.broadcast %cst_24 : bf16 to vector<64x128xbf16>
    %46 = tpu.concatenate %44, %45 in 1 : vector<64x256xbf16>, vector<64x128xbf16> -> vector<64x384xbf16>
    %47 = vector.extract_strided_slice %46 {offsets = [0, 1], sizes = [64, 256], strides = [1, 1]} : vector<64x384xbf16> to vector<64x256xbf16>
    %48 = vector.broadcast %6 : vector<1x256xf32> to vector<64x256xf32>
    %49 = arith.mulf %39, %48 : vector<64x256xf32>
    %50 = arith.truncf %49 : vector<64x256xf32> to vector<64x256xbf16>
    %cst_25 = arith.constant 0.000000e+00 : bf16
    %51 = vector.broadcast %cst_25 : bf16 to vector<64x128xbf16>
    %52 = tpu.concatenate %51, %50 in 1 : vector<64x128xbf16>, vector<64x256xbf16> -> vector<64x384xbf16>
    %53 = vector.extract_strided_slice %52 {offsets = [0, 127], sizes = [64, 256], strides = [1, 1]} : vector<64x384xbf16> to vector<64x256xbf16>
    %54 = tpu.concatenate %53, %41, %47 in 0 : vector<64x256xbf16>, vector<64x256xbf16>, vector<64x256xbf16> -> vector<192x256xbf16>
    %c0_26 = arith.constant 0 : index
    %c0_27 = arith.constant 0 : index
    %c0_28 = arith.constant 0 : index
    %55 = vector.load %arg3[%c0_26, %c0_27, %c0_28] : memref<3x6x192xbf16, #tpu.memory_space<vmem>>, vector<1x6x192xbf16>
    %56 = vector.shape_cast %55 : vector<1x6x192xbf16> to vector<6x192xbf16>
    %cst_29 = arith.constant dense<0.000000e+00> : vector<6x256xf32>
    %57 = tpu.matmul %56, %54, %cst_29 {dimension_numbers = #tpu.dot_dimension_numbers<[1], [0], [0], [1], [0, 0, 1, 1], [], []>} : vector<6x192xbf16>, vector<192x256xbf16>, vector<6x256xf32> -> vector<6x256xf32>
    %cst_30 = arith.constant 0.000000e+00 : f32
    %58 = vector.broadcast %cst_30 : f32 to vector<6x128xf32>
    %59 = tpu.concatenate %58, %57 in 1 : vector<6x128xf32>, vector<6x256xf32> -> vector<6x384xf32>
    %60 = vector.extract_strided_slice %59 {offsets = [0, 112], sizes = [6, 256], strides = [1, 1]} : vector<6x384xf32> to vector<6x256xf32>
    %c1_31 = arith.constant 1 : index
    %c0_32 = arith.constant 0 : index
    %c0_33 = arith.constant 0 : index
    %61 = vector.load %arg3[%c1_31, %c0_32, %c0_33] : memref<3x6x192xbf16, #tpu.memory_space<vmem>>, vector<1x6x192xbf16>
    %62 = vector.shape_cast %61 : vector<1x6x192xbf16> to vector<6x192xbf16>
    %cst_34 = arith.constant dense<0.000000e+00> : vector<6x256xf32>
    %63 = tpu.matmul %62, %54, %cst_34 {dimension_numbers = #tpu.dot_dimension_numbers<[1], [0], [0], [1], [0, 0, 1, 1], [], []>} : vector<6x192xbf16>, vector<192x256xbf16>, vector<6x256xf32> -> vector<6x256xf32>
    %64 = arith.addf %60, %63 : vector<6x256xf32>
    %c2 = arith.constant 2 : index
    %c0_35 = arith.constant 0 : index
    %c0_36 = arith.constant 0 : index
    %65 = vector.load %arg3[%c2, %c0_35, %c0_36] : memref<3x6x192xbf16, #tpu.memory_space<vmem>>, vector<1x6x192xbf16>
    %66 = vector.shape_cast %65 : vector<1x6x192xbf16> to vector<6x192xbf16>
    %cst_37 = arith.constant dense<0.000000e+00> : vector<6x256xf32>
    %67 = tpu.matmul %66, %54, %cst_37 {dimension_numbers = #tpu.dot_dimension_numbers<[1], [0], [0], [1], [0, 0, 1, 1], [], []>} : vector<6x192xbf16>, vector<192x256xbf16>, vector<6x256xf32> -> vector<6x256xf32>
    %cst_38 = arith.constant 0.000000e+00 : f32
    %68 = vector.broadcast %cst_38 : f32 to vector<6x128xf32>
    %69 = tpu.concatenate %67, %68 in 1 : vector<6x256xf32>, vector<6x128xf32> -> vector<6x384xf32>
    %70 = vector.extract_strided_slice %69 {offsets = [0, 16], sizes = [6, 256], strides = [1, 1]} : vector<6x384xf32> to vector<6x256xf32>
    %71 = arith.addf %64, %70 : vector<6x256xf32>
    %72 = vector.broadcast %40 : vector<6x1xf32> to vector<6x256xf32>
    %73 = arith.addf %71, %72 : vector<6x256xf32>
    %c0_39 = arith.constant 0 : index
    %c0_40 = arith.constant 0 : index
    %c0_41 = arith.constant 0 : index
    %74 = vector.load %arg8[%c0_39, %c0_40, %c0_41] : memref<1x6x256xf32, #tpu.memory_space<vmem>>, vector<1x6x256xf32>
    %75 = vector.shape_cast %74 : vector<1x6x256xf32> to vector<6x256xf32>
    %76 = vector.shape_cast %73 : vector<6x256xf32> to vector<1x6x256xf32>
    tpu.vector_store %arg8[%c0_39, %c0_40, %c0_41], %76 {strides = array<i32>} : memref<1x6x256xf32, #tpu.memory_space<vmem>>, vector<1x6x256xf32>,
    return
  }
  func.func @transform_0(%arg0: i32) -> (i32, i32, i32) {
    %c0_i32 = arith.constant 0 : i32
    %c0_i32_0 = arith.constant 0 : i32
    %c0_i32_1 = arith.constant 0 : i32
    return %arg0, %c0_i32, %c0_i32_0 : i32, i32, i32
  }
  func.func @transform_1(%arg0: i32) -> (i32, i32, i32) {
    %c0_i32 = arith.constant 0 : i32
    %c0_i32_0 = arith.constant 0 : i32
    %c0_i32_1 = arith.constant 0 : i32
    %c0_i32_2 = arith.constant 0 : i32
    return %c0_i32, %c0_i32_0, %c0_i32_1 : i32, i32, i32
  }
  func.func @transform_2(%arg0: i32) -> (i32, i32, i32) {
    %c0_i32 = arith.constant 0 : i32
    %c0_i32_0 = arith.constant 0 : i32
    %c0_i32_1 = arith.constant 0 : i32
    %c0_i32_2 = arith.constant 0 : i32
    return %c0_i32, %c0_i32_0, %c0_i32_1 : i32, i32, i32
  }
  func.func @transform_3(%arg0: i32) -> (i32, i32) {
    %c0_i32 = arith.constant 0 : i32
    %c0_i32_0 = arith.constant 0 : i32
    %c0_i32_1 = arith.constant 0 : i32
    return %c0_i32, %c0_i32_0 : i32, i32
  }
  func.func @transform_4(%arg0: i32) -> (i32, i32) {
    %c0_i32 = arith.constant 0 : i32
    %c0_i32_0 = arith.constant 0 : i32
    %c0_i32_1 = arith.constant 0 : i32
    return %c0_i32, %c0_i32_0 : i32, i32
  }
  func.func @transform_5(%arg0: i32) -> (i32, i32) {
    %c0_i32 = arith.constant 0 : i32
    %c0_i32_0 = arith.constant 0 : i32
    %c0_i32_1 = arith.constant 0 : i32
    return %c0_i32, %c0_i32_0 : i32, i32
  }
  func.func @transform_6(%arg0: i32) -> (i32, i32) {
    %c0_i32 = arith.constant 0 : i32
    %c0_i32_0 = arith.constant 0 : i32
    %c0_i32_1 = arith.constant 0 : i32
    return %c0_i32, %c0_i32_0 : i32, i32
  }
  func.func @transform_7(%arg0: i32) -> (i32, i32, i32) {
    %c0_i32 = arith.constant 0 : i32
    %c0_i32_0 = arith.constant 0 : i32
    %c0_i32_1 = arith.constant 0 : i32
    return %arg0, %c0_i32, %c0_i32_0 : i32, i32, i32
  }
}

</mosaic_0001>

<bundles_post_ra>
// kernel: encoder_forward.7
= control target key start
LH: loop header
LB: loop body
LE: loop exit
PB: predicated region body
PF: predicated region fallthrough
CT: control target
= control target key end

     0   :  { %s1294_s15 = smov 0   ;;  %s1605_s0 = inlined_call_operand.vmem [shape: f32[2,16,256], index: 0, kind: input, shape index: {}]   ;;  %s1606_s1 = inlined_call_operand.vmem [shape: f32[2,1,256], index: 1, kind: input, shape index: {}]   ;;  %s1607_s2 = inlined_call_operand.vmem [shape: bf16[3,64,48], index: 2, kind: input, shape index: {}]   ;;  %s1608_s3 = inlined_call_operand.vmem [shape: f32[64,1], index: 3, kind: input, shape index: {}]   ;;  %s1609_s4 = inlined_call_operand.vmem [shape: bf16[2,64,256], index: 4, kind: output, shape index: {}]  }
   0x1 LB: > { %s1131_s16 = sadd.s32 4294967295, %s1259_s15   ;;  %p1135_p0 = scmp.ge.s32.totalorder %s1259_s15, 1  ;;  %s1259_s15 = sphi %s1294_s15, %s14_s15  }
   0x2   : > { %p162_p1 = scmp.lt.s32.totalorder %s1259_s15, 3 }
   0x4   : > { %p163_p2 = pnand %p1135_p0, %p162_p1 }
   0x5   : > { %p188_p3 = scmp.lt.s32.totalorder (!%p163_p2), %s1131_s16, 1  ;;  %s1262_s17 = smov (!%p163_p2), 126  }
   0x6   : > { %166 = sbr.rel (%p163_p2) target bundleno = 790 (0x316), region = 36  ;;  %s1263_s26 = smov (!%p163_p2), 127  }
   0x7   : > { %s1264_s27 = smov (!%p163_p2), 1   ;;  %s1267_s21 = smov (!%p163_p2), 112  }
   0x8   : > { %s1268_s22 = smov (!%p163_p2), 16  }
   0xb   : > { %v217_v0 = vlaneseq  ;;  %v1261_v1 = vmov 0   ;;  %s1611_s16 = smov (!%p188_p3, %s1131_s16), 1  ;;  %v203_v2 = vld [vmem:[%s1606_s1] sm:$0x3]  ;;  %v1140_v13 = vld [vmem:[%s1606_s1 + $0x2] sm:$0x3] }
   0xc   : > { %265 = vrot.lane.b32.xlu1 %v1261_v1, %s1262_s17  ;;  %376 = vmatprep.mubr.bf16.mxu0 %v1261_v1  ;;  %s1199_s20 = sshll.u32 %s1611_s16, 5  ;;  %vm267_vm0 = vcmask 1031168   ;;  %vm256_vm1 = vcmask 1039360   ;;  %v207_v37 = vld [vmem:[%s1608_s3 + $0x8] sm:$0xff]  ;;  %v206_v38 = vld [vmem:[%s1608_s3] sm:$0xff]  ;;  %v208_v39 = vld [vmem:[%s1608_s3 + $0x10] sm:$0xff] }
   0xd   : > { %v218_v3 = vshrl.u32 %v217_v0, 7  ;;  %396 = vmatprep.mubr.bf16.mxu1 %v1261_v1  ;;  %1240 = vset.pattern.permute.xlu1 %v1261_v1  ;;  %s192_s23 = scalar_lea.vmem %s1605_s0, %s1199_s20  ;;  %v209_v40 = vld [vmem:[%s1608_s3 + $0x18] sm:$0xff]  ;;  %v210_v41 = vld [vmem:[%s1608_s3 + $0x20] sm:$0xff]  ;;  %v211_v42 = vld [vmem:[%s1608_s3 + $0x28] sm:$0xff]  ;;  %vm318_vm2 = vcmask 7168   ;;  %vm331_vm3 = vcmask 392192  }
   0xe   : > { %1239 = vset.pattern.permute.xlu0 %v1261_v1  ;;  %v199_v6 = vld [vmem:[%s192_s23] sm:$0xff]  ;;  %v201_v7 = vld [vmem:[%s192_s23 + $0x10] sm:$0xff]  ;;  %v200_v10 = vld [vmem:[%s192_s23 + $0x8] sm:$0xff]  ;;  %s1266_s20 = smov 96   ;;  %vm801_vm4 = vcmask 785408   ;;  %vm579_vm5 = vcmask 916480  }
   0xf   : > { %v219_v4 = vsub.s32 0, %v218_v3  ;;  %v223_v5 = vsub.s32 1, %v218_v3  ;;  %v202_v11 = vld [vmem:[%s192_s23 + $0x18] sm:$0xff]  ;;  %v214_v12 = vpack.c.bf16 %v201_v7, %v199_v6  ;;  %v212_v43 = vld [vmem:[%s1608_s3 + $0x30] sm:$0xff]  ;;  %v1241_v60 = vld [vmem:[%s1607_s2] sm:$0xff]   ;;  %s1200_s23 = sshll.u32 %s1611_s16, 6 }
  0x10   : > { %v215_v25 = vpack.c.bf16 %v202_v11, %v200_v10  ;;  %v213_v44 = vld [vmem:[%s1608_s3 + $0x38] sm:$0xff]  ;;  %v1242_v61 = vld [vmem:[%s1607_s2 + $0x10] sm:$0xff]   ;;  %v1243_v62 = vld [vmem:[%s1607_s2 + $0x8] sm:$0xff]   ;;  %vm1042_vm6 = vcmask 1043456   ;;  %vm1044_vm7 = vcmask 130048  }
  0x11   : > { %v220_v8 = vrot.slane %v203_v2, %v219_v4  ;;  %v224_v9 = vrot.slane %v203_v2, %v223_v5  ;;  %252 = vrot.lane.b32.xlu1 %v214_v12, %s1263_s26  ;;  %v237_v18 = vrot.slane %v1140_v13, %v219_v4  ;;  %v241_v24 = vrot.slane %v1140_v13, %v223_v5  ;;  %v1244_v63 = vld [vmem:[%s1607_s2 + $0x18] sm:$0xff]   ;;  %v1245_v0 = vld [vmem:[%s1607_s2 + $0x20] sm:$0xff]   ;;  %v1247_v3 = vld [vmem:[%s1607_s2 + $0x28] sm:$0xff]  }
  0x12   : > { %v1246_v2 = vld [vmem:[%s1607_s2 + $0x40] sm:$0xff]   ;;  %v1248_v4 = vld [vmem:[%s1607_s2 + $0x48] sm:$0xff]   ;;  %v1249_v5 = vld [vmem:[%s1607_s2 + $0x30] sm:$0xff]  }
  0x13   : > { %v227_v14 = vmul.f32 %v220_v8, %v199_v6  ;;  %v229_v15 = vmul.f32 %v220_v8, %v201_v7  ;;  %v228_v16 = vmul.f32 %v224_v9, %v200_v10  ;;  %v230_v17 = vmul.f32 %v224_v9, %v202_v11  ;;  %v1252_v8 = vld [vmem:[%s1607_s2 + $0x58] sm:$0xff]  }
  0x14   : > { %v244_v20 = vmul.f32 %v237_v18, %v199_v6  ;;  %v246_v21 = vmul.f32 %v237_v18, %v201_v7  ;;  %v245_v26 = vmul.f32 %v241_v24, %v200_v10  ;;  %v247_v27 = vmul.f32 %v241_v24, %v202_v11  ;;  %v1250_v6 = vld [vmem:[%s1607_s2 + $0x50] sm:$0xff]   ;;  %v1251_v7 = vld [vmem:[%s1607_s2 + $0x38] sm:$0xff]  }
  0x15   : > { %v231_v19 = vpack.c.bf16 %v229_v15, %v227_v14  ;;  %v232_v22 = vpack.c.bf16 %v230_v17, %v228_v16  ;;  %v1265_v9 = vmov 0.0  }
  0x16   : > { %v248_v23 = vpack.c.bf16 %v246_v21, %v244_v20  ;;  %v249_v28 = vpack.c.bf16 %v247_v27, %v245_v26 }
  0x17   : > { %261 = vrot.lane.b32.xlu0 %v231_v19, %s1262_s17 }
  0x1b   : > { %263 = vrot.lane.b32.xlu0 %v232_v22, %s1262_s17 }
  0x1f   : > { %254 = vrot.lane.b32.xlu0 %v215_v25, %s1263_s26  ;;  %s1576_s26 = scalar_lea.vmem %s1609_s4, %s1200_s23 }
  0x7e   : > { %v266_v30 = vpop.permute.xlu1 %265 }
  0x83   : > { %v253_v33 = vpop.permute.xlu1 %252 }
  0x89   : > { %v262_v29 = vpop.permute.xlu0 %261 }
  0x8a   : > { %312 = vrot.lane.b32.xlu1 %v262_v29, %s1264_s27 }
  0x8d   : > { %v264_v31 = vpop.permute.xlu0 %263 }
  0x8e   : > { %v268_v32 = vsel %vm267_vm0, %v262_v29, %v264_v31  ;;  %v269_v36 = vsel %vm267_vm0, %v264_v31, %v266_v30 }
  0x8f   : > { %314 = vrot.lane.b32.xlu1 %v268_v32, %s1264_s27 }
  0x91   : > { %v255_v34 = vpop.permute.xlu0 %254 }
  0x92   : > { %v257_v35 = vsel %vm256_vm1, %v253_v33, %v255_v34 }
  0x93   : > { %310 = vrot.lane.b32.xlu1 %v255_v34, %s1264_s27  ;;  %308 = vrot.lane.b32.xlu0 %v257_v35, %s1264_s27 }
  0x97   : > { %316 = vrot.lane.b32.xlu0 %v269_v36, %s1264_s27  ;;  %302 = vrot.lane.b32.xlu1 %v248_v23, %s1264_s27 }
  0x9b   : > { %306 = vrot.lane.b32.xlu0 %v253_v33, %s1264_s27  ;;  %300 = vrot.lane.b32.xlu1 %v1261_v1, %s1264_s27 }
  0x9f   : > { %304 = vrot.lane.b32.xlu0 %v249_v28, %s1264_s27  ;;  %873 = vperm.xlu1 %1240, %v207_v37  }
  0xa3   : > { %868 = vperm.xlu0 %1239, %v206_v38   ;;  %878 = vperm.xlu1 %1240, %v208_v39  }
  0xa7   : > { %883 = vperm.xlu0 %1239, %v209_v40   ;;  %888 = vperm.xlu1 %1240, %v210_v41  }
  0xab   : > { %893 = vperm.xlu0 %1239, %v211_v42   ;;  %898 = vperm.xlu1 %1240, %v212_v43  }
  0xaf   : > { %903 = vperm.xlu0 %1239, %v213_v44   ;;  %771 = vrot.lane.b32.xlu1 %v1265_v9, %s1266_s20 }
  0xfc   : > { %v313_v45 = vpop.permute.xlu1 %312 }
 0x101   : > { %v315_v46 = vpop.permute.xlu1 %314 }
 0x102   : > { %v323_v52 = vsel %vm318_vm2, %v313_v45, %v315_v46 }
 0x105   : > { %v309_v47 = vpop.permute.xlu0 %308  ;;  %v311_v48 = vpop.permute.xlu1 %310 }
 0x106   : > { %v322_v53 = vsel %vm318_vm2, %v309_v47, %v311_v48 }
 0x109   : > { %v317_v49 = vpop.permute.xlu0 %316  ;;  %v303_v51 = vpop.permute.xlu1 %302 }
 0x10a   : > { %v324_v50 = vsel %vm318_vm2, %v315_v46, %v317_v49 }
 0x10b   : > { %354 = vmatprep.subr.bf16.mxu0 %v324_v50  ;;  %1217 = vmatprep.subr.bf16.mxu1 %v324_v50 }
 0x10c   : > { %355 = vmatpush1.bf16.msra.mxu0 %v323_v52  ;;  %1220 = vmatpush1.bf16.msra.mxu1 %v323_v52 }
 0x10d   : > { %v307_v54 = vpop.permute.xlu0 %306  ;;  %356 = vmatprep.subr.bf16.mxu0 %v322_v53  ;;  %1218 = vmatprep.subr.bf16.mxu1 %v322_v53  ;;  %v301_v56 = vpop.permute.xlu1 %300 }
 0x10e   : > { %v321_v55 = vsel %vm318_vm2, %v307_v54, %v309_v47  ;;  %v319_v59 = vsel %vm318_vm2, %v301_v56, %v303_v51 }
 0x110   : > { %357 = vmatpush1.bf16.msra.mxu0 %v321_v55  ;;  %1221 = vmatpush1.bf16.msra.mxu1 %v321_v55 }
 0x111   : > { %v305_v57 = vpop.permute.xlu0 %304 }
 0x112   : > { %v320_v58 = vsel %vm318_vm2, %v303_v51, %v305_v57 }
 0x113   : > { %358 = vmatprep.subr.bf16.mxu0 %v320_v58  ;;  %1219 = vmatprep.subr.bf16.mxu1 %v320_v58 }
 0x114   : > { %359 = vmatpush1.bf16.msra.mxu0 %v319_v59  ;;  %1222 = vmatpush1.bf16.msra.mxu1 %v319_v59 }
 0x115   : > { %468 = vmatprep.subr.bf16.mxu1 %v324_v50  ;;  %687 = vmatprep.subr.bf16.mxu0 %v324_v50 }
 0x117   : > { %1145 = vmatmul.mubr.msk.bf16.vlgmr.msra.gmra.mxu0 %vm331_vm3, %v1241_v60  ;;  %1147 = vmatmul.mubr.msk.bf16.vlgmr.msra.gmra.mxu1 %vm331_vm3, %v1242_v61 }
 0x118   : > { %469 = vmatpush1.bf16.msra.mxu1 %v323_v52  ;;  %688 = vmatpush1.bf16.msra.mxu0 %v323_v52 }
 0x119   : > { %470 = vmatprep.subr.bf16.mxu1 %v322_v53  ;;  %689 = vmatprep.subr.bf16.mxu0 %v322_v53 }
 0x11a   : > { %386 = vmatprep.mubr.bf16.mxu0 %v1261_v1  ;;  %406 = vmatprep.mubr.bf16.mxu1 %v1261_v1  ;;  %v874_v57 = vpop.permute.xlu1 %873 }
 0x11c   : > { %471 = vmatpush1.bf16.msra.mxu1 %v321_v55  ;;  %690 = vmatpush1.bf16.msra.mxu0 %v321_v55 }
 0x11d   : > { %472 = vmatprep.subr.bf16.mxu1 %v320_v58  ;;  %691 = vmatprep.subr.bf16.mxu0 %v320_v58 }
 0x11e   : > { %v869_v58 = vpop.permute.xlu0 %868 }
 0x11f   : > { %1146 = vmatmul.mubr.msk.bf16.gmra.mxu0 %vm331_vm3, %v1243_v62  ;;  %1148 = vmatmul.mubr.msk.bf16.gmra.mxu1 %vm331_vm3, %v1244_v63 }
 0x120   : > { %473 = vmatpush1.bf16.msra.mxu1 %v319_v59  ;;  %692 = vmatpush1.bf16.msra.mxu0 %v319_v59  ;;  %v1476_v59 = vpop.permute.xlu1 %878 }
 0x121   : > { %490 = vmatprep.mubr.bf16.mxu1 %v1261_v1  ;;  %709 = vmatprep.mubr.bf16.mxu0 %v1261_v1 }
 0x122   : > { %v1478_v60 = vpop.permute.xlu0 %883 }
 0x124   : > { %v1480_v61 = vpop.permute.xlu1 %888 }
 0x126   : > { %v1482_v62 = vpop.permute.xlu0 %893 }
 0x127   : > { %1161 = vmatmul.mubr.msk.bf16.vlgmr.msra.gmra.mxu1 %vm331_vm3, %v1245_v0  ;;  %1177 = vmatmul.mubr.msk.bf16.vlgmr.msra.gmra.mxu0 %vm331_vm3, %v1246_v2 }
 0x128   : > { %500 = vmatprep.mubr.bf16.mxu1 %v1261_v1  ;;  %719 = vmatprep.mubr.bf16.mxu0 %v1261_v1  ;;  %v1484_v63 = vpop.permute.xlu1 %898 }
 0x12a   : > { %v1488_v2 = vpop.permute.xlu0 %903 }
 0x12c   : > { %v1486_v0 = vpop.permute.xlu1 %771 }
 0x12f   : > { %1162 = vmatmul.mubr.msk.bf16.gmra.mxu1 %vm331_vm3, %v1247_v3  ;;  %1178 = vmatmul.mubr.msk.bf16.gmra.mxu0 %vm331_vm3, %v1248_v4 }
 0x130   : > { %510 = vmatprep.mubr.bf16.mxu1 %v1261_v1  ;;  %729 = vmatprep.mubr.bf16.mxu0 %v1261_v1 }
 0x137   : > { %1163 = vmatmul.mubr.msk.bf16.gmra.mxu1 %vm331_vm3, %v1249_v5  ;;  %1179 = vmatmul.mubr.msk.bf16.gmra.mxu0 %vm331_vm3, %v1250_v6 }
 0x138   : > { %520 = vmatprep.mubr.bf16.mxu1 %v1261_v1  ;;  %739 = vmatprep.mubr.bf16.mxu0 %v1261_v1 }
 0x13f   : > { %1164 = vmatmul.mubr.msk.bf16.gmra.mxu1 %vm331_vm3, %v1251_v7  ;;  %1180 = vmatmul.mubr.msk.bf16.gmra.mxu0 %vm331_vm3, %v1252_v8 }
 0x1d7   : > { %v1412_v10 = vpop.f32.mrf.mxu0  ;;  %v1414_v11 = vpop.f32.mrf.mxu1 }
 0x1d9   : > { %v1416_v1 = vpop.f32.mrf.mxu0  ;;  %v1418_v12 = vpop.f32.mrf.mxu1 }
 0x1db   : > { %v1420_v13 = vpop.f32.mrf.mxu0  ;;  %v1422_v14 = vpop.f32.mrf.mxu1 }
 0x1dd   : > { %v1424_v15 = vpop.f32.mrf.mxu0  ;;  %v1426_v16 = vpop.f32.mrf.mxu1 }
 0x1df   : > { %v1428_v17 = vpop.f32.mrf.mxu0  ;;  %v1430_v18 = vpop.f32.mrf.mxu1 }
 0x1e1   : > { %v1432_v19 = vpop.f32.mrf.mxu0  ;;  %v1434_v20 = vpop.f32.mrf.mxu1 }
 0x1e3   : > { %v1436_v21 = vpop.f32.mrf.mxu0  ;;  %v1438_v22 = vpop.f32.mrf.mxu1 }
 0x1e5   : > { %v1440_v23 = vpop.f32.mrf.mxu0  ;;  %v1442_v24 = vpop.f32.mrf.mxu1 }
 0x1e7   : > { %v492_v25 = vpop.f32.mrf.mxu1  ;;  %v711_v26 = vpop.f32.mrf.mxu0 }
 0x1e8   : > { %547 = vrot.lane.b32.xlu0 %v492_v25, %s1267_s21  ;;  %767 = vrot.lane.b32.xlu1 %v711_v26, %s1266_s20 }
 0x1e9   : > { %v494_v27 = vpop.f32.mrf.mxu1  ;;  %v713_v28 = vpop.f32.mrf.mxu0 }
 0x1eb   : > { %v496_v29 = vpop.f32.mrf.mxu1  ;;  %v715_v30 = vpop.f32.mrf.mxu0 }
 0x1ec   : > { %549 = vrot.lane.b32.xlu1 %v494_v27, %s1267_s21  ;;  %769 = vrot.lane.b32.xlu0 %v713_v28, %s1266_s20 }
 0x1ed   : > { %v498_v31 = vpop.f32.mrf.mxu1  ;;  %v717_v32 = vpop.f32.mrf.mxu0 }
 0x1ef   : > { %v502_v33 = vpop.f32.mrf.mxu1  ;;  %v721_v35 = vpop.f32.mrf.mxu0 }
 0x1f0   : > { %553 = vrot.lane.b32.xlu1 %v498_v31, %s1267_s21  ;;  %551 = vrot.lane.b32.xlu0 %v496_v29, %s1267_s21 }
 0x1f1   : > { %v504_v34 = vpop.f32.mrf.mxu1  ;;  %v723_v37 = vpop.f32.mrf.mxu0 }
 0x1f3   : > { %v506_v36 = vpop.f32.mrf.mxu1  ;;  %v725_v39 = vpop.f32.mrf.mxu0 }
 0x1f4   : > { %773 = vrot.lane.b32.xlu0 %v715_v30, %s1266_s20  ;;  %775 = vrot.lane.b32.xlu1 %v717_v32, %s1266_s20 }
 0x1f5   : > { %v508_v38 = vpop.f32.mrf.mxu1  ;;  %v727_v40 = vpop.f32.mrf.mxu0 }
 0x1f7   : > { %v512_v41 = vpop.f32.mrf.mxu1  ;;  %v731_v43 = vpop.f32.mrf.mxu0 }
 0x1f8   : > { %555 = vrot.lane.b32.xlu0 %v502_v33, %s1267_s21  ;;  %557 = vrot.lane.b32.xlu1 %v504_v34, %s1267_s21 }
 0x1f9   : > { %v514_v42 = vpop.f32.mrf.mxu1  ;;  %v733_v45 = vpop.f32.mrf.mxu0 }
 0x1fb   : > { %v516_v44 = vpop.f32.mrf.mxu1  ;;  %v735_v47 = vpop.f32.mrf.mxu0 }
 0x1fc   : > { %777 = vrot.lane.b32.xlu0 %v721_v35, %s1266_s20  ;;  %779 = vrot.lane.b32.xlu1 %v723_v37, %s1266_s20 }
 0x1fd   : > { %v518_v46 = vpop.f32.mrf.mxu1  ;;  %v737_v48 = vpop.f32.mrf.mxu0 }
 0x1ff   : > { %v522_v49 = vpop.f32.mrf.mxu1  ;;  %v741_v51 = vpop.f32.mrf.mxu0 }
 0x200   : > { %559 = vrot.lane.b32.xlu0 %v506_v36, %s1267_s21  ;;  %561 = vrot.lane.b32.xlu1 %v508_v38, %s1267_s21 }
 0x201   : > { %v524_v50 = vpop.f32.mrf.mxu1  ;;  %v743_v53 = vpop.f32.mrf.mxu0 }
 0x203   : > { %v526_v52 = vpop.f32.mrf.mxu1  ;;  %v745_v55 = vpop.f32.mrf.mxu0 }
 0x204   : > { %781 = vrot.lane.b32.xlu0 %v725_v39, %s1266_s20  ;;  %783 = vrot.lane.b32.xlu1 %v727_v40, %s1266_s20 }
 0x205   : > { %v528_v54 = vpop.f32.mrf.mxu1  ;;  %v747_v56 = vpop.f32.mrf.mxu0 }
 0x208   : > { %563 = vrot.lane.b32.xlu0 %v512_v41, %s1267_s21  ;;  %565 = vrot.lane.b32.xlu1 %v514_v42, %s1267_s21 }
 0x20c   : > { %785 = vrot.lane.b32.xlu0 %v731_v43, %s1266_s20  ;;  %787 = vrot.lane.b32.xlu1 %v733_v45, %s1266_s20 }
 0x210   : > { %567 = vrot.lane.b32.xlu0 %v516_v44, %s1267_s21  ;;  %569 = vrot.lane.b32.xlu1 %v518_v46, %s1267_s21 }
 0x214   : > { %789 = vrot.lane.b32.xlu0 %v735_v47, %s1266_s20  ;;  %791 = vrot.lane.b32.xlu1 %v737_v48, %s1266_s20 }
 0x218   : > { %571 = vrot.lane.b32.xlu0 %v522_v49, %s1267_s21  ;;  %573 = vrot.lane.b32.xlu1 %v524_v50, %s1267_s21 }
 0x21c   : > { %793 = vrot.lane.b32.xlu0 %v741_v51, %s1266_s20  ;;  %795 = vrot.lane.b32.xlu1 %v743_v53, %s1266_s20 }
 0x220   : > { %575 = vrot.lane.b32.xlu0 %v526_v52, %s1267_s21  ;;  %577 = vrot.lane.b32.xlu1 %v528_v54, %s1267_s21 }
 0x224   : > { %797 = vrot.lane.b32.xlu0 %v745_v55, %s1266_s20  ;;  %799 = vrot.lane.b32.xlu1 %v747_v56, %s1266_s20 }
 0x25a   : > { %v548_v3 = vpop.permute.xlu0 %547  ;;  %v768_v4 = vpop.permute.xlu1 %767 }
 0x25b   : > { %v842_v25 = vadd.f32 %v768_v4, %v548_v3 }
 0x25d   : > { %v906_v34 = vadd.f32 %v869_v58, %v842_v25 }
 0x25e   : > { %v770_v5 = vpop.permute.xlu0 %769  ;;  %v550_v6 = vpop.permute.xlu1 %549 }
 0x25f   : > { %v803_v7 = vsel %vm801_vm4, %v770_v5, %v1486_v0  ;;  %v580_v8 = vsel %vm579_vm5, %v548_v3, %v550_v6  ;;  %v614_v9 = vadd.f32 %v550_v6, %v1416_v1  ;;  %v802_v27 = vsel %vm801_vm4, %v768_v4, %v770_v5 }
 0x260   : > { %v613_v26 = vadd.f32 %v580_v8, %v1412_v10 }
 0x261   : > { %v844_v28 = vadd.f32 %v803_v7, %v614_v9 }
 0x262   : > { %v843_v29 = vadd.f32 %v802_v27, %v613_v26  ;;  %v552_v30 = vpop.permute.xlu0 %551  ;;  %v554_v31 = vpop.permute.xlu1 %553 }
 0x263   : > { %v581_v32 = vsel %vm579_vm5, %v552_v30, %v554_v31  ;;  %v908_v33 = vadd.f32 %v869_v58, %v844_v28  ;;  %v617_v38 = vadd.f32 %v554_v31, %v1424_v15 }
 0x264   : > { %v907_v35 = vadd.f32 %v869_v58, %v843_v29  ;;  %v616_v37 = vadd.f32 %v581_v32, %v1420_v13 }
 0x265   : > { %v1202_v36 = vpack.c.bf16 %v908_v33, %v908_v33 }
 0x266   : > { %v774_v1 = vpop.permute.xlu0 %773  ;;  %v776_v39 = vpop.permute.xlu1 %775  ;;  %v1201_v40 = vpack.c.bf16 %v907_v35, %v906_v34 }
 0x267   : > { %v845_v10 = vadd.f32 %v774_v1, %v552_v30  ;;  %v804_v41 = vsel %vm801_vm4, %v774_v1, %v776_v39  ;;  %v805_v42 = vsel %vm801_vm4, %v776_v39, %v1486_v0  ;;  %996 = vrot.lane.b32.xlu1 %v1202_v36, %s1268_s22 }
 0x268   : > { %v846_v43 = vadd.f32 %v804_v41, %v616_v37  ;;  %v847_v44 = vadd.f32 %v805_v42, %v617_v38  ;;  %994 = vrot.lane.b32.xlu0 %v1201_v40, %s1268_s22 }
 0x269   : > { %v909_v45 = vadd.f32 %v874_v57, %v845_v10 }
 0x26a   : > { %v910_v13 = vadd.f32 %v874_v57, %v846_v43  ;;  %v556_v46 = vpop.permute.xlu0 %555  ;;  %v558_v15 = vpop.permute.xlu1 %557  ;;  %v911_v47 = vadd.f32 %v874_v57, %v847_v44 }
 0x26b   : > { %v582_v48 = vsel %vm579_vm5, %v556_v46, %v558_v15  ;;  %v620_v52 = vadd.f32 %v558_v15, %v1432_v19 }
 0x26c   : > { %v1204_v49 = vpack.c.bf16 %v911_v47, %v911_v47  ;;  %v1203_v50 = vpack.c.bf16 %v910_v13, %v909_v45  ;;  %v619_v51 = vadd.f32 %v582_v48, %v1428_v17 }
 0x26e   : > { %v778_v53 = vpop.permute.xlu0 %777  ;;  %1000 = vrot.lane.b32.xlu1 %v1204_v49, %s1268_s22  ;;  %998 = vrot.lane.b32.xlu0 %v1203_v50, %s1268_s22  ;;  %v780_v54 = vpop.permute.xlu1 %779 }
 0x26f   : > { %v848_v55 = vadd.f32 %v778_v53, %v556_v46  ;;  %v806_v56 = vsel %vm801_vm4, %v778_v53, %v780_v54  ;;  %v807_v57 = vsel %vm801_vm4, %v780_v54, %v1486_v0 }
 0x270   : > { %v849_v58 = vadd.f32 %v806_v56, %v619_v51  ;;  %v850_v3 = vadd.f32 %v807_v57, %v620_v52 }
 0x271   : > { %v912_v4 = vadd.f32 %v1476_v59, %v848_v55 }
 0x272   : > { %v913_v17 = vadd.f32 %v1476_v59, %v849_v58  ;;  %v560_v5 = vpop.permute.xlu0 %559  ;;  %v562_v19 = vpop.permute.xlu1 %561  ;;  %v914_v6 = vadd.f32 %v1476_v59, %v850_v3 }
 0x273   : > { %v583_v7 = vsel %vm579_vm5, %v560_v5, %v562_v19  ;;  %v623_v26 = vadd.f32 %v562_v19, %v1440_v23 }
 0x274   : > { %v1206_v8 = vpack.c.bf16 %v914_v6, %v914_v6  ;;  %v1205_v9 = vpack.c.bf16 %v913_v17, %v912_v4  ;;  %v622_v25 = vadd.f32 %v583_v7, %v1436_v21 }
 0x276   : > { %v782_v27 = vpop.permute.xlu0 %781  ;;  %1004 = vrot.lane.b32.xlu1 %v1206_v8, %s1268_s22  ;;  %1002 = vrot.lane.b32.xlu0 %v1205_v9, %s1268_s22  ;;  %v784_v28 = vpop.permute.xlu1 %783 }
 0x277   : > { %v851_v29 = vadd.f32 %v782_v27, %v560_v5  ;;  %v808_v30 = vsel %vm801_vm4, %v782_v27, %v784_v28  ;;  %v809_v59 = vsel %vm801_vm4, %v784_v28, %v1486_v0 }
 0x278   : > { %v852_v31 = vadd.f32 %v808_v30, %v622_v25  ;;  %v853_v32 = vadd.f32 %v809_v59, %v623_v26 }
 0x279   : > { %v915_v33 = vadd.f32 %v1478_v60, %v851_v29 }
 0x27a   : > { %v916_v21 = vadd.f32 %v1478_v60, %v852_v31  ;;  %v564_v34 = vpop.permute.xlu0 %563  ;;  %v566_v23 = vpop.permute.xlu1 %565  ;;  %v917_v35 = vadd.f32 %v1478_v60, %v853_v32 }
 0x27b   : > { %v584_v36 = vsel %vm579_vm5, %v564_v34, %v566_v23  ;;  %v626_v39 = vadd.f32 %v566_v23, %v1418_v12 }
 0x27c   : > { %v1208_v37 = vpack.c.bf16 %v917_v35, %v917_v35  ;;  %v1207_v38 = vpack.c.bf16 %v916_v21, %v915_v33  ;;  %v625_v1 = vadd.f32 %v584_v36, %v1414_v11 }
 0x27e   : > { %v786_v40 = vpop.permute.xlu0 %785  ;;  %1008 = vrot.lane.b32.xlu1 %v1208_v37, %s1268_s22  ;;  %1006 = vrot.lane.b32.xlu0 %v1207_v38, %s1268_s22  ;;  %v788_v10 = vpop.permute.xlu1 %787 }
 0x27f   : > { %v854_v41 = vadd.f32 %v786_v40, %v564_v34  ;;  %v810_v42 = vsel %vm801_vm4, %v786_v40, %v788_v10  ;;  %v811_v60 = vsel %vm801_vm4, %v788_v10, %v1486_v0 }
 0x280   : > { %v855_v43 = vadd.f32 %v810_v42, %v625_v1  ;;  %v856_v44 = vadd.f32 %v811_v60, %v626_v39 }
 0x281   : > { %v918_v45 = vadd.f32 %v1480_v61, %v854_v41 }
 0x282   : > { %v919_v11 = vadd.f32 %v1480_v61, %v855_v43  ;;  %v568_v13 = vpop.permute.xlu0 %567  ;;  %v570_v12 = vpop.permute.xlu1 %569  ;;  %v920_v46 = vadd.f32 %v1480_v61, %v856_v44 }
 0x283   : > { %v585_v15 = vsel %vm579_vm5, %v568_v13, %v570_v12  ;;  %v629_v50 = vadd.f32 %v570_v12, %v1426_v16 }
 0x284   : > { %v1210_v47 = vpack.c.bf16 %v920_v46, %v920_v46  ;;  %v1209_v48 = vpack.c.bf16 %v919_v11, %v918_v45  ;;  %v628_v49 = vadd.f32 %v585_v15, %v1422_v14 }
 0x286   : > { %v790_v51 = vpop.permute.xlu0 %789  ;;  %1012 = vrot.lane.b32.xlu1 %v1210_v47, %s1268_s22  ;;  %1010 = vrot.lane.b32.xlu0 %v1209_v48, %s1268_s22  ;;  %v792_v52 = vpop.permute.xlu1 %791 }
 0x287   : > { %v857_v53 = vadd.f32 %v790_v51, %v568_v13  ;;  %v812_v54 = vsel %vm801_vm4, %v790_v51, %v792_v52  ;;  %v813_v61 = vsel %vm801_vm4, %v792_v52, %v1486_v0 }
 0x288   : > { %v858_v55 = vadd.f32 %v812_v54, %v628_v49  ;;  %v859_v56 = vadd.f32 %v813_v61, %v629_v50 }
 0x289   : > { %v921_v57 = vadd.f32 %v1482_v62, %v857_v53 }
 0x28a   : > { %v922_v14 = vadd.f32 %v1482_v62, %v858_v55  ;;  %v572_v58 = vpop.permute.xlu0 %571  ;;  %v574_v16 = vpop.permute.xlu1 %573  ;;  %v923_v3 = vadd.f32 %v1482_v62, %v859_v56 }
 0x28b   : > { %v586_v4 = vsel %vm579_vm5, %v572_v58, %v574_v16  ;;  %v632_v6 = vadd.f32 %v574_v16, %v1434_v20 }
 0x28c   : > { %v1212_v17 = vpack.c.bf16 %v923_v3, %v923_v3  ;;  %v1211_v5 = vpack.c.bf16 %v922_v14, %v921_v57  ;;  %v631_v19 = vadd.f32 %v586_v4, %v1430_v18 }
 0x28e   : > { %v794_v7 = vpop.permute.xlu0 %793  ;;  %1016 = vrot.lane.b32.xlu1 %v1212_v17, %s1268_s22  ;;  %1014 = vrot.lane.b32.xlu0 %v1211_v5, %s1268_s22  ;;  %v796_v8 = vpop.permute.xlu1 %795 }
 0x28f   : > { %v860_v9 = vadd.f32 %v794_v7, %v572_v58  ;;  %v814_v25 = vsel %vm801_vm4, %v794_v7, %v796_v8  ;;  %v815_v62 = vsel %vm801_vm4, %v796_v8, %v1486_v0 }
 0x290   : > { %v861_v26 = vadd.f32 %v814_v25, %v631_v19  ;;  %v862_v27 = vadd.f32 %v815_v62, %v632_v6 }
 0x291   : > { %v924_v28 = vadd.f32 %v1484_v63, %v860_v9 }
 0x292   : > { %v925_v18 = vadd.f32 %v1484_v63, %v861_v26  ;;  %v576_v29 = vpop.permute.xlu0 %575  ;;  %v578_v20 = vpop.permute.xlu1 %577  ;;  %v926_v30 = vadd.f32 %v1484_v63, %v862_v27 }
 0x293   : > { %v587_v59 = vsel %vm579_vm5, %v576_v29, %v578_v20  ;;  %v635_v21 = vadd.f32 %v578_v20, %v1442_v24 }
 0x294   : > { %v1214_v31 = vpack.c.bf16 %v926_v30, %v926_v30  ;;  %v1213_v32 = vpack.c.bf16 %v925_v18, %v924_v28  ;;  %v634_v33 = vadd.f32 %v587_v59, %v1438_v22 }
 0x296   : > { %v798_v34 = vpop.permute.xlu0 %797  ;;  %1020 = vrot.lane.b32.xlu1 %v1214_v31, %s1268_s22  ;;  %1018 = vrot.lane.b32.xlu0 %v1213_v32, %s1268_s22  ;;  %v800_v23 = vpop.permute.xlu1 %799 }
 0x297   : > { %v863_v35 = vadd.f32 %v798_v34, %v576_v29  ;;  %v816_v36 = vsel %vm801_vm4, %v798_v34, %v800_v23  ;;  %v817_v63 = vsel %vm801_vm4, %v800_v23, %v1486_v0 }
 0x298   : > { %v864_v37 = vadd.f32 %v816_v36, %v634_v33  ;;  %v865_v38 = vadd.f32 %v817_v63, %v635_v21 }
 0x299   : > { %v927_v1 = vadd.f32 %v1488_v2, %v863_v35 }
 0x29a   : > { %v928_v22 = vadd.f32 %v1488_v2, %v864_v37  ;;  %v929_v24 = vadd.f32 %v1488_v2, %v865_v38 }
 0x29c   : > { %v1216_v39 = vpack.c.bf16 %v929_v24, %v929_v24  ;;  %v1215_v40 = vpack.c.bf16 %v928_v22, %v927_v1 }
 0x29e   : > { %1024 = vrot.lane.b32.xlu1 %v1216_v39, %s1268_s22  ;;  %1022 = vrot.lane.b32.xlu0 %v1215_v40, %s1268_s22 }
 0x2d9   : > { %v997_v10 = vpop.permute.xlu1 %996 }
 0x2da   : > { %v1027_v41 = vrot.slane %v997_v10, 4  ;;  %v995_v42 = vpop.permute.xlu0 %994 }
 0x2db   : > { %v1026_v0 = vrot.slane %v995_v42, 4 }
 0x2dd   : > { %v1043_v2 = vsel %vm1042_vm6, %v1026_v0, %v1027_v41 }
 0x2de   : > { %v1045_v60 = vsel %vm1044_vm7, %v995_v42, %v1043_v2 }
 0x2df   : > { %1068 = vst [vmem:[%s1576_s26] sm:$0xff] %v1045_v60 }
 0x2e0   : > { %v999_v43 = vpop.permute.xlu0 %998  ;;  %v1001_v44 = vpop.permute.xlu1 %1000 }
 0x2e1   : > { %v1028_v45 = vrot.slane %v999_v43, 4  ;;  %v1029_v11 = vrot.slane %v1001_v44, 4 }
 0x2e3   : > { %v1046_v13 = vsel %vm1042_vm6, %v1028_v45, %v1029_v11 }
 0x2e4   : > { %v1047_v12 = vsel %vm1044_vm7, %v999_v43, %v1046_v13 }
 0x2e5   : > { %1069 = vst [vmem:[%s1576_s26 + $0x8] sm:$0xff] %v1047_v12 }
 0x2e8   : > { %v1003_v46 = vpop.permute.xlu0 %1002  ;;  %v1005_v15 = vpop.permute.xlu1 %1004 }
 0x2e9   : > { %v1030_v47 = vrot.slane %v1003_v46, 4  ;;  %v1031_v48 = vrot.slane %v1005_v15, 4 }
 0x2eb   : > { %v1048_v49 = vsel %vm1042_vm6, %v1030_v47, %v1031_v48 }
 0x2ec   : > { %v1049_v50 = vsel %vm1044_vm7, %v1003_v46, %v1048_v49 }
 0x2ed   : > { %1070 = vst [vmem:[%s1576_s26 + $0x10] sm:$0xff] %v1049_v50 }
 0x2f0   : > { %v1007_v51 = vpop.permute.xlu0 %1006  ;;  %v1009_v52 = vpop.permute.xlu1 %1008 }
 0x2f1   : > { %v1032_v53 = vrot.slane %v1007_v51, 4  ;;  %v1033_v54 = vrot.slane %v1009_v52, 4 }
 0x2f3   : > { %v1050_v61 = vsel %vm1042_vm6, %v1032_v53, %v1033_v54 }
 0x2f4   : > { %v1051_v55 = vsel %vm1044_vm7, %v1007_v51, %v1050_v61 }
 0x2f5   : > { %1071 = vst [vmem:[%s1576_s26 + $0x18] sm:$0xff] %v1051_v55 }
 0x2f8   : > { %v1011_v56 = vpop.permute.xlu0 %1010  ;;  %v1013_v57 = vpop.permute.xlu1 %1012 }
 0x2f9   : > { %v1034_v14 = vrot.slane %v1011_v56, 4  ;;  %v1035_v58 = vrot.slane %v1013_v57, 4 }
 0x2fb   : > { %v1052_v16 = vsel %vm1042_vm6, %v1034_v14, %v1035_v58 }
 0x2fc   : > { %v1053_v3 = vsel %vm1044_vm7, %v1011_v56, %v1052_v16 }
 0x2fd   : > { %1072 = vst [vmem:[%s1576_s26 + $0x20] sm:$0xff] %v1053_v3 }
 0x300   : > { %v1015_v4 = vpop.permute.xlu0 %1014  ;;  %v1017_v17 = vpop.permute.xlu1 %1016 }
 0x301   : > { %v1036_v5 = vrot.slane %v1015_v4, 4  ;;  %v1037_v19 = vrot.slane %v1017_v17, 4 }
 0x303   : > { %v1054_v6 = vsel %vm1042_vm6, %v1036_v5, %v1037_v19 }
 0x304   : > { %v1055_v7 = vsel %vm1044_vm7, %v1015_v4, %v1054_v6 }
 0x305   : > { %1073 = vst [vmem:[%s1576_s26 + $0x28] sm:$0xff] %v1055_v7 }
 0x308   : > { %v1019_v8 = vpop.permute.xlu0 %1018  ;;  %v1021_v9 = vpop.permute.xlu1 %1020 }
 0x309   : > { %v1038_v25 = vrot.slane %v1019_v8, 4  ;;  %v1039_v62 = vrot.slane %v1021_v9, 4 }
 0x30b   : > { %v1056_v26 = vsel %vm1042_vm6, %v1038_v25, %v1039_v62 }
 0x30c   : > { %v1057_v27 = vsel %vm1044_vm7, %v1019_v8, %v1056_v26 }
 0x30d   : > { %1074 = vst [vmem:[%s1576_s26 + $0x30] sm:$0xff] %v1057_v27 }
 0x310   : > { %v1023_v28 = vpop.permute.xlu0 %1022  ;;  %v1025_v18 = vpop.permute.xlu1 %1024 }
 0x311   : > { %v1040_v29 = vrot.slane %v1023_v28, 4  ;;  %v1041_v20 = vrot.slane %v1025_v18, 4 }
 0x313   : > { %v1058_v30 = vsel %vm1042_vm6, %v1040_v29, %v1041_v20 }
 0x314   : > { %v1059_v59 = vsel %vm1044_vm7, %v1023_v28, %v1058_v30 }
 0x315   : > { %1075 = vst [vmem:[%s1576_s26 + $0x38] sm:$0xff] %v1059_v59 }
 0x316 PF: > { %s14_s15 = sadd.s32 1, %s1259_s15  }
 0x317   : > { %p11_p4 = scmp.ge.s32.totalorder %s14_s15, 4  }
 0x319   :  { %13 = sbr.rel (!%p11_p4) target bundleno = 1 (0x1), region = 69 }

// kernel: encoder_forward.13
= control target key start
LH: loop header
LB: loop body
LE: loop exit
PB: predicated region body
PF: predicated region fallthrough
CT: control target
= control target key end

     0   :  { %s1669_s24 = smov 0   ;;  %s2428_s0 = inlined_call_operand.vmem [shape: bf16[2,64,256], index: 0, kind: input, shape index: {}]   ;;  %s2429_s1 = inlined_call_operand.vmem [shape: f32[2,1,256], index: 1, kind: input, shape index: {}]   ;;  %s2430_s2 = inlined_call_operand.vmem [shape: bf16[3,6,192], index: 2, kind: input, shape index: {}]   ;;  %s2431_s3 = inlined_call_operand.vmem [shape: f32[6,1], index: 3, kind: input, shape index: {}]   ;;  %s2432_s4 = inlined_call_operand.vmem [shape: f32[64,1], index: 4, kind: input, shape index: {}]   ;;  %s2433_s5 = inlined_call_operand.vmem [shape: f32[64,1], index: 5, kind: input, shape index: {}]   ;;  %s2434_s6 = inlined_call_operand.vmem [shape: f32[64,64], index: 6, kind: input, shape index: {}]   ;;  %s2435_s7 = inlined_call_operand.vmem [shape: f32[2,6,256], index: 7, kind: output, shape index: {}]  }
   0x1 LB: > { %s1468_s25 = sadd.s32 4294967295, %s1619_s24   ;;  %p1472_p0 = scmp.ge.s32.totalorder %s1619_s24, 1  ;;  %s1619_s24 = sphi %s1669_s24, %s17_s24  }
   0x2   : > { %p237_p1 = scmp.lt.s32.totalorder %s1619_s24, 3 }
   0x4   : > { %p238_p2 = pnand %p1472_p0, %p237_p1 }
   0x5   : > { %p269_p3 = scmp.lt.s32.totalorder (!%p238_p2), %s1468_s25, 1  ;;  %s1623_s17 = smov (!%p238_p2), 127  }
   0x6   : > { %241 = sbr.rel (%p238_p2) target bundleno = 1640 (0x668), region = 48  ;;  %s1624_s18 = smov (!%p238_p2), 126  }
   0x7   : > { %s1625_s19 = smov (!%p238_p2), 1   ;;  %s1626_s30 = smov (!%p238_p2), 112  }
   0x8   : > { %s1627_s8 = smov (!%p238_p2), 96   ;;  %s1628_s9 = smov (!%p238_p2), 16  }
   0xb   : > { %v1621_v0 = vmov 0.0   ;;  %s2437_s25 = smov (!%p269_p3, %s1468_s25), 1  ;;  %v1747_v25 = vld [vmem:[%s2434_s6] sm:$0xff]  ;;  %vm331_vm0 = vcmask 523264   ;;  %v1759_v26 = vld [vmem:[%s2434_s6 + $0x8] sm:$0xff]  ;;  %v1767_v27 = vld [vmem:[%s2434_s6 + $0x10] sm:$0xff] }
   0xc   : > { %420 = vmatprep.mubr.f32.mxu1 %v1621_v0  ;;  %s1507_s26 = sshll.u32 %s2437_s25, 6  ;;  %v1775_v28 = vld [vmem:[%s2434_s6 + $0x18] sm:$0xff]  ;;  %v1783_v29 = vld [vmem:[%s2434_s6 + $0x20] sm:$0xff]  ;;  %v1791_v30 = vld [vmem:[%s2434_s6 + $0x28] sm:$0xff]  ;;  %v1622_v58 = vmov 0   ;;  %vm1038_vm1 = vcmask 1039360  }
   0xd   : > { %s273_s29 = scalar_lea.vmem %s2428_s0, %s1507_s26  ;;  %v1799_v31 = vld [vmem:[%s2434_s6 + $0x30] sm:$0xff]  ;;  %v1807_v32 = vld [vmem:[%s2434_s6 + $0x38] sm:$0xff]  ;;  %1526 = vset.pattern.permute.xlu1 %v1622_v58  ;;  %1525 = vset.pattern.permute.xlu0 %v1622_v58  ;;  %v311_v62 = vld [vmem:[%s2432_s4 + $0x20] sm:$0xff]  ;;  %vm1070_vm2 = vcmask 1031168   ;;  %vm1160_vm3 = vcmask 7168   ;;  %vm1311_vm4 = vcmask 916480  }
   0xe   : > { %v1684_v1 = vld [vmem:[%s273_s29 + $0x38] sm:$0xff]  ;;  %v1686_v2 = vld [vmem:[%s273_s29 + $0x30] sm:$0xff]  ;;  %v1688_v3 = vld [vmem:[%s273_s29 + $0x28] sm:$0xff]  ;;  %vm1380_vm5 = vcmask 785408   ;;  %s1508_s10 = sshll.u32 %s2437_s25, 4  ;;  %vm1406_vm6 = vcmask 130048  }
   0xf   : > { %v303_v4 = vunpack.c.h.bf16 %v1684_v1  ;;  %v302_v5 = vunpack.c.l.bf16 %v1684_v1  ;;  %v301_v6 = vunpack.c.h.bf16 %v1686_v2  ;;  %v300_v7 = vunpack.c.l.bf16 %v1686_v2  ;;  %v1694_v8 = vld [vmem:[%s273_s29 + $0x20] sm:$0xff]  ;;  %v1702_v11 = vld [vmem:[%s273_s29 + $0x18] sm:$0xff]  ;;  %v1710_v14 = vld [vmem:[%s273_s29 + $0x10] sm:$0xff]  ;;  %s278_s13 = scalar_lea.vmem %s2435_s7, %s1508_s10 }
  0x10   : > { %v299_v9 = vunpack.c.h.bf16 %v1688_v3  ;;  %v298_v10 = vunpack.c.l.bf16 %v1688_v3  ;;  %v297_v12 = vunpack.c.h.bf16 %v1694_v8  ;;  %v296_v13 = vunpack.c.l.bf16 %v1694_v8  ;;  %v1718_v17 = vld [vmem:[%s273_s29 + $0x8] sm:$0xff]  ;;  %v1726_v20 = vld [vmem:[%s273_s29] sm:$0xff]  ;;  %v314_v57 = vld [vmem:[%s2432_s4 + $0x38] sm:$0xff] }
  0x11   : > { %372 = vmatprep.subr.mxu1 %v303_v4  ;;  %v295_v15 = vunpack.c.h.bf16 %v1702_v11  ;;  %v294_v16 = vunpack.c.l.bf16 %v1702_v11  ;;  %v293_v18 = vunpack.c.h.bf16 %v1710_v14  ;;  %v292_v19 = vunpack.c.l.bf16 %v1710_v14  ;;  %v313_v59 = vld [vmem:[%s2432_s4 + $0x30] sm:$0xff]  ;;  %v322_v61 = vld [vmem:[%s2433_s5 + $0x38] sm:$0xff]  ;;  %v312_v63 = vld [vmem:[%s2432_s4 + $0x28] sm:$0xff] }
  0x12   : > { %373 = vmatpush1.msra.mxu1 %v302_v5  ;;  %v291_v21 = vunpack.c.h.bf16 %v1718_v17  ;;  %v290_v22 = vunpack.c.l.bf16 %v1718_v17  ;;  %v289_v23 = vunpack.c.h.bf16 %v1726_v20  ;;  %v288_v24 = vunpack.c.l.bf16 %v1726_v20  ;;  %v321_v60 = vld [vmem:[%s2433_s5 + $0x30] sm:$0xff] }
  0x13   : > { %374 = vmatprep.subr.mxu1 %v301_v6 }
  0x14   : > { %375 = vmatpush1.msra.mxu1 %v300_v7 }
  0x15   : > { %376 = vmatprep.subr.mxu1 %v299_v9 }
  0x16   : > { %377 = vmatpush1.msra.mxu1 %v298_v10 }
  0x17   : > { %378 = vmatprep.subr.mxu1 %v297_v12 }
  0x18   : > { %379 = vmatpush1.msra.mxu1 %v296_v13 }
  0x19   : > { %380 = vmatprep.subr.mxu1 %v295_v15 }
  0x1a   : > { %381 = vmatpush1.msra.mxu1 %v294_v16 }
  0x1b   : > { %382 = vmatprep.subr.mxu1 %v293_v18 }
  0x1c   : > { %383 = vmatpush1.msra.mxu1 %v292_v19 }
  0x1d   : > { %384 = vmatprep.subr.mxu1 %v291_v21 }
  0x1e   : > { %385 = vmatpush1.msra.mxu1 %v290_v22 }
  0x1f   : > { %386 = vmatprep.subr.mxu1 %v289_v23 }
  0x20   : > { %387 = vmatpush1.msra.mxu1 %v288_v24 }
  0x21   : > { %1478 = vmatmul.mubr.msk.f32.vlgmr.msra.gmra.mxu1 %vm331_vm0, %v1747_v25 }
  0x22   : > { %426 = vmatprep.mubr.f32.mxu1 %v1621_v0 }
  0x25   : > { %1479 = vmatmul.mubr.msk.f32.gmra.mxu1 %vm331_vm0, %v1759_v26 }
  0x26   : > { %432 = vmatprep.mubr.f32.mxu1 %v1621_v0 }
  0x29   : > { %1480 = vmatmul.mubr.msk.f32.gmra.mxu1 %vm331_vm0, %v1767_v27 }
  0x2a   : > { %438 = vmatprep.mubr.f32.mxu1 %v1621_v0 }
  0x2d   : > { %1481 = vmatmul.mubr.msk.f32.gmra.mxu1 %vm331_vm0, %v1775_v28 }
  0x2e   : > { %444 = vmatprep.mubr.f32.mxu1 %v1621_v0 }
  0x31   : > { %1482 = vmatmul.mubr.msk.f32.gmra.mxu1 %vm331_vm0, %v1783_v29 }
  0x32   : > { %450 = vmatprep.mubr.f32.mxu1 %v1621_v0 }
  0x35   : > { %1483 = vmatmul.mubr.msk.f32.gmra.mxu1 %vm331_vm0, %v1791_v30 }
  0x36   : > { %456 = vmatprep.mubr.f32.mxu1 %v1621_v0 }
  0x39   : > { %1484 = vmatmul.mubr.msk.f32.gmra.mxu1 %vm331_vm0, %v1799_v31 }
  0x3a   : > { %462 = vmatprep.mubr.f32.mxu1 %v1621_v0 }
  0x3d   : > { %1485 = vmatmul.mubr.msk.f32.gmra.mxu1 %vm331_vm0, %v1807_v32 }
  0x3e   : > { %598 = vmatprep.mubr.f32.mxu1 %v1621_v0 }
  0xe1   : > { %v422_v33 = vpop.f32.mrf.mxu1 }
  0xe3   : > { %v424_v34 = vpop.f32.mrf.mxu1 }
  0xe4   : > { %v469_v53 = vadd.f32 %v424_v34, %v422_v33  ;;  %v319_v33 = vld [vmem:[%s2433_s5 + $0x20] sm:$0xff]  ;;  %v320_v34 = vld [vmem:[%s2433_s5 + $0x28] sm:$0xff] }
  0xe5   : > { %v428_v35 = vpop.f32.mrf.mxu1 }
  0xe7   : > { %v430_v36 = vpop.f32.mrf.mxu1 }
  0xe8   : > { %v472_v56 = vadd.f32 %v430_v36, %v428_v35  ;;  %v309_v35 = vld [vmem:[%s2432_s4 + $0x10] sm:$0xff] }
  0xe9   : > { %v434_v37 = vpop.f32.mrf.mxu1 }
  0xeb   : > { %v436_v38 = vpop.f32.mrf.mxu1 }
  0xec   : > { %v475_v51 = vadd.f32 %v436_v38, %v434_v37 }
  0xed   : > { %v440_v39 = vpop.f32.mrf.mxu1 }
  0xef   : > { %v442_v40 = vpop.f32.mrf.mxu1 }
  0xf0   : > { %v478_v55 = vadd.f32 %v442_v40, %v440_v39 }
  0xf1   : > { %v446_v41 = vpop.f32.mrf.mxu1 }
  0xf3   : > { %v448_v42 = vpop.f32.mrf.mxu1 }
  0xf4   : > { %v481_v48 = vadd.f32 %v448_v42, %v446_v41 }
  0xf5   : > { %v452_v43 = vpop.f32.mrf.mxu1 }
  0xf7   : > { %v454_v44 = vpop.f32.mrf.mxu1 }
  0xf8   : > { %v484_v45 = vadd.f32 %v454_v44, %v452_v43 }
  0xf9   : > { %v458_v46 = vpop.f32.mrf.mxu1 }
  0xfa   : > { %485 = vadd.xlane.f32.xlu1 %v484_v45 }
  0xfb   : > { %v460_v47 = vpop.f32.mrf.mxu1 }
  0xfc   : > { %v487_v54 = vadd.f32 %v460_v47, %v458_v46 }
  0xfd   : > { %v464_v49 = vpop.f32.mrf.mxu1 }
  0xfe   : > { %482 = vadd.xlane.f32.xlu1 %v481_v48 }
  0xff   : > { %v466_v50 = vpop.f32.mrf.mxu1 }
 0x100   : > { %v490_v52 = vadd.f32 %v466_v50, %v464_v49 }
 0x102   : > { %476 = vadd.xlane.f32.xlu1 %v475_v51  ;;  %491 = vadd.xlane.f32.xlu0 %v490_v52 }
 0x106   : > { %470 = vadd.xlane.f32.xlu1 %v469_v53  ;;  %488 = vadd.xlane.f32.xlu0 %v487_v54 }
 0x10a   : > { %479 = vadd.xlane.f32.xlu0 %v478_v55 }
 0x10e   : > { %473 = vadd.xlane.f32.xlu0 %v472_v56 }
 0x117   : > { %748 = vperm.xlu1 %1526, %v314_v57  }
 0x11b   : > { %799 = vperm.xlu1 %1526, %v321_v60  }
 0x11f   : > { %804 = vperm.xlu1 %1526, %v322_v61  }
 0x123   : > { %733 = vperm.xlu1 %1526, %v311_v62  }
 0x124   : > { %743 = vperm.xlu0 %1525, %v313_v59  }
 0x127   : > { %738 = vperm.xlu1 %1526, %v312_v63  }
 0x12b   : > { %789 = vperm.xlu1 %1526, %v319_v33  }
 0x12f   : > { %794 = vperm.xlu1 %1526, %v320_v34  }
 0x133   : > { %723 = vperm.xlu1 %1526, %v309_v35  }
 0x183   : > { %v486_v36 = vpop.xlane.xlu1 %485 }
 0x184   : > { %v499_v40 = vmul.f32 0.00390625, %v486_v36 }
 0x186   : > { %v1855_v49 = vsub.f32 %v299_v9, %v499_v40 }
 0x187   : > { %v483_v37 = vpop.xlane.xlu1 %482 }
 0x188   : > { %v498_v43 = vmul.f32 0.00390625, %v483_v37 }
 0x18a   : > { %v1871_v50 = vsub.f32 %v297_v12, %v498_v43  ;;  %v1879_v3 = vsub.f32 %v296_v13, %v498_v43  ;;  %v529_v12 = vmul.f32 %v1855_v49, %v1855_v49 }
 0x18b   : > { %v492_v38 = vpop.xlane.xlu0 %491  ;;  %v477_v44 = vpop.xlane.xlu1 %476 }
 0x18c   : > { %v501_v39 = vmul.f32 0.00390625, %v492_v38  ;;  %v496_v9 = vmul.f32 0.00390625, %v477_v44  ;;  %v527_v56 = vmul.f32 %v1871_v50, %v1871_v50  ;;  %v526_v57 = vmul.f32 %v1879_v3, %v1879_v3 }
 0x18e   : > { %v1843_v41 = vsub.f32 %v302_v5, %v501_v39  ;;  %v1847_v42 = vsub.f32 %v303_v4, %v501_v39  ;;  %v1867_v4 = vsub.f32 %v298_v10, %v499_v40  ;;  %v1895_v13 = vsub.f32 %v293_v18, %v496_v9 }
 0x18f   : > { %v489_v45 = vpop.xlane.xlu0 %488  ;;  %v1903_v11 = vsub.f32 %v292_v19, %v496_v9  ;;  %v307_v9 = vld [vmem:[%s2432_s4] sm:$0xff] }
 0x190   : > { %v532_v46 = vmul.f32 %v1843_v41, %v1843_v41  ;;  %v500_v47 = vmul.f32 0.00390625, %v489_v45  ;;  %v533_v48 = vmul.f32 %v1847_v42, %v1847_v42  ;;  %v528_v53 = vmul.f32 %v1867_v4, %v1867_v4 }
 0x191   : > { %v523_v19 = vmul.f32 %v1895_v13, %v1895_v13 }
 0x192   : > { %v1859_v5 = vsub.f32 %v300_v7, %v500_v47  ;;  %v1863_v1 = vsub.f32 %v301_v6, %v500_v47  ;;  %550 = vmatprep.subr.mxu1 %v533_v48  ;;  %v471_v6 = vpop.xlane.xlu1 %470  ;;  %v317_v48 = vld [vmem:[%s2433_s5 + $0x10] sm:$0xff] }
 0x193   : > { %v480_v51 = vpop.xlane.xlu0 %479  ;;  %551 = vmatpush1.msra.mxu1 %v532_v46  ;;  %v494_v55 = vmul.f32 0.00390625, %v471_v6  ;;  %v316_v6 = vld [vmem:[%s2433_s5 + $0x8] sm:$0xff] }
 0x194   : > { %v530_v52 = vmul.f32 %v1859_v5, %v1859_v5  ;;  %v497_v7 = vmul.f32 0.00390625, %v480_v51  ;;  %v531_v2 = vmul.f32 %v1863_v1, %v1863_v1  ;;  %v310_v51 = vld [vmem:[%s2432_s4 + $0x18] sm:$0xff] }
 0x195   : > { %v1919_v14 = vsub.f32 %v289_v23, %v494_v55  ;;  %v1927_v61 = vsub.f32 %v288_v24, %v494_v55 }
 0x196   : > { %v1883_v10 = vsub.f32 %v295_v15, %v497_v7  ;;  %552 = vmatprep.subr.mxu1 %v531_v2  ;;  %v1891_v54 = vsub.f32 %v294_v16, %v497_v7  ;;  %v315_v7 = vld [vmem:[%s2433_s5] sm:$0xff]  ;;  %v308_v2 = vld [vmem:[%s2432_s4 + $0x8] sm:$0xff] }
 0x197   : > { %553 = vmatpush1.msra.mxu1 %v530_v52  ;;  %v474_v8 = vpop.xlane.xlu0 %473  ;;  %v519_v23 = vmul.f32 %v1919_v14, %v1919_v14  ;;  %v518_v62 = vmul.f32 %v1927_v61, %v1927_v61  ;;  %v318_v52 = vld [vmem:[%s2433_s5 + $0x18] sm:$0xff] }
 0x198   : > { %v495_v15 = vmul.f32 0.00390625, %v474_v8  ;;  %554 = vmatprep.subr.mxu1 %v529_v12  ;;  %v525_v18 = vmul.f32 %v1883_v10, %v1883_v10  ;;  %v524_v59 = vmul.f32 %v1891_v54, %v1891_v54  ;;  %v1981_v12 = vpop.permute.xlu1 %748 }
 0x199   : > { %555 = vmatpush1.msra.mxu1 %v528_v53 }
 0x19a   : > { %v1907_v16 = vsub.f32 %v291_v21, %v495_v15  ;;  %556 = vmatprep.subr.mxu1 %v527_v56  ;;  %v1915_v60 = vsub.f32 %v290_v22, %v495_v15  ;;  %v522_v21 = vmul.f32 %v1903_v11, %v1903_v11 }
 0x19b   : > { %557 = vmatpush1.msra.mxu1 %v526_v57 }
 0x19c   : > { %558 = vmatprep.subr.mxu1 %v525_v18  ;;  %v521_v17 = vmul.f32 %v1907_v16, %v1907_v16  ;;  %v520_v22 = vmul.f32 %v1915_v60, %v1915_v60  ;;  %v1983_v53 = vpop.permute.xlu1 %799 }
 0x19d   : > { %559 = vmatpush1.msra.mxu1 %v524_v59 }
 0x19e   : > { %560 = vmatprep.subr.mxu1 %v523_v19 }
 0x19f   : > { %561 = vmatpush1.msra.mxu1 %v522_v21  ;;  %v1995_v18 = vpop.permute.xlu0 %743 }
 0x1a0   : > { %562 = vmatprep.subr.mxu1 %v521_v17  ;;  %v1985_v8 = vpop.permute.xlu1 %804 }
 0x1a1   : > { %563 = vmatpush1.msra.mxu1 %v520_v22 }
 0x1a2   : > { %564 = vmatprep.subr.mxu1 %v519_v23 }
 0x1a3   : > { %565 = vmatpush1.msra.mxu1 %v518_v62 }
 0x1a4   : > { %1486 = vmatmul.mubr.msk.f32.vlgmr.msra.gmra.mxu1 %vm331_vm0, %v1747_v25  ;;  %v1987_v55 = vpop.permute.xlu1 %733 }
 0x1a5   : > { %604 = vmatprep.mubr.f32.mxu1 %v1621_v0 }
 0x1a8   : > { %1487 = vmatmul.mubr.msk.f32.gmra.mxu1 %vm331_vm0, %v1759_v26  ;;  %v1989_v15 = vpop.permute.xlu1 %738 }
 0x1a9   : > { %610 = vmatprep.mubr.f32.mxu1 %v1621_v0 }
 0x1ac   : > { %1488 = vmatmul.mubr.msk.f32.gmra.mxu1 %vm331_vm0, %v1767_v27  ;;  %v1991_v56 = vpop.permute.xlu1 %789 }
 0x1ad   : > { %616 = vmatprep.mubr.f32.mxu1 %v1621_v0 }
 0x1b0   : > { %1489 = vmatmul.mubr.msk.f32.gmra.mxu1 %vm331_vm0, %v1775_v28  ;;  %v1993_v57 = vpop.permute.xlu1 %794 }
 0x1b1   : > { %622 = vmatprep.mubr.f32.mxu1 %v1621_v0 }
 0x1b4   : > { %1490 = vmatmul.mubr.msk.f32.gmra.mxu1 %vm331_vm0, %v1783_v29  ;;  %v724_v59 = vpop.permute.xlu1 %723 }
 0x1b5   : > { %628 = vmatprep.mubr.f32.mxu1 %v1621_v0 }
 0x1b8   : > { %1491 = vmatmul.mubr.msk.f32.gmra.mxu1 %vm331_vm0, %v1791_v30 }
 0x1b9   : > { %634 = vmatprep.mubr.f32.mxu1 %v1621_v0 }
 0x1bc   : > { %1492 = vmatmul.mubr.msk.f32.gmra.mxu1 %vm331_vm0, %v1799_v31 }
 0x1bd   : > { %640 = vmatprep.mubr.f32.mxu1 %v1621_v0 }
 0x1c0   : > { %1493 = vmatmul.mubr.msk.f32.gmra.mxu1 %vm331_vm0, %v1807_v32 }
 0x264   : > { %v600_v20 = vpop.f32.mrf.mxu1 }
 0x266   : > { %v602_v24 = vpop.f32.mrf.mxu1 }
 0x267   : > { %v647_v25 = vadd.f32 %v602_v24, %v600_v20 }
 0x268   : > { %v606_v26 = vpop.f32.mrf.mxu1 }
 0x269   : > { %648 = vadd.xlane.f32.xlu0 %v647_v25 }
 0x26a   : > { %v608_v27 = vpop.f32.mrf.mxu1 }
 0x26b   : > { %v650_v28 = vadd.f32 %v608_v27, %v606_v26 }
 0x26c   : > { %v612_v29 = vpop.f32.mrf.mxu1 }
 0x26d   : > { %651 = vadd.xlane.f32.xlu1 %v650_v28 }
 0x26e   : > { %v614_v30 = vpop.f32.mrf.mxu1 }
 0x26f   : > { %v653_v63 = vadd.f32 %v614_v30, %v612_v29 }
 0x270   : > { %v618_v33 = vpop.f32.mrf.mxu1 }
 0x271   : > { %654 = vadd.xlane.f32.xlu0 %v653_v63 }
 0x272   : > { %v620_v34 = vpop.f32.mrf.mxu1 }
 0x273   : > { %v656_v31 = vadd.f32 %v620_v34, %v618_v33 }
 0x274   : > { %v624_v35 = vpop.f32.mrf.mxu1 }
 0x275   : > { %657 = vadd.xlane.f32.xlu1 %v656_v31 }
 0x276   : > { %v626_v36 = vpop.f32.mrf.mxu1 }
 0x277   : > { %v659_v37 = vadd.f32 %v626_v36, %v624_v35 }
 0x278   : > { %v630_v32 = vpop.f32.mrf.mxu1 }
 0x279   : > { %660 = vadd.xlane.f32.xlu0 %v659_v37 }
 0x27a   : > { %v632_v38 = vpop.f32.mrf.mxu1 }
 0x27b   : > { %v662_v39 = vadd.f32 %v632_v38, %v630_v32 }
 0x27c   : > { %v636_v40 = vpop.f32.mrf.mxu1 }
 0x27d   : > { %663 = vadd.xlane.f32.xlu1 %v662_v39 }
 0x27e   : > { %v638_v43 = vpop.f32.mrf.mxu1 }
 0x27f   : > { %v665_v44 = vadd.f32 %v638_v43, %v636_v40 }
 0x280   : > { %v642_v45 = vpop.f32.mrf.mxu1 }
 0x281   : > { %666 = vadd.xlane.f32.xlu0 %v665_v44 }
 0x282   : > { %v644_v46 = vpop.f32.mrf.mxu1 }
 0x283   : > { %v668_v47 = vadd.f32 %v644_v46, %v642_v45 }
 0x285   : > { %669 = vadd.xlane.f32.xlu1 %v668_v47 }
 0x296   : > { %779 = vperm.xlu1 %1526, %v317_v48  }
 0x297   : > { %728 = vperm.xlu0 %1525, %v310_v51  }
 0x29a   : > { %713 = vperm.xlu1 %1526, %v307_v9  }
 0x29b   : > { %784 = vperm.xlu0 %1525, %v318_v52  }
 0x29e   : > { %769 = vperm.xlu1 %1526, %v315_v7  }
 0x29f   : > { %718 = vperm.xlu0 %1525, %v308_v2  }
 0x2a3   : > { %774 = vperm.xlu0 %1525, %v316_v6  }
 0x2f2   : > { %v649_v19 = vpop.xlane.xlu0 %648 }
 0x2f3   : > { %v671_v23 = vmul.f32 0.00390625, %v649_v19 }
 0x2f5   : > { %v679_v26 = vadd.f32 1e-06, %v671_v23 }
 0x2f6   : > { %v652_v21 = vpop.xlane.xlu1 %651 }
 0x2f7   : > { %v672_v20 = vmul.f32 0.00390625, %v652_v21 }
 0x2f9   : > { %v680_v28 = vadd.f32 1e-06, %v672_v20 }
 0x2fa   : > { %v655_v17 = vpop.xlane.xlu0 %654 }
 0x2fb   : > { %v673_v22 = vmul.f32 0.00390625, %v655_v17 }
 0x2fd   : > { %v681_v62 = vadd.f32 1e-06, %v673_v22 }
 0x2fe   : > { %v658_v24 = vpop.xlane.xlu1 %657 }
 0x2ff   : > { %1533 = vrsqrt.f32 %v681_v62  ;;  %v674_v25 = vmul.f32 0.00390625, %v658_v24 }
 0x301   : > { %v682_v27 = vadd.f32 1e-06, %v674_v25 }
 0x302   : > { %v661_v29 = vpop.xlane.xlu0 %660 }
 0x303   : > { %1535 = vrsqrt.f32 %v682_v27  ;;  %v675_v30 = vmul.f32 0.00390625, %v661_v29 }
 0x304   : > { %1537 = vrsqrt.f32 %v679_v26 }
 0x305   : > { %v683_v63 = vadd.f32 1e-06, %v675_v30  ;;  %1539 = vrsqrt.f32 %v680_v28 }
 0x306   : > { %v664_v33 = vpop.xlane.xlu1 %663 }
 0x307   : > { %1541 = vrsqrt.f32 %v683_v63  ;;  %v676_v34 = vmul.f32 0.00390625, %v664_v33 }
 0x309   : > { %v684_v31 = vadd.f32 1e-06, %v676_v34 }
 0x30a   : > { %v667_v35 = vpop.xlane.xlu0 %666 }
 0x30b   : > { %1543 = vrsqrt.f32 %v684_v31  ;;  %v677_v36 = vmul.f32 0.00390625, %v667_v35 }
 0x30c   : > { %v1534_v37 = vpop.eup %1533 }
 0x30d   : > { %v685_v32 = vadd.f32 1e-06, %v677_v36  ;;  %v699_v38 = vmul.f32 %v1534_v37, %v1903_v11  ;;  %v700_v39 = vmul.f32 %v1534_v37, %v1895_v13 }
 0x30e   : > { %v670_v40 = vpop.xlane.xlu1 %669 }
 0x30f   : > { %1545 = vrsqrt.f32 %v685_v32  ;;  %v678_v43 = vmul.f32 0.00390625, %v670_v40  ;;  %v755_v47 = vmul.f32 %v724_v59, %v699_v38  ;;  %v756_v48 = vmul.f32 %v724_v59, %v700_v39 }
 0x310   : > { %v1536_v44 = vpop.eup %1535 }
 0x311   : > { %v1538_v45 = vpop.eup %1537  ;;  %v686_v46 = vadd.f32 1e-06, %v678_v43  ;;  %v701_v9 = vmul.f32 %v1536_v44, %v1891_v54  ;;  %v702_v52 = vmul.f32 %v1536_v44, %v1883_v10 }
 0x312   : > { %v780_v51 = vpop.permute.xlu1 %779  ;;  %v729_v7 = vpop.permute.xlu0 %728  ;;  %v695_v19 = vmul.f32 %v1538_v45, %v1927_v61  ;;  %v696_v62 = vmul.f32 %v1538_v45, %v1919_v14 }
 0x313   : > { %v1540_v2 = vpop.eup %1539  ;;  %1547 = vrsqrt.f32 %v686_v46  ;;  %v2001_v6 = vadd.f32 %v780_v51, %v755_v47  ;;  %v2003_v11 = vadd.f32 %v780_v51, %v756_v48  ;;  %v757_v22 = vmul.f32 %v729_v7, %v701_v9 }
 0x314   : > { %v1542_v13 = vpop.eup %1541  ;;  %v758_v10 = vmul.f32 %v729_v7, %v702_v52  ;;  %v697_v24 = vmul.f32 %v1540_v2, %v1915_v60  ;;  %v698_v61 = vmul.f32 %v1540_v2, %v1907_v16 }
 0x315   : > { %v827_v21 = vsub.f32 0.0, %v2001_v6  ;;  %v828_v17 = vsub.f32 0.0, %v2003_v11  ;;  %v704_v59 = vmul.f32 %v1542_v13, %v1871_v50  ;;  %v703_v54 = vmul.f32 %v1542_v13, %v1879_v3 }
 0x316   : > { %v714_v23 = vpop.permute.xlu1 %713  ;;  %v785_v20 = vpop.permute.xlu0 %784 }
 0x317   : > { %v847_v25 = vmul.f32 1.442695, %v827_v21  ;;  %v849_v26 = vmul.f32 1.442695, %v828_v17  ;;  %v751_v27 = vmul.f32 %v714_v23, %v695_v19  ;;  %v752_v29 = vmul.f32 %v714_v23, %v696_v62 }
 0x318   : > { %v1544_v28 = vpop.eup %1543  ;;  %v2013_v30 = vadd.f32 %v785_v20, %v757_v22  ;;  %v2015_v50 = vadd.f32 %v785_v20, %v758_v10  ;;  %v760_v3 = vmul.f32 %v1987_v55, %v704_v59  ;;  %v759_v60 = vmul.f32 %v1987_v55, %v703_v54 }
 0x319   : > { %1549 = vpow2.f32 %v847_v25  ;;  %v706_v63 = vmul.f32 %v1544_v28, %v1855_v49  ;;  %v705_v14 = vmul.f32 %v1544_v28, %v1867_v4 }
 0x31a   : > { %1551 = vpow2.f32 %v849_v26  ;;  %v829_v33 = vsub.f32 0.0, %v2013_v30  ;;  %v830_v16 = vsub.f32 0.0, %v2015_v50  ;;  %v770_v34 = vpop.permute.xlu1 %769  ;;  %v719_v31 = vpop.permute.xlu0 %718  ;;  %v2024_v35 = vadd.f32 %v1991_v56, %v760_v3 }
 0x31b   : > { %v2026_v36 = vadd.f32 %v770_v34, %v751_v27  ;;  %v2028_v37 = vadd.f32 %v770_v34, %v752_v29  ;;  %v753_v32 = vmul.f32 %v719_v31, %v697_v24  ;;  %v754_v49 = vmul.f32 %v719_v31, %v698_v61 }
 0x31c   : > { %v1546_v38 = vpop.eup %1545  ;;  %v851_v4 = vmul.f32 1.442695, %v829_v33  ;;  %v853_v39 = vmul.f32 1.442695, %v830_v16  ;;  %v762_v55 = vmul.f32 %v1989_v15, %v706_v63  ;;  %v832_v40 = vsub.f32 0.0, %v2024_v35 }
 0x31d   : > { %v823_v43 = vsub.f32 0.0, %v2026_v36  ;;  %v824_v44 = vsub.f32 0.0, %v2028_v37  ;;  %v708_v45 = vmul.f32 %v1546_v38, %v1863_v1  ;;  %v707_v46 = vmul.f32 %v1546_v38, %v1859_v5 }
 0x31e   : > { %1553 = vpow2.f32 %v851_v4  ;;  %v775_v47 = vpop.permute.xlu0 %774  ;;  %v2037_v48 = vadd.f32 %v1993_v57, %v762_v55  ;;  %v857_v51 = vmul.f32 1.442695, %v832_v40  ;;  %v761_v9 = vmul.f32 %v1989_v15, %v705_v14 }
 0x31f   : > { %1555 = vpow2.f32 %v853_v39  ;;  %v839_v52 = vmul.f32 1.442695, %v823_v43  ;;  %v841_v7 = vmul.f32 1.442695, %v824_v44  ;;  %v2040_v2 = vadd.f32 %v775_v47, %v753_v32 }
 0x320   : > { %v1548_v13 = vpop.eup %1547  ;;  %v2042_v19 = vadd.f32 %v775_v47, %v754_v49  ;;  %v764_v1 = vmul.f32 %v1995_v18, %v708_v45  ;;  %v763_v5 = vmul.f32 %v1995_v18, %v707_v46  ;;  %v834_v21 = vsub.f32 0.0, %v2037_v48 }
 0x321   : > { %1557 = vpow2.f32 %v839_v52  ;;  %v825_v17 = vsub.f32 0.0, %v2040_v2  ;;  %v710_v59 = vmul.f32 %v1548_v13, %v1847_v42  ;;  %v709_v15 = vmul.f32 %v1548_v13, %v1843_v41  ;;  %v1477_v52 = vld [vmem:[%s2429_s1 + $0x2] sm:$0x3] }
 0x322   : > { %1559 = vpow2.f32 %v841_v7  ;;  %v826_v54 = vsub.f32 0.0, %v2042_v19  ;;  %v2052_v22 = vadd.f32 %v1983_v53, %v764_v1  ;;  %v2055_v10 = vadd.f32 %v1983_v53, %v763_v5 }
 0x323   : > { %v843_v23 = vmul.f32 1.442695, %v825_v17  ;;  %v766_v18 = vmul.f32 %v1981_v12, %v710_v59  ;;  %v765_v62 = vmul.f32 %v1981_v12, %v709_v15  ;;  %1561 = vpow2.f32 %v857_v51 }
 0x324   : > { %v845_v20 = vmul.f32 1.442695, %v826_v54  ;;  %v836_v42 = vsub.f32 0.0, %v2052_v22  ;;  %v835_v41 = vsub.f32 0.0, %v2055_v10  ;;  %v861_v24 = vmul.f32 1.442695, %v834_v21 }
 0x325   : > { %1563 = vpow2.f32 %v843_v23  ;;  %v2062_v25 = vadd.f32 %v1985_v8, %v766_v18  ;;  %v2065_v26 = vadd.f32 %v1985_v8, %v765_v62  ;;  %v2068_v53 = vadd.f32 %v1991_v56, %v759_v60 }
 0x326   : > { %v1550_v27 = vpop.eup %1549  ;;  %1565 = vpow2.f32 %v845_v20  ;;  %v865_v12 = vmul.f32 1.442695, %v836_v42  ;;  %v863_v61 = vmul.f32 1.442695, %v835_v41  ;;  %v2073_v33 = vadd.f32 %v1993_v57, %v761_v9 }
 0x327   : > { %v1552_v28 = vpop.eup %1551  ;;  %v875_v29 = vadd.f32 1.0, %v1550_v27  ;;  %v838_v3 = vsub.f32 0.0, %v2062_v25  ;;  %v837_v63 = vsub.f32 0.0, %v2065_v26  ;;  %1567 = vpow2.f32 %v861_v24 }
 0x328   : > { %v876_v14 = vadd.f32 1.0, %v1552_v28  ;;  %1569 = vpow2.f32 %v865_v12  ;;  %v831_v8 = vsub.f32 0.0, %v2068_v53  ;;  %v945_v16 = vlaneseq }
 0x329   : > { %1571 = vrcp.f32 %v875_v29  ;;  %v869_v56 = vmul.f32 1.442695, %v838_v3  ;;  %v867_v60 = vmul.f32 1.442695, %v837_v63  ;;  %v833_v49 = vsub.f32 0.0, %v2073_v33 }
 0x32a   : > { %1573 = vrcp.f32 %v876_v14  ;;  %v855_v38 = vmul.f32 1.442695, %v831_v8  ;;  %v2077_v39 = vshrl.u32 %v945_v16, 7 }
 0x32b   : > { %v1554_v34 = vpop.eup %1553  ;;  %1575 = vpow2.f32 %v869_v56  ;;  %v859_v45 = vmul.f32 1.442695, %v833_v49 }
 0x32c   : > { %v1556_v31 = vpop.eup %1555  ;;  %v877_v32 = vadd.f32 1.0, %v1554_v34  ;;  %1577 = vpow2.f32 %v863_v61  ;;  %v947_v47 = vsub.s32 0, %v2077_v39  ;;  %v951_v9 = vsub.s32 1, %v2077_v39 }
 0x32d   : > { %v878_v4 = vadd.f32 1.0, %v1556_v31  ;;  %1579 = vpow2.f32 %v867_v60 }
 0x32e   : > { %v1558_v57 = vpop.eup %1557  ;;  %1581 = vrcp.f32 %v877_v32  ;;  %v2086_v59 = vrot.slane %v1477_v52, %v947_v47  ;;  %v2090_v23 = vrot.slane %v1477_v52, %v951_v9 }
 0x32f   : > { %v1560_v55 = vpop.eup %1559  ;;  %1583 = vrcp.f32 %v878_v4  ;;  %v871_v40 = vadd.f32 1.0, %v1558_v57 }
 0x330   : > { %v1562_v43 = vpop.eup %1561  ;;  %v872_v44 = vadd.f32 1.0, %v1560_v55  ;;  %1585 = vpow2.f32 %v855_v38 }
 0x331   : > { %1587 = vrcp.f32 %v871_v40  ;;  %v880_v46 = vadd.f32 1.0, %v1562_v43 }
 0x332   : > { %v1564_v51 = vpop.eup %1563  ;;  %1589 = vrcp.f32 %v872_v44 }
 0x333   : > { %v1566_v7 = vpop.eup %1565  ;;  %v873_v13 = vadd.f32 1.0, %v1564_v51  ;;  %1591 = vrcp.f32 %v880_v46 }
 0x334   : > { %v1568_v1 = vpop.eup %1567  ;;  %v874_v5 = vadd.f32 1.0, %v1566_v7  ;;  %1593 = vpow2.f32 %v859_v45 }
 0x335   : > { %v1570_v21 = vpop.eup %1569  ;;  %1595 = vrcp.f32 %v873_v13  ;;  %v882_v17 = vadd.f32 1.0, %v1568_v1  ;;  %v304_v1 = vld [vmem:[%s2429_s1] sm:$0x3] }
 0x336   : > { %v1572_v15 = vpop.eup %1571  ;;  %1597 = vrcp.f32 %v874_v5  ;;  %v884_v54 = vadd.f32 1.0, %v1570_v21 }
 0x337   : > { %v1574_v18 = vpop.eup %1573  ;;  %v2093_v62 = vmul.f32 %v1572_v15, %v2001_v6  ;;  %1599 = vrcp.f32 %v882_v17 }
 0x338   : > { %v1576_v20 = vpop.eup %1575  ;;  %v2096_v42 = vmul.f32 %v1574_v18, %v2003_v11  ;;  %1601 = vrcp.f32 %v884_v54 }
 0x339   : > { %v1578_v41 = vpop.eup %1577  ;;  %v886_v24 = vadd.f32 1.0, %v1576_v20  ;;  %v2100_v27 = vmul.f32 %v2086_v59, %v2093_v62 }
 0x33a   : > { %v1580_v12 = vpop.eup %1579  ;;  %v883_v61 = vadd.f32 1.0, %v1578_v41  ;;  %v2104_v28 = vmul.f32 %v2090_v23, %v2096_v42 }
 0x33b   : > { %v1582_v6 = vpop.eup %1581  ;;  %1603 = vrcp.f32 %v886_v24  ;;  %v885_v29 = vadd.f32 1.0, %v1580_v12  ;;  %v948_v24 = vrot.slane %v304_v1, %v947_v47 }
 0x33c   : > { %v1584_v3 = vpop.eup %1583  ;;  %v2107_v11 = vmul.f32 %v1582_v6, %v2013_v30  ;;  %1605 = vrcp.f32 %v883_v61 }
 0x33d   : > { %v1586_v63 = vpop.eup %1585  ;;  %v2110_v14 = vmul.f32 %v1584_v3, %v2015_v50  ;;  %1607 = vrcp.f32 %v885_v29 }
 0x33e   : > { %v1588_v8 = vpop.eup %1587  ;;  %v879_v56 = vadd.f32 1.0, %v1586_v63  ;;  %v2114_v60 = vmul.f32 %v2086_v59, %v2107_v11 }
 0x33f   : > { %v1590_v16 = vpop.eup %1589  ;;  %v2117_v34 = vmul.f32 %v1588_v8, %v2026_v36  ;;  %v2121_v30 = vmul.f32 %v2090_v23, %v2110_v14 }
 0x340   : > { %v1592_v31 = vpop.eup %1591  ;;  %v2124_v32 = vmul.f32 %v1590_v16, %v2028_v37  ;;  %1609 = vrcp.f32 %v879_v56  ;;  %v1008_v50 = vpack.c.bf16 %v2114_v60, %v2100_v27 }
 0x341   : > { %v1594_v49 = vpop.eup %1593  ;;  %v2129_v38 = vmul.f32 %v1592_v31, %v2024_v35  ;;  %v1009_v36 = vpack.c.bf16 %v2121_v30, %v2104_v28  ;;  %v2139_v37 = vmul.f32 %v2086_v59, %v2117_v34 }
 0x342   : > { %v1596_v4 = vpop.eup %1595  ;;  %v881_v57 = vadd.f32 1.0, %v1594_v49  ;;  %v2135_v55 = vmul.f32 %v2090_v23, %v2124_v32 }
 0x343   : > { %v1598_v40 = vpop.eup %1597  ;;  %v2142_v43 = vmul.f32 %v1596_v4, %v2040_v2  ;;  %v2146_v35 = vmul.f32 %v2090_v23, %v2129_v38 }
 0x344   : > { %v1600_v44 = vpop.eup %1599  ;;  %v2149_v45 = vmul.f32 %v1598_v40, %v2042_v19  ;;  %1611 = vrcp.f32 %v881_v57 }
 0x345   : > { %v1602_v46 = vpop.eup %1601  ;;  %v930_v51 = vmul.f32 %v1600_v44, %v2037_v48  ;;  %v2154_v52 = vmul.f32 %v2086_v59, %v2142_v43 }
 0x346   : > { %v2157_v7 = vmul.f32 %v1602_v46, %v2052_v22  ;;  %v2161_v2 = vmul.f32 %v2090_v23, %v2149_v45  ;;  %v937_v40 = vpack.c.bf16 %v2149_v45, %v2124_v32 }
 0x347   : > { %v2164_v13 = vmul.f32 %v2090_v23, %v930_v51  ;;  %v1006_v15 = vpack.c.bf16 %v2154_v52, %v2139_v37  ;;  %v2298_v52 = vld [vmem:[%s2430_s2 + $0x8] sm:$0x77] }
 0x348   : > { %v1604_v19 = vpop.eup %1603  ;;  %v2171_v48 = vmul.f32 %v2090_v23, %v2157_v7  ;;  %v1007_v22 = vpack.c.bf16 %v2161_v2, %v2135_v55  ;;  %v2303_v2 = vld [vmem:[%s2430_s2] sm:$0x77] }
 0x349   : > { %v1606_v5 = vpop.eup %1605  ;;  %v934_v21 = vmul.f32 %v1604_v19, %v2062_v25  ;;  %v1011_v17 = vpack.c.bf16 %v2164_v13, %v2146_v35  ;;  %v961_v19 = vmul.f32 %v948_v24, %v2107_v11 }
 0x34a   : > { %v1608_v54 = vpop.eup %1607  ;;  %v931_v18 = vmul.f32 %v1606_v5, %v2055_v10  ;;  %v936_v5 = vpack.c.bf16 %v2142_v43, %v2117_v34 }
 0x34b   : > { %v943_v20 = vpack.c.bf16 %v934_v21, %v2157_v7  ;;  %v933_v41 = vmul.f32 %v1608_v54, %v2065_v26  ;;  %v2186_v12 = vmul.f32 %v2090_v23, %v934_v21  ;;  %v941_v23 = vpack.c.bf16 %v930_v51, %v2129_v38 }
 0x34c   : > { %v2189_v25 = vmul.f32 %v2086_v59, %v931_v18  ;;  %v967_v29 = vmul.f32 %v948_v24, %v931_v18  ;;  %v959_v54 = vmul.f32 %v948_v24, %v2093_v62 }
 0x34d   : > { %v1610_v61 = vpop.eup %1609  ;;  %1036 = vrot.lane.b32.xlu0 %v943_v20, %s1623_s17  ;;  %v942_v6 = vpack.c.bf16 %v933_v41, %v931_v18  ;;  %v969_v10 = vmul.f32 %v948_v24, %v933_v41  ;;  %v2193_v3 = vmul.f32 %v2086_v59, %v933_v41  ;;  %v1013_v47 = vpack.c.bf16 %v2186_v12, %v2171_v48 }
 0x34e   : > { %v927_v26 = vmul.f32 %v1610_v61, %v2068_v53  ;;  %v939_v53 = vpack.c.bf16 %v2110_v14, %v2096_v42  ;;  %v952_v18 = vrot.slane %v304_v1, %v951_v9  ;;  %v973_v20 = vpack.c.bf16 %v961_v19, %v959_v54 }
 0x34f   : > { %1034 = vrot.lane.b32.xlu1 %v942_v6, %s1623_s17  ;;  %v977_v63 = vpack.c.bf16 %v969_v10, %v967_v29  ;;  %v1012_v8 = vpack.c.bf16 %v2193_v3, %v2189_v25  ;;  %v955_v10 = vmul.f32 %v948_v24, %v2117_v34 }
 0x350   : > { %v2203_v56 = vmul.f32 %v2086_v59, %v927_v26  ;;  %v963_v46 = vmul.f32 %v948_v24, %v927_v26  ;;  %v966_v41 = vmul.f32 %v952_v18, %v930_v51  ;;  %v964_v61 = vmul.f32 %v952_v18, %v2129_v38 }
 0x351   : > { %v1612_v16 = vpop.eup %1611  ;;  %1032 = vrot.lane.b32.xlu0 %v941_v23, %s1623_s17  ;;  %v970_v29 = vmul.f32 %v952_v18, %v934_v21  ;;  %v962_v9 = vmul.f32 %v952_v18, %v2110_v14  ;;  %v960_v51 = vmul.f32 %v952_v18, %v2096_v42  ;;  %v958_v38 = vmul.f32 %v952_v18, %v2149_v45 }
 0x352   : > { %v929_v31 = vmul.f32 %v1612_v16, %v2073_v33  ;;  %v938_v33 = vpack.c.bf16 %v2107_v11, %v2093_v62  ;;  %v957_v11 = vmul.f32 %v948_v24, %v2142_v43  ;;  %v976_v6 = vpack.c.bf16 %v966_v41, %v964_v61 }
 0x353   : > { %v968_v62 = vmul.f32 %v952_v18, %v2157_v7  ;;  %v974_v1 = vpack.c.bf16 %v962_v9, %v960_v51  ;;  %v956_v43 = vmul.f32 %v952_v18, %v2124_v32 }
 0x354   : > { %v940_v49 = vpack.c.bf16 %v929_v31, %v927_v26  ;;  %v2210_v4 = vmul.f32 %v2086_v59, %v929_v31  ;;  %v965_v44 = vmul.f32 %v948_v24, %v929_v31  ;;  %v971_v26 = vpack.c.bf16 %v957_v11, %v955_v10 }
 0x355   : > { %1028 = vrot.lane.b32.xlu0 %v939_v53, %s1623_s17  ;;  %v978_v39 = vpack.c.bf16 %v970_v29, %v968_v62  ;;  %v972_v21 = vpack.c.bf16 %v958_v38, %v956_v43 }
 0x356   : > { %1030 = vrot.lane.b32.xlu1 %v940_v49, %s1623_s17  ;;  %v1010_v57 = vpack.c.bf16 %v2210_v4, %v2203_v56  ;;  %v975_v59 = vpack.c.bf16 %v965_v44, %v963_v46 }
 0x359   : > { %1024 = vrot.lane.b32.xlu0 %v937_v40, %s1623_s17 }
 0x35a   : > { %1026 = vrot.lane.b32.xlu1 %v938_v33, %s1623_s17 }
 0x35d   : > { %1062 = vrot.lane.b32.xlu0 %v975_v59, %s1624_s18 }
 0x35e   : > { %1022 = vrot.lane.b32.xlu1 %v936_v5, %s1623_s17 }
 0x361   : > { %1058 = vrot.lane.b32.xlu0 %v973_v20, %s1624_s18 }
 0x362   : > { %1056 = vrot.lane.b32.xlu1 %v1622_v58, %s1624_s18 }
 0x365   : > { %1066 = vrot.lane.b32.xlu0 %v977_v63, %s1624_s18 }
 0x366   : > { %1064 = vrot.lane.b32.xlu1 %v976_v6, %s1624_s18 }
 0x369   : > { %1052 = vrot.lane.b32.xlu0 %v971_v26, %s1624_s18 }
 0x36a   : > { %1068 = vrot.lane.b32.xlu1 %v978_v39, %s1624_s18 }
 0x36e   : > { %1060 = vrot.lane.b32.xlu1 %v974_v1, %s1624_s18 }
 0x372   : > { %1054 = vrot.lane.b32.xlu1 %v972_v21, %s1624_s18 }
 0x3bf   : > { %v1037_v34 = vpop.permute.xlu0 %1036 }
 0x3c1   : > { %v1035_v24 = vpop.permute.xlu1 %1034 }
 0x3c2   : > { %v1042_v32 = vsel %vm1038_vm1, %v1035_v24, %v1037_v34 }
 0x3c3   : > { %v1033_v23 = vpop.permute.xlu0 %1032 }
 0x3c7   : > { %v1029_v63 = vpop.permute.xlu0 %1028 }
 0x3c8   : > { %v1031_v7 = vpop.permute.xlu1 %1030 }
 0x3c9   : > { %v1041_v53 = vsel %vm1038_vm1, %v1031_v7, %v1033_v23 }
 0x3cb   : > { %v1025_v14 = vpop.permute.xlu0 %1024 }
 0x3cc   : > { %v1027_v16 = vpop.permute.xlu1 %1026 }
 0x3cd   : > { %1118 = vrot.lane.b32.xlu0 %v1027_v16, %s1625_s19  ;;  %v1040_v31 = vsel %vm1038_vm1, %v1027_v16, %v1029_v63 }
 0x3cf   : > { %v1063_v25 = vpop.permute.xlu0 %1062 }
 0x3d0   : > { %v1023_v42 = vpop.permute.xlu1 %1022 }
 0x3d1   : > { %1120 = vrot.lane.b32.xlu0 %v1040_v31, %s1625_s19  ;;  %v1039_v45 = vsel %vm1038_vm1, %v1023_v42, %v1025_v14 }
 0x3d2   : > { %1114 = vrot.lane.b32.xlu1 %v1039_v45, %s1625_s19 }
 0x3d3   : > { %v1059_v35 = vpop.permute.xlu0 %1058 }
 0x3d4   : > { %v1057_v49 = vpop.permute.xlu1 %1056 }
 0x3d5   : > { %1128 = vrot.lane.b32.xlu0 %v1033_v23, %s1625_s19 }
 0x3d6   : > { %1122 = vrot.lane.b32.xlu1 %v1029_v63, %s1625_s19 }
 0x3d9   : > { %1130 = vrot.lane.b32.xlu0 %v1035_v24, %s1625_s19 }
 0x3da   : > { %1124 = vrot.lane.b32.xlu1 %v1031_v7, %s1625_s19 }
 0x3dd   : > { %1132 = vrot.lane.b32.xlu0 %v1042_v32, %s1625_s19 }
 0x3de   : > { %1126 = vrot.lane.b32.xlu1 %v1041_v53, %s1625_s19 }
 0x3e1   : > { %1116 = vrot.lane.b32.xlu0 %v1025_v14, %s1625_s19 }
 0x3e2   : > { %1134 = vrot.lane.b32.xlu1 %v1037_v34, %s1625_s19 }
 0x3e5   : > { %1108 = vrot.lane.b32.xlu0 %v1012_v8, %s1625_s19 }
 0x3e6   : > { %1112 = vrot.lane.b32.xlu1 %v1023_v42, %s1625_s19 }
 0x3e9   : > { %1094 = vrot.lane.b32.xlu0 %v1622_v58, %s1625_s19  ;;  %v1065_v58 = vpop.permute.xlu1 %1064 }
 0x3ea   : > { %1110 = vrot.lane.b32.xlu1 %v1013_v47, %s1625_s19  ;;  %v1075_v28 = vsel %vm1070_vm2, %v1063_v25, %v1065_v58  ;;  %v1076_v27 = vsel %vm1070_vm2, %v1065_v58, %v1057_v49  ;;  %v935_v47 = vld [vmem:[%s2431_s3] sm:$0x3f] }
 0x3ed   : > { %1106 = vrot.lane.b32.xlu0 %v1011_v17, %s1625_s19  ;;  %v1069_v30 = vpop.permute.xlu1 %1068  ;;  %v1495_v17 = vcombine.high %v2303_v2, %v2303_v2 }
 0x3ee   : > { %1104 = vrot.lane.b32.xlu1 %v1010_v57, %s1625_s19  ;;  %v1078_v60 = vsel %vm1070_vm2, %v1069_v30, %v1057_v49 }
 0x3ef   : > { %1496 = vmatprep.mubr.msk.bf16.mxu0 %vm331_vm0, %v1495_v17 }
 0x3f1   : > { %1102 = vrot.lane.b32.xlu0 %v1009_v36, %s1625_s19  ;;  %v1061_v36 = vpop.permute.xlu1 %1060 }
 0x3f2   : > { %1100 = vrot.lane.b32.xlu1 %v1008_v50, %s1625_s19  ;;  %v1067_v50 = vpop.permute.xlu0 %1066  ;;  %v1074_v37 = vsel %vm1070_vm2, %v1061_v36, %v1057_v49  ;;  %v1073_v48 = vsel %vm1070_vm2, %v1059_v35, %v1061_v36 }
 0x3f3   : > { %v1077_v55 = vsel %vm1070_vm2, %v1067_v50, %v1069_v30 }
 0x3f5   : > { %1098 = vrot.lane.b32.xlu0 %v1007_v22, %s1625_s19  ;;  %v1055_v13 = vpop.permute.xlu1 %1054  ;;  %v1499_v22 = vcombine.high %v2298_v52, %v2298_v52 }
 0x3f6   : > { %1096 = vrot.lane.b32.xlu1 %v1006_v15, %s1625_s19  ;;  %v1053_v15 = vpop.permute.xlu0 %1052  ;;  %v1072_v3 = vsel %vm1070_vm2, %v1055_v13, %v1057_v49 }
 0x3f7   : > { %1500 = vmatprep.mubr.msk.bf16.mxu1 %vm331_vm0, %v1499_v22  ;;  %v1071_v12 = vsel %vm1070_vm2, %v1053_v15, %v1055_v13  ;;  %v1501_v22 = vld [vmem:[%s2430_s2 + $0x10] sm:$0x77] }
 0x3f9   : > { %1150 = vrot.lane.b32.xlu0 %v1075_v28, %s1625_s19 }
 0x3fa   : > { %1152 = vrot.lane.b32.xlu1 %v1076_v27, %s1625_s19 }
 0x3fd   : > { %1158 = vrot.lane.b32.xlu0 %v1078_v60, %s1625_s19 }
 0x3fe   : > { %1154 = vrot.lane.b32.xlu1 %v1067_v50, %s1625_s19 }
 0x401   : > { %1148 = vrot.lane.b32.xlu0 %v1063_v25, %s1625_s19 }
 0x402   : > { %1156 = vrot.lane.b32.xlu1 %v1077_v55, %s1625_s19 }
 0x405   : > { %1146 = vrot.lane.b32.xlu0 %v1074_v37, %s1625_s19 }
 0x406   : > { %1144 = vrot.lane.b32.xlu1 %v1073_v48, %s1625_s19 }
 0x409   : > { %1138 = vrot.lane.b32.xlu0 %v1071_v12, %s1625_s19  ;;  %v1498_v12 = vcombine.low %v2298_v52, %v2298_v52  ;;  %v1502_v52 = vcombine.low %v1501_v22, %v1501_v22 }
 0x40a   : > { %1142 = vrot.lane.b32.xlu1 %v1059_v35, %s1625_s19 }
 0x40d   : > { %1136 = vrot.lane.b32.xlu0 %v1053_v15, %s1625_s19 }
 0x40e   : > { %1140 = vrot.lane.b32.xlu1 %v1072_v3, %s1625_s19  ;;  %v1494_v3 = vcombine.low %v2303_v2, %v2303_v2 }
 0x412   : > { %1391 = vperm.xlu1 %1526, %v935_v47   ;;  %v1503_v47 = vcombine.high %v1501_v22, %v1501_v22 }
 0x43f   : > { %v1119_v8 = vpop.permute.xlu0 %1118 }
 0x443   : > { %v1121_v56 = vpop.permute.xlu0 %1120 }
 0x444   : > { %v1115_v4 = vpop.permute.xlu1 %1114  ;;  %v2349_v62 = vsel %vm1160_vm3, %v1119_v8, %v1121_v56 }
 0x447   : > { %v1129_v57 = vpop.permute.xlu0 %1128 }
 0x448   : > { %v1123_v40 = vpop.permute.xlu1 %1122 }
 0x449   : > { %v2344_v29 = vsel %vm1160_vm3, %v1121_v56, %v1123_v40 }
 0x44b   : > { %v1131_v44 = vpop.permute.xlu0 %1130 }
 0x44c   : > { %v1125_v33 = vpop.permute.xlu1 %1124 }
 0x44f   : > { %v1133_v46 = vpop.permute.xlu0 %1132 }
 0x450   : > { %v1127_v59 = vpop.permute.xlu1 %1126  ;;  %v2329_v18 = vsel %vm1160_vm3, %v1131_v44, %v1133_v46 }
 0x451   : > { %v2334_v41 = vsel %vm1160_vm3, %v1127_v59, %v1129_v57  ;;  %v2339_v11 = vsel %vm1160_vm3, %v1125_v33, %v1127_v59 }
 0x453   : > { %v1117_v19 = vpop.permute.xlu0 %1116 }
 0x454   : > { %v1135_v5 = vpop.permute.xlu1 %1134  ;;  %v2354_v39 = vsel %vm1160_vm3, %v1115_v4, %v1117_v19 }
 0x455   : > { %v2324_v54 = vsel %vm1160_vm3, %v1133_v46, %v1135_v5 }
 0x456   : > { %1212 = vmatprep.subr.bf16.mxu0 %v2324_v54  ;;  %1264 = vmatprep.subr.bf16.mxu1 %v2324_v54 }
 0x457   : > { %1213 = vmatpush1.bf16.msra.mxu0 %v2329_v18  ;;  %1265 = vmatpush1.bf16.msra.mxu1 %v2329_v18  ;;  %v1109_v20 = vpop.permute.xlu0 %1108 }
 0x458   : > { %v1113_v61 = vpop.permute.xlu1 %1112  ;;  %1214 = vmatprep.subr.bf16.mxu0 %v2334_v41  ;;  %1266 = vmatprep.subr.bf16.mxu1 %v2334_v41 }
 0x459   : > { %v2359_v51 = vsel %vm1160_vm3, %v1113_v61, %v1115_v4 }
 0x45b   : > { %1215 = vmatpush1.bf16.msra.mxu0 %v2339_v11  ;;  %1267 = vmatpush1.bf16.msra.mxu1 %v2339_v11  ;;  %v1095_v6 = vpop.permute.xlu0 %1094 }
 0x45c   : > { %v1111_v10 = vpop.permute.xlu1 %1110  ;;  %1216 = vmatprep.subr.bf16.mxu0 %v2344_v29  ;;  %1268 = vmatprep.subr.bf16.mxu1 %v2344_v29  ;;  %v2369_v21 = vsel %vm1160_vm3, %v1095_v6, %v1109_v20 }
 0x45d   : > { %v2364_v38 = vsel %vm1160_vm3, %v1109_v20, %v1111_v10 }
 0x45f   : > { %1217 = vmatpush1.bf16.msra.mxu0 %v2349_v62  ;;  %1269 = vmatpush1.bf16.msra.mxu1 %v2349_v62  ;;  %v1107_v26 = vpop.permute.xlu0 %1106 }
 0x460   : > { %v1105_v9 = vpop.permute.xlu1 %1104  ;;  %1218 = vmatprep.subr.bf16.mxu0 %v2354_v39  ;;  %1270 = vmatprep.subr.bf16.mxu1 %v2354_v39 }
 0x461   : > { %v2374_v24 = vsel %vm1160_vm3, %v1105_v9, %v1107_v26  ;;  %v2379_v7 = vsel %vm1160_vm3, %v1095_v6, %v1105_v9 }
 0x463   : > { %1219 = vmatpush1.bf16.msra.mxu0 %v2359_v51  ;;  %1271 = vmatpush1.bf16.msra.mxu1 %v2359_v51  ;;  %v1103_v1 = vpop.permute.xlu0 %1102 }
 0x464   : > { %v1101_v43 = vpop.permute.xlu1 %1100  ;;  %1220 = vmatprep.subr.bf16.mxu0 %v2364_v38  ;;  %1272 = vmatprep.subr.bf16.mxu1 %v2364_v38 }
 0x465   : > { %v2384_v16 = vsel %vm1160_vm3, %v1101_v43, %v1103_v1  ;;  %v1163_v42 = vsel %vm1160_vm3, %v1095_v6, %v1101_v43 }
 0x467   : > { %1221 = vmatpush1.bf16.msra.mxu0 %v2369_v21  ;;  %1273 = vmatpush1.bf16.msra.mxu1 %v2369_v21  ;;  %v1099_v34 = vpop.permute.xlu0 %1098 }
 0x468   : > { %v1097_v23 = vpop.permute.xlu1 %1096  ;;  %1222 = vmatprep.subr.bf16.mxu0 %v2374_v24  ;;  %1274 = vmatprep.subr.bf16.mxu1 %v2374_v24 }
 0x469   : > { %v1162_v45 = vsel %vm1160_vm3, %v1097_v23, %v1099_v34  ;;  %v1161_v53 = vsel %vm1160_vm3, %v1095_v6, %v1097_v23 }
 0x46b   : > { %1223 = vmatpush1.bf16.msra.mxu0 %v2379_v7  ;;  %1275 = vmatpush1.bf16.msra.mxu1 %v2379_v7  ;;  %v1151_v63 = vpop.permute.xlu0 %1150 }
 0x46c   : > { %v1153_v14 = vpop.permute.xlu1 %1152  ;;  %1224 = vmatprep.subr.bf16.mxu0 %v2384_v16  ;;  %1276 = vmatprep.subr.bf16.mxu1 %v2384_v16 }
 0x46d   : > { %v1182_v30 = vsel %vm1160_vm3, %v1151_v63, %v1153_v14 }
 0x46f   : > { %1225 = vmatpush1.bf16.msra.mxu0 %v1163_v42  ;;  %1277 = vmatpush1.bf16.msra.mxu1 %v1163_v42  ;;  %v1159_v31 = vpop.permute.xlu0 %1158 }
 0x470   : > { %v1155_v32 = vpop.permute.xlu1 %1154  ;;  %1226 = vmatprep.subr.bf16.mxu0 %v1162_v45  ;;  %1278 = vmatprep.subr.bf16.mxu1 %v1162_v45 }
 0x473   : > { %1227 = vmatpush1.bf16.msra.mxu0 %v1161_v53  ;;  %1279 = vmatpush1.bf16.msra.mxu1 %v1161_v53  ;;  %v1149_v49 = vpop.permute.xlu0 %1148 }
 0x474   : > { %v1157_v25 = vpop.permute.xlu1 %1156  ;;  %v1181_v60 = vsel %vm1160_vm3, %v1149_v49, %v1151_v63 }
 0x475   : > { %v1184_v58 = vsel %vm1160_vm3, %v1157_v25, %v1159_v31  ;;  %v1183_v35 = vsel %vm1160_vm3, %v1155_v32, %v1157_v25 }
 0x476   : > { %1236 = vmatprep.subr.bf16.mxu0 %v1184_v58  ;;  %1288 = vmatprep.subr.bf16.mxu1 %v1184_v58 }
 0x477   : > { %1237 = vmatpush2.bf16.msra.mxu0 %v1183_v35  ;;  %1289 = vmatpush2.bf16.msra.mxu1 %v1183_v35  ;;  %v1147_v28 = vpop.permute.xlu0 %1146 }
 0x478   : > { %v1145_v27 = vpop.permute.xlu1 %1144  ;;  %1238 = vmatprep.subr.bf16.mxu0 %v1182_v30  ;;  %1290 = vmatprep.subr.bf16.mxu1 %v1182_v30 }
 0x479   : > { %v1180_v36 = vsel %vm1160_vm3, %v1145_v27, %v1147_v28 }
 0x47b   : > { %1239 = vmatpush2.bf16.msra.mxu0 %v1181_v60  ;;  %1291 = vmatpush2.bf16.msra.mxu1 %v1181_v60  ;;  %v1139_v50 = vpop.permute.xlu0 %1138 }
 0x47c   : > { %v1143_v55 = vpop.permute.xlu1 %1142  ;;  %1240 = vmatprep.subr.bf16.mxu0 %v1180_v36  ;;  %1292 = vmatprep.subr.bf16.mxu1 %v1180_v36 }
 0x47d   : > { %v1179_v37 = vsel %vm1160_vm3, %v1143_v55, %v1145_v27 }
 0x47f   : > { %1241 = vmatpush2.bf16.msra.mxu0 %v1179_v37  ;;  %1293 = vmatpush2.bf16.msra.mxu1 %v1179_v37  ;;  %v1137_v13 = vpop.permute.xlu0 %1136 }
 0x480   : > { %v1141_v48 = vpop.permute.xlu1 %1140  ;;  %v1177_v15 = vsel %vm1160_vm3, %v1137_v13, %v1139_v50 }
 0x481   : > { %v1178_v17 = vsel %vm1160_vm3, %v1139_v50, %v1141_v48 }
 0x482   : > { %1242 = vmatprep.subr.bf16.mxu0 %v1178_v17  ;;  %1294 = vmatprep.subr.bf16.mxu1 %v1178_v17 }
 0x483   : > { %1243 = vmatpush2.bf16.msra.mxu0 %v1177_v15  ;;  %1295 = vmatpush2.bf16.msra.mxu1 %v1177_v15 }
 0x484   : > { %1330 = vmatprep.subr.bf16.mxu0 %v2324_v54 }
 0x486   : > { %1297 = vmatmul.mubr.bf16.vlgmr.msra.gmra.mxu1 %v1498_v12  ;;  %1245 = vmatmul.mubr.bf16.vlgmr.msra.gmra.mxu0 %v1494_v3 }
 0x487   : > { %1331 = vmatpush1.bf16.msra.mxu0 %v2329_v18  ;;  %1504 = vmatprep.mubr.msk.bf16.mxu0 %vm331_vm0, %v1503_v47 }
 0x488   : > { %1332 = vmatprep.subr.bf16.mxu0 %v2334_v41 }
 0x48b   : > { %1333 = vmatpush1.bf16.msra.mxu0 %v2339_v11 }
 0x48c   : > { %1334 = vmatprep.subr.bf16.mxu0 %v2344_v29 }
 0x48d   : > { %v1392_v54 = vpop.permute.xlu1 %1391 }
 0x48f   : > { %1335 = vmatpush1.bf16.msra.mxu0 %v2349_v62 }
 0x490   : > { %1336 = vmatprep.subr.bf16.mxu0 %v2354_v39 }
 0x493   : > { %1337 = vmatpush1.bf16.msra.mxu0 %v2359_v51 }
 0x494   : > { %1338 = vmatprep.subr.bf16.mxu0 %v2364_v38 }
 0x497   : > { %1339 = vmatpush1.bf16.msra.mxu0 %v2369_v21 }
 0x498   : > { %1340 = vmatprep.subr.bf16.mxu0 %v2374_v24 }
 0x49b   : > { %1341 = vmatpush1.bf16.msra.mxu0 %v2379_v7 }
 0x49c   : > { %1342 = vmatprep.subr.bf16.mxu0 %v2384_v16 }
 0x49f   : > { %1343 = vmatpush1.bf16.msra.mxu0 %v1163_v42 }
 0x4a0   : > { %1344 = vmatprep.subr.bf16.mxu0 %v1162_v45 }
 0x4a3   : > { %1345 = vmatpush1.bf16.msra.mxu0 %v1161_v53 }
 0x4a4   : > { %1354 = vmatprep.subr.bf16.mxu0 %v1184_v58 }
 0x4a7   : > { %1355 = vmatpush2.bf16.msra.mxu0 %v1183_v35 }
 0x4a8   : > { %1356 = vmatprep.subr.bf16.mxu0 %v1182_v30 }
 0x4ab   : > { %1357 = vmatpush2.bf16.msra.mxu0 %v1181_v60 }
 0x4ac   : > { %1358 = vmatprep.subr.bf16.mxu0 %v1180_v36 }
 0x4af   : > { %1359 = vmatpush2.bf16.msra.mxu0 %v1179_v37 }
 0x4b0   : > { %1360 = vmatprep.subr.bf16.mxu0 %v1178_v17 }
 0x4b3   : > { %1361 = vmatpush2.bf16.msra.mxu0 %v1177_v15 }
 0x4b6   : > { %1363 = vmatmul.mubr.bf16.vlgmr.msra.gmra.mxu0 %v1502_v52 }
 0x546   : > { %v1298_v2 = vpop.f32.mrf.mxu1  ;;  %v1246_v8 = vpop.f32.mrf.mxu0 }
 0x547   : > { %1307 = vrot.lane.b32.xlu1 %v1298_v2, %s1626_s30 }
 0x548   : > { %v1300_v56 = vpop.f32.mrf.mxu1  ;;  %v1248_v4 = vpop.f32.mrf.mxu0 }
 0x549   : > { %1309 = vrot.lane.b32.xlu0 %v1300_v56, %s1626_s30 }
 0x54a   : > { %v1250_v57 = vpop.f32.mrf.mxu0  ;;  %v1302_v40 = vpop.f32.mrf.mxu1 }
 0x54c   : > { %v1251_v44 = vpop.f32.mrf.mxu0  ;;  %v1303_v33 = vpop.f32.mrf.mxu1 }
 0x576   : > { %v1364_v46 = vpop.f32.mrf.mxu0 }
 0x577   : > { %1374 = vrot.lane.b32.xlu0 %v1364_v46, %s1627_s8 }
 0x578   : > { %v1366_v59 = vpop.f32.mrf.mxu0 }
 0x579   : > { %1376 = vrot.lane.b32.xlu1 %v1366_v59, %s1627_s8 }
 0x57a   : > { %v1368_v19 = vpop.f32.mrf.mxu0 }
 0x57b   : > { %1378 = vrot.lane.b32.xlu0 %v1621_v0, %s1627_s8 }
 0x57c   : > { %v1369_v5 = vpop.f32.mrf.mxu0 }
 0x5b9   : > { %v1308_v18 = vpop.permute.xlu1 %1307 }
 0x5bb   : > { %v1310_v20 = vpop.permute.xlu0 %1309 }
 0x5bc   : > { %v1312_v41 = vsel %vm1311_vm4, %v1308_v18, %v1310_v20  ;;  %v1318_v26 = vadd.f32 %v1310_v20, %v1248_v4 }
 0x5bd   : > { %v1317_v6 = vadd.f32 %v1312_v41, %v1246_v8 }
 0x5e9   : > { %v1375_v61 = vpop.permute.xlu0 %1374 }
 0x5ea   : > { %v1386_v11 = vadd.f32 %v1375_v61, %v1308_v18 }
 0x5eb   : > { %v1377_v29 = vpop.permute.xlu1 %1376 }
 0x5ec   : > { %v1394_v10 = vadd.f32 %v1392_v54, %v1386_v11  ;;  %v1381_v62 = vsel %vm1380_vm5, %v1375_v61, %v1377_v29 }
 0x5ed   : > { %v1387_v39 = vadd.f32 %v1381_v62, %v1317_v6  ;;  %v1379_v9 = vpop.permute.xlu0 %1378 }
 0x5ee   : > { %v1382_v51 = vsel %vm1380_vm5, %v1377_v29, %v1379_v9  ;;  %1400 = vrot.lane.b32.xlu1 %v1394_v10, %s1628_s9 }
 0x5ef   : > { %v1388_v0 = vadd.f32 %v1382_v51, %v1318_v26  ;;  %v1395_v1 = vadd.f32 %v1392_v54, %v1387_v39 }
 0x5f1   : > { %1402 = vrot.lane.b32.xlu0 %v1395_v1, %s1628_s9  ;;  %v1396_v38 = vadd.f32 %v1392_v54, %v1388_v0 }
 0x5f3   : > { %1404 = vrot.lane.b32.xlu1 %v1396_v38, %s1628_s9 }
 0x660   : > { %v1401_v43 = vpop.permute.xlu1 %1400 }
 0x663   : > { %v1403_v21 = vpop.permute.xlu0 %1402 }
 0x664   : > { %v1407_v34 = vsel %vm1406_vm6, %v1401_v43, %v1403_v21 }
 0x665   : > { %1411 = vst [vmem:[%s278_s13] sm:$0x3f] %v1407_v34  ;;  %v1405_v24 = vpop.permute.xlu1 %1404 }
 0x666   : > { %v1408_v23 = vsel %vm1406_vm6, %v1403_v21, %v1405_v24 }
 0x667   : > { %1412 = vst [vmem:[%s278_s13 + $0x8] sm:$0x3f] %v1408_v23 }
 0x668 PF: > { %s17_s24 = sadd.s32 1, %s1619_s24  }
 0x669   : > { %p14_p4 = scmp.ge.s32.totalorder %s17_s24, 4  }
 0x66b   :  { %16 = sbr.rel (!%p14_p4) target bundleno = 1 (0x1), region = 81 }

// kernel: encoder_forward.11
= control target key start
LH: loop header
LB: loop body
LE: loop exit
PB: predicated region body
PF: predicated region fallthrough
CT: control target
= control target key end

     0   :  { %s4076_s21 = smov 0   ;;  %s5514_s0 = inlined_call_operand.vmem [shape: bf16[2,64,256], index: 0, kind: input, shape index: {}]   ;;  %s5515_s1 = inlined_call_operand.vmem [shape: f32[64,1], index: 1, kind: input, shape index: {}]   ;;  %s5516_s2 = inlined_call_operand.vmem [shape: f32[64,1], index: 2, kind: input, shape index: {}]   ;;  %s5517_s3 = inlined_call_operand.vmem [shape: f32[64,64], index: 3, kind: input, shape index: {}]   ;;  %s5518_s4 = inlined_call_operand.vmem [shape: bf16[64,64], index: 4, kind: input, shape index: {}]   ;;  %s5519_s5 = inlined_call_operand.vmem [shape: f32[1,64], index: 5, kind: input, shape index: {}]   ;;  %s5520_s6 = inlined_call_operand.vmem [shape: bf16[64,64], index: 6, kind: input, shape index: {}]   ;;  %s5521_s7 = inlined_call_operand.vmem [shape: f32[1,64], index: 7, kind: input, shape index: {}]   ;;  %s5522_s8 = inlined_call_operand.vmem [shape: bf16[64,64], index: 8, kind: input, shape index: {}]   ;;  %s5523_s9 = inlined_call_operand.vmem [shape: f32[1,64], index: 9, kind: input, shape index: {}]   ;;  %s5524_s10 = inlined_call_operand.vmem [shape: bf16[64,64], index: 10, kind: input, shape index: {}]   ;;  %s5525_s11 = inlined_call_operand.vmem [shape: f32[1,64], index: 11, kind: input, shape index: {}]   ;;  %s5526_s12 = inlined_call_operand.vmem [shape: bf16[2,64,256], index: 12, kind: output, shape index: {}]  }
   0x1 LB: > { %s3212_s22 = sadd.s32 4294967295, %s4007_s21   ;;  %p3216_p0 = scmp.ge.s32.totalorder %s4007_s21, 1  ;;  %s4007_s21 = sphi %s4076_s21, %s22_s21  }
   0x2   : > { %p362_p1 = scmp.lt.s32.totalorder %s4007_s21, 3 }
   0x4   : > { %p363_p2 = pnand %p3216_p0, %p362_p1 }
   0x6   : > { %366 = sbr.rel (%p363_p2) target bundleno = 2482 (0x9b2), region = 68 }
   0xb   : > { %p404_p3 = scmp.lt.s32.totalorder %s3212_s22, 1  ;;  %v4009_v0 = vmov 0.0   ;;  %v4143_v25 = vld [vmem:[%s5517_s3] sm:$0xff]  ;;  %vm463_vm0 = vcmask 523264   ;;  %v4153_v26 = vld [vmem:[%s5517_s3 + $0x8] sm:$0xff]  ;;  %v4161_v27 = vld [vmem:[%s5517_s3 + $0x10] sm:$0xff] }
   0xc   : > { %552 = vmatprep.mubr.f32.mxu0 %v4009_v0  ;;  %730 = vmatprep.mubr.f32.mxu1 %v4009_v0  ;;  %v4169_v28 = vld [vmem:[%s5517_s3 + $0x18] sm:$0xff]  ;;  %v4177_v29 = vld [vmem:[%s5517_s3 + $0x20] sm:$0xff]  ;;  %v4185_v30 = vld [vmem:[%s5517_s3 + $0x28] sm:$0xff]  ;;  %v4010_v58 = vmov 0  }
   0xd   : > { %s5632_s22 = smov (!%p404_p3, %s3212_s22), 1  ;;  %v4193_v31 = vld [vmem:[%s5517_s3 + $0x30] sm:$0xff]  ;;  %v4201_v32 = vld [vmem:[%s5517_s3 + $0x38] sm:$0xff]  ;;  %v440_v57 = vld [vmem:[%s5515_s1 + $0x8] sm:$0xff]  ;;  %3776 = vset.pattern.permute.xlu1 %v4010_v58  ;;  %3775 = vset.pattern.permute.xlu0 %v4010_v58 }
   0xe   : > { %s3347_s23 = sshll.u32 %s5632_s22, 6  ;;  %v447_v59 = vld [vmem:[%s5516_s2] sm:$0xff]  ;;  %v444_v61 = vld [vmem:[%s5515_s1 + $0x28] sm:$0xff]  ;;  %v441_v62 = vld [vmem:[%s5515_s1 + $0x10] sm:$0xff] }
   0xf   : > { %s408_s26 = scalar_lea.vmem %s5514_s0, %s3347_s23  ;;  %v439_v60 = vld [vmem:[%s5515_s1] sm:$0xff]  ;;  %v445_v63 = vld [vmem:[%s5515_s1 + $0x30] sm:$0xff]  ;;  %s5487_s27 = scalar_lea.vmem %s5526_s12, %s3347_s23 }
  0x10   : > { %v422_v1 = vld [vmem:[%s408_s26 + $0x38] sm:$0xff]  ;;  %v421_v2 = vld [vmem:[%s408_s26 + $0x30] sm:$0xff]  ;;  %v420_v3 = vld [vmem:[%s408_s26 + $0x28] sm:$0xff] }
  0x11   : > { %v4094_v4 = vunpack.c.h.bf16 %v422_v1  ;;  %v4096_v5 = vunpack.c.l.bf16 %v422_v1  ;;  %v4098_v6 = vunpack.c.h.bf16 %v421_v2  ;;  %v4100_v7 = vunpack.c.l.bf16 %v421_v2  ;;  %v419_v8 = vld [vmem:[%s408_s26 + $0x20] sm:$0xff]  ;;  %v418_v9 = vld [vmem:[%s408_s26 + $0x18] sm:$0xff]  ;;  %v417_v12 = vld [vmem:[%s408_s26 + $0x10] sm:$0xff] }
  0x12   : > { %v4103_v10 = vunpack.c.h.bf16 %v420_v3  ;;  %v4106_v11 = vunpack.c.l.bf16 %v420_v3  ;;  %v4109_v13 = vunpack.c.h.bf16 %v419_v8  ;;  %v4112_v14 = vunpack.c.l.bf16 %v419_v8  ;;  %v416_v15 = vld [vmem:[%s408_s26 + $0x8] sm:$0xff]  ;;  %v415_v20 = vld [vmem:[%s408_s26] sm:$0xff]  ;;  %v446_v2 = vld [vmem:[%s5515_s1 + $0x38] sm:$0xff] }
  0x13   : > { %5559 = vst [vmem:[#allocation2_spill] sm:$0xff] %v4094_v4  ;;  %5560 = vst [vmem:[#allocation3_spill] sm:$0xff] %v4096_v5  ;;  %504 = vmatprep.subr.mxu0 %v4094_v4  ;;  %v4115_v16 = vunpack.c.h.bf16 %v418_v9  ;;  %v4118_v17 = vunpack.c.l.bf16 %v418_v9  ;;  %v4121_v18 = vunpack.c.h.bf16 %v417_v12  ;;  %v4124_v19 = vunpack.c.l.bf16 %v417_v12  ;;  %v448_v1 = vld [vmem:[%s5516_s2 + $0x8] sm:$0xff]  ;;  %v442_v3 = vld [vmem:[%s5515_s1 + $0x18] sm:$0xff] }
  0x14   : > { %5561 = vst [vmem:[#allocation4_spill] sm:$0xff] %v4098_v6  ;;  %5562 = vst [vmem:[#allocation5_spill] sm:$0xff] %v4100_v7  ;;  %505 = vmatpush1.msra.mxu0 %v4096_v5  ;;  %v4127_v21 = vunpack.c.h.bf16 %v416_v15  ;;  %v4130_v22 = vunpack.c.l.bf16 %v416_v15  ;;  %v4133_v23 = vunpack.c.h.bf16 %v415_v20  ;;  %v4136_v24 = vunpack.c.l.bf16 %v415_v20  ;;  %v449_v8 = vld [vmem:[%s5516_s2 + $0x10] sm:$0xff]  ;;  %v443_v9 = vld [vmem:[%s5515_s1 + $0x20] sm:$0xff] }
  0x15   : > { %5563 = vst [vmem:[#allocation6_spill] sm:$0xff] %v4103_v10  ;;  %5564 = vst [vmem:[#allocation7_spill] sm:$0xff] %v4106_v11  ;;  %506 = vmatprep.subr.mxu0 %v4098_v6  ;;  %v450_v12 = vld [vmem:[%s5516_s2 + $0x18] sm:$0xff]  ;;  %v451_v15 = vld [vmem:[%s5516_s2 + $0x20] sm:$0xff] }
  0x16   : > { %5565 = vst [vmem:[#allocation8_spill] sm:$0xff] %v4109_v13  ;;  %507 = vmatpush1.msra.mxu0 %v4100_v7  ;;  %5566 = vst [vmem:[#allocation9_spill] sm:$0xff] %v4112_v14  ;;  %v452_v20 = vld [vmem:[%s5516_s2 + $0x28] sm:$0xff] }
  0x17   : > { %508 = vmatprep.subr.mxu0 %v4103_v10  ;;  %5567 = vst [vmem:[#allocation10_spill] sm:$0xff] %v4115_v16  ;;  %5568 = vst [vmem:[#allocation11_spill] sm:$0xff] %v4118_v17 }
  0x18   : > { %509 = vmatpush1.msra.mxu0 %v4106_v11  ;;  %5569 = vst [vmem:[#allocation12_spill] sm:$0xff] %v4121_v18  ;;  %5570 = vst [vmem:[#allocation13_spill] sm:$0xff] %v4124_v19 }
  0x19   : > { %510 = vmatprep.subr.mxu0 %v4109_v13  ;;  %5571 = vst [vmem:[#allocation14_spill] sm:$0xff] %v4127_v21  ;;  %5572 = vst [vmem:[#allocation15_spill] sm:$0xff] %v4130_v22 }
  0x1a   : > { %511 = vmatpush1.msra.mxu0 %v4112_v14  ;;  %5573 = vst [vmem:[#allocation16_spill] sm:$0xff] %v4133_v23  ;;  %5574 = vst [vmem:[#allocation17_spill] sm:$0xff] %v4136_v24 }
  0x1b   : > { %512 = vmatprep.subr.mxu0 %v4115_v16 }
  0x1c   : > { %513 = vmatpush1.msra.mxu0 %v4118_v17 }
  0x1d   : > { %514 = vmatprep.subr.mxu0 %v4121_v18 }
  0x1e   : > { %515 = vmatpush1.msra.mxu0 %v4124_v19 }
  0x1f   : > { %516 = vmatprep.subr.mxu0 %v4127_v21 }
  0x20   : > { %517 = vmatpush1.msra.mxu0 %v4130_v22 }
  0x21   : > { %518 = vmatprep.subr.mxu0 %v4133_v23 }
  0x22   : > { %519 = vmatpush1.msra.mxu0 %v4136_v24 }
  0x23   : > { %3221 = vmatmul.mubr.msk.f32.vlgmr.msra.gmra.mxu0 %vm463_vm0, %v4143_v25 }
  0x24   : > { %558 = vmatprep.mubr.f32.mxu0 %v4009_v0 }
  0x27   : > { %3222 = vmatmul.mubr.msk.f32.gmra.mxu0 %vm463_vm0, %v4153_v26 }
  0x28   : > { %564 = vmatprep.mubr.f32.mxu0 %v4009_v0 }
  0x2b   : > { %3223 = vmatmul.mubr.msk.f32.gmra.mxu0 %vm463_vm0, %v4161_v27 }
  0x2c   : > { %570 = vmatprep.mubr.f32.mxu0 %v4009_v0 }
  0x2f   : > { %3224 = vmatmul.mubr.msk.f32.gmra.mxu0 %vm463_vm0, %v4169_v28 }
  0x30   : > { %576 = vmatprep.mubr.f32.mxu0 %v4009_v0 }
  0x33   : > { %3225 = vmatmul.mubr.msk.f32.gmra.mxu0 %vm463_vm0, %v4177_v29 }
  0x34   : > { %582 = vmatprep.mubr.f32.mxu0 %v4009_v0 }
  0x37   : > { %3226 = vmatmul.mubr.msk.f32.gmra.mxu0 %vm463_vm0, %v4185_v30 }
  0x38   : > { %588 = vmatprep.mubr.f32.mxu0 %v4009_v0 }
  0x3b   : > { %3227 = vmatmul.mubr.msk.f32.gmra.mxu0 %vm463_vm0, %v4193_v31 }
  0x3c   : > { %594 = vmatprep.mubr.f32.mxu0 %v4009_v0 }
  0x3f   : > { %3228 = vmatmul.mubr.msk.f32.gmra.mxu0 %vm463_vm0, %v4201_v32 }
  0xe3   : > { %v554_v33 = vpop.f32.mrf.mxu0 }
  0xe5   : > { %v556_v34 = vpop.f32.mrf.mxu0 }
  0xe6   : > { %v601_v53 = vadd.f32 %v556_v34, %v554_v33 }
  0xe7   : > { %v560_v35 = vpop.f32.mrf.mxu0 }
  0xe9   : > { %v562_v36 = vpop.f32.mrf.mxu0 }
  0xea   : > { %v604_v56 = vadd.f32 %v562_v36, %v560_v35 }
  0xeb   : > { %v566_v37 = vpop.f32.mrf.mxu0 }
  0xed   : > { %v568_v38 = vpop.f32.mrf.mxu0 }
  0xee   : > { %v607_v51 = vadd.f32 %v568_v38, %v566_v37 }
  0xef   : > { %v572_v39 = vpop.f32.mrf.mxu0 }
  0xf1   : > { %v574_v40 = vpop.f32.mrf.mxu0 }
  0xf2   : > { %v610_v55 = vadd.f32 %v574_v40, %v572_v39 }
  0xf3   : > { %v578_v41 = vpop.f32.mrf.mxu0 }
  0xf5   : > { %v580_v42 = vpop.f32.mrf.mxu0 }
  0xf6   : > { %v613_v48 = vadd.f32 %v580_v42, %v578_v41 }
  0xf7   : > { %v584_v43 = vpop.f32.mrf.mxu0 }
  0xf9   : > { %v586_v44 = vpop.f32.mrf.mxu0 }
  0xfa   : > { %v616_v45 = vadd.f32 %v586_v44, %v584_v43 }
  0xfb   : > { %v590_v46 = vpop.f32.mrf.mxu0 }
  0xfc   : > { %617 = vadd.xlane.f32.xlu1 %v616_v45 }
  0xfd   : > { %v592_v47 = vpop.f32.mrf.mxu0 }
  0xfe   : > { %v619_v54 = vadd.f32 %v592_v47, %v590_v46 }
  0xff   : > { %v596_v49 = vpop.f32.mrf.mxu0 }
 0x100   : > { %614 = vadd.xlane.f32.xlu1 %v613_v48 }
 0x101   : > { %v598_v50 = vpop.f32.mrf.mxu0 }
 0x102   : > { %v622_v52 = vadd.f32 %v598_v50, %v596_v49 }
 0x104   : > { %608 = vadd.xlane.f32.xlu1 %v607_v51  ;;  %623 = vadd.xlane.f32.xlu0 %v622_v52 }
 0x108   : > { %602 = vadd.xlane.f32.xlu1 %v601_v53  ;;  %620 = vadd.xlane.f32.xlu0 %v619_v54 }
 0x10c   : > { %611 = vadd.xlane.f32.xlu0 %v610_v55 }
 0x110   : > { %605 = vadd.xlane.f32.xlu0 %v604_v56 }
 0x119   : > { %850 = vperm.xlu1 %3776, %v440_v57  }
 0x11d   : > { %901 = vperm.xlu1 %3776, %v447_v59  }
 0x121   : > { %855 = vperm.xlu1 %3776, %v441_v62  }
 0x125   : > { %906 = vperm.xlu1 %3776, %v448_v1  }
 0x126   : > { %845 = vperm.xlu0 %3775, %v439_v60  }
 0x129   : > { %860 = vperm.xlu1 %3776, %v442_v3  }
 0x12a   : > { %870 = vperm.xlu0 %3775, %v444_v61  }
 0x12d   : > { %911 = vperm.xlu1 %3776, %v449_v8  }
 0x12e   : > { %875 = vperm.xlu0 %3775, %v445_v63  }
 0x131   : > { %865 = vperm.xlu1 %3776, %v443_v9  }
 0x132   : > { %880 = vperm.xlu0 %3775, %v446_v2  }
 0x135   : > { %916 = vperm.xlu1 %3776, %v450_v12  }
 0x139   : > { %921 = vperm.xlu1 %3776, %v451_v15  }
 0x13d   : > { %926 = vperm.xlu1 %3776, %v452_v20  }
 0x185   : > { %v618_v33 = vpop.xlane.xlu1 %617 }
 0x186   : > { %v631_v37 = vmul.f32 0.00390625, %v618_v33 }
 0x188   : > { %v4258_v46 = vsub.f32 %v4103_v10, %v631_v37  ;;  %v4267_v49 = vsub.f32 %v4106_v11, %v631_v37 }
 0x189   : > { %v615_v34 = vpop.xlane.xlu1 %614 }
 0x18a   : > { %v630_v40 = vmul.f32 0.00390625, %v615_v34  ;;  %v661_v59 = vmul.f32 %v4258_v46, %v4258_v46  ;;  %v660_v62 = vmul.f32 %v4267_v49, %v4267_v49 }
 0x18c   : > { %v4270_v50 = vsub.f32 %v4109_v13, %v630_v40  ;;  %v4277_v56 = vsub.f32 %v4112_v14, %v630_v40 }
 0x18d   : > { %v624_v35 = vpop.xlane.xlu0 %623  ;;  %v609_v41 = vpop.xlane.xlu1 %608 }
 0x18e   : > { %v633_v36 = vmul.f32 0.00390625, %v624_v35  ;;  %v628_v52 = vmul.f32 0.00390625, %v609_v41  ;;  %v659_v3 = vmul.f32 %v4270_v50, %v4270_v50  ;;  %v658_v9 = vmul.f32 %v4277_v56, %v4277_v56 }
 0x190   : > { %v4248_v38 = vsub.f32 %v4094_v4, %v633_v36  ;;  %v4251_v39 = vsub.f32 %v4096_v5, %v633_v36  ;;  %v4290_v63 = vsub.f32 %v4121_v18, %v628_v52  ;;  %v4295_v8 = vsub.f32 %v4124_v19, %v628_v52 }
 0x191   : > { %v621_v42 = vpop.xlane.xlu0 %620  ;;  %v603_v57 = vpop.xlane.xlu1 %602 }
 0x192   : > { %v632_v43 = vmul.f32 0.00390625, %v621_v42  ;;  %v665_v44 = vmul.f32 %v4248_v38, %v4248_v38  ;;  %v664_v45 = vmul.f32 %v4251_v39, %v4251_v39  ;;  %v626_v1 = vmul.f32 0.00390625, %v603_v57 }
 0x193   : > { %v655_v35 = vmul.f32 %v4290_v63, %v4290_v63  ;;  %v654_v37 = vmul.f32 %v4295_v8, %v4295_v8 }
 0x194   : > { %v4261_v47 = vsub.f32 %v4100_v7, %v632_v43  ;;  %v4264_v48 = vsub.f32 %v4098_v6, %v632_v43  ;;  %682 = vmatprep.subr.mxu1 %v665_v44  ;;  %v4310_v34 = vsub.f32 %v4133_v23, %v626_v1  ;;  %v4315_v36 = vsub.f32 %v4136_v24, %v626_v1 }
 0x195   : > { %683 = vmatpush1.msra.mxu1 %v664_v45  ;;  %v612_v51 = vpop.xlane.xlu0 %611 }
 0x196   : > { %v629_v53 = vmul.f32 0.00390625, %v612_v51  ;;  %v663_v54 = vmul.f32 %v4264_v48, %v4264_v48  ;;  %v662_v55 = vmul.f32 %v4261_v47, %v4261_v47  ;;  %v651_v42 = vmul.f32 %v4310_v34, %v4310_v34 }
 0x197   : > { %v650_v43 = vmul.f32 %v4315_v36, %v4315_v36 }
 0x198   : > { %v4280_v58 = vsub.f32 %v4115_v16, %v629_v53  ;;  %684 = vmatprep.subr.mxu1 %v663_v54  ;;  %v4285_v60 = vsub.f32 %v4118_v17, %v629_v53 }
 0x199   : > { %685 = vmatpush1.msra.mxu1 %v662_v55  ;;  %v606_v61 = vpop.xlane.xlu0 %605 }
 0x19a   : > { %v627_v2 = vmul.f32 0.00390625, %v606_v61  ;;  %686 = vmatprep.subr.mxu1 %v661_v59  ;;  %v657_v15 = vmul.f32 %v4280_v58, %v4280_v58  ;;  %v656_v33 = vmul.f32 %v4285_v60, %v4285_v60 }
 0x19b   : > { %687 = vmatpush1.msra.mxu1 %v660_v62 }
 0x19c   : > { %v4300_v12 = vsub.f32 %v4127_v21, %v627_v2  ;;  %688 = vmatprep.subr.mxu1 %v659_v3  ;;  %v4305_v20 = vsub.f32 %v4130_v22, %v627_v2 }
 0x19d   : > { %689 = vmatpush1.msra.mxu1 %v658_v9 }
 0x19e   : > { %690 = vmatprep.subr.mxu1 %v657_v15  ;;  %v653_v40 = vmul.f32 %v4300_v12, %v4300_v12  ;;  %v652_v41 = vmul.f32 %v4305_v20, %v4305_v20  ;;  %v453_v15 = vld [vmem:[%s5516_s2 + $0x30] sm:$0xff] }
 0x19f   : > { %691 = vmatpush1.msra.mxu1 %v656_v33  ;;  %v454_v33 = vld [vmem:[%s5516_s2 + $0x38] sm:$0xff] }
 0x1a0   : > { %692 = vmatprep.subr.mxu1 %v655_v35  ;;  %v3777_v35 = vld [vmem:[%s5518_s4 + $0x18] sm:$0xff]  }
 0x1a1   : > { %693 = vmatpush1.msra.mxu1 %v654_v37  ;;  %v3778_v37 = vld [vmem:[%s5520_s6 + $0x18] sm:$0xff]   ;;  %3597 = vmatprep.subr.bf16.mxu0 %v3777_v35 }
 0x1a2   : > { %694 = vmatprep.subr.mxu1 %v653_v40  ;;  %3598 = vmatpush3.bf16.msra.mxu0 %v3777_v35  ;;  %v851_v40 = vpop.permute.xlu1 %850 }
 0x1a3   : > { %695 = vmatpush1.msra.mxu1 %v652_v41 }
 0x1a4   : > { %696 = vmatprep.subr.mxu1 %v651_v42 }
 0x1a5   : > { %697 = vmatpush1.msra.mxu1 %v650_v43 }
 0x1a6   : > { %3229 = vmatmul.mubr.msk.f32.vlgmr.msra.gmra.mxu1 %vm463_vm0, %v4143_v25  ;;  %3637 = vmatprep.subr.bf16.mxu1 %v3778_v37  ;;  %v902_v41 = vpop.permute.xlu1 %901 }
 0x1a7   : > { %736 = vmatprep.mubr.f32.mxu1 %v4009_v0  ;;  %3638 = vmatpush3.bf16.msra.mxu1 %v3778_v37 }
 0x1aa   : > { %3230 = vmatmul.mubr.msk.f32.gmra.mxu1 %vm463_vm0, %v4153_v26  ;;  %v4362_v42 = vpop.permute.xlu1 %855 }
 0x1ab   : > { %742 = vmatprep.mubr.f32.mxu1 %v4009_v0 }
 0x1ae   : > { %3231 = vmatmul.mubr.msk.f32.gmra.mxu1 %vm463_vm0, %v4161_v27  ;;  %v4364_v43 = vpop.permute.xlu1 %906 }
 0x1af   : > { %748 = vmatprep.mubr.f32.mxu1 %v4009_v0 }
 0x1b2   : > { %3232 = vmatmul.mubr.msk.f32.gmra.mxu1 %vm463_vm0, %v4169_v28 }
 0x1b3   : > { %754 = vmatprep.mubr.f32.mxu1 %v4009_v0 }
 0x1b6   : > { %3233 = vmatmul.mubr.msk.f32.gmra.mxu1 %vm463_vm0, %v4177_v29 }
 0x1b7   : > { %760 = vmatprep.mubr.f32.mxu1 %v4009_v0 }
 0x1ba   : > { %3234 = vmatmul.mubr.msk.f32.gmra.mxu1 %vm463_vm0, %v4185_v30 }
 0x1bb   : > { %766 = vmatprep.mubr.f32.mxu1 %v4009_v0 }
 0x1be   : > { %3235 = vmatmul.mubr.msk.f32.gmra.mxu1 %vm463_vm0, %v4193_v31 }
 0x1bf   : > { %772 = vmatprep.mubr.f32.mxu1 %v4009_v0 }
 0x1c2   : > { %3236 = vmatmul.mubr.msk.f32.gmra.mxu1 %vm463_vm0, %v4201_v32 }
 0x266   : > { %v732_v25 = vpop.f32.mrf.mxu1 }
 0x268   : > { %v734_v26 = vpop.f32.mrf.mxu1 }
 0x269   : > { %v779_v27 = vadd.f32 %v734_v26, %v732_v25  ;;  %v4366_v25 = vpop.permute.xlu1 %860 }
 0x26a   : > { %v738_v28 = vpop.f32.mrf.mxu1 }
 0x26b   : > { %780 = vadd.xlane.f32.xlu0 %v779_v27  ;;  %v846_v27 = vpop.permute.xlu0 %845 }
 0x26c   : > { %v740_v29 = vpop.f32.mrf.mxu1 }
 0x26d   : > { %v782_v44 = vadd.f32 %v740_v29, %v738_v28  ;;  %v4368_v26 = vpop.permute.xlu1 %911 }
 0x26e   : > { %v744_v45 = vpop.f32.mrf.mxu1 }
 0x26f   : > { %783 = vadd.xlane.f32.xlu1 %v782_v44  ;;  %v4372_v29 = vpop.permute.xlu0 %870 }
 0x270   : > { %v746_v30 = vpop.f32.mrf.mxu1 }
 0x271   : > { %v785_v51 = vadd.f32 %v746_v30, %v744_v45  ;;  %v4370_v28 = vpop.permute.xlu1 %865 }
 0x272   : > { %v750_v52 = vpop.f32.mrf.mxu1 }
 0x273   : > { %786 = vadd.xlane.f32.xlu0 %v785_v51  ;;  %v4376_v45 = vpop.permute.xlu0 %875 }
 0x274   : > { %v752_v53 = vpop.f32.mrf.mxu1 }
 0x275   : > { %v788_v31 = vadd.f32 %v752_v53, %v750_v52  ;;  %v4374_v44 = vpop.permute.xlu1 %916 }
 0x276   : > { %v756_v54 = vpop.f32.mrf.mxu1 }
 0x277   : > { %789 = vadd.xlane.f32.xlu1 %v788_v31  ;;  %v4380_v51 = vpop.permute.xlu0 %880 }
 0x278   : > { %v758_v0 = vpop.f32.mrf.mxu1 }
 0x279   : > { %v791_v55 = vadd.f32 %v758_v0, %v756_v54  ;;  %v4378_v30 = vpop.permute.xlu1 %921 }
 0x27a   : > { %v762_v32 = vpop.f32.mrf.mxu1 }
 0x27b   : > { %792 = vadd.xlane.f32.xlu0 %v791_v55 }
 0x27c   : > { %v764_v57 = vpop.f32.mrf.mxu1 }
 0x27d   : > { %v794_v59 = vadd.f32 %v764_v57, %v762_v32  ;;  %v4382_v52 = vpop.permute.xlu1 %926 }
 0x27e   : > { %v768_v61 = vpop.f32.mrf.mxu1 }
 0x27f   : > { %795 = vadd.xlane.f32.xlu1 %v794_v59 }
 0x280   : > { %v770_v62 = vpop.f32.mrf.mxu1 }
 0x281   : > { %v797_v1 = vadd.f32 %v770_v62, %v768_v61 }
 0x282   : > { %v774_v2 = vpop.f32.mrf.mxu1 }
 0x283   : > { %798 = vadd.xlane.f32.xlu0 %v797_v1 }
 0x284   : > { %v776_v3 = vpop.f32.mrf.mxu1 }
 0x285   : > { %v800_v9 = vadd.f32 %v776_v3, %v774_v2 }
 0x287   : > { %801 = vadd.xlane.f32.xlu1 %v800_v9 }
 0x298   : > { %931 = vperm.xlu1 %3776, %v453_v15  }
 0x299   : > { %936 = vperm.xlu0 %3775, %v454_v33  }
 0x2f4   : > { %v781_v53 = vpop.xlane.xlu0 %780 }
 0x2f5   : > { %v803_v31 = vmul.f32 0.00390625, %v781_v53 }
 0x2f7   : > { %v811_v54 = vadd.f32 1e-06, %v803_v31 }
 0x2f8   : > { %v784_v0 = vpop.xlane.xlu1 %783 }
 0x2f9   : > { %3793 = vrsqrt.f32 %v811_v54  ;;  %v804_v55 = vmul.f32 0.00390625, %v784_v0 }
 0x2fb   : > { %v812_v32 = vadd.f32 1e-06, %v804_v55 }
 0x2fc   : > { %v787_v57 = vpop.xlane.xlu0 %786 }
 0x2fd   : > { %3795 = vrsqrt.f32 %v812_v32  ;;  %v805_v59 = vmul.f32 0.00390625, %v787_v57  ;;  %v3779_v32 = vld [vmem:[%s5518_s4 + $0x10] sm:$0xff]  }
 0x2fe   : > { %v3780_v57 = vld [vmem:[%s5520_s6 + $0x10] sm:$0xff]   ;;  %3599 = vmatprep.subr.bf16.mxu0 %v3779_v32 }
 0x2ff   : > { %v813_v61 = vadd.f32 1e-06, %v805_v59  ;;  %3639 = vmatprep.subr.bf16.mxu1 %v3780_v57  ;;  %3600 = vmatpush3.bf16.msra.mxu0 %v3779_v32 }
 0x300   : > { %v790_v62 = vpop.xlane.xlu1 %789  ;;  %3640 = vmatpush3.bf16.msra.mxu1 %v3780_v57 }
 0x301   : > { %3797 = vrsqrt.f32 %v813_v61  ;;  %v806_v1 = vmul.f32 0.00390625, %v790_v62 }
 0x303   : > { %v814_v2 = vadd.f32 1e-06, %v806_v1 }
 0x304   : > { %v793_v3 = vpop.xlane.xlu0 %792 }
 0x305   : > { %3799 = vrsqrt.f32 %v814_v2  ;;  %v807_v9 = vmul.f32 0.00390625, %v793_v3 }
 0x306   : > { %v3794_v15 = vpop.eup %3793 }
 0x307   : > { %v815_v33 = vadd.f32 1e-06, %v807_v9  ;;  %v828_v35 = vmul.f32 %v3794_v15, %v4310_v34  ;;  %v827_v37 = vmul.f32 %v3794_v15, %v4315_v36 }
 0x308   : > { %v796_v53 = vpop.xlane.xlu1 %795 }
 0x309   : > { %3801 = vrsqrt.f32 %v815_v33  ;;  %v808_v31 = vmul.f32 0.00390625, %v796_v53  ;;  %v884_v54 = vmul.f32 %v846_v27, %v828_v35  ;;  %v883_v0 = vmul.f32 %v846_v27, %v827_v37  ;;  %v3782_v35 = vld [vmem:[%s5520_s6 + $0x8] sm:$0xff]  }
 0x30a   : > { %v3796_v55 = vpop.eup %3795  ;;  %3641 = vmatprep.subr.bf16.mxu1 %v3782_v35 }
 0x30b   : > { %v816_v59 = vadd.f32 1e-06, %v808_v31  ;;  %v940_v61 = vadd.f32 %v902_v41, %v884_v54  ;;  %v939_v62 = vadd.f32 %v902_v41, %v883_v0  ;;  %v830_v34 = vmul.f32 %v3796_v55, %v4300_v12  ;;  %v3783_v54 = vld [vmem:[%s5518_s4] sm:$0xff]   ;;  %3642 = vmatpush3.bf16.msra.mxu1 %v3782_v35 }
 0x30c   : > { %v799_v36 = vpop.xlane.xlu0 %798  ;;  %v829_v1 = vmul.f32 %v3796_v55, %v4305_v20  ;;  %v3781_v20 = vld [vmem:[%s5518_s4 + $0x8] sm:$0xff]   ;;  %v3784_v0 = vld [vmem:[%s5520_s6] sm:$0xff]  }
 0x30d   : > { %3803 = vrsqrt.f32 %v816_v59  ;;  %v809_v27 = vmul.f32 0.00390625, %v799_v36  ;;  %987 = vxpose.xlu0.b32.start [1/8] (short) %v940_v61, 128  ;;  %955 = vxpose.xlu1.b32.start [1/8] (short) %v939_v62, 128  ;;  %v886_v2 = vmul.f32 %v851_v40, %v830_v34 }
 0x30e   : > { %v3798_v3 = vpop.eup %3797  ;;  %v885_v9 = vmul.f32 %v851_v40, %v829_v1  ;;  %3601 = vmatprep.subr.bf16.mxu0 %v3781_v20  ;;  %3643 = vmatprep.subr.bf16.mxu1 %v3784_v0 }
 0x30f   : > { %v817_v15 = vadd.f32 1e-06, %v809_v27  ;;  %v942_v33 = vadd.f32 %v4364_v43, %v886_v2  ;;  %v832_v41 = vmul.f32 %v3798_v3, %v4290_v63  ;;  %v831_v12 = vmul.f32 %v3798_v3, %v4295_v8  ;;  %3602 = vmatpush3.bf16.msra.mxu0 %v3781_v20  ;;  %3644 = vmatpush3.bf16.msra.mxu1 %v3784_v0 }
 0x310   : > { %v802_v37 = vpop.xlane.xlu1 %801  ;;  %v941_v40 = vadd.f32 %v4364_v43, %v885_v9  ;;  %3603 = vmatprep.subr.bf16.mxu0 %v3783_v54 }
 0x311   : > { %3805 = vrsqrt.f32 %v817_v15  ;;  %v810_v53 = vmul.f32 0.00390625, %v802_v37  ;;  %988 = vxpose.xlu0.b32.cont [2/8] (short) %v942_v33, 128  ;;  %v888_v31 = vmul.f32 %v4362_v42, %v832_v41  ;;  %v887_v63 = vmul.f32 %v4362_v42, %v831_v12 }
 0x312   : > { %v3800_v8 = vpop.eup %3799  ;;  %956 = vxpose.xlu1.b32.cont [2/8] (short) %v941_v40, 128 }
 0x313   : > { %v818_v43 = vadd.f32 1e-06, %v810_v53  ;;  %v944_v55 = vadd.f32 %v4368_v26, %v888_v31  ;;  %v943_v32 = vadd.f32 %v4368_v26, %v887_v63  ;;  %v834_v57 = vmul.f32 %v3800_v8, %v4280_v58  ;;  %3604 = vmatpush3.bf16.msra.mxu0 %v3783_v54 }
 0x314   : > { %v833_v42 = vmul.f32 %v3800_v8, %v4285_v60  ;;  %v932_v12 = vpop.permute.xlu1 %931 }
 0x315   : > { %3807 = vrsqrt.f32 %v818_v43  ;;  %989 = vxpose.xlu0.b32.cont [3/8] (short) %v944_v55, 128  ;;  %v890_v59 = vmul.f32 %v4366_v25, %v834_v57  ;;  %v3786_v55 = vld [vmem:[%s5522_s8 + $0x10] sm:$0xff]   ;;  %v3787_v57 = vld [vmem:[%s5522_s8 + $0x8] sm:$0xff]  }
 0x316   : > { %v3802_v61 = vpop.eup %3801  ;;  %957 = vxpose.xlu1.b32.cont [3/8] (short) %v943_v32, 128  ;;  %v889_v62 = vmul.f32 %v4366_v25, %v833_v42 }
 0x317   : > { %v946_v34 = vadd.f32 %v4374_v44, %v890_v59  ;;  %v836_v26 = vmul.f32 %v3802_v61, %v4270_v50  ;;  %v835_v58 = vmul.f32 %v3802_v61, %v4277_v56 }
 0x318   : > { %v945_v60 = vadd.f32 %v4374_v44, %v889_v62  ;;  %v3788_v62 = vld [vmem:[%s5522_s8] sm:$0xff]  }
 0x319   : > { %990 = vxpose.xlu0.b32.cont [4/8] (short) %v946_v34, 128  ;;  %v892_v36 = vmul.f32 %v4370_v28, %v836_v26  ;;  %v891_v1 = vmul.f32 %v4370_v28, %v835_v58 }
 0x31a   : > { %v3804_v27 = vpop.eup %3803  ;;  %958 = vxpose.xlu1.b32.cont [4/8] (short) %v945_v60, 128 }
 0x31b   : > { %v948_v2 = vadd.f32 %v4378_v30, %v892_v36  ;;  %v947_v25 = vadd.f32 %v4378_v30, %v891_v1  ;;  %v838_v3 = vmul.f32 %v3804_v27, %v4258_v46  ;;  %v837_v50 = vmul.f32 %v3804_v27, %v4267_v49 }
 0x31d   : > { %991 = vxpose.xlu0.b32.cont [5/8] (short) %v948_v2, 128  ;;  %v894_v56 = vmul.f32 %v4372_v29, %v838_v3  ;;  %v893_v44 = vmul.f32 %v4372_v29, %v837_v50 }
 0x31e   : > { %v3806_v9 = vpop.eup %3805  ;;  %959 = vxpose.xlu1.b32.cont [5/8] (short) %v947_v25, 128 }
 0x31f   : > { %v839_v15 = vmul.f32 %v3806_v9, %v4261_v47  ;;  %v840_v28 = vmul.f32 %v3806_v9, %v4264_v48  ;;  %v950_v33 = vadd.f32 %v4382_v52, %v894_v56  ;;  %v949_v41 = vadd.f32 %v4382_v52, %v893_v44  ;;  %v937_v52 = vpop.permute.xlu0 %936 }
 0x321   : > { %v895_v30 = vmul.f32 %v4376_v45, %v839_v15  ;;  %v896_v46 = vmul.f32 %v4376_v45, %v840_v28  ;;  %992 = vxpose.xlu0.b32.cont [6/8] (short) %v950_v33, 128  ;;  %v3785_v45 = vld [vmem:[%s5522_s8 + $0x18] sm:$0xff]  }
 0x322   : > { %v3808_v49 = vpop.eup %3807  ;;  %960 = vxpose.xlu1.b32.cont [6/8] (short) %v949_v41, 128  ;;  %3677 = vmatprep.subr.bf16.mxu0 %v3785_v45 }
 0x323   : > { %v951_v20 = vadd.f32 %v932_v12, %v895_v30  ;;  %v952_v29 = vadd.f32 %v932_v12, %v896_v46  ;;  %v841_v35 = vmul.f32 %v3808_v49, %v4251_v39  ;;  %v842_v47 = vmul.f32 %v3808_v49, %v4248_v38 }
 0x325   : > { %v897_v48 = vmul.f32 %v4380_v51, %v841_v35  ;;  %v898_v37 = vmul.f32 %v4380_v51, %v842_v47  ;;  %993 = vxpose.xlu0.b32.cont [7/8] (short) %v952_v29, 128 }
 0x326   : > { %961 = vxpose.xlu1.b32.cont [7/8] (short) %v951_v20, 128 }
 0x327   : > { %v953_v40 = vadd.f32 %v937_v52, %v897_v48  ;;  %v954_v53 = vadd.f32 %v937_v52, %v898_v37 }
 0x329   : > { %994 = vxpose.xlu0.b32.end [8/8] (short) %v954_v53, 128 }
 0x32a   : > { %962 = vxpose.xlu1.b32.end [8/8] (short) %v953_v40, 128 }
 0x389   : > { %v1003_v39 = vpop.trf.xlu0 }
 0x38a   : > { %v971_v31 = vpop.trf.xlu1 }
 0x38d   : > { %v1004_v8 = vpop.trf.xlu0 }
 0x38e   : > { %v972_v63 = vpop.trf.xlu1  ;;  %v1027_v20 = vpack.c.bf16 %v1004_v8, %v1003_v39 }
 0x38f   : > { %v4443_v38 = vpack.c.bf16 %v972_v63, %v971_v31 }
 0x391   : > { %3605 = vmatprep.mubr.msk.bf16.mxu0 %vm463_vm0, %v4443_v38  ;;  %3645 = vmatprep.mubr.msk.bf16.mxu1 %vm463_vm0, %v4443_v38  ;;  %v1005_v0 = vpop.trf.xlu0 }
 0x392   : > { %v973_v51 = vpop.trf.xlu1 }
 0x395   : > { %v1006_v42 = vpop.trf.xlu0 }
 0x396   : > { %v974_v54 = vpop.trf.xlu1  ;;  %v1028_v35 = vpack.c.bf16 %v1006_v42, %v1005_v0 }
 0x397   : > { %v4449_v43 = vpack.c.bf16 %v974_v54, %v973_v51  ;;  %v4518_v51 = vld [vmem:[%s5519_s5] ss:$0 sm:$0xff] }
 0x398   : > { %v4523_v54 = vld [vmem:[%s5521_s7] ss:$0 sm:$0xff] }
 0x399   : > { %3606 = vmatmul.mubr.msk.bf16.vlgmr.msra.gmra.mxu0 %vm463_vm0, %v4449_v43  ;;  %3646 = vmatmul.mubr.msk.bf16.vlgmr.msra.gmra.mxu1 %vm463_vm0, %v4449_v43  ;;  %v1007_v26 = vpop.trf.xlu0 }
 0x39a   : > { %v975_v32 = vpop.trf.xlu1  ;;  %3678 = vmatpush3.bf16.msra.mxu0 %v3785_v45 }
 0x39b   : > { %3679 = vmatprep.subr.bf16.mxu0 %v3786_v55 }
 0x39d   : > { %v1008_v36 = vpop.trf.xlu0 }
 0x39e   : > { %v976_v59 = vpop.trf.xlu1  ;;  %3680 = vmatpush3.bf16.msra.mxu0 %v3786_v55  ;;  %v1029_v47 = vpack.c.bf16 %v1008_v36, %v1007_v26 }
 0x39f   : > { %v4461_v61 = vpack.c.bf16 %v976_v59, %v975_v32  ;;  %3681 = vmatprep.subr.bf16.mxu0 %v3787_v57 }
 0x3a1   : > { %3609 = vmatprep.mubr.msk.bf16.mxu0 %vm463_vm0, %v4461_v61  ;;  %3649 = vmatprep.mubr.msk.bf16.mxu1 %vm463_vm0, %v4461_v61  ;;  %v1009_v2 = vpop.trf.xlu0 }
 0x3a2   : > { %v977_v34 = vpop.trf.xlu1  ;;  %3682 = vmatpush3.bf16.msra.mxu0 %v3787_v57 }
 0x3a3   : > { %3683 = vmatprep.subr.bf16.mxu0 %v3788_v62 }
 0x3a5   : > { %v1010_v50 = vpop.trf.xlu0 }
 0x3a6   : > { %v978_v58 = vpop.trf.xlu1  ;;  %3684 = vmatpush3.bf16.msra.mxu0 %v3788_v62  ;;  %v1030_v37 = vpack.c.bf16 %v1010_v50, %v1009_v2 }
 0x3a7   : > { %v1022_v60 = vpack.c.bf16 %v978_v58, %v977_v34 }
 0x3a9   : > { %3610 = vmatmul.mubr.msk.bf16.gmra.mxu0 %vm463_vm0, %v1022_v60  ;;  %3650 = vmatmul.mubr.msk.bf16.gmra.mxu1 %vm463_vm0, %v1022_v60  ;;  %v1011_v15 = vpop.trf.xlu0 }
 0x3aa   : > { %v979_v1 = vpop.trf.xlu1 }
 0x3ad   : > { %v1012_v41 = vpop.trf.xlu0 }
 0x3ae   : > { %v980_v27 = vpop.trf.xlu1  ;;  %v1031_v52 = vpack.c.bf16 %v1012_v41, %v1011_v15 }
 0x3af   : > { %v1023_v25 = vpack.c.bf16 %v980_v27, %v979_v1 }
 0x3b1   : > { %3613 = vmatprep.mubr.msk.bf16.mxu0 %vm463_vm0, %v1023_v25  ;;  %3653 = vmatprep.mubr.msk.bf16.mxu1 %vm463_vm0, %v1023_v25  ;;  %v1013_v49 = vpop.trf.xlu0 }
 0x3b2   : > { %v981_v3 = vpop.trf.xlu1 }
 0x3b5   : > { %v1014_v29 = vpop.trf.xlu0 }
 0x3b6   : > { %v982_v56 = vpop.trf.xlu1  ;;  %v1032_v45 = vpack.c.bf16 %v1014_v29, %v1013_v49 }
 0x3b7   : > { %v1024_v44 = vpack.c.bf16 %v982_v56, %v981_v3 }
 0x3b9   : > { %3614 = vmatmul.mubr.msk.bf16.gmra.mxu0 %vm463_vm0, %v1024_v44  ;;  %3654 = vmatmul.mubr.msk.bf16.gmra.mxu1 %vm463_vm0, %v1024_v44  ;;  %v1015_v48 = vpop.trf.xlu0 }
 0x3ba   : > { %v983_v9 = vpop.trf.xlu1 }
 0x3bd   : > { %v1016_v40 = vpop.trf.xlu0 }
 0x3be   : > { %v984_v28 = vpop.trf.xlu1  ;;  %v1033_v31 = vpack.c.bf16 %v1016_v40, %v1015_v48 }
 0x3bf   : > { %v1025_v33 = vpack.c.bf16 %v984_v28, %v983_v9 }
 0x3c1   : > { %3617 = vmatprep.mubr.msk.bf16.mxu0 %vm463_vm0, %v1025_v33  ;;  %3657 = vmatprep.mubr.msk.bf16.mxu1 %vm463_vm0, %v1025_v33  ;;  %v1017_v53 = vpop.trf.xlu0 }
 0x3c2   : > { %v985_v30 = vpop.trf.xlu1 }
 0x3c5   : > { %v1018_v39 = vpop.trf.xlu0 }
 0x3c6   : > { %v986_v46 = vpop.trf.xlu1  ;;  %v1034_v63 = vpack.c.bf16 %v1018_v39, %v1017_v53 }
 0x3c7   : > { %v1026_v12 = vpack.c.bf16 %v986_v46, %v985_v30 }
 0x3c9   : > { %3618 = vmatmul.mubr.msk.bf16.gmra.mxu0 %vm463_vm0, %v1026_v12  ;;  %3658 = vmatmul.mubr.msk.bf16.gmra.mxu1 %vm463_vm0, %v1026_v12 }
 0x3ca   : > { %3621 = vmatprep.mubr.msk.bf16.mxu0 %vm463_vm0, %v1027_v20  ;;  %3661 = vmatprep.mubr.msk.bf16.mxu1 %vm463_vm0, %v1027_v20 }
 0x3d1   : > { %3622 = vmatmul.mubr.msk.bf16.gmra.mxu0 %vm463_vm0, %v1028_v35  ;;  %3662 = vmatmul.mubr.msk.bf16.gmra.mxu1 %vm463_vm0, %v1028_v35 }
 0x3d2   : > { %3625 = vmatprep.mubr.msk.bf16.mxu0 %vm463_vm0, %v1029_v47  ;;  %3665 = vmatprep.mubr.msk.bf16.mxu1 %vm463_vm0, %v1029_v47 }
 0x3d9   : > { %3626 = vmatmul.mubr.msk.bf16.gmra.mxu0 %vm463_vm0, %v1030_v37  ;;  %3666 = vmatmul.mubr.msk.bf16.gmra.mxu1 %vm463_vm0, %v1030_v37 }
 0x3da   : > { %3629 = vmatprep.mubr.msk.bf16.mxu0 %vm463_vm0, %v1031_v52  ;;  %3669 = vmatprep.mubr.msk.bf16.mxu1 %vm463_vm0, %v1031_v52 }
 0x3e1   : > { %3630 = vmatmul.mubr.msk.bf16.gmra.mxu0 %vm463_vm0, %v1032_v45  ;;  %3670 = vmatmul.mubr.msk.bf16.gmra.mxu1 %vm463_vm0, %v1032_v45 }
 0x3e2   : > { %3633 = vmatprep.mubr.msk.bf16.mxu0 %vm463_vm0, %v1033_v31  ;;  %3673 = vmatprep.mubr.msk.bf16.mxu1 %vm463_vm0, %v1033_v31 }
 0x3e9   : > { %3634 = vmatmul.mubr.msk.bf16.gmra.mxu0 %vm463_vm0, %v1034_v63  ;;  %3674 = vmatmul.mubr.msk.bf16.gmra.mxu1 %vm463_vm0, %v1034_v63 }
 0x3ea   : > { %3685 = vmatprep.mubr.msk.bf16.mxu0 %vm463_vm0, %v4443_v38 }
 0x3f1   : > { %3686 = vmatmul.mubr.msk.bf16.vlgmr.msra.gmra.mxu0 %vm463_vm0, %v4449_v43 }
 0x3f2   : > { %3689 = vmatprep.mubr.msk.bf16.mxu0 %vm463_vm0, %v4461_v61 }
 0x3f9   : > { %3690 = vmatmul.mubr.msk.bf16.gmra.mxu0 %vm463_vm0, %v1022_v60 }
 0x3fa   : > { %3693 = vmatprep.mubr.msk.bf16.mxu0 %vm463_vm0, %v1023_v25 }
 0x401   : > { %3694 = vmatmul.mubr.msk.bf16.gmra.mxu0 %vm463_vm0, %v1024_v44 }
 0x402   : > { %3697 = vmatprep.mubr.msk.bf16.mxu0 %vm463_vm0, %v1025_v33 }
 0x409   : > { %3698 = vmatmul.mubr.msk.bf16.gmra.mxu0 %vm463_vm0, %v1026_v12 }
 0x40a   : > { %3701 = vmatprep.mubr.msk.bf16.mxu0 %vm463_vm0, %v1027_v20 }
 0x411   : > { %3702 = vmatmul.mubr.msk.bf16.gmra.mxu0 %vm463_vm0, %v1028_v35 }
 0x412   : > { %3705 = vmatprep.mubr.msk.bf16.mxu0 %vm463_vm0, %v1029_v47 }
 0x419   : > { %3706 = vmatmul.mubr.msk.bf16.gmra.mxu0 %vm463_vm0, %v1030_v37 }
 0x41a   : > { %3709 = vmatprep.mubr.msk.bf16.mxu0 %vm463_vm0, %v1031_v52 }
 0x421   : > { %3710 = vmatmul.mubr.msk.bf16.gmra.mxu0 %vm463_vm0, %v1032_v45 }
 0x422   : > { %3713 = vmatprep.mubr.msk.bf16.mxu0 %vm463_vm0, %v1033_v31 }
 0x429   : > { %3714 = vmatmul.mubr.msk.bf16.gmra.mxu0 %vm463_vm0, %v1034_v63 }
 0x459   : > { %v3607_v38 = vpop.f32.mrf.mxu0  ;;  %v3647_v8 = vpop.f32.mrf.mxu1 }
 0x45a   : > { %v1165_v57 = vadd.f32 %v3607_v38, %v4518_v51  ;;  %v4529_v42 = vadd.f32 %v3647_v8, %v4523_v54 }
 0x45b   : > { %v1156_v0 = vpop.f32.mrf.mxu0  ;;  %v4525_v43 = vpop.f32.mrf.mxu1 }
 0x45c   : > { %v1157_v34 = vadd.f32 %v4518_v51, %v1156_v0 }
 0x45d   : > { %v3608_v55 = vpop.f32.mrf.mxu0  ;;  %v3648_v32 = vpop.f32.mrf.mxu1 }
 0x45e   : > { %v1168_v59 = vadd.f32 %v3608_v55, %v4518_v51  ;;  %v4533_v61 = vadd.f32 %v3648_v32, %v4523_v54 }
 0x45f   : > { %v1159_v62 = vpop.f32.mrf.mxu0  ;;  %v4545_v1 = vpop.f32.mrf.mxu1 }
 0x460   : > { %v4536_v26 = vpack.c.bf16 %v1168_v59, %v1165_v57  ;;  %v1160_v60 = vadd.f32 %v4518_v51, %v1159_v62 }
 0x462   : > { %v4541_v36 = vpack.c.bf16 %v1160_v60, %v1157_v34 }
 0x464   : > { %3433 = vmatprep.mubr.msk.bf16.mxu1 %vm463_vm0, %v4541_v36 }
 0x469   : > { %v3611_v27 = vpop.f32.mrf.mxu0  ;;  %v3651_v2 = vpop.f32.mrf.mxu1 }
 0x46a   : > { %v1181_v44 = vadd.f32 %v3611_v27, %v4518_v51  ;;  %v4553_v9 = vadd.f32 %v3651_v2, %v4523_v54 }
 0x46b   : > { %v4547_v25 = vpop.f32.mrf.mxu0  ;;  %v4549_v3 = vpop.f32.mrf.mxu1 }
 0x46d   : > { %v3612_v50 = vpop.f32.mrf.mxu0  ;;  %v3652_v56 = vpop.f32.mrf.mxu1 }
 0x46e   : > { %v1184_v15 = vadd.f32 %v3612_v50, %v4518_v51  ;;  %v4557_v28 = vadd.f32 %v3652_v56, %v4523_v54 }
 0x46f   : > { %v4563_v30 = vpop.f32.mrf.mxu0  ;;  %v4565_v46 = vpop.f32.mrf.mxu1 }
 0x470   : > { %v4559_v33 = vpack.c.bf16 %v1184_v15, %v1181_v44 }
 0x479   : > { %v3615_v49 = vpop.f32.mrf.mxu0  ;;  %v4567_v12 = vpop.f32.mrf.mxu1 }
 0x47a   : > { %v1197_v35 = vadd.f32 %v3615_v49, %v4518_v51 }
 0x47b   : > { %v4569_v20 = vpop.f32.mrf.mxu0  ;;  %v4573_v48 = vpop.f32.mrf.mxu1 }
 0x47d   : > { %v3616_v29 = vpop.f32.mrf.mxu0  ;;  %v4577_v52 = vpop.f32.mrf.mxu1 }
 0x47e   : > { %v1200_v47 = vadd.f32 %v3616_v29, %v4518_v51 }
 0x47f   : > { %v4579_v40 = vpop.f32.mrf.mxu0  ;;  %v4581_v53 = vpop.f32.mrf.mxu1 }
 0x480   : > { %v4575_v37 = vpack.c.bf16 %v1200_v47, %v1197_v35 }
 0x489   : > { %v3619_v45 = vpop.f32.mrf.mxu0  ;;  %v3659_v31 = vpop.f32.mrf.mxu1 }
 0x48a   : > { %v1213_v0 = vadd.f32 %v3619_v45, %v4518_v51  ;;  %v1413_v18 = vadd.f32 %v3659_v31, %v4523_v54 }
 0x48b   : > { %v4583_v39 = vpop.f32.mrf.mxu0  ;;  %v4585_v63 = vpop.f32.mrf.mxu1 }
 0x48d   : > { %v3620_v38 = vpop.f32.mrf.mxu0  ;;  %v3660_v8 = vpop.f32.mrf.mxu1 }
 0x48e   : > { %v1216_v55 = vadd.f32 %v3620_v38, %v4518_v51 }
 0x48f   : > { %v4589_v32 = vpop.f32.mrf.mxu0  ;;  %v4591_v57 = vpop.f32.mrf.mxu1 }
 0x490   : > { %v4593_v59 = vpack.c.bf16 %v1216_v55, %v1213_v0 }
 0x491   : > { %v3623_v62 = vpop.f32.mrf.mxu0  ;;  %v3663_v34 = vpop.f32.mrf.mxu1 }
 0x492   : > { %v1229_v56 = vadd.f32 %v3623_v62, %v4518_v51  ;;  %v4597_v44 = vadd.f32 %v3663_v34, %v4523_v54 }
 0x493   : > { %v1220_v60 = vpop.f32.mrf.mxu0  ;;  %v1420_v27 = vpop.f32.mrf.mxu1 }
 0x494   : > { %v1221_v29 = vadd.f32 %v4518_v51, %v1220_v60  ;;  %v4605_v35 = vadd.f32 %v4523_v54, %v1420_v27 }
 0x495   : > { %v3624_v2 = vpop.f32.mrf.mxu0  ;;  %v3664_v50 = vpop.f32.mrf.mxu1 }
 0x496   : > { %v1232_v15 = vadd.f32 %v3624_v2, %v4518_v51  ;;  %v4601_v49 = vadd.f32 %v3664_v50, %v4523_v54 }
 0x497   : > { %v1223_v47 = vpop.f32.mrf.mxu0  ;;  %v1423_v45 = vpop.f32.mrf.mxu1 }
 0x498   : > { %v4607_v38 = vpack.c.bf16 %v1232_v15, %v1229_v56  ;;  %v1224_v55 = vadd.f32 %v4518_v51, %v1223_v47  ;;  %v4613_v62 = vadd.f32 %v4523_v54, %v1423_v45 }
 0x499   : > { %v3627_v34 = vpop.f32.mrf.mxu0  ;;  %v4615_v2 = vpop.f32.mrf.mxu1 }
 0x49a   : > { %v4617_v50 = vpack.c.bf16 %v1224_v55, %v1221_v29  ;;  %v1245_v0 = vadd.f32 %v3627_v34, %v4518_v51 }
 0x49b   : > { %v1236_v27 = vpop.f32.mrf.mxu0  ;;  %v4621_v58 = vpop.f32.mrf.mxu1 }
 0x49c   : > { %v1237_v4 = vadd.f32 %v4518_v51, %v1236_v27 }
 0x49d   : > { %v3628_v56 = vpop.f32.mrf.mxu0  ;;  %v4623_v15 = vpop.f32.mrf.mxu1 }
 0x49e   : > { %v1248_v47 = vadd.f32 %v3628_v56, %v4518_v51 }
 0x49f   : > { %v1239_v45 = vpop.f32.mrf.mxu0  ;;  %v4627_v41 = vpop.f32.mrf.mxu1 }
 0x4a0   : > { %v4630_v29 = vpack.c.bf16 %v1248_v47, %v1245_v0  ;;  %v1240_v55 = vadd.f32 %v4518_v51, %v1239_v45 }
 0x4a1   : > { %v3631_v60 = vpop.f32.mrf.mxu0  ;;  %v3671_v5 = vpop.f32.mrf.mxu1 }
 0x4a2   : > { %v4633_v6 = vpack.c.bf16 %v1240_v55, %v1237_v4  ;;  %v1261_v56 = vadd.f32 %v3631_v60, %v4518_v51  ;;  %v1416_v4 = vadd.f32 %v3660_v8, %v4523_v54 }
 0x4a3   : > { %v1252_v7 = vpop.f32.mrf.mxu0  ;;  %v4635_v10 = vpop.f32.mrf.mxu1 }
 0x4a4   : > { %v1253_v0 = vadd.f32 %v4518_v51, %v1252_v7  ;;  %v1706_v21 = vpack.c.bf16 %v1416_v4, %v1413_v18 }
 0x4a5   : > { %v3632_v11 = vpop.f32.mrf.mxu0  ;;  %v3672_v34 = vpop.f32.mrf.mxu1 }
 0x4a6   : > { %v1264_v13 = vadd.f32 %v3632_v11, %v4518_v51 }
 0x4a7   : > { %v1255_v14 = vpop.f32.mrf.mxu0  ;;  %v1455_v16 = vpop.f32.mrf.mxu1 }
 0x4a8   : > { %v4640_v27 = vpack.c.bf16 %v1264_v13, %v1261_v56  ;;  %v1256_v47 = vadd.f32 %v4518_v51, %v1255_v14 }
 0x4a9   : > { %v3635_v45 = vpop.f32.mrf.mxu0  ;;  %v3675_v55 = vpop.f32.mrf.mxu1 }
 0x4aa   : > { %v4644_v17 = vpack.c.bf16 %v1256_v47, %v1253_v0  ;;  %v1277_v23 = vadd.f32 %v3635_v45, %v4518_v51  ;;  %v1477_v7 = vadd.f32 %v3675_v55, %v4523_v54  ;;  %v1408_v55 = vadd.f32 %v4523_v54, %v4591_v57 }
 0x4ab   : > { %v1268_v19 = vpop.f32.mrf.mxu0  ;;  %v1468_v60 = vpop.f32.mrf.mxu1 }
 0x4ac   : > { %v1269_v8 = vadd.f32 %v4518_v51, %v1268_v19  ;;  %v1469_v56 = vadd.f32 %v4523_v54, %v1468_v60  ;;  %v1785_v19 = vsel %vm463_vm0, %v1706_v21, 0 }
 0x4ad   : > { %v3636_v11 = vpop.f32.mrf.mxu0  ;;  %v3676_v22 = vpop.f32.mrf.mxu1 }
 0x4ae   : > { %v1280_v13 = vadd.f32 %v3636_v11, %v4518_v51  ;;  %v1480_v14 = vadd.f32 %v3676_v22, %v4523_v54 }
 0x4af   : > { %v1271_v0 = vpop.f32.mrf.mxu0  ;;  %v1471_v47 = vpop.f32.mrf.mxu1 }
 0x4b0   : > { %v4653_v31 = vpack.c.bf16 %v1280_v13, %v1277_v23  ;;  %v1714_v24 = vpack.c.bf16 %v1480_v14, %v1477_v7  ;;  %v1272_v18 = vadd.f32 %v4518_v51, %v1271_v0  ;;  %v1472_v4 = vadd.f32 %v4523_v54, %v1471_v47  ;;  %v4666_v23 = vld [vmem:[%s5523_s9] ss:$0 sm:$0xff] }
 0x4b1   : > { %v3687_v45 = vpop.f32.mrf.mxu0  ;;  %v1405_v7 = vadd.f32 %v4523_v54, %v4585_v63  ;;  %v1464_v14 = vadd.f32 %v3672_v34, %v4523_v54  ;;  %v1400_v34 = vadd.f32 %v4577_v52, %v4523_v54 }
 0x4b2   : > { %v4659_v11 = vpack.c.bf16 %v1272_v18, %v1269_v8  ;;  %v1713_v22 = vpack.c.bf16 %v1472_v4, %v1469_v56  ;;  %3757 = vmatprep.subr.msk.bf16.mxu1 %vm463_vm0, %v1714_v24  ;;  %v4673_v24 = vadd.f32 %v3687_v45, %v4666_v23  ;;  %v1461_v56 = vadd.f32 %v3671_v5, %v4523_v54 }
 0x4b3   : > { %v1556_v60 = vpop.f32.mrf.mxu0  ;;  %3418 = vmatpush3.bf16.xpose.msra.mxu1 %v1785_v19  ;;  %v1705_v13 = vpack.c.bf16 %v1408_v55, %v1405_v7  ;;  %v1456_v7 = vadd.f32 %v4523_v54, %v1455_v16 }
 0x4b4   : > { %3758 = vmatprep.subr.msk.bf16.mxu1 %vm463_vm0, %v1713_v22  ;;  %v4680_v0 = vadd.f32 %v4666_v23, %v1556_v60  ;;  %v1712_v4 = vpack.c.bf16 %v1464_v14, %v1461_v56  ;;  %v1397_v22 = vadd.f32 %v4567_v12, %v4523_v54 }
 0x4b5   : > { %v3688_v57 = vpop.f32.mrf.mxu0  ;;  %v1782_v55 = vsel %vm463_vm0, %v1705_v13, 0  ;;  %v1453_v13 = vadd.f32 %v4523_v54, %v4635_v10 }
 0x4b6   : > { %v4676_v21 = vadd.f32 %v3688_v57, %v4666_v23  ;;  %v1704_v60 = vpack.c.bf16 %v1400_v34, %v1397_v22 }
 0x4b7   : > { %v1559_v8 = vpop.f32.mrf.mxu0  ;;  %v1711_v34 = vpack.c.bf16 %v1456_v7, %v1453_v13 }
 0x4b8   : > { %v4685_v47 = vadd.f32 %v4666_v23, %v1559_v8  ;;  %v1779_v10 = vsel %vm463_vm0, %v1704_v60, 0 }
 0x4b9   : > { %v3691_v18 = vpop.f32.mrf.mxu0 }
 0x4ba   : > { %v4697_v57 = vadd.f32 %v3691_v18, %v4666_v23  ;;  %v1392_v18 = vadd.f32 %v4523_v54, %v4581_v53  ;;  %v1448_v53 = vadd.f32 %v4623_v15, %v4523_v54  ;;  %v1437_v15 = vadd.f32 %v4523_v54, %v4621_v58 }
 0x4bb   : > { %v1572_v5 = vpop.f32.mrf.mxu0  ;;  %3420 = vmatpush3.bf16.xpose.msra.mxu1 %v1782_v55 }
 0x4bc   : > { %3759 = vmatprep.subr.msk.bf16.mxu1 %vm463_vm0, %v1712_v4  ;;  %v4705_v8 = vadd.f32 %v4666_v23, %v1572_v5  ;;  %v1389_v5 = vadd.f32 %v4523_v54, %v4573_v48 }
 0x4bd   : > { %v3692_v19 = vpop.f32.mrf.mxu0 }
 0x4be   : > { %v4700_v52 = vadd.f32 %v3692_v19, %v4666_v23  ;;  %v1703_v19 = vpack.c.bf16 %v1392_v18, %v1389_v5  ;;  %v1440_v18 = vadd.f32 %v4523_v54, %v4627_v41  ;;  %v1373_v41 = vadd.f32 %v4523_v54, %v4549_v3 }
 0x4bf   : > { %v1575_v14 = vpop.f32.mrf.mxu0 }
 0x4c0   : > { %v4710_v56 = vadd.f32 %v4666_v23, %v1575_v14  ;;  %v1445_v14 = vadd.f32 %v4615_v2, %v4523_v54  ;;  %v1376_v2 = vadd.f32 %v4523_v54, %v4565_v46 }
 0x4c1   : > { %v4712_v16 = vpop.f32.mrf.mxu0 }
 0x4c2   : > { %v1710_v13 = vpack.c.bf16 %v1448_v53, %v1445_v14  ;;  %v1709_v53 = vpack.c.bf16 %v1440_v18, %v1437_v15 }
 0x4c3   : > { %v4719_v55 = vpop.f32.mrf.mxu0  ;;  %3422 = vmatpush3.bf16.xpose.msra.mxu1 %v1779_v10  ;;  %v1776_v10 = vsel %vm463_vm0, %v1703_v19, 0  ;;  %v5575_v19 = vpack.c.bf16 %v4557_v28, %v4553_v9  ;;  %v5576_v9 = vpack.c.bf16 %v4601_v49, %v4597_v44  ;;  %v5578_v44 = vpack.c.bf16 %v4613_v62, %v4605_v35 }
 0x4c4   : > { %3760 = vmatprep.subr.msk.bf16.mxu1 %vm463_vm0, %v1711_v34 }
 0x4c5   : > { %v4724_v22 = vpop.f32.mrf.mxu0  ;;  %v1773_v14 = vsel %vm463_vm0, %v5575_v19, 0 }
 0x4c7   : > { %v4728_v7 = vpop.f32.mrf.mxu0 }
 0x4c9   : > { %v3699_v60 = vpop.f32.mrf.mxu0 }
 0x4cb   : > { %v1604_v45 = vpop.f32.mrf.mxu0  ;;  %3424 = vmatpush3.bf16.xpose.msra.mxu1 %v1776_v10  ;;  %v1701_v10 = vpack.c.bf16 %v1376_v2, %v1373_v41  ;;  %v5577_v2 = vpack.c.bf16 %v4533_v61, %v4529_v42 }
 0x4cc   : > { %3761 = vmatprep.subr.msk.bf16.mxu1 %vm463_vm0, %v1710_v13 }
 0x4cd   : > { %v3700_v48 = vpop.f32.mrf.mxu0  ;;  %v1770_v18 = vsel %vm463_vm0, %v1701_v10, 0  ;;  %v1357_v10 = vadd.f32 %v4523_v54, %v4525_v43  ;;  %v1613_v43 = vadd.f32 %v3699_v60, %v4666_v23  ;;  %v1176_v60 = vadd.f32 %v4518_v51, %v4563_v30 }
 0x4ce   : > { %v1616_v42 = vadd.f32 %v3700_v48, %v4666_v23  ;;  %v1600_v48 = vadd.f32 %v4724_v22, %v4666_v23  ;;  %v1592_v30 = vadd.f32 %v4666_v23, %v4728_v7 }
 0x4cf   : > { %v1607_v34 = vpop.f32.mrf.mxu0 }
 0x4d1   : > { %v4738_v5 = vpop.f32.mrf.mxu0 }
 0x4d3   : > { %v4746_v13 = vpop.f32.mrf.mxu0  ;;  %3426 = vmatpush3.bf16.xpose.msra.mxu1 %v1773_v14  ;;  %v1767_v14 = vsel %vm463_vm0, %v5577_v2, 0 }
 0x4d4   : > { %3762 = vmatprep.subr.msk.bf16.mxu1 %vm463_vm0, %v1709_v53  ;;  %v1360_v53 = vadd.f32 %v4523_v54, %v4545_v1 }
 0x4d5   : > { %v4751_v58 = vpop.f32.mrf.mxu0 }
 0x4d7   : > { %v4753_v63 = vpop.f32.mrf.mxu0 }
 0x4d9   : > { %v3707_v46 = vpop.f32.mrf.mxu0 }
 0x4db   : > { %v4756_v15 = vpop.f32.mrf.mxu0  ;;  %3428 = vmatpush3.bf16.xpose.msra.mxu1 %v1770_v18  ;;  %v1699_v18 = vpack.c.bf16 %v1360_v53, %v1357_v10  ;;  %v2587_v10 = vpack.c.bf16 %v1616_v42, %v1613_v43  ;;  %v1597_v42 = vadd.f32 %v4712_v16, %v4666_v23  ;;  %v1645_v16 = vadd.f32 %v3707_v46, %v4666_v23 }
 0x4dc   : > { %3763 = vmatprep.subr.msk.bf16.mxu1 %vm463_vm0, %v5576_v9  ;;  %v1637_v7 = vadd.f32 %v4666_v23, %v4756_v15  ;;  %v1629_v46 = vadd.f32 %v4738_v5, %v4666_v23  ;;  %v1192_v15 = vadd.f32 %v4518_v51, %v4579_v40  ;;  %v5581_v40 = vpack.c.bf16 %v4676_v21, %v4673_v24 }
 0x4dd   : > { %v3708_v28 = vpop.f32.mrf.mxu0  ;;  %v1764_v1 = vsel %vm463_vm0, %v1699_v18, 0 }
 0x4de   : > { %v1648_v22 = vadd.f32 %v3708_v28, %v4666_v23 }
 0x4df   : > { %v1639_v3 = vpop.f32.mrf.mxu0 }
 0x4e0   : > { %v1640_v43 = vadd.f32 %v4666_v23, %v1639_v3 }
 0x4e1   : > { %v3711_v19 = vpop.f32.mrf.mxu0 }
 0x4e2   : > { %v2590_v28 = vpack.c.bf16 %v1640_v43, %v1637_v7 }
 0x4e3   : > { %v1652_v41 = vpop.f32.mrf.mxu0  ;;  %3430 = vmatpush3.bf16.xpose.msra.mxu1 %v1767_v14 }
 0x4e4   : > { %3764 = vmatprep.subr.msk.bf16.mxu1 %vm463_vm0, %v5578_v44  ;;  %v1608_v44 = vadd.f32 %v4666_v23, %v1607_v34 }
 0x4e5   : > { %v3712_v49 = vpop.f32.mrf.mxu0 }
 0x4e6   : > { %v1664_v18 = vadd.f32 %v3712_v49, %v4666_v23 }
 0x4e7   : > { %v1655_v9 = vpop.f32.mrf.mxu0 }
 0x4e9   : > { %v3715_v4 = vpop.f32.mrf.mxu0 }
 0x4ea   : > { %v1677_v2 = vadd.f32 %v3715_v4, %v4666_v23  ;;  %v1605_v4 = vadd.f32 %v4666_v23, %v1604_v45  ;;  %v1173_v45 = vadd.f32 %v4518_v51, %v4547_v25  ;;  %v1589_v25 = vadd.f32 %v4666_v23, %v4719_v55 }
 0x4eb   : > { %v1668_v12 = vpop.f32.mrf.mxu0  ;;  %3432 = vmatpush3.bf16.xpose.msra.mxu1 %v1764_v1  ;;  %v5579_v55 = vpack.c.bf16 %v4700_v52, %v4697_v57  ;;  %v1621_v57 = vadd.f32 %v4666_v23, %v4746_v13 }
 0x4ec   : > { %v1669_v62 = vadd.f32 %v4666_v23, %v1668_v12  ;;  %v1661_v12 = vadd.f32 %v3711_v19, %v4666_v23  ;;  %v2586_v34 = vpack.c.bf16 %v1608_v44, %v1605_v4  ;;  %v1653_v19 = vadd.f32 %v4666_v23, %v1652_v41 }
 0x4ed   : > { %v3716_v61 = vpop.f32.mrf.mxu0  ;;  %v2584_v41 = vpack.c.bf16 %v1592_v30, %v1589_v25 }
 0x4ee   : > { %v1680_v54 = vadd.f32 %v3716_v61, %v4666_v23  ;;  %v2593_v49 = vpack.c.bf16 %v1664_v18, %v1661_v12  ;;  %v1685_v61 = vpack.c.bf16 %v1176_v60, %v1173_v45 }
 0x4ef   : > { %v1671_v35 = vpop.f32.mrf.mxu0 }
 0x4f0   : > { %v2595_v14 = vpack.c.bf16 %v1680_v54, %v1677_v2  ;;  %v1672_v53 = vadd.f32 %v4666_v23, %v1671_v35  ;;  %v2585_v2 = vpack.c.bf16 %v1600_v48, %v1597_v42  ;;  %v1189_v35 = vadd.f32 %v4518_v51, %v4569_v20 }
 0x4f1   : > { %v5582_v20 = vpack.c.bf16 %v4685_v47, %v4680_v0 }
 0x4f2   : > { %v2594_v1 = vpack.c.bf16 %v1672_v53, %v1669_v62  ;;  %3434 = vmatmul.mubr.msk.bf16.vlgmr.msra.gmra.mxu1 %vm463_vm0, %v4541_v36  ;;  %3465 = vmatprep.subr.bf16.mxu0 %v2595_v14  ;;  %v1656_v36 = vadd.f32 %v4666_v23, %v1655_v9  ;;  %v2591_v9 = vpack.c.bf16 %v1648_v22, %v1645_v16 }
 0x4f3   : > { %3435 = vmatprep.mubr.msk.bf16.mxu1 %vm463_vm0, %v4536_v26  ;;  %3466 = vmatpush3.bf16.msra.mxu0 %v2587_v10  ;;  %v5580_v62 = vpack.c.bf16 %v4710_v56, %v4705_v8  ;;  %v1687_v52 = vpack.c.bf16 %v1192_v15, %v1189_v35 }
 0x4f4   : > { %3467 = vmatprep.subr.bf16.mxu0 %v2594_v1  ;;  %v2592_v54 = vpack.c.bf16 %v1656_v36, %v1653_v19 }
 0x4f7   : > { %3468 = vmatpush3.bf16.msra.mxu0 %v2586_v34 }
 0x4f8   : > { %3469 = vmatprep.subr.bf16.mxu0 %v2593_v49 }
 0x4fa   : > { %3436 = vmatmul.mubr.msk.bf16.gmra.mxu1 %vm463_vm0, %v4536_v26  ;;  %v1632_v26 = vadd.f32 %v4751_v58, %v4666_v23  ;;  %v1624_v58 = vadd.f32 %v4666_v23, %v4753_v63  ;;  %v1208_v23 = vadd.f32 %v4518_v51, %v4589_v32 }
 0x4fb   : > { %3437 = vmatprep.mubr.msk.bf16.mxu1 %vm463_vm0, %v1685_v61  ;;  %3470 = vmatpush3.bf16.msra.mxu0 %v2585_v2 }
 0x4fc   : > { %3471 = vmatprep.subr.bf16.mxu0 %v2592_v54  ;;  %v2589_v3 = vpack.c.bf16 %v1632_v26, %v1629_v46  ;;  %v2588_v5 = vpack.c.bf16 %v1624_v58, %v1621_v57 }
 0x4ff   : > { %3472 = vmatpush3.bf16.msra.mxu0 %v2584_v41 }
 0x500   : > { %3473 = vmatprep.subr.bf16.mxu0 %v2591_v9 }
 0x502   : > { %3438 = vmatmul.mubr.msk.bf16.gmra.mxu1 %vm463_vm0, %v1685_v61 }
 0x503   : > { %3439 = vmatprep.mubr.msk.bf16.mxu1 %vm463_vm0, %v4559_v33  ;;  %3474 = vmatpush3.bf16.msra.mxu0 %v5579_v55 }
 0x504   : > { %3475 = vmatprep.subr.bf16.mxu0 %v2590_v28 }
 0x507   : > { %3476 = vmatpush3.bf16.msra.mxu0 %v5580_v62 }
 0x508   : > { %3477 = vmatprep.subr.bf16.mxu0 %v2589_v3 }
 0x50a   : > { %3440 = vmatmul.mubr.msk.bf16.gmra.mxu1 %vm463_vm0, %v4559_v33  ;;  %v1205_v33 = vadd.f32 %v4518_v51, %v4583_v39 }
 0x50b   : > { %3441 = vmatprep.mubr.msk.bf16.mxu1 %vm463_vm0, %v1687_v52  ;;  %3478 = vmatpush3.bf16.msra.mxu0 %v5581_v40 }
 0x50c   : > { %3479 = vmatprep.subr.bf16.mxu0 %v2588_v5  ;;  %v1689_v63 = vpack.c.bf16 %v1208_v23, %v1205_v33 }
 0x50f   : > { %3480 = vmatpush3.bf16.msra.mxu0 %v5582_v20 }
 0x512   : > { %3442 = vmatmul.mubr.msk.bf16.gmra.mxu1 %vm463_vm0, %v1687_v52 }
 0x513   : > { %3443 = vmatprep.mubr.msk.bf16.mxu1 %vm463_vm0, %v4575_v37 }
 0x51a   : > { %3444 = vmatmul.mubr.msk.bf16.gmra.mxu1 %vm463_vm0, %v4575_v37 }
 0x51b   : > { %3445 = vmatprep.mubr.msk.bf16.mxu1 %vm463_vm0, %v1689_v63 }
 0x522   : > { %3446 = vmatmul.mubr.msk.bf16.gmra.mxu1 %vm463_vm0, %v1689_v63 }
 0x523   : > { %3447 = vmatprep.mubr.msk.bf16.mxu1 %vm463_vm0, %v4593_v59 }
 0x52a   : > { %3448 = vmatmul.mubr.msk.bf16.gmra.mxu1 %vm463_vm0, %v4593_v59 }
 0x52b   : > { %3449 = vmatprep.mubr.msk.bf16.mxu1 %vm463_vm0, %v4617_v50 }
 0x532   : > { %3450 = vmatmul.mubr.msk.bf16.gmra.mxu1 %vm463_vm0, %v4617_v50 }
 0x533   : > { %3451 = vmatprep.mubr.msk.bf16.mxu1 %vm463_vm0, %v4607_v38 }
 0x53a   : > { %3452 = vmatmul.mubr.msk.bf16.gmra.mxu1 %vm463_vm0, %v4607_v38 }
 0x53b   : > { %3453 = vmatprep.mubr.msk.bf16.mxu1 %vm463_vm0, %v4633_v6 }
 0x542   : > { %3454 = vmatmul.mubr.msk.bf16.gmra.mxu1 %vm463_vm0, %v4633_v6 }
 0x543   : > { %3455 = vmatprep.mubr.msk.bf16.mxu1 %vm463_vm0, %v4630_v29 }
 0x54a   : > { %3456 = vmatmul.mubr.msk.bf16.gmra.mxu1 %vm463_vm0, %v4630_v29 }
 0x54b   : > { %3457 = vmatprep.mubr.msk.bf16.mxu1 %vm463_vm0, %v4644_v17 }
 0x552   : > { %3458 = vmatmul.mubr.msk.bf16.gmra.mxu1 %vm463_vm0, %v4644_v17 }
 0x553   : > { %3459 = vmatprep.mubr.msk.bf16.mxu1 %vm463_vm0, %v4640_v27 }
 0x55a   : > { %3460 = vmatmul.mubr.msk.bf16.gmra.mxu1 %vm463_vm0, %v4640_v27 }
 0x55b   : > { %3461 = vmatprep.mubr.msk.bf16.mxu1 %vm463_vm0, %v4659_v11 }
 0x562   : > { %3462 = vmatmul.mubr.msk.bf16.gmra.mxu1 %vm463_vm0, %v4659_v11 }
 0x563   : > { %3463 = vmatprep.mubr.msk.bf16.mxu1 %vm463_vm0, %v4653_v31 }
 0x56a   : > { %3464 = vmatmul.mubr.msk.bf16.gmra.mxu1 %vm463_vm0, %v4653_v31 }
 0x5b2   : > { %v1845_v6 = vpop.f32.mrf.mxu1 }
 0x5b3   : > { %v4888_v51 = vmul.f32 0.125, %v1845_v6 }
 0x5b4   : > { %v1847_v17 = vpop.f32.mrf.mxu1 }
 0x5b5   : > { %v4890_v37 = vmul.f32 0.125, %v1847_v17 }
 0x5b6   : > { %v1849_v39 = vpop.f32.mrf.mxu1 }
 0x5b7   : > { %v2068_v32 = vmax.f32 %v4888_v51, %v4890_v37  ;;  %v4894_v38 = vmul.f32 0.125, %v1849_v39 }
 0x5b8   : > { %v1851_v59 = vpop.f32.mrf.mxu1 }
 0x5b9   : > { %v4896_v50 = vmul.f32 0.125, %v1851_v59  ;;  %2069 = vmax.xlane.f32.xlu0 %v2068_v32 }
 0x5ba   : > { %v1855_v29 = vpop.f32.mrf.mxu1 }
 0x5bb   : > { %v2071_v27 = vmax.f32 %v4894_v38, %v4896_v50  ;;  %v4900_v11 = vmul.f32 0.125, %v1855_v29 }
 0x5bc   : > { %v1857_v31 = vpop.f32.mrf.mxu1 }
 0x5bd   : > { %v4902_v24 = vmul.f32 0.125, %v1857_v31  ;;  %2072 = vmax.xlane.f32.xlu1 %v2071_v27 }
 0x5be   : > { %v1859_v21 = vpop.f32.mrf.mxu1 }
 0x5bf   : > { %v2074_v0 = vmax.f32 %v4900_v11, %v4902_v24  ;;  %v4906_v8 = vmul.f32 0.125, %v1859_v21 }
 0x5c0   : > { %v1861_v47 = vpop.f32.mrf.mxu1 }
 0x5c1   : > { %v4908_v56 = vmul.f32 0.125, %v1861_v47  ;;  %2075 = vmax.xlane.f32.xlu0 %v2074_v0 }
 0x5c2   : > { %v1865_v13 = vpop.f32.mrf.mxu1 }
 0x5c3   : > { %v2077_v14 = vmax.f32 %v4906_v8, %v4908_v56  ;;  %v4912_v10 = vmul.f32 0.125, %v1865_v13 }
 0x5c4   : > { %v1867_v53 = vpop.f32.mrf.mxu1 }
 0x5c5   : > { %v4914_v44 = vmul.f32 0.125, %v1867_v53  ;;  %2078 = vmax.xlane.f32.xlu1 %v2077_v14 }
 0x5c6   : > { %v1869_v18 = vpop.f32.mrf.mxu1 }
 0x5c7   : > { %v2080_v1 = vmax.f32 %v4912_v10, %v4914_v44  ;;  %v4918_v12 = vmul.f32 0.125, %v1869_v18 }
 0x5c8   : > { %v1871_v4 = vpop.f32.mrf.mxu1 }
 0x5c9   : > { %v4920_v60 = vmul.f32 0.125, %v1871_v4  ;;  %2081 = vmax.xlane.f32.xlu0 %v2080_v1 }
 0x5ca   : > { %v1875_v48 = vpop.f32.mrf.mxu1 }
 0x5cb   : > { %v2083_v34 = vmax.f32 %v4918_v12, %v4920_v60  ;;  %v4924_v36 = vmul.f32 0.125, %v1875_v48 }
 0x5cc   : > { %v1877_v49 = vpop.f32.mrf.mxu1 }
 0x5cd   : > { %v4926_v45 = vmul.f32 0.125, %v1877_v49  ;;  %2084 = vmax.xlane.f32.xlu1 %v2083_v34 }
 0x5ce   : > { %v1879_v42 = vpop.f32.mrf.mxu1 }
 0x5cf   : > { %v2086_v19 = vmax.f32 %v4924_v36, %v4926_v45  ;;  %v4930_v2 = vmul.f32 0.125, %v1879_v42 }
 0x5d0   : > { %v1881_v61 = vpop.f32.mrf.mxu1 }
 0x5d1   : > { %v4932_v30 = vmul.f32 0.125, %v1881_v61  ;;  %2087 = vmax.xlane.f32.xlu0 %v2086_v19 }
 0x5d2   : > { %v1885_v22 = vpop.f32.mrf.mxu1 }
 0x5d3   : > { %v2089_v54 = vmax.f32 %v4930_v2, %v4932_v30  ;;  %v4936_v16 = vmul.f32 0.125, %v1885_v22 }
 0x5d4   : > { %v1887_v25 = vpop.f32.mrf.mxu1 }
 0x5d5   : > { %v4938_v41 = vmul.f32 0.125, %v1887_v25  ;;  %2090 = vmax.xlane.f32.xlu1 %v2089_v54 }
 0x5d6   : > { %v1889_v9 = vpop.f32.mrf.mxu1 }
 0x5d7   : > { %v2092_v43 = vmax.f32 %v4936_v16, %v4938_v41  ;;  %v4942_v26 = vmul.f32 0.125, %v1889_v9 }
 0x5d8   : > { %v1891_v7 = vpop.f32.mrf.mxu1 }
 0x5d9   : > { %v4944_v28 = vmul.f32 0.125, %v1891_v7  ;;  %2093 = vmax.xlane.f32.xlu0 %v2092_v43 }
 0x5da   : > { %v1895_v55 = vpop.f32.mrf.mxu1 }
 0x5db   : > { %v2095_v46 = vmax.f32 %v4942_v26, %v4944_v28  ;;  %v4948_v3 = vmul.f32 0.125, %v1895_v55 }
 0x5dc   : > { %v1897_v15 = vpop.f32.mrf.mxu1 }
 0x5dd   : > { %v4950_v58 = vmul.f32 0.125, %v1897_v15  ;;  %2096 = vmax.xlane.f32.xlu1 %v2095_v46 }
 0x5de   : > { %v1899_v35 = vpop.f32.mrf.mxu1 }
 0x5df   : > { %v2098_v62 = vmax.f32 %v4948_v3, %v4950_v58  ;;  %v4954_v52 = vmul.f32 0.125, %v1899_v35 }
 0x5e0   : > { %v1901_v57 = vpop.f32.mrf.mxu1 }
 0x5e1   : > { %v4956_v5 = vmul.f32 0.125, %v1901_v57  ;;  %2099 = vmax.xlane.f32.xlu0 %v2098_v62 }
 0x5e2   : > { %v1905_v40 = vpop.f32.mrf.mxu1 }
 0x5e3   : > { %v2101_v20 = vmax.f32 %v4954_v52, %v4956_v5  ;;  %v4960_v33 = vmul.f32 0.125, %v1905_v40 }
 0x5e4   : > { %v1907_v23 = vpop.f32.mrf.mxu1 }
 0x5e5   : > { %v4962_v63 = vmul.f32 0.125, %v1907_v23  ;;  %2102 = vmax.xlane.f32.xlu1 %v2101_v20 }
 0x5e6   : > { %v1909_v6 = vpop.f32.mrf.mxu1 }
 0x5e7   : > { %v2104_v17 = vmax.f32 %v4960_v33, %v4962_v63  ;;  %v4966_v32 = vmul.f32 0.125, %v1909_v6 }
 0x5e8   : > { %v1911_v39 = vpop.f32.mrf.mxu1 }
 0x5e9   : > { %v4968_v59 = vmul.f32 0.125, %v1911_v39  ;;  %2105 = vmax.xlane.f32.xlu0 %v2104_v17 }
 0x5ea   : > { %v1915_v29 = vpop.f32.mrf.mxu1 }
 0x5eb   : > { %v2107_v27 = vmax.f32 %v4966_v32, %v4968_v59  ;;  %v4972_v21 = vmul.f32 0.125, %v1915_v29 }
 0x5ec   : > { %v1917_v31 = vpop.f32.mrf.mxu1 }
 0x5ed   : > { %v4974_v0 = vmul.f32 0.125, %v1917_v31  ;;  %2108 = vmax.xlane.f32.xlu1 %v2107_v27 }
 0x5ee   : > { %v1919_v47 = vpop.f32.mrf.mxu1 }
 0x5ef   : > { %v2110_v13 = vmax.f32 %v4972_v21, %v4974_v0  ;;  %v4978_v53 = vmul.f32 0.125, %v1919_v47 }
 0x5f0   : > { %v1921_v14 = vpop.f32.mrf.mxu1 }
 0x5f1   : > { %v4980_v18 = vmul.f32 0.125, %v1921_v14  ;;  %2111 = vmax.xlane.f32.xlu0 %v2110_v13 }
 0x5f2   : > { %v1925_v1 = vpop.f32.mrf.mxu1 }
 0x5f3   : > { %v2113_v4 = vmax.f32 %v4978_v53, %v4980_v18  ;;  %v4984_v34 = vmul.f32 0.125, %v1925_v1 }
 0x5f4   : > { %v1927_v48 = vpop.f32.mrf.mxu1 }
 0x5f5   : > { %v4986_v49 = vmul.f32 0.125, %v1927_v48  ;;  %2114 = vmax.xlane.f32.xlu1 %v2113_v4 }
 0x5f6   : > { %v1929_v42 = vpop.f32.mrf.mxu1 }
 0x5f7   : > { %v2116_v19 = vmax.f32 %v4984_v34, %v4986_v49  ;;  %v4990_v22 = vmul.f32 0.125, %v1929_v42 }
 0x5f8   : > { %v1931_v61 = vpop.f32.mrf.mxu1 }
 0x5f9   : > { %v4992_v54 = vmul.f32 0.125, %v1931_v61  ;;  %2117 = vmax.xlane.f32.xlu0 %v2116_v19 }
 0x5fa   : > { %v1935_v25 = vpop.f32.mrf.mxu1 }
 0x5fb   : > { %v2119_v9 = vmax.f32 %v4990_v22, %v4992_v54  ;;  %v4996_v7 = vmul.f32 0.125, %v1935_v25 }
 0x5fc   : > { %v1937_v43 = vpop.f32.mrf.mxu1 }
 0x5fd   : > { %v4998_v55 = vmul.f32 0.125, %v1937_v43  ;;  %2120 = vmax.xlane.f32.xlu1 %v2119_v9 }
 0x5fe   : > { %v1939_v46 = vpop.f32.mrf.mxu1 }
 0x5ff   : > { %v2122_v15 = vmax.f32 %v4996_v7, %v4998_v55  ;;  %v5002_v62 = vmul.f32 0.125, %v1939_v46 }
 0x600   : > { %v1941_v35 = vpop.f32.mrf.mxu1 }
 0x601   : > { %v5004_v57 = vmul.f32 0.125, %v1941_v35  ;;  %2123 = vmax.xlane.f32.xlu0 %v2122_v15 }
 0x602   : > { %v1945_v40 = vpop.f32.mrf.mxu1 }
 0x603   : > { %v2125_v20 = vmax.f32 %v5002_v62, %v5004_v57  ;;  %v5008_v6 = vmul.f32 0.125, %v1945_v40 }
 0x604   : > { %v1947_v23 = vpop.f32.mrf.mxu1 }
 0x605   : > { %v5010_v17 = vmul.f32 0.125, %v1947_v23  ;;  %2126 = vmax.xlane.f32.xlu1 %v2125_v20 }
 0x606   : > { %v1949_v39 = vpop.f32.mrf.mxu1 }
 0x607   : > { %v2128_v29 = vmax.f32 %v5008_v6, %v5010_v17  ;;  %v5014_v31 = vmul.f32 0.125, %v1949_v39 }
 0x608   : > { %v1951_v27 = vpop.f32.mrf.mxu1 }
 0x609   : > { %v5016_v47 = vmul.f32 0.125, %v1951_v27  ;;  %2129 = vmax.xlane.f32.xlu0 %v2128_v29 }
 0x60a   : > { %v1955_v13 = vpop.f32.mrf.mxu1 }
 0x60b   : > { %v2131_v14 = vmax.f32 %v5014_v31, %v5016_v47  ;;  %v5020_v4 = vmul.f32 0.125, %v1955_v13 }
 0x60c   : > { %v1957_v1 = vpop.f32.mrf.mxu1 }
 0x60d   : > { %v5022_v48 = vmul.f32 0.125, %v1957_v1  ;;  %2132 = vmax.xlane.f32.xlu1 %v2131_v14 }
 0x60e   : > { %v1959_v42 = vpop.f32.mrf.mxu1 }
 0x60f   : > { %v2134_v19 = vmax.f32 %v5020_v4, %v5022_v48  ;;  %v5026_v25 = vmul.f32 0.125, %v1959_v42 }
 0x610   : > { %v1961_v61 = vpop.f32.mrf.mxu1 }
 0x611   : > { %5583 = vst [vmem:[#allocation18_spill] sm:$0xff] %v5026_v25  ;;  %v5028_v9 = vmul.f32 0.125, %v1961_v61  ;;  %2135 = vmax.xlane.f32.xlu0 %v2134_v19 }
 0x612   : > { %v1965_v46 = vpop.f32.mrf.mxu1 }
 0x613   : > { %5584 = vst [vmem:[#allocation19_spill] sm:$0xff] %v5028_v9  ;;  %v2137_v43 = vmax.f32 %v5026_v25, %v5028_v9 }
 0x614   : > { %v1967_v15 = vpop.f32.mrf.mxu1 }
 0x615   : > { %2138 = vmax.xlane.f32.xlu1 %v2137_v43 }
 0x616   : > { %v5032_v35 = vpop.f32.mrf.mxu1 }
 0x618   : > { %v1971_v40 = vpop.f32.mrf.mxu1 }
 0x61a   : > { %v5034_v23 = vpop.f32.mrf.mxu1 }
 0x61c   : > { %v1977_v1 = vpop.f32.mrf.mxu1 }
 0x61e   : > { %v5040_v25 = vpop.f32.mrf.mxu1 }
 0x642   : > { %v2070_v20 = vpop.xlane.xlu0 %2069 }
 0x643   : > { %v2164_v39 = vsub.f32 %v4888_v51, %v2070_v20  ;;  %v2165_v29 = vsub.f32 %v4890_v37, %v2070_v20 }
 0x645   : > { %v2228_v27 = vmul.f32 1.442695, %v2164_v39  ;;  %v2230_v13 = vmul.f32 1.442695, %v2165_v29 }
 0x646   : > { %v2073_v14 = vpop.xlane.xlu1 %2072 }
 0x647   : > { %3809 = vpow2.f32 %v2228_v27  ;;  %v2166_v42 = vsub.f32 %v4894_v38, %v2073_v14  ;;  %v2167_v19 = vsub.f32 %v4896_v50, %v2073_v14  ;;  %v1981_v27 = vpop.f32.mrf.mxu1 }
 0x648   : > { %3811 = vpow2.f32 %v2230_v13 }
 0x649   : > { %v2232_v61 = vmul.f32 1.442695, %v2166_v42  ;;  %v2234_v43 = vmul.f32 1.442695, %v2167_v19  ;;  %v5046_v19 = vpop.f32.mrf.mxu1 }
 0x64a   : > { %v2076_v9 = vpop.xlane.xlu0 %2075 }
 0x64b   : > { %3813 = vpow2.f32 %v2232_v61  ;;  %v2168_v51 = vsub.f32 %v4900_v11, %v2076_v9  ;;  %v2169_v37 = vsub.f32 %v4902_v24, %v2076_v9 }
 0x64c   : > { %3815 = vpow2.f32 %v2234_v43 }
 0x64d   : > { %v2236_v20 = vmul.f32 1.442695, %v2168_v51  ;;  %v2238_v39 = vmul.f32 1.442695, %v2169_v37  ;;  %v5054_v51 = vmul.f32 0.125, %v1967_v15 }
 0x64e   : > { %v2079_v29 = vpop.xlane.xlu1 %2078 }
 0x64f   : > { %3817 = vpow2.f32 %v2236_v20  ;;  %v2170_v38 = vsub.f32 %v4906_v8, %v2079_v29  ;;  %v2171_v50 = vsub.f32 %v4908_v56, %v2079_v29  ;;  %v1987_v20 = vpop.f32.mrf.mxu1  ;;  %v5062_v29 = vmul.f32 0.125, %v1965_v46 }
 0x650   : > { %3819 = vpow2.f32 %v2238_v39 }
 0x651   : > { %v2240_v13 = vmul.f32 1.442695, %v2170_v38  ;;  %v2242_v14 = vmul.f32 1.442695, %v2171_v50 }
 0x652   : > { %v2082_v42 = vpop.xlane.xlu0 %2081 }
 0x653   : > { %3821 = vpow2.f32 %v2240_v13  ;;  %v2172_v11 = vsub.f32 %v4912_v10, %v2082_v42  ;;  %v2173_v24 = vsub.f32 %v4914_v44, %v2082_v42  ;;  %v5066_v13 = vmul.f32 0.125, %v1971_v40 }
 0x654   : > { %v5050_v9 = vpop.eup %3809  ;;  %3823 = vpow2.f32 %v2242_v14 }
 0x655   : > { %v5052_v61 = vpop.eup %3811  ;;  %v2244_v43 = vmul.f32 1.442695, %v2172_v11  ;;  %v2246_v8 = vmul.f32 1.442695, %v2173_v24 }
 0x656   : > { %v2085_v56 = vpop.xlane.xlu1 %2084  ;;  %v2356_v37 = vadd.f32 %v5052_v61, %v5050_v9 }
 0x657   : > { %3825 = vpow2.f32 %v2244_v43  ;;  %v2174_v39 = vsub.f32 %v4918_v12, %v2085_v56  ;;  %v2175_v10 = vsub.f32 %v4920_v60, %v2085_v56  ;;  %v2140_v12 = vmax.f32 %v5062_v29, %v5054_v51  ;;  %v5072_v60 = vpop.f32.mrf.mxu1 }
 0x658   : > { %v5060_v44 = vpop.eup %3813  ;;  %3827 = vpow2.f32 %v2246_v8  ;;  %2357 = vadd.xlane.f32.xlu0 %v2356_v37  ;;  %v5079_v43 = vmul.f32 0.125, %v5032_v35  ;;  %v5083_v37 = vmul.f32 0.125, %v1977_v1 }
 0x659   : > { %v5064_v38 = vpop.eup %3815  ;;  %v2248_v15 = vmul.f32 1.442695, %v2174_v39  ;;  %v2250_v50 = vmul.f32 1.442695, %v2175_v10  ;;  %v1991_v10 = vpop.f32.mrf.mxu1 }
 0x65a   : > { %v2088_v14 = vpop.xlane.xlu0 %2087  ;;  %v2359_v42 = vadd.f32 %v5064_v38, %v5060_v44 }
 0x65b   : > { %3829 = vpow2.f32 %v2248_v15  ;;  %v2176_v46 = vsub.f32 %v4924_v36, %v2088_v14  ;;  %v2177_v11 = vsub.f32 %v4926_v45, %v2088_v14  ;;  %v2143_v45 = vmax.f32 %v5079_v43, %v5066_v13 }
 0x65c   : > { %v5076_v24 = vpop.eup %3817  ;;  %3831 = vpow2.f32 %v2250_v50  ;;  %2360 = vadd.xlane.f32.xlu1 %v2359_v42  ;;  %2141 = vmax.xlane.f32.xlu0 %v2140_v12  ;;  %v5094_v14 = vmul.f32 0.125, %v5034_v23 }
 0x65d   : > { %v5081_v40 = vpop.eup %3819  ;;  %v2252_v8 = vmul.f32 1.442695, %v2176_v46  ;;  %v2254_v56 = vmul.f32 1.442695, %v2177_v11  ;;  %v5098_v46 = vmul.f32 0.125, %v1981_v27 }
 0x65e   : > { %v2091_v39 = vpop.xlane.xlu1 %2090  ;;  %v2362_v36 = vadd.f32 %v5081_v40, %v5076_v24 }
 0x65f   : > { %3833 = vpow2.f32 %v2252_v8  ;;  %v2178_v35 = vsub.f32 %v4930_v2, %v2091_v39  ;;  %v2179_v15 = vsub.f32 %v4932_v30, %v2091_v39  ;;  %v2146_v30 = vmax.f32 %v5094_v14, %v5083_v37  ;;  %v1995_v8 = vpop.f32.mrf.mxu1 }
 0x660   : > { %v5091_v50 = vpop.eup %3821  ;;  %3835 = vpow2.f32 %v2254_v56  ;;  %2363 = vadd.xlane.f32.xlu0 %v2362_v36  ;;  %2144 = vmax.xlane.f32.xlu1 %v2143_v45  ;;  %v5109_v36 = vmul.f32 0.125, %v5040_v25 }
 0x661   : > { %5585 = vst [vmem:[#allocation20_spill] sm:$0xff] %v5091_v50  ;;  %v5096_v1 = vpop.eup %3823  ;;  %v2256_v42 = vmul.f32 1.442695, %v2178_v35  ;;  %v2258_v12 = vmul.f32 1.442695, %v2179_v15 }
 0x662   : > { %v2094_v11 = vpop.xlane.xlu0 %2093  ;;  %v2365_v2 = vadd.f32 %v5096_v1, %v5091_v50  ;;  %v2149_v15 = vmax.f32 %v5109_v36, %v5098_v46  ;;  %v5128_v50 = vmul.f32 0.125, %v1991_v10 }
 0x663   : > { %3837 = vpow2.f32 %v2256_v42  ;;  %v2180_v23 = vsub.f32 %v4936_v16, %v2094_v11  ;;  %v2181_v56 = vsub.f32 %v4938_v41, %v2094_v11  ;;  %v5115_v42 = vmul.f32 0.125, %v1987_v20  ;;  %v1997_v11 = vpop.f32.mrf.mxu1 }
 0x664   : > { %v5106_v39 = vpop.eup %3825  ;;  %3839 = vpow2.f32 %v2258_v12  ;;  %2366 = vadd.xlane.f32.xlu1 %v2365_v2  ;;  %2147 = vmax.xlane.f32.xlu0 %v2146_v30  ;;  %v5124_v30 = vmul.f32 0.125, %v5046_v19 }
 0x665   : > { %5586 = vst [vmem:[#allocation21_spill] sm:$0xff] %v5106_v39  ;;  %v5111_v27 = vpop.eup %3827  ;;  %v2260_v45 = vmul.f32 1.442695, %v2180_v23  ;;  %v2262_v35 = vmul.f32 1.442695, %v2181_v56 }
 0x666   : > { %v2097_v16 = vpop.xlane.xlu1 %2096  ;;  %v2368_v41 = vadd.f32 %v5111_v27, %v5106_v39 }
 0x667   : > { %3841 = vpow2.f32 %v2260_v45  ;;  %v2182_v25 = vsub.f32 %v4942_v26, %v2097_v16  ;;  %v2183_v12 = vsub.f32 %v4944_v28, %v2097_v16  ;;  %v2152_v28 = vmax.f32 %v5124_v30, %v5115_v42  ;;  %v1999_v45 = vpop.f32.mrf.mxu1 }
 0x668   : > { %v5121_v2 = vpop.eup %3829  ;;  %3843 = vpow2.f32 %v2262_v35  ;;  %2369 = vadd.xlane.f32.xlu0 %v2368_v41  ;;  %2150 = vmax.xlane.f32.xlu1 %v2149_v15  ;;  %v5139_v16 = vmul.f32 0.125, %v5072_v60 }
 0x669   : > { %5587 = vst [vmem:[#allocation22_spill] sm:$0xff] %v5121_v2  ;;  %v5126_v20 = vpop.eup %3831  ;;  %v2264_v23 = vmul.f32 1.442695, %v2182_v25  ;;  %v2266_v56 = vmul.f32 1.442695, %v2183_v12 }
 0x66a   : > { %v2100_v39 = vpop.xlane.xlu0 %2099  ;;  %v2371_v26 = vadd.f32 %v5126_v20, %v5121_v2  ;;  %v2155_v12 = vmax.f32 %v5139_v16, %v5128_v50 }
 0x66b   : > { %3845 = vpow2.f32 %v2264_v23  ;;  %v2184_v19 = vsub.f32 %v4948_v3, %v2100_v39  ;;  %v2185_v35 = vsub.f32 %v4950_v58, %v2100_v39  ;;  %v5145_v23 = vmul.f32 0.125, %v1997_v11  ;;  %v2001_v39 = vpop.f32.mrf.mxu1 }
 0x66c   : > { %v5136_v15 = vpop.eup %3833  ;;  %3847 = vpow2.f32 %v2266_v56  ;;  %2372 = vadd.xlane.f32.xlu1 %v2371_v26  ;;  %2153 = vmax.xlane.f32.xlu0 %v2152_v28  ;;  %v5153_v28 = vmul.f32 0.125, %v1995_v8  ;;  %v5157_v2 = vmul.f32 0.125, %v2001_v39 }
 0x66d   : > { %5588 = vst [vmem:[#allocation23_spill] sm:$0xff] %v5136_v15  ;;  %v5141_v10 = vpop.eup %3835  ;;  %v2268_v41 = vmul.f32 1.442695, %v2184_v19  ;;  %v2270_v25 = vmul.f32 1.442695, %v2185_v35 }
 0x66e   : > { %v2103_v3 = vpop.xlane.xlu1 %2102  ;;  %v2374_v58 = vadd.f32 %v5141_v10, %v5136_v15 }
 0x66f   : > { %3849 = vpow2.f32 %v2268_v41  ;;  %v2186_v60 = vsub.f32 %v4954_v52, %v2103_v3  ;;  %v2187_v56 = vsub.f32 %v4956_v5, %v2103_v3  ;;  %v2158_v52 = vmax.f32 %v5153_v28, %v5145_v23 }
 0x670   : > { %v5151_v26 = vpop.eup %3837  ;;  %3851 = vpow2.f32 %v2270_v25  ;;  %2375 = vadd.xlane.f32.xlu0 %v2374_v58  ;;  %2156 = vmax.xlane.f32.xlu1 %v2155_v12  ;;  %v5167_v12 = vmul.f32 0.125, %v1999_v45 }
 0x671   : > { %v5155_v19 = vpop.eup %3839  ;;  %v2272_v11 = vmul.f32 1.442695, %v2186_v60  ;;  %v2274_v35 = vmul.f32 1.442695, %v2187_v56 }
 0x672   : > { %v2106_v15 = vpop.xlane.xlu0 %2105  ;;  %v2377_v41 = vadd.f32 %v5155_v19, %v5151_v26  ;;  %v2161_v60 = vmax.f32 %v5167_v12, %v5157_v2 }
 0x673   : > { %3853 = vpow2.f32 %v2272_v11  ;;  %v2188_v5 = vsub.f32 %v4960_v33, %v2106_v15  ;;  %v2189_v8 = vsub.f32 %v4962_v63, %v2106_v15 }
 0x674   : > { %v5165_v25 = vpop.eup %3841  ;;  %3855 = vpow2.f32 %v2274_v35  ;;  %2378 = vadd.xlane.f32.xlu1 %v2377_v41  ;;  %2159 = vmax.xlane.f32.xlu0 %v2158_v52 }
 0x675   : > { %v5169_v3 = vpop.eup %3843  ;;  %v2276_v58 = vmul.f32 1.442695, %v2188_v5  ;;  %v2278_v39 = vmul.f32 1.442695, %v2189_v8 }
 0x676   : > { %v2109_v56 = vpop.xlane.xlu1 %2108  ;;  %v2380_v33 = vadd.f32 %v5169_v3, %v5165_v25 }
 0x677   : > { %3857 = vpow2.f32 %v2276_v58  ;;  %v2190_v63 = vsub.f32 %v4966_v32, %v2109_v56  ;;  %v2191_v45 = vsub.f32 %v4968_v59, %v2109_v56 }
 0x678   : > { %v5177_v15 = vpop.eup %3845  ;;  %3859 = vpow2.f32 %v2278_v39  ;;  %2381 = vadd.xlane.f32.xlu0 %v2380_v33  ;;  %2162 = vmax.xlane.f32.xlu1 %v2161_v60 }
 0x679   : > { %v5179_v11 = vpop.eup %3847  ;;  %v2280_v35 = vmul.f32 1.442695, %v2190_v63  ;;  %v2282_v41 = vmul.f32 1.442695, %v2191_v45 }
 0x67a   : > { %v2112_v52 = vpop.xlane.xlu0 %2111  ;;  %v2383_v5 = vadd.f32 %v5179_v11, %v5177_v15 }
 0x67b   : > { %3861 = vpow2.f32 %v2280_v35  ;;  %v2192_v8 = vsub.f32 %v4972_v21, %v2112_v52  ;;  %v2193_v32 = vsub.f32 %v4974_v0, %v2112_v52 }
 0x67c   : > { %v5185_v58 = vpop.eup %3849  ;;  %3863 = vpow2.f32 %v2282_v41  ;;  %2384 = vadd.xlane.f32.xlu1 %v2383_v5 }
 0x67d   : > { %v5187_v59 = vpop.eup %3851  ;;  %v2284_v39 = vmul.f32 1.442695, %v2192_v8  ;;  %v2286_v60 = vmul.f32 1.442695, %v2193_v32 }
 0x67e   : > { %v2115_v56 = vpop.xlane.xlu1 %2114  ;;  %v2386_v33 = vadd.f32 %v5187_v59, %v5185_v58 }
 0x67f   : > { %3865 = vpow2.f32 %v2284_v39  ;;  %v2194_v63 = vsub.f32 %v4978_v53, %v2115_v56  ;;  %v2195_v45 = vsub.f32 %v4980_v18, %v2115_v56 }
 0x680   : > { %v5193_v21 = vpop.eup %3853  ;;  %3867 = vpow2.f32 %v2286_v60  ;;  %2387 = vadd.xlane.f32.xlu0 %v2386_v33 }
 0x681   : > { %v5195_v0 = vpop.eup %3855  ;;  %v2288_v35 = vmul.f32 1.442695, %v2194_v63  ;;  %v2290_v41 = vmul.f32 1.442695, %v2195_v45 }
 0x682   : > { %v2118_v52 = vpop.xlane.xlu0 %2117  ;;  %v2389_v5 = vadd.f32 %v5195_v0, %v5193_v21 }
 0x683   : > { %3869 = vpow2.f32 %v2288_v35  ;;  %v2196_v8 = vsub.f32 %v4984_v34, %v2118_v52  ;;  %v2197_v32 = vsub.f32 %v4986_v49, %v2118_v52 }
 0x684   : > { %v5201_v53 = vpop.eup %3857  ;;  %3871 = vpow2.f32 %v2290_v41  ;;  %2390 = vadd.xlane.f32.xlu1 %v2389_v5 }
 0x685   : > { %v5203_v18 = vpop.eup %3859  ;;  %v2292_v39 = vmul.f32 1.442695, %v2196_v8  ;;  %v2294_v60 = vmul.f32 1.442695, %v2197_v32 }
 0x686   : > { %v2121_v56 = vpop.xlane.xlu1 %2120  ;;  %v2392_v33 = vadd.f32 %v5203_v18, %v5201_v53 }
 0x687   : > { %3873 = vpow2.f32 %v2292_v39  ;;  %v2198_v63 = vsub.f32 %v4990_v22, %v2121_v56  ;;  %v2199_v45 = vsub.f32 %v4992_v54, %v2121_v56 }
 0x688   : > { %v5209_v34 = vpop.eup %3861  ;;  %3875 = vpow2.f32 %v2294_v60  ;;  %2393 = vadd.xlane.f32.xlu0 %v2392_v33 }
 0x689   : > { %v5211_v49 = vpop.eup %3863  ;;  %v2296_v35 = vmul.f32 1.442695, %v2198_v63  ;;  %v2298_v41 = vmul.f32 1.442695, %v2199_v45 }
 0x68a   : > { %v2124_v52 = vpop.xlane.xlu0 %2123  ;;  %v2395_v5 = vadd.f32 %v5211_v49, %v5209_v34 }
 0x68b   : > { %3877 = vpow2.f32 %v2296_v35  ;;  %v2200_v8 = vsub.f32 %v4996_v7, %v2124_v52  ;;  %v2201_v32 = vsub.f32 %v4998_v55, %v2124_v52 }
 0x68c   : > { %v5217_v22 = vpop.eup %3865  ;;  %3879 = vpow2.f32 %v2298_v41  ;;  %2396 = vadd.xlane.f32.xlu1 %v2395_v5 }
 0x68d   : > { %v5219_v54 = vpop.eup %3867  ;;  %v2300_v39 = vmul.f32 1.442695, %v2200_v8  ;;  %v2302_v60 = vmul.f32 1.442695, %v2201_v32 }
 0x68e   : > { %v2127_v56 = vpop.xlane.xlu1 %2126  ;;  %v2398_v33 = vadd.f32 %v5219_v54, %v5217_v22 }
 0x68f   : > { %3881 = vpow2.f32 %v2300_v39  ;;  %v2202_v63 = vsub.f32 %v5002_v62, %v2127_v56  ;;  %v2203_v45 = vsub.f32 %v5004_v57, %v2127_v56 }
 0x690   : > { %v5225_v7 = vpop.eup %3869  ;;  %3883 = vpow2.f32 %v2302_v60  ;;  %2399 = vadd.xlane.f32.xlu0 %v2398_v33 }
 0x691   : > { %v5227_v55 = vpop.eup %3871  ;;  %v2304_v35 = vmul.f32 1.442695, %v2202_v63  ;;  %v2306_v41 = vmul.f32 1.442695, %v2203_v45 }
 0x692   : > { %v2130_v52 = vpop.xlane.xlu0 %2129  ;;  %v2401_v5 = vadd.f32 %v5227_v55, %v5225_v7 }
 0x693   : > { %3885 = vpow2.f32 %v2304_v35  ;;  %v2204_v8 = vsub.f32 %v5008_v6, %v2130_v52  ;;  %v2205_v32 = vsub.f32 %v5010_v17, %v2130_v52 }
 0x694   : > { %v5233_v62 = vpop.eup %3873  ;;  %3887 = vpow2.f32 %v2306_v41  ;;  %2402 = vadd.xlane.f32.xlu1 %v2401_v5 }
 0x695   : > { %5589 = vst [vmem:[#allocation24_spill] sm:$0xff] %v5233_v62  ;;  %v5235_v57 = vpop.eup %3875  ;;  %v2308_v39 = vmul.f32 1.442695, %v2204_v8  ;;  %v2310_v60 = vmul.f32 1.442695, %v2205_v32 }
 0x696   : > { %v2133_v56 = vpop.xlane.xlu1 %2132  ;;  %v2404_v33 = vadd.f32 %v5235_v57, %v5233_v62 }
 0x697   : > { %3889 = vpow2.f32 %v2308_v39  ;;  %v2206_v63 = vsub.f32 %v5014_v31, %v2133_v56  ;;  %v2207_v45 = vsub.f32 %v5016_v47, %v2133_v56 }
 0x698   : > { %v5241_v6 = vpop.eup %3877  ;;  %3891 = vpow2.f32 %v2310_v60  ;;  %2405 = vadd.xlane.f32.xlu0 %v2404_v33 }
 0x699   : > { %v5243_v17 = vpop.eup %3879  ;;  %v2312_v35 = vmul.f32 1.442695, %v2206_v63  ;;  %v2314_v41 = vmul.f32 1.442695, %v2207_v45  ;;  %v5591_v63 = vld [vmem:[#allocation18_spill] sm:$0xff] }
 0x69a   : > { %v2136_v52 = vpop.xlane.xlu0 %2135  ;;  %v2407_v5 = vadd.f32 %v5243_v17, %v5241_v6 }
 0x69b   : > { %3893 = vpow2.f32 %v2312_v35  ;;  %v2208_v8 = vsub.f32 %v5020_v4, %v2136_v52  ;;  %v2209_v32 = vsub.f32 %v5022_v48, %v2136_v52  ;;  %v5592_v35 = vld [vmem:[#allocation19_spill] sm:$0xff] }
 0x69c   : > { %v5249_v31 = vpop.eup %3881  ;;  %3895 = vpow2.f32 %v2314_v41  ;;  %2408 = vadd.xlane.f32.xlu1 %v2407_v5 }
 0x69d   : > { %5590 = vst [vmem:[#allocation25_spill] sm:$0xff] %v5249_v31  ;;  %v5251_v47 = vpop.eup %3883  ;;  %v2316_v39 = vmul.f32 1.442695, %v2208_v8  ;;  %v2318_v60 = vmul.f32 1.442695, %v2209_v32 }
 0x69e   : > { %v2139_v56 = vpop.xlane.xlu1 %2138  ;;  %v2410_v33 = vadd.f32 %v5251_v47, %v5249_v31 }
 0x69f   : > { %3897 = vpow2.f32 %v2316_v39  ;;  %v2210_v45 = vsub.f32 %v5591_v63, %v2139_v56  ;;  %v2211_v62 = vsub.f32 %v5592_v35, %v2139_v56 }
 0x6a0   : > { %v5257_v4 = vpop.eup %3885  ;;  %3899 = vpow2.f32 %v2318_v60  ;;  %2411 = vadd.xlane.f32.xlu0 %v2410_v33 }
 0x6a1   : > { %v5259_v48 = vpop.eup %3887  ;;  %v2320_v41 = vmul.f32 1.442695, %v2210_v45  ;;  %v2322_v52 = vmul.f32 1.442695, %v2211_v62 }
 0x6a2   : > { %v2413_v5 = vadd.f32 %v5259_v48, %v5257_v4 }
 0x6a3   : > { %3901 = vpow2.f32 %v2320_v41 }
 0x6a4   : > { %v5263_v8 = vpop.eup %3889  ;;  %3903 = vpow2.f32 %v2322_v52  ;;  %2414 = vadd.xlane.f32.xlu1 %v2413_v5 }
 0x6a5   : > { %5593 = vst [vmem:[#allocation18_spill] sm:$0xff] %v5263_v8  ;;  %v5265_v32 = vpop.eup %3891 }
 0x6a6   : > { %5594 = vst [vmem:[#allocation19_spill] sm:$0xff] %v5265_v32  ;;  %v2416_v39 = vadd.f32 %v5265_v32, %v5263_v8 }
 0x6a8   : > { %v5269_v56 = vpop.eup %3893  ;;  %2417 = vadd.xlane.f32.xlu0 %v2416_v39 }
 0x6a9   : > { %5595 = vst [vmem:[#allocation26_spill] sm:$0xff] %v5269_v56  ;;  %v5271_v60 = vpop.eup %3895 }
 0x6aa   : > { %5596 = vst [vmem:[#allocation27_spill] sm:$0xff] %v5271_v60  ;;  %v2419_v62 = vadd.f32 %v5271_v60, %v5269_v56 }
 0x6ac   : > { %v5275_v33 = vpop.eup %3897  ;;  %2420 = vadd.xlane.f32.xlu1 %v2419_v62 }
 0x6ad   : > { %5597 = vst [vmem:[#allocation28_spill] sm:$0xff] %v5275_v33  ;;  %v5277_v63 = vpop.eup %3899 }
 0x6ae   : > { %5598 = vst [vmem:[#allocation29_spill] sm:$0xff] %v5277_v63  ;;  %v2422_v45 = vadd.f32 %v5277_v63, %v5275_v33 }
 0x6b0   : > { %v5281_v35 = vpop.eup %3901  ;;  %2423 = vadd.xlane.f32.xlu0 %v2422_v45 }
 0x6b1   : > { %5599 = vst [vmem:[#allocation30_spill] sm:$0xff] %v5281_v35  ;;  %v5283_v41 = vpop.eup %3903 }
 0x6b2   : > { %5600 = vst [vmem:[#allocation31_spill] sm:$0xff] %v5283_v41  ;;  %v2425_v52 = vadd.f32 %v5283_v41, %v5281_v35 }
 0x6b4   : > { %2426 = vadd.xlane.f32.xlu1 %v2425_v52 }
 0x6e1   : > { %v2358_v5 = vpop.xlane.xlu0 %2357 }
 0x6e2   : > { %3905 = vrcp.f32 %v2358_v5 }
 0x6e5   : > { %v2361_v39 = vpop.xlane.xlu1 %2360  ;;  %v2142_v8 = vpop.xlane.xlu0 %2141 }
 0x6e6   : > { %3907 = vrcp.f32 %v2361_v39  ;;  %v2212_v62 = vsub.f32 %v5062_v29, %v2142_v8  ;;  %v2213_v56 = vsub.f32 %v5054_v51, %v2142_v8 }
 0x6e8   : > { %v2324_v60 = vmul.f32 1.442695, %v2212_v62  ;;  %v2326_v33 = vmul.f32 1.442695, %v2213_v56 }
 0x6e9   : > { %v2364_v63 = vpop.xlane.xlu0 %2363  ;;  %v2145_v32 = vpop.xlane.xlu1 %2144 }
 0x6ea   : > { %3909 = vpow2.f32 %v2324_v60  ;;  %v2214_v45 = vsub.f32 %v5079_v43, %v2145_v32  ;;  %v2215_v31 = vsub.f32 %v5066_v13, %v2145_v32 }
 0x6eb   : > { %3911 = vpow2.f32 %v2326_v33 }
 0x6ec   : > { %v2328_v52 = vmul.f32 1.442695, %v2214_v45  ;;  %v2330_v35 = vmul.f32 1.442695, %v2215_v31  ;;  %3913 = vrcp.f32 %v2364_v63 }
 0x6ed   : > { %v2367_v5 = vpop.xlane.xlu1 %2366  ;;  %v2148_v41 = vpop.xlane.xlu0 %2147 }
 0x6ee   : > { %3915 = vpow2.f32 %v2328_v52  ;;  %v2216_v29 = vsub.f32 %v5094_v14, %v2148_v41  ;;  %v2217_v51 = vsub.f32 %v5083_v37, %v2148_v41 }
 0x6ef   : > { %3917 = vpow2.f32 %v2330_v35  ;;  %v3906_v60 = vpop.eup %3905 }
 0x6f0   : > { %3919 = vrcp.f32 %v2367_v5  ;;  %v2332_v8 = vmul.f32 1.442695, %v2216_v29  ;;  %v2334_v56 = vmul.f32 1.442695, %v2217_v51  ;;  %v2485_v14 = vmul.f32 %v3906_v60, %v5052_v61 }
 0x6f1   : > { %v2370_v39 = vpop.xlane.xlu0 %2369  ;;  %v2151_v43 = vpop.xlane.xlu1 %2150  ;;  %v2484_v62 = vmul.f32 %v3906_v60, %v5050_v9 }
 0x6f2   : > { %3921 = vpow2.f32 %v2332_v8  ;;  %v2218_v13 = vsub.f32 %v5109_v36, %v2151_v43  ;;  %v2219_v31 = vsub.f32 %v5098_v46, %v2151_v43 }
 0x6f3   : > { %v3908_v32 = vpop.eup %3907  ;;  %3923 = vpow2.f32 %v2334_v56 }
 0x6f4   : > { %v2336_v33 = vmul.f32 1.442695, %v2218_v13  ;;  %v2338_v63 = vmul.f32 1.442695, %v2219_v31  ;;  %v2487_v37 = vmul.f32 %v3908_v32, %v5064_v38  ;;  %3925 = vrcp.f32 %v2370_v39 }
 0x6f5   : > { %v2373_v35 = vpop.xlane.xlu1 %2372  ;;  %v2154_v41 = vpop.xlane.xlu0 %2153  ;;  %v2486_v45 = vmul.f32 %v3908_v32, %v5060_v44 }
 0x6f6   : > { %3927 = vpow2.f32 %v2336_v33  ;;  %v2220_v36 = vsub.f32 %v5124_v30, %v2154_v41  ;;  %v2221_v46 = vsub.f32 %v5115_v42, %v2154_v41  ;;  %v2549_v52 = vpack.c.bf16 %v2487_v37, %v2485_v14 }
 0x6f7   : > { %v5301_v5 = vpop.eup %3909  ;;  %3929 = vpow2.f32 %v2338_v63  ;;  %v2548_v29 = vpack.c.bf16 %v2486_v45, %v2484_v62  ;;  %v5601_v62 = vld [vmem:[#allocation20_spill] sm:$0xff] }
 0x6f8   : > { %v5303_v61 = vpop.eup %3911  ;;  %3931 = vrcp.f32 %v2373_v35  ;;  %v2340_v38 = vmul.f32 1.442695, %v2220_v36  ;;  %v2342_v51 = vmul.f32 1.442695, %v2221_v46  ;;  %2628 = vmatprep.mubr.bf16.mxu0 %v2549_v52 }
 0x6f9   : > { %2629 = vmatmul.mubr.bf16.vlgmr.msra.gmra.mxu0 %v2548_v29  ;;  %v2376_v9 = vpop.xlane.xlu0 %2375  ;;  %v2157_v8 = vpop.xlane.xlu1 %2156  ;;  %v2428_v44 = vadd.f32 %v5303_v61, %v5301_v5 }
 0x6fa   : > { %v3914_v30 = vpop.eup %3913  ;;  %3933 = vpow2.f32 %v2340_v38  ;;  %v2222_v42 = vsub.f32 %v5139_v16, %v2157_v8  ;;  %v2223_v56 = vsub.f32 %v5128_v50, %v2157_v8 }
 0x6fb   : > { %v5309_v60 = vpop.eup %3915  ;;  %3935 = vpow2.f32 %v2342_v51  ;;  %2429 = vadd.xlane.f32.xlu0 %v2428_v44  ;;  %v2489_v14 = vmul.f32 %v3914_v30, %v5081_v40  ;;  %v2488_v41 = vmul.f32 %v3914_v30, %v5076_v24 }
 0x6fc   : > { %v5311_v39 = vpop.eup %3917  ;;  %v2344_v43 = vmul.f32 1.442695, %v2222_v42  ;;  %v2346_v13 = vmul.f32 1.442695, %v2223_v56  ;;  %3937 = vrcp.f32 %v2376_v9 }
 0x6fd   : > { %v3920_v31 = vpop.eup %3919  ;;  %v2379_v32 = vpop.xlane.xlu1 %2378  ;;  %v2431_v63 = vadd.f32 %v5311_v39, %v5309_v60 }
 0x6fe   : > { %v2160_v33 = vpop.xlane.xlu0 %2159  ;;  %3939 = vpow2.f32 %v2344_v43  ;;  %v2491_v37 = vmul.f32 %v3920_v31, %v5096_v1  ;;  %v2490_v45 = vmul.f32 %v3920_v31, %v5601_v62 }
 0x6ff   : > { %v2224_v50 = vsub.f32 %v5153_v28, %v2160_v33  ;;  %v2225_v16 = vsub.f32 %v5145_v23, %v2160_v33  ;;  %v5319_v35 = vpop.eup %3921  ;;  %3941 = vpow2.f32 %v2346_v13  ;;  %2432 = vadd.xlane.f32.xlu1 %v2431_v63 }
 0x700   : > { %v5323_v36 = vpop.eup %3923  ;;  %3943 = vrcp.f32 %v2379_v32  ;;  %v2551_v52 = vpack.c.bf16 %v2491_v37, %v2489_v14  ;;  %v2550_v29 = vpack.c.bf16 %v2490_v45, %v2488_v41  ;;  %v5603_v32 = vld [vmem:[#allocation22_spill] sm:$0xff] }
 0x701   : > { %v2348_v46 = vmul.f32 1.442695, %v2224_v50  ;;  %v2350_v40 = vmul.f32 1.442695, %v2225_v16  ;;  %v2163_v28 = vpop.xlane.xlu1 %2162  ;;  %v2434_v23 = vadd.f32 %v5323_v36, %v5319_v35  ;;  %v3926_v1 = vpop.eup %3925 }
 0x702   : > { %2636 = vmatprep.mubr.bf16.mxu0 %v2551_v52  ;;  %v2382_v38 = vpop.xlane.xlu0 %2381  ;;  %v2226_v51 = vsub.f32 %v5167_v12, %v2163_v28  ;;  %v2227_v24 = vsub.f32 %v5157_v2, %v2163_v28  ;;  %v2493_v13 = vmul.f32 %v3926_v1, %v5111_v27  ;;  %v5602_v12 = vld [vmem:[#allocation21_spill] sm:$0xff]  ;;  %v5604_v28 = vld [vmem:[#allocation23_spill] sm:$0xff] }
 0x703   : > { %3945 = vpow2.f32 %v2348_v46  ;;  %v5329_v9 = vpop.eup %3927  ;;  %2637 = vmatmul.mubr.bf16.gmra.mxu0 %v2550_v29  ;;  %2435 = vadd.xlane.f32.xlu0 %v2434_v23  ;;  %v2492_v31 = vmul.f32 %v3926_v1, %v5602_v12 }
 0x704   : > { %3947 = vpow2.f32 %v2350_v40  ;;  %v5331_v8 = vpop.eup %3929  ;;  %v2352_v44 = vmul.f32 1.442695, %v2226_v51  ;;  %v2354_v30 = vmul.f32 1.442695, %v2227_v24 }
 0x705   : > { %v3932_v42 = vpop.eup %3931  ;;  %3949 = vrcp.f32 %v2382_v38  ;;  %v2385_v56 = vpop.xlane.xlu1 %2384  ;;  %v2437_v43 = vadd.f32 %v5331_v8, %v5329_v9 }
 0x706   : > { %3951 = vpow2.f32 %v2352_v44  ;;  %v2495_v2 = vmul.f32 %v3932_v42, %v5126_v20  ;;  %v2494_v33 = vmul.f32 %v3932_v42, %v5603_v32 }
 0x707   : > { %v5339_v63 = vpop.eup %3933  ;;  %3953 = vpow2.f32 %v2354_v30  ;;  %2438 = vadd.xlane.f32.xlu1 %v2437_v43 }
 0x708   : > { %v5341_v14 = vpop.eup %3935  ;;  %3955 = vrcp.f32 %v2385_v56  ;;  %v2553_v50 = vpack.c.bf16 %v2495_v2, %v2493_v13  ;;  %v2552_v16 = vpack.c.bf16 %v2494_v33, %v2492_v31 }
 0x709   : > { %v2388_v37 = vpop.xlane.xlu0 %2387  ;;  %v2440_v27 = vadd.f32 %v5341_v14, %v5339_v63  ;;  %v3938_v41 = vpop.eup %3937 }
 0x70a   : > { %2644 = vmatprep.mubr.bf16.mxu0 %v2553_v50  ;;  %3957 = vrcp.f32 %v2388_v37  ;;  %v2497_v52 = vmul.f32 %v3938_v41, %v5141_v10  ;;  %v2496_v23 = vmul.f32 %v3938_v41, %v5604_v28 }
 0x70b   : > { %v5345_v20 = vpop.eup %3939  ;;  %2645 = vmatmul.mubr.bf16.gmra.mxu0 %v2552_v16  ;;  %2441 = vadd.xlane.f32.xlu0 %v2440_v27 }
 0x70c   : > { %v5347_v62 = vpop.eup %3941 }
 0x70d   : > { %v3944_v45 = vpop.eup %3943  ;;  %v2391_v46 = vpop.xlane.xlu1 %2390  ;;  %v2443_v40 = vadd.f32 %v5347_v62, %v5345_v20 }
 0x70e   : > { %3959 = vrcp.f32 %v2391_v46  ;;  %v2499_v29 = vmul.f32 %v3944_v45, %v5155_v19  ;;  %v2498_v1 = vmul.f32 %v3944_v45, %v5151_v26 }
 0x70f   : > { %2444 = vadd.xlane.f32.xlu1 %v2443_v40 }
 0x710   : > { %v5355_v38 = vpop.eup %3945  ;;  %v2555_v24 = vpack.c.bf16 %v2499_v29, %v2497_v52  ;;  %v2554_v44 = vpack.c.bf16 %v2498_v1, %v2496_v23 }
 0x711   : > { %v5357_v51 = vpop.eup %3947  ;;  %v2394_v30 = vpop.xlane.xlu0 %2393 }
 0x712   : > { %v2446_v42 = vadd.f32 %v5357_v51, %v5355_v38  ;;  %v3950_v56 = vpop.eup %3949  ;;  %2652 = vmatprep.mubr.bf16.mxu0 %v2555_v24  ;;  %3961 = vrcp.f32 %v2394_v30 }
 0x713   : > { %v5361_v10 = vpop.eup %3951  ;;  %2653 = vmatmul.mubr.bf16.gmra.mxu0 %v2554_v44  ;;  %v2501_v2 = vmul.f32 %v3950_v56, %v5169_v3  ;;  %v2500_v31 = vmul.f32 %v3950_v56, %v5165_v25 }
 0x714   : > { %2447 = vadd.xlane.f32.xlu0 %v2446_v42  ;;  %v5363_v19 = vpop.eup %3953 }
 0x715   : > { %v3956_v26 = vpop.eup %3955  ;;  %v2397_v43 = vpop.xlane.xlu1 %2396  ;;  %v2449_v13 = vadd.f32 %v5363_v19, %v5361_v10 }
 0x716   : > { %3963 = vrcp.f32 %v2397_v43  ;;  %v2503_v12 = vmul.f32 %v3956_v26, %v5179_v11  ;;  %v2502_v32 = vmul.f32 %v3956_v26, %v5177_v15 }
 0x717   : > { %2450 = vadd.xlane.f32.xlu1 %v2449_v13  ;;  %v3958_v16 = vpop.eup %3957 }
 0x718   : > { %v2557_v33 = vpack.c.bf16 %v2503_v12, %v2501_v2  ;;  %v2556_v50 = vpack.c.bf16 %v2502_v32, %v2500_v31  ;;  %v2505_v41 = vmul.f32 %v3958_v16, %v5187_v59  ;;  %v2504_v25 = vmul.f32 %v3958_v16, %v5185_v58  ;;  %v5605_v32 = vld [vmem:[#allocation24_spill] sm:$0xff] }
 0x719   : > { %v2400_v37 = vpop.xlane.xlu0 %2399 }
 0x71a   : > { %2660 = vmatprep.mubr.bf16.mxu0 %v2557_v33  ;;  %3965 = vrcp.f32 %v2400_v37 }
 0x71b   : > { %v3960_v27 = vpop.eup %3959  ;;  %2661 = vmatmul.mubr.bf16.gmra.mxu0 %v2556_v50 }
 0x71c   : > { %v2507_v3 = vmul.f32 %v3960_v27, %v5195_v0  ;;  %v2506_v45 = vmul.f32 %v3960_v27, %v5193_v21 }
 0x71d   : > { %v2403_v11 = vpop.xlane.xlu1 %2402 }
 0x71e   : > { %3967 = vrcp.f32 %v2403_v11  ;;  %v2559_v15 = vpack.c.bf16 %v2507_v3, %v2505_v41  ;;  %v2558_v46 = vpack.c.bf16 %v2506_v45, %v2504_v25 }
 0x71f   : > { %v3962_v40 = vpop.eup %3961 }
 0x720   : > { %2668 = vmatprep.mubr.bf16.mxu0 %v2559_v15  ;;  %v2509_v28 = vmul.f32 %v3962_v40, %v5203_v18  ;;  %v2508_v21 = vmul.f32 %v3962_v40, %v5201_v53 }
 0x721   : > { %v2406_v52 = vpop.xlane.xlu0 %2405 }
 0x722   : > { %3969 = vrcp.f32 %v2406_v52 }
 0x723   : > { %v3964_v29 = vpop.eup %3963  ;;  %2669 = vmatmul.mubr.bf16.gmra.mxu0 %v2558_v46  ;;  %v3790_v46 = vld [vmem:[%s5524_s10 + $0x10] sm:$0xff]  }
 0x724   : > { %v2511_v59 = vmul.f32 %v3964_v29, %v5211_v49  ;;  %v2510_v0 = vmul.f32 %v3964_v29, %v5209_v34  ;;  %v3789_v34 = vld [vmem:[%s5524_s10 + $0x18] sm:$0xff]  }
 0x725   : > { %v2409_v23 = vpop.xlane.xlu1 %2408  ;;  %3717 = vmatprep.subr.bf16.mxu1 %v3789_v34 }
 0x726   : > { %3971 = vrcp.f32 %v2409_v23  ;;  %v2561_v58 = vpack.c.bf16 %v2511_v59, %v2509_v28  ;;  %v2560_v1 = vpack.c.bf16 %v2510_v0, %v2508_v21  ;;  %3718 = vmatpush3.bf16.msra.mxu1 %v3789_v34  ;;  %v5610_v59 = vld [vmem:[#allocation18_spill] sm:$0xff]  ;;  %v3791_v23 = vld [vmem:[%s5524_s10 + $0x8] sm:$0xff]  }
 0x727   : > { %v3966_v24 = vpop.eup %3965  ;;  %3719 = vmatprep.subr.bf16.mxu1 %v3790_v46  ;;  %v5613_v34 = vld [vmem:[#allocation30_spill] sm:$0xff] }
 0x728   : > { %2676 = vmatprep.mubr.bf16.mxu0 %v2561_v58  ;;  %v2513_v42 = vmul.f32 %v3966_v24, %v5219_v54  ;;  %v2512_v56 = vmul.f32 %v3966_v24, %v5217_v22  ;;  %v3792_v24 = vld [vmem:[%s5524_s10] sm:$0xff]  }
 0x729   : > { %v2412_v44 = vpop.xlane.xlu0 %2411 }
 0x72a   : > { %3973 = vrcp.f32 %v2412_v44  ;;  %3720 = vmatpush3.bf16.msra.mxu1 %v3790_v46 }
 0x72b   : > { %v3968_v30 = vpop.eup %3967  ;;  %2677 = vmatmul.mubr.bf16.gmra.mxu0 %v2560_v1  ;;  %3721 = vmatprep.subr.bf16.mxu1 %v3791_v23 }
 0x72c   : > { %v2515_v18 = vmul.f32 %v3968_v30, %v5227_v55  ;;  %v2514_v49 = vmul.f32 %v3968_v30, %v5225_v7  ;;  %v5611_v30 = vld [vmem:[#allocation29_spill] sm:$0xff] }
 0x72d   : > { %v2415_v53 = vpop.xlane.xlu1 %2414 }
 0x72e   : > { %3975 = vrcp.f32 %v2415_v53  ;;  %v2563_v26 = vpack.c.bf16 %v2515_v18, %v2513_v42  ;;  %v2562_v43 = vpack.c.bf16 %v2514_v49, %v2512_v56  ;;  %3722 = vmatpush3.bf16.msra.mxu1 %v3791_v23  ;;  %v5612_v18 = vld [vmem:[#allocation31_spill] sm:$0xff]  ;;  %v5614_v56 = vld [vmem:[#allocation28_spill] sm:$0xff] }
 0x72f   : > { %v3970_v13 = vpop.eup %3969  ;;  %3723 = vmatprep.subr.bf16.mxu1 %v3792_v24 }
 0x730   : > { %2684 = vmatprep.mubr.bf16.mxu0 %v2563_v26  ;;  %v2517_v7 = vmul.f32 %v3970_v13, %v5235_v57  ;;  %v2516_v22 = vmul.f32 %v3970_v13, %v5605_v32 }
 0x731   : > { %v2418_v2 = vpop.xlane.xlu0 %2417 }
 0x732   : > { %3977 = vrcp.f32 %v2418_v2  ;;  %3724 = vmatpush3.bf16.msra.mxu1 %v3792_v24 }
 0x733   : > { %v3972_v54 = vpop.eup %3971  ;;  %2685 = vmatmul.mubr.bf16.gmra.mxu0 %v2562_v43 }
 0x734   : > { %v2519_v55 = vmul.f32 %v3972_v54, %v5243_v17  ;;  %v2518_v12 = vmul.f32 %v3972_v54, %v5241_v6  ;;  %v5606_v6 = vld [vmem:[#allocation25_spill] sm:$0xff] }
 0x735   : > { %v2421_v31 = vpop.xlane.xlu1 %2420 }
 0x736   : > { %3979 = vrcp.f32 %v2421_v31  ;;  %v2565_v33 = vpack.c.bf16 %v2519_v55, %v2517_v7  ;;  %v2564_v50 = vpack.c.bf16 %v2518_v12, %v2516_v22 }
 0x737   : > { %v3974_v16 = vpop.eup %3973 }
 0x738   : > { %2692 = vmatprep.mubr.bf16.mxu0 %v2565_v33  ;;  %v2521_v41 = vmul.f32 %v3974_v16, %v5251_v47  ;;  %v2520_v45 = vmul.f32 %v3974_v16, %v5606_v6  ;;  %v5607_v47 = vld [vmem:[#allocation19_spill] sm:$0xff] }
 0x739   : > { %v2424_v37 = vpop.xlane.xlu0 %2423 }
 0x73a   : > { %3981 = vrcp.f32 %v2424_v37 }
 0x73b   : > { %v3976_v27 = vpop.eup %3975  ;;  %2693 = vmatmul.mubr.bf16.gmra.mxu0 %v2564_v50 }
 0x73c   : > { %v2523_v57 = vmul.f32 %v3976_v27, %v5259_v48  ;;  %v2522_v17 = vmul.f32 %v3976_v27, %v5257_v4  ;;  %v5608_v48 = vld [vmem:[#allocation27_spill] sm:$0xff]  ;;  %v5609_v4 = vld [vmem:[#allocation26_spill] sm:$0xff] }
 0x73d   : > { %v2427_v3 = vpop.xlane.xlu1 %2426 }
 0x73e   : > { %3983 = vrcp.f32 %v2427_v3  ;;  %v2567_v11 = vpack.c.bf16 %v2523_v57, %v2521_v41  ;;  %v2566_v25 = vpack.c.bf16 %v2522_v17, %v2520_v45 }
 0x73f   : > { %v3978_v15 = vpop.eup %3977 }
 0x740   : > { %2700 = vmatprep.mubr.bf16.mxu0 %v2567_v11  ;;  %v2525_v52 = vmul.f32 %v3978_v15, %v5607_v47  ;;  %v2524_v0 = vmul.f32 %v3978_v15, %v5610_v59 }
 0x743   : > { %v3980_v40 = vpop.eup %3979  ;;  %2701 = vmatmul.mubr.bf16.gmra.mxu0 %v2566_v25 }
 0x744   : > { %v2527_v29 = vmul.f32 %v3980_v40, %v5608_v48  ;;  %v2526_v28 = vmul.f32 %v3980_v40, %v5609_v4 }
 0x746   : > { %v2569_v21 = vpack.c.bf16 %v2527_v29, %v2525_v52  ;;  %v2568_v58 = vpack.c.bf16 %v2526_v28, %v2524_v0 }
 0x747   : > { %v3982_v1 = vpop.eup %3981 }
 0x748   : > { %2708 = vmatprep.mubr.bf16.mxu0 %v2569_v21  ;;  %v2529_v42 = vmul.f32 %v3982_v1, %v5611_v30  ;;  %v2528_v26 = vmul.f32 %v3982_v1, %v5614_v56 }
 0x74b   : > { %v3984_v44 = vpop.eup %3983  ;;  %2709 = vmatmul.mubr.bf16.gmra.mxu0 %v2568_v58 }
 0x74c   : > { %v2531_v49 = vmul.f32 %v3984_v44, %v5612_v18  ;;  %v2530_v53 = vmul.f32 %v3984_v44, %v5613_v34 }
 0x74e   : > { %v2571_v43 = vpack.c.bf16 %v2531_v49, %v2529_v42  ;;  %v2570_v13 = vpack.c.bf16 %v2530_v53, %v2528_v26 }
 0x750   : > { %2716 = vmatprep.mubr.bf16.mxu0 %v2571_v43 }
 0x753   : > { %2717 = vmatmul.mubr.bf16.gmra.mxu0 %v2570_v13 }
 0x784   : > { %v2430_v2 = vpop.xlane.xlu0 %2429 }
 0x785   : > { %3985 = vrcp.f32 %v2430_v2 }
 0x788   : > { %v2433_v54 = vpop.xlane.xlu1 %2432 }
 0x789   : > { %3987 = vrcp.f32 %v2433_v54 }
 0x78c   : > { %v2436_v7 = vpop.xlane.xlu0 %2435 }
 0x78d   : > { %3989 = vrcp.f32 %v2436_v7 }
 0x790   : > { %v2439_v55 = vpop.xlane.xlu1 %2438 }
 0x791   : > { %3991 = vrcp.f32 %v2439_v55 }
 0x792   : > { %v3986_v12 = vpop.eup %3985 }
 0x793   : > { %v2533_v22 = vmul.f32 %v3986_v12, %v5303_v61  ;;  %v2532_v50 = vmul.f32 %v3986_v12, %v5301_v5 }
 0x794   : > { %v2442_v31 = vpop.xlane.xlu0 %2441 }
 0x795   : > { %3993 = vrcp.f32 %v2442_v31 }
 0x796   : > { %v3988_v32 = vpop.eup %3987 }
 0x797   : > { %v2535_v33 = vmul.f32 %v3988_v32, %v5311_v39  ;;  %v2534_v16 = vmul.f32 %v3988_v32, %v5309_v60 }
 0x798   : > { %v2445_v37 = vpop.xlane.xlu1 %2444 }
 0x799   : > { %3995 = vrcp.f32 %v2445_v37  ;;  %v2573_v27 = vpack.c.bf16 %v2535_v33, %v2533_v22  ;;  %v2572_v41 = vpack.c.bf16 %v2534_v16, %v2532_v50 }
 0x79a   : > { %v3990_v57 = vpop.eup %3989 }
 0x79b   : > { %2724 = vmatprep.mubr.bf16.mxu0 %v2573_v27  ;;  %v2537_v6 = vmul.f32 %v3990_v57, %v5323_v36  ;;  %v2536_v39 = vmul.f32 %v3990_v57, %v5319_v35 }
 0x79c   : > { %2725 = vmatmul.mubr.bf16.gmra.mxu0 %v2572_v41 }
 0x79d   : > { %v2448_v17 = vpop.xlane.xlu0 %2447 }
 0x79e   : > { %v3992_v3 = vpop.eup %3991  ;;  %3997 = vrcp.f32 %v2448_v17 }
 0x79f   : > { %v2539_v61 = vmul.f32 %v3992_v3, %v5331_v8  ;;  %v2538_v5 = vmul.f32 %v3992_v3, %v5329_v9 }
 0x7a0   : > { %v2451_v45 = vpop.xlane.xlu1 %2450 }
 0x7a1   : > { %3999 = vrcp.f32 %v2451_v45  ;;  %v2575_v60 = vpack.c.bf16 %v2539_v61, %v2537_v6  ;;  %v2574_v11 = vpack.c.bf16 %v2538_v5, %v2536_v39 }
 0x7a2   : > { %v3994_v25 = vpop.eup %3993 }
 0x7a3   : > { %2732 = vmatprep.mubr.bf16.mxu0 %v2575_v60  ;;  %v2541_v46 = vmul.f32 %v3994_v25, %v5341_v14  ;;  %v2540_v36 = vmul.f32 %v3994_v25, %v5339_v63 }
 0x7a4   : > { %2733 = vmatmul.mubr.bf16.gmra.mxu0 %v2574_v11 }
 0x7a6   : > { %v3996_v15 = vpop.eup %3995 }
 0x7a7   : > { %v2543_v40 = vmul.f32 %v3996_v15, %v5347_v62  ;;  %v2542_v8 = vmul.f32 %v3996_v15, %v5345_v20 }
 0x7a9   : > { %v2577_v47 = vpack.c.bf16 %v2543_v40, %v2541_v46  ;;  %v2576_v35 = vpack.c.bf16 %v2542_v8, %v2540_v36 }
 0x7ab   : > { %2740 = vmatprep.mubr.bf16.mxu0 %v2577_v47  ;;  %v3998_v9 = vpop.eup %3997 }
 0x7ac   : > { %2741 = vmatmul.mubr.bf16.gmra.mxu0 %v2576_v35  ;;  %v2545_v48 = vmul.f32 %v3998_v9, %v5357_v51  ;;  %v2544_v4 = vmul.f32 %v3998_v9, %v5355_v38 }
 0x7ae   : > { %v4000_v52 = vpop.eup %3999 }
 0x7af   : > { %v2547_v29 = vmul.f32 %v4000_v52, %v5363_v19  ;;  %v2546_v14 = vmul.f32 %v4000_v52, %v5361_v10 }
 0x7b1   : > { %v2579_v28 = vpack.c.bf16 %v2547_v29, %v2545_v48  ;;  %v2578_v62 = vpack.c.bf16 %v2546_v14, %v2544_v4 }
 0x7b3   : > { %2748 = vmatprep.mubr.bf16.mxu0 %v2579_v28 }
 0x7b4   : > { %2749 = vmatmul.mubr.bf16.gmra.mxu0 %v2578_v62 }
 0x7b9   : > { %v3481_v63 = vpop.f32.mrf.mxu0 }
 0x7bb   : > { %v3482_v20 = vpop.f32.mrf.mxu0 }
 0x7bc   : > { %v3483_v23 = vadd.f32 %v3482_v20, %v3481_v63 }
 0x7bd   : > { %v3484_v59 = vpop.f32.mrf.mxu0 }
 0x7bf   : > { %v3485_v0 = vpop.f32.mrf.mxu0 }
 0x7c0   : > { %v3486_v21 = vadd.f32 %v3485_v0, %v3484_v59 }
 0x7c2   : > { %v2757_v58 = vpack.c.bf16 %v3486_v21, %v3483_v23 }
 0x7c3   : > { %v3487_v1 = vpop.f32.mrf.mxu0 }
 0x7c4   : > { %3725 = vmatprep.mubr.msk.bf16.mxu1 %vm463_vm0, %v2757_v58 }
 0x7c5   : > { %v3488_v51 = vpop.f32.mrf.mxu0 }
 0x7c6   : > { %v3489_v38 = vadd.f32 %v3488_v51, %v3487_v1 }
 0x7c7   : > { %v3490_v19 = vpop.f32.mrf.mxu0 }
 0x7c9   : > { %v3491_v24 = vpop.f32.mrf.mxu0 }
 0x7ca   : > { %v3492_v44 = vadd.f32 %v3491_v24, %v3490_v19 }
 0x7cb   : > { %v3493_v10 = vpop.f32.mrf.mxu0 }
 0x7cc   : > { %v2758_v30 = vpack.c.bf16 %v3492_v44, %v3489_v38 }
 0x7cd   : > { %v3494_v42 = vpop.f32.mrf.mxu0 }
 0x7ce   : > { %3726 = vmatmul.mubr.msk.bf16.vlgmr.msra.gmra.mxu1 %vm463_vm0, %v2758_v30  ;;  %v3495_v34 = vadd.f32 %v3494_v42, %v3493_v10 }
 0x7cf   : > { %v3496_v18 = vpop.f32.mrf.mxu0 }
 0x7d1   : > { %v3497_v49 = vpop.f32.mrf.mxu0 }
 0x7d2   : > { %v3498_v53 = vadd.f32 %v3497_v49, %v3496_v18 }
 0x7d3   : > { %v3499_v56 = vpop.f32.mrf.mxu0 }
 0x7d4   : > { %v2759_v26 = vpack.c.bf16 %v3498_v53, %v3495_v34 }
 0x7d5   : > { %v3500_v43 = vpop.f32.mrf.mxu0 }
 0x7d6   : > { %3729 = vmatprep.mubr.msk.bf16.mxu1 %vm463_vm0, %v2759_v26  ;;  %v3501_v54 = vadd.f32 %v3500_v43, %v3499_v56 }
 0x7d7   : > { %v3502_v13 = vpop.f32.mrf.mxu0 }
 0x7d9   : > { %v3503_v2 = vpop.f32.mrf.mxu0 }
 0x7da   : > { %v3504_v7 = vadd.f32 %v3503_v2, %v3502_v13 }
 0x7db   : > { %v3505_v55 = vpop.f32.mrf.mxu0 }
 0x7dc   : > { %v2760_v12 = vpack.c.bf16 %v3504_v7, %v3501_v54 }
 0x7dd   : > { %v3506_v31 = vpop.f32.mrf.mxu0 }
 0x7de   : > { %3730 = vmatmul.mubr.msk.bf16.gmra.mxu1 %vm463_vm0, %v2760_v12  ;;  %v3507_v33 = vadd.f32 %v3506_v31, %v3505_v55 }
 0x7df   : > { %v3508_v32 = vpop.f32.mrf.mxu0 }
 0x7e1   : > { %v3509_v22 = vpop.f32.mrf.mxu0 }
 0x7e2   : > { %v3510_v50 = vadd.f32 %v3509_v22, %v3508_v32 }
 0x7e3   : > { %v3511_v16 = vpop.f32.mrf.mxu0 }
 0x7e4   : > { %v2761_v37 = vpack.c.bf16 %v3510_v50, %v3507_v33 }
 0x7e5   : > { %v3512_v27 = vpop.f32.mrf.mxu0 }
 0x7e6   : > { %3733 = vmatprep.mubr.msk.bf16.mxu1 %vm463_vm0, %v2761_v37  ;;  %v3513_v17 = vadd.f32 %v3512_v27, %v3511_v16 }
 0x7e7   : > { %v3514_v41 = vpop.f32.mrf.mxu0 }
 0x7e9   : > { %v3515_v57 = vpop.f32.mrf.mxu0 }
 0x7ea   : > { %v3516_v3 = vadd.f32 %v3515_v57, %v3514_v41 }
 0x7eb   : > { %v3517_v6 = vpop.f32.mrf.mxu0 }
 0x7ec   : > { %v2762_v61 = vpack.c.bf16 %v3516_v3, %v3513_v17 }
 0x7ed   : > { %v3518_v39 = vpop.f32.mrf.mxu0 }
 0x7ee   : > { %3734 = vmatmul.mubr.msk.bf16.gmra.mxu1 %vm463_vm0, %v2762_v61  ;;  %v3519_v60 = vadd.f32 %v3518_v39, %v3517_v6 }
 0x7ef   : > { %v3520_v5 = vpop.f32.mrf.mxu0 }
 0x7f1   : > { %v3521_v45 = vpop.f32.mrf.mxu0 }
 0x7f2   : > { %v3522_v11 = vadd.f32 %v3521_v45, %v3520_v5 }
 0x7f3   : > { %v3523_v25 = vpop.f32.mrf.mxu0 }
 0x7f4   : > { %v2763_v15 = vpack.c.bf16 %v3522_v11, %v3519_v60 }
 0x7f5   : > { %v3524_v46 = vpop.f32.mrf.mxu0 }
 0x7f6   : > { %3737 = vmatprep.mubr.msk.bf16.mxu1 %vm463_vm0, %v2763_v15  ;;  %v3525_v8 = vadd.f32 %v3524_v46, %v3523_v25  ;;  %v5446_v15 = vld [vmem:[%s5525_s11] ss:$0 sm:$0xff] }
 0x7f7   : > { %v3526_v40 = vpop.f32.mrf.mxu0 }
 0x7f9   : > { %v3527_v36 = vpop.f32.mrf.mxu0 }
 0x7fa   : > { %v3528_v47 = vadd.f32 %v3527_v36, %v3526_v40 }
 0x7fb   : > { %v3529_v35 = vpop.f32.mrf.mxu0 }
 0x7fc   : > { %v2764_v9 = vpack.c.bf16 %v3528_v47, %v3525_v8 }
 0x7fd   : > { %v3530_v52 = vpop.f32.mrf.mxu0 }
 0x7fe   : > { %3738 = vmatmul.mubr.msk.bf16.gmra.mxu1 %vm463_vm0, %v2764_v9  ;;  %v3531_v4 = vadd.f32 %v3530_v52, %v3529_v35 }
 0x7ff   : > { %v3532_v48 = vpop.f32.mrf.mxu0 }
 0x801   : > { %v3533_v29 = vpop.f32.mrf.mxu0 }
 0x802   : > { %v3534_v14 = vadd.f32 %v3533_v29, %v3532_v48 }
 0x803   : > { %v3535_v28 = vpop.f32.mrf.mxu0 }
 0x804   : > { %v2765_v62 = vpack.c.bf16 %v3534_v14, %v3531_v4 }
 0x805   : > { %v3536_v63 = vpop.f32.mrf.mxu0 }
 0x806   : > { %3741 = vmatprep.mubr.msk.bf16.mxu1 %vm463_vm0, %v2765_v62  ;;  %v3537_v0 = vadd.f32 %v3536_v63, %v3535_v28 }
 0x807   : > { %v3538_v20 = vpop.f32.mrf.mxu0 }
 0x809   : > { %v3539_v59 = vpop.f32.mrf.mxu0 }
 0x80a   : > { %v3540_v23 = vadd.f32 %v3539_v59, %v3538_v20 }
 0x80b   : > { %v3541_v21 = vpop.f32.mrf.mxu0 }
 0x80c   : > { %v2766_v58 = vpack.c.bf16 %v3540_v23, %v3537_v0 }
 0x80d   : > { %v3542_v1 = vpop.f32.mrf.mxu0 }
 0x80e   : > { %3742 = vmatmul.mubr.msk.bf16.gmra.mxu1 %vm463_vm0, %v2766_v58  ;;  %v3543_v24 = vadd.f32 %v3542_v1, %v3541_v21 }
 0x80f   : > { %v3544_v51 = vpop.f32.mrf.mxu0 }
 0x811   : > { %v3545_v19 = vpop.f32.mrf.mxu0 }
 0x812   : > { %v3546_v38 = vadd.f32 %v3545_v19, %v3544_v51 }
 0x813   : > { %v3547_v44 = vpop.f32.mrf.mxu0 }
 0x814   : > { %v2767_v10 = vpack.c.bf16 %v3546_v38, %v3543_v24 }
 0x815   : > { %v3548_v30 = vpop.f32.mrf.mxu0 }
 0x816   : > { %3745 = vmatprep.mubr.msk.bf16.mxu1 %vm463_vm0, %v2767_v10  ;;  %v3549_v49 = vadd.f32 %v3548_v30, %v3547_v44 }
 0x817   : > { %v3550_v42 = vpop.f32.mrf.mxu0 }
 0x819   : > { %v3551_v18 = vpop.f32.mrf.mxu0 }
 0x81a   : > { %v3552_v34 = vadd.f32 %v3551_v18, %v3550_v42 }
 0x81c   : > { %v2768_v53 = vpack.c.bf16 %v3552_v34, %v3549_v49 }
 0x81e   : > { %3746 = vmatmul.mubr.msk.bf16.gmra.mxu1 %vm463_vm0, %v2768_v53 }
 0x85c   : > { %v3553_v56 = vpop.f32.mrf.mxu0 }
 0x85e   : > { %v3554_v26 = vpop.f32.mrf.mxu0 }
 0x85f   : > { %v3555_v2 = vadd.f32 %v3554_v26, %v3553_v56 }
 0x860   : > { %v3556_v43 = vpop.f32.mrf.mxu0 }
 0x862   : > { %v3557_v13 = vpop.f32.mrf.mxu0 }
 0x863   : > { %v3558_v54 = vadd.f32 %v3557_v13, %v3556_v43 }
 0x864   : > { %v3559_v7 = vpop.f32.mrf.mxu0 }
 0x865   : > { %v2769_v55 = vpack.c.bf16 %v3558_v54, %v3555_v2 }
 0x866   : > { %v3560_v12 = vpop.f32.mrf.mxu0 }
 0x867   : > { %3749 = vmatprep.mubr.msk.bf16.mxu1 %vm463_vm0, %v2769_v55  ;;  %v3561_v22 = vadd.f32 %v3560_v12, %v3559_v7 }
 0x868   : > { %v3562_v31 = vpop.f32.mrf.mxu0 }
 0x86a   : > { %v3563_v32 = vpop.f32.mrf.mxu0 }
 0x86b   : > { %v3564_v33 = vadd.f32 %v3563_v32, %v3562_v31 }
 0x86c   : > { %v3565_v50 = vpop.f32.mrf.mxu0 }
 0x86d   : > { %v2770_v16 = vpack.c.bf16 %v3564_v33, %v3561_v22 }
 0x86e   : > { %v3566_v37 = vpop.f32.mrf.mxu0 }
 0x86f   : > { %3750 = vmatmul.mubr.msk.bf16.gmra.mxu1 %vm463_vm0, %v2770_v16  ;;  %v3567_v57 = vadd.f32 %v3566_v37, %v3565_v50 }
 0x870   : > { %v3568_v27 = vpop.f32.mrf.mxu0 }
 0x872   : > { %v3569_v41 = vpop.f32.mrf.mxu0 }
 0x873   : > { %v3570_v17 = vadd.f32 %v3569_v41, %v3568_v27 }
 0x874   : > { %v3571_v3 = vpop.f32.mrf.mxu0 }
 0x875   : > { %v2771_v6 = vpack.c.bf16 %v3570_v17, %v3567_v57 }
 0x876   : > { %v3572_v61 = vpop.f32.mrf.mxu0 }
 0x877   : > { %3753 = vmatprep.mubr.msk.bf16.mxu1 %vm463_vm0, %v2771_v6  ;;  %v3573_v45 = vadd.f32 %v3572_v61, %v3571_v3 }
 0x878   : > { %v3574_v39 = vpop.f32.mrf.mxu0 }
 0x87a   : > { %v3575_v5 = vpop.f32.mrf.mxu0 }
 0x87b   : > { %v3576_v60 = vadd.f32 %v3575_v5, %v3574_v39 }
 0x87d   : > { %v2772_v11 = vpack.c.bf16 %v3576_v60, %v3573_v45 }
 0x87f   : > { %3754 = vmatmul.mubr.msk.bf16.gmra.mxu1 %vm463_vm0, %v2772_v11 }
 0x88e   : > { %v3727_v25 = vpop.f32.mrf.mxu1 }
 0x88f   : > { %v2903_v35 = vadd.f32 %v3727_v25, %v5446_v15 }
 0x890   : > { %v2894_v46 = vpop.f32.mrf.mxu1 }
 0x891   : > { %v2895_v40 = vadd.f32 %v5446_v15, %v2894_v46 }
 0x892   : > { %v3728_v36 = vpop.f32.mrf.mxu1 }
 0x893   : > { %3021 = vxpose.xlu0.b32.start [1/16] (narrow) %v2895_v40, 64  ;;  %v2906_v9 = vadd.f32 %v3728_v36, %v5446_v15 }
 0x894   : > { %v2897_v8 = vpop.f32.mrf.mxu1 }
 0x895   : > { %v2898_v47 = vadd.f32 %v5446_v15, %v2897_v8  ;;  %v5615_v8 = vld [vmem:[#allocation17_spill] sm:$0xff] }
 0x897   : > { %3022 = vxpose.xlu0.b32.cont [2/16] (narrow) %v2898_v47, 64 }
 0x89b   : > { %3023 = vxpose.xlu0.b32.cont [3/16] (narrow) %v2903_v35, 64 }
 0x89e   : > { %v3731_v52 = vpop.f32.mrf.mxu1 }
 0x89f   : > { %3024 = vxpose.xlu0.b32.cont [4/16] (narrow) %v2906_v9, 64  ;;  %v2919_v62 = vadd.f32 %v3731_v52, %v5446_v15  ;;  %v5616_v52 = vld [vmem:[#allocation16_spill] sm:$0xff] }
 0x8a0   : > { %v2910_v48 = vpop.f32.mrf.mxu1 }
 0x8a1   : > { %v2911_v29 = vadd.f32 %v5446_v15, %v2910_v48 }
 0x8a2   : > { %v3732_v4 = vpop.f32.mrf.mxu1 }
 0x8a3   : > { %3025 = vxpose.xlu0.b32.cont [5/16] (narrow) %v2911_v29, 64  ;;  %v2922_v63 = vadd.f32 %v3732_v4, %v5446_v15  ;;  %v5617_v29 = vld [vmem:[#allocation15_spill] sm:$0xff] }
 0x8a4   : > { %v2913_v14 = vpop.f32.mrf.mxu1 }
 0x8a5   : > { %v2914_v28 = vadd.f32 %v5446_v15, %v2913_v14 }
 0x8a7   : > { %3026 = vxpose.xlu0.b32.cont [6/16] (narrow) %v2914_v28, 64  ;;  %v5618_v28 = vld [vmem:[#allocation14_spill] sm:$0xff] }
 0x8ab   : > { %3027 = vxpose.xlu0.b32.cont [7/16] (narrow) %v2919_v62, 64 }
 0x8ae   : > { %v3735_v20 = vpop.f32.mrf.mxu1 }
 0x8af   : > { %3028 = vxpose.xlu0.b32.cont [8/16] (narrow) %v2922_v63, 64  ;;  %v2935_v1 = vadd.f32 %v3735_v20, %v5446_v15 }
 0x8b0   : > { %v2926_v59 = vpop.f32.mrf.mxu1 }
 0x8b1   : > { %v2927_v0 = vadd.f32 %v5446_v15, %v2926_v59  ;;  %v5619_v59 = vld [vmem:[#allocation13_spill] sm:$0xff] }
 0x8b2   : > { %v3736_v23 = vpop.f32.mrf.mxu1 }
 0x8b3   : > { %3029 = vxpose.xlu0.b32.cont [9/16] (narrow) %v2927_v0, 64  ;;  %v2938_v51 = vadd.f32 %v3736_v23, %v5446_v15 }
 0x8b4   : > { %v2929_v21 = vpop.f32.mrf.mxu1 }
 0x8b5   : > { %v2930_v58 = vadd.f32 %v5446_v15, %v2929_v21  ;;  %v5620_v21 = vld [vmem:[#allocation12_spill] sm:$0xff] }
 0x8b7   : > { %3030 = vxpose.xlu0.b32.cont [10/16] (narrow) %v2930_v58, 64 }
 0x8bb   : > { %3031 = vxpose.xlu0.b32.cont [11/16] (narrow) %v2935_v1, 64 }
 0x8be   : > { %v3739_v19 = vpop.f32.mrf.mxu1 }
 0x8bf   : > { %3032 = vxpose.xlu0.b32.cont [12/16] (narrow) %v2938_v51, 64  ;;  %v2951_v42 = vadd.f32 %v3739_v19, %v5446_v15  ;;  %v5621_v51 = vld [vmem:[#allocation11_spill] sm:$0xff] }
 0x8c0   : > { %v2942_v24 = vpop.f32.mrf.mxu1 }
 0x8c1   : > { %v2943_v38 = vadd.f32 %v5446_v15, %v2942_v24 }
 0x8c2   : > { %v3740_v44 = vpop.f32.mrf.mxu1 }
 0x8c3   : > { %3033 = vxpose.xlu0.b32.cont [13/16] (narrow) %v2943_v38, 64  ;;  %v2954_v18 = vadd.f32 %v3740_v44, %v5446_v15  ;;  %v5622_v44 = vld [vmem:[#allocation10_spill] sm:$0xff] }
 0x8c4   : > { %v2945_v10 = vpop.f32.mrf.mxu1 }
 0x8c5   : > { %v2946_v30 = vadd.f32 %v5446_v15, %v2945_v10 }
 0x8c7   : > { %3034 = vxpose.xlu0.b32.cont [14/16] (narrow) %v2946_v30, 64 }
 0x8cb   : > { %3035 = vxpose.xlu0.b32.cont [15/16] (narrow) %v2951_v42, 64  ;;  %v5623_v42 = vld [vmem:[#allocation9_spill] sm:$0xff] }
 0x8ce   : > { %v3743_v49 = vpop.f32.mrf.mxu1 }
 0x8cf   : > { %3036 = vxpose.xlu0.b32.end [16/16] (narrow) %v2954_v18, 64  ;;  %v2967_v13 = vadd.f32 %v3743_v49, %v5446_v15 }
 0x8d0   : > { %v2958_v34 = vpop.f32.mrf.mxu1 }
 0x8d1   : > { %v2959_v53 = vadd.f32 %v5446_v15, %v2958_v34  ;;  %v5624_v34 = vld [vmem:[#allocation8_spill] sm:$0xff] }
 0x8d2   : > { %v3744_v56 = vpop.f32.mrf.mxu1 }
 0x8d3   : > { %3053 = vxpose.xlu1.b32.start [1/16] (narrow) %v2959_v53, 64  ;;  %v2970_v2 = vadd.f32 %v3744_v56, %v5446_v15 }
 0x8d4   : > { %v2961_v26 = vpop.f32.mrf.mxu1 }
 0x8d5   : > { %v2962_v43 = vadd.f32 %v5446_v15, %v2961_v26 }
 0x8d7   : > { %3054 = vxpose.xlu1.b32.cont [2/16] (narrow) %v2962_v43, 64  ;;  %v5625_v43 = vld [vmem:[#allocation7_spill] sm:$0xff] }
 0x8db   : > { %3055 = vxpose.xlu1.b32.cont [3/16] (narrow) %v2967_v13, 64 }
 0x8de   : > { %v3747_v54 = vpop.f32.mrf.mxu1 }
 0x8df   : > { %3056 = vxpose.xlu1.b32.cont [4/16] (narrow) %v2970_v2, 64  ;;  %v2983_v22 = vadd.f32 %v3747_v54, %v5446_v15  ;;  %v5626_v54 = vld [vmem:[#allocation6_spill] sm:$0xff] }
 0x8e0   : > { %v2974_v7 = vpop.f32.mrf.mxu1 }
 0x8e1   : > { %v2975_v55 = vadd.f32 %v5446_v15, %v2974_v7 }
 0x8e2   : > { %v3748_v12 = vpop.f32.mrf.mxu1 }
 0x8e3   : > { %3057 = vxpose.xlu1.b32.cont [5/16] (narrow) %v2975_v55, 64  ;;  %v2986_v33 = vadd.f32 %v3748_v12, %v5446_v15  ;;  %v5627_v12 = vld [vmem:[#allocation5_spill] sm:$0xff] }
 0x8e4   : > { %v2977_v31 = vpop.f32.mrf.mxu1 }
 0x8e5   : > { %v2978_v32 = vadd.f32 %v5446_v15, %v2977_v31 }
 0x8e7   : > { %3058 = vxpose.xlu1.b32.cont [6/16] (narrow) %v2978_v32, 64 }
 0x8eb   : > { %3059 = vxpose.xlu1.b32.cont [7/16] (narrow) %v2983_v22, 64 }
 0x8ef   : > { %3060 = vxpose.xlu1.b32.cont [8/16] (narrow) %v2986_v33, 64  ;;  %v5628_v33 = vld [vmem:[#allocation4_spill] sm:$0xff] }
 0x90f   : > { %v3037_v46 = vpop.trf.xlu0 }
 0x910   : > { %v3085_v47 = vadd.f32 %v3037_v46, %v5615_v8 }
 0x913   : > { %v3038_v40 = vpop.trf.xlu0 }
 0x914   : > { %v3087_v4 = vadd.f32 %v3038_v40, %v5617_v29 }
 0x917   : > { %v3039_v36 = vpop.trf.xlu0 }
 0x918   : > { %v3089_v0 = vadd.f32 %v3039_v36, %v5619_v59 }
 0x91b   : > { %v3040_v9 = vpop.trf.xlu0 }
 0x91c   : > { %v3091_v19 = vadd.f32 %v3040_v9, %v5621_v51 }
 0x91f   : > { %v3041_v63 = vpop.trf.xlu0 }
 0x920   : > { %v3093_v18 = vadd.f32 %v3041_v63, %v5623_v42 }
 0x923   : > { %v3042_v38 = vpop.trf.xlu0 }
 0x924   : > { %v3095_v13 = vadd.f32 %v3042_v38, %v5625_v43 }
 0x927   : > { %v3043_v56 = vpop.trf.xlu0 }
 0x928   : > { %v3097_v31 = vadd.f32 %v3043_v56, %v5627_v12 }
 0x92b   : > { %v3044_v22 = vpop.trf.xlu0 }
 0x92f   : > { %v3751_v50 = vpop.f32.mrf.mxu1 }
 0x930   : > { %v2999_v17 = vadd.f32 %v3751_v50, %v5446_v15 }
 0x931   : > { %v2990_v16 = vpop.f32.mrf.mxu1 }
 0x932   : > { %v2991_v37 = vadd.f32 %v5446_v15, %v2990_v16 }
 0x933   : > { %v3752_v27 = vpop.f32.mrf.mxu1 }
 0x934   : > { %3061 = vxpose.xlu1.b32.cont [9/16] (narrow) %v2991_v37, 64  ;;  %v3002_v3 = vadd.f32 %v3752_v27, %v5446_v15  ;;  %v5629_v37 = vld [vmem:[#allocation3_spill] sm:$0xff] }
 0x935   : > { %v2993_v41 = vpop.f32.mrf.mxu1  ;;  %v3099_v27 = vadd.f32 %v3044_v22, %v5629_v37 }
 0x936   : > { %v2994_v57 = vadd.f32 %v5446_v15, %v2993_v41 }
 0x938   : > { %3062 = vxpose.xlu1.b32.cont [10/16] (narrow) %v2994_v57, 64  ;;  %v5630_v57 = vld [vmem:[#allocation2_spill] sm:$0xff] }
 0x93c   : > { %3063 = vxpose.xlu1.b32.cont [11/16] (narrow) %v2999_v17, 64 }
 0x93f   : > { %v3755_v6 = vpop.f32.mrf.mxu1 }
 0x940   : > { %3064 = vxpose.xlu1.b32.cont [12/16] (narrow) %v3002_v3, 64  ;;  %v3015_v11 = vadd.f32 %v3755_v6, %v5446_v15 }
 0x941   : > { %v3006_v61 = vpop.f32.mrf.mxu1 }
 0x942   : > { %v3007_v39 = vadd.f32 %v5446_v15, %v3006_v61 }
 0x943   : > { %v3756_v5 = vpop.f32.mrf.mxu1 }
 0x944   : > { %3065 = vxpose.xlu1.b32.cont [13/16] (narrow) %v3007_v39, 64  ;;  %v3018_v25 = vadd.f32 %v3756_v5, %v5446_v15 }
 0x945   : > { %v3009_v45 = vpop.f32.mrf.mxu1 }
 0x946   : > { %v3010_v60 = vadd.f32 %v5446_v15, %v3009_v45 }
 0x948   : > { %3066 = vxpose.xlu1.b32.cont [14/16] (narrow) %v3010_v60, 64 }
 0x94c   : > { %3067 = vxpose.xlu1.b32.cont [15/16] (narrow) %v3015_v11, 64 }
 0x950   : > { %3068 = vxpose.xlu1.b32.end [16/16] (narrow) %v3018_v25, 64 }
 0x990   : > { %v3069_v35 = vpop.trf.xlu1 }
 0x991   : > { %v3086_v48 = vadd.f32 %v3069_v35, %v5616_v52 }
 0x993   : > { %v3349_v15 = vpack.c.bf16 %v3086_v48, %v3085_v47 }
 0x994   : > { %v3070_v14 = vpop.trf.xlu1 }
 0x995   : > { %3149 = vst [vmem:[%s5487_s27] sm:$0xff] %v3349_v15  ;;  %v3088_v62 = vadd.f32 %v3070_v14, %v5618_v28 }
 0x997   : > { %v3350_v20 = vpack.c.bf16 %v3088_v62, %v3087_v4 }
 0x998   : > { %v3071_v23 = vpop.trf.xlu1 }
 0x999   : > { %3150 = vst [vmem:[%s5487_s27 + $0x8] sm:$0xff] %v3350_v20  ;;  %v3090_v58 = vadd.f32 %v3071_v23, %v5620_v21 }
 0x99b   : > { %v3351_v1 = vpack.c.bf16 %v3090_v58, %v3089_v0 }
 0x99c   : > { %v3072_v24 = vpop.trf.xlu1 }
 0x99d   : > { %3151 = vst [vmem:[%s5487_s27 + $0x10] sm:$0xff] %v3351_v1  ;;  %v3092_v10 = vadd.f32 %v3072_v24, %v5622_v44 }
 0x99f   : > { %v3352_v30 = vpack.c.bf16 %v3092_v10, %v3091_v19 }
 0x9a0   : > { %v3073_v49 = vpop.trf.xlu1 }
 0x9a1   : > { %3152 = vst [vmem:[%s5487_s27 + $0x18] sm:$0xff] %v3352_v30  ;;  %v3094_v53 = vadd.f32 %v3073_v49, %v5624_v34 }
 0x9a3   : > { %v3353_v26 = vpack.c.bf16 %v3094_v53, %v3093_v18 }
 0x9a4   : > { %v3074_v2 = vpop.trf.xlu1 }
 0x9a5   : > { %3153 = vst [vmem:[%s5487_s27 + $0x20] sm:$0xff] %v3353_v26  ;;  %v3096_v7 = vadd.f32 %v3074_v2, %v5626_v54 }
 0x9a7   : > { %v3354_v55 = vpack.c.bf16 %v3096_v7, %v3095_v13 }
 0x9a8   : > { %v3075_v32 = vpop.trf.xlu1 }
 0x9a9   : > { %3154 = vst [vmem:[%s5487_s27 + $0x28] sm:$0xff] %v3354_v55  ;;  %v3098_v50 = vadd.f32 %v3075_v32, %v5628_v33 }
 0x9ab   : > { %v3355_v16 = vpack.c.bf16 %v3098_v50, %v3097_v31 }
 0x9ac   : > { %v3076_v41 = vpop.trf.xlu1 }
 0x9ad   : > { %3155 = vst [vmem:[%s5487_s27 + $0x30] sm:$0xff] %v3355_v16  ;;  %v3100_v17 = vadd.f32 %v3076_v41, %v5630_v57 }
 0x9af   : > { %v3356_v3 = vpack.c.bf16 %v3100_v17, %v3099_v27 }
 0x9b1   : > { %3156 = vst [vmem:[%s5487_s27 + $0x38] sm:$0xff] %v3356_v3 }
 0x9b2 PF: > { %s22_s21 = sadd.s32 1, %s4007_s21  }
 0x9b3   : > { %p19_p4 = scmp.ge.s32.totalorder %s22_s21, 4  }
 0x9b5   :  { %21 = sbr.rel (!%p19_p4) target bundleno = 1 (0x1), region = 98 }

// kernel: encoder_forward.8
= control target key start
LH: loop header
LB: loop body
LE: loop exit
PB: predicated region body
PF: predicated region fallthrough
CT: control target
= control target key end

     0   :  { %s4855_s17 = smov 0   ;;  %s7429_s0 = inlined_call_operand.vmem [shape: bf16[2,64,256], index: 0, kind: input, shape index: {}]   ;;  %s7430_s1 = inlined_call_operand.vmem [shape: f32[2,1,256], index: 1, kind: input, shape index: {}]   ;;  %s7431_s2 = inlined_call_operand.vmem [shape: bf16[3,64,192], index: 2, kind: input, shape index: {}]   ;;  %s7432_s3 = inlined_call_operand.vmem [shape: f32[64,1], index: 3, kind: input, shape index: {}]   ;;  %s7433_s4 = inlined_call_operand.vmem [shape: f32[64,1], index: 4, kind: input, shape index: {}]   ;;  %s7434_s5 = inlined_call_operand.vmem [shape: f32[64,1], index: 5, kind: input, shape index: {}]   ;;  %s7435_s6 = inlined_call_operand.vmem [shape: bf16[3,64,192], index: 6, kind: input, shape index: {}]   ;;  %s7436_s7 = inlined_call_operand.vmem [shape: f32[64,1], index: 7, kind: input, shape index: {}]   ;;  %s7437_s8 = inlined_call_operand.vmem [shape: f32[64,1], index: 8, kind: input, shape index: {}]   ;;  %s7438_s9 = inlined_call_operand.vmem [shape: f32[64,1], index: 9, kind: input, shape index: {}]   ;;  %s7439_s10 = inlined_call_operand.vmem [shape: f32[64,64], index: 10, kind: input, shape index: {}]   ;;  %s7440_s11 = inlined_call_operand.vmem [shape: bf16[2,64,256], index: 11, kind: output, shape index: {}]  }
   0x1 LB: > { %s4241_s18 = sadd.s32 4294967295, %s4784_s17   ;;  %p4245_p0 = scmp.ge.s32.totalorder %s4784_s17, 1  ;;  %s4784_s17 = sphi %s4855_s17, %s21_s17  }
   0x2   : > { %p337_p1 = scmp.lt.s32.totalorder %s4784_s17, 3 }
   0x4   : > { %p338_p2 = pnand %p4245_p0, %p337_p1 }
   0x6   : > { %341 = sbr.rel (%p338_p2) target bundleno = 3617 (0xe21), region = 64 }
   0xb   : > { %p377_p3 = scmp.lt.s32.totalorder %s4241_s18, 1  ;;  %v7441_v0 = vmov 0.0   ;;  %v4922_v25 = vld [vmem:[%s7439_s10] sm:$0xff]  ;;  %vm439_vm0 = vcmask 523264   ;;  %v4932_v26 = vld [vmem:[%s7439_s10 + $0x8] sm:$0xff]  ;;  %v4940_v27 = vld [vmem:[%s7439_s10 + $0x10] sm:$0xff] }
   0xc   : > { %528 = vmatprep.mubr.f32.mxu0 %v7441_v0  ;;  %706 = vmatprep.mubr.f32.mxu1 %v7441_v0  ;;  %v4948_v28 = vld [vmem:[%s7439_s10 + $0x18] sm:$0xff]  ;;  %v4956_v29 = vld [vmem:[%s7439_s10 + $0x20] sm:$0xff]  ;;  %v4964_v30 = vld [vmem:[%s7439_s10 + $0x28] sm:$0xff]  ;;  %v4787_v58 = vmov 0   ;;  %s4788_s25 = smov 127   ;;  %s4789_s28 = smov 126  }
   0xd   : > { %s7525_s18 = smov (!%p377_p3, %s4241_s18), 1  ;;  %v4972_v31 = vld [vmem:[%s7439_s10 + $0x30] sm:$0xff]  ;;  %v4980_v32 = vld [vmem:[%s7439_s10 + $0x38] sm:$0xff]  ;;  %4465 = vset.pattern.permute.xlu1 %v4787_v58  ;;  %4464 = vset.pattern.permute.xlu0 %v4787_v58  ;;  %v427_v62 = vld [vmem:[%s7433_s4 + $0x20] sm:$0xff]  ;;  %s4790_s29 = smov 1   ;;  %vm1153_vm1 = vcmask 1039360  }
   0xe   : > { %s4405_s19 = sshll.u32 %s7525_s18, 6  ;;  %v430_v57 = vld [vmem:[%s7433_s4 + $0x38] sm:$0xff]  ;;  %v429_v59 = vld [vmem:[%s7433_s4 + $0x30] sm:$0xff]  ;;  %v428_v63 = vld [vmem:[%s7433_s4 + $0x28] sm:$0xff]  ;;  %vm1185_vm2 = vcmask 1031168   ;;  %s4791_s20 = smov 96  }
   0xf   : > { %s381_s22 = scalar_lea.vmem %s7429_s0, %s4405_s19  ;;  %v437_v60 = vld [vmem:[%s7434_s5 + $0x30] sm:$0xff]  ;;  %v438_v61 = vld [vmem:[%s7434_s5 + $0x38] sm:$0xff]  ;;  %vm1312_vm3 = vcmask 7168   ;;  %s4792_s23 = smov 112   ;;  %vm1624_vm4 = vcmask 916480   ;;  %vm1862_vm5 = vcmask 785408  }
  0x10   : > { %v395_v1 = vld [vmem:[%s381_s22 + $0x38] sm:$0xff]  ;;  %v394_v2 = vld [vmem:[%s381_s22 + $0x30] sm:$0xff]  ;;  %v393_v3 = vld [vmem:[%s381_s22 + $0x28] sm:$0xff]  ;;  %s4793_s30 = smov 16   ;;  %vm2079_vm6 = vcmask 130048   ;;  %s4794_s16 = smov 15  }
  0x11   : > { %v4873_v4 = vunpack.c.h.bf16 %v395_v1  ;;  %v4875_v5 = vunpack.c.l.bf16 %v395_v1  ;;  %v4877_v6 = vunpack.c.h.bf16 %v394_v2  ;;  %v4879_v7 = vunpack.c.l.bf16 %v394_v2  ;;  %v392_v8 = vld [vmem:[%s381_s22 + $0x20] sm:$0xff]  ;;  %v391_v9 = vld [vmem:[%s381_s22 + $0x18] sm:$0xff]  ;;  %v390_v12 = vld [vmem:[%s381_s22 + $0x10] sm:$0xff] }
  0x12   : > { %v4882_v10 = vunpack.c.h.bf16 %v393_v3  ;;  %v4885_v11 = vunpack.c.l.bf16 %v393_v3  ;;  %v4888_v13 = vunpack.c.h.bf16 %v392_v8  ;;  %v4891_v14 = vunpack.c.l.bf16 %v392_v8  ;;  %v389_v15 = vld [vmem:[%s381_s22 + $0x8] sm:$0xff]  ;;  %v388_v18 = vld [vmem:[%s381_s22] sm:$0xff]  ;;  %v425_v3 = vld [vmem:[%s7433_s4 + $0x10] sm:$0xff] }
  0x13   : > { %7466 = vst [vmem:[#allocation2_spill] sm:$0xff] %v4873_v4  ;;  %7467 = vst [vmem:[#allocation3_spill] sm:$0xff] %v4875_v5  ;;  %480 = vmatprep.subr.mxu0 %v4873_v4  ;;  %v4894_v16 = vunpack.c.h.bf16 %v391_v9  ;;  %v4897_v17 = vunpack.c.l.bf16 %v391_v9  ;;  %v4900_v19 = vunpack.c.h.bf16 %v390_v12  ;;  %v4903_v20 = vunpack.c.l.bf16 %v390_v12  ;;  %v435_v1 = vld [vmem:[%s7434_s5 + $0x20] sm:$0xff]  ;;  %v436_v2 = vld [vmem:[%s7434_s5 + $0x28] sm:$0xff] }
  0x14   : > { %7468 = vst [vmem:[#allocation4_spill] sm:$0xff] %v4877_v6  ;;  %7469 = vst [vmem:[#allocation5_spill] sm:$0xff] %v4879_v7  ;;  %481 = vmatpush1.msra.mxu0 %v4875_v5  ;;  %v4906_v21 = vunpack.c.h.bf16 %v389_v15  ;;  %v4909_v22 = vunpack.c.l.bf16 %v389_v15  ;;  %v4912_v23 = vunpack.c.h.bf16 %v388_v18  ;;  %v4915_v24 = vunpack.c.l.bf16 %v388_v18 }
  0x15   : > { %7470 = vst [vmem:[#allocation6_spill] sm:$0xff] %v4882_v10  ;;  %7471 = vst [vmem:[#allocation7_spill] sm:$0xff] %v4885_v11  ;;  %482 = vmatprep.subr.mxu0 %v4877_v6  ;;  %vm3123_vm7 = vcmask 121856   ;;  %vm4153_vm8 = vcmask 1043456  }
  0x16   : > { %7472 = vst [vmem:[#allocation8_spill] sm:$0xff] %v4888_v13  ;;  %483 = vmatpush1.msra.mxu0 %v4879_v7  ;;  %7473 = vst [vmem:[#allocation9_spill] sm:$0xff] %v4891_v14 }
  0x17   : > { %484 = vmatprep.subr.mxu0 %v4882_v10  ;;  %7474 = vst [vmem:[#allocation10_spill] sm:$0xff] %v4894_v16  ;;  %7475 = vst [vmem:[#allocation11_spill] sm:$0xff] %v4897_v17 }
  0x18   : > { %485 = vmatpush1.msra.mxu0 %v4885_v11  ;;  %7476 = vst [vmem:[#allocation12_spill] sm:$0xff] %v4900_v19  ;;  %7477 = vst [vmem:[#allocation13_spill] sm:$0xff] %v4903_v20 }
  0x19   : > { %486 = vmatprep.subr.mxu0 %v4888_v13  ;;  %7478 = vst [vmem:[#allocation14_spill] sm:$0xff] %v4906_v21  ;;  %7479 = vst [vmem:[#allocation15_spill] sm:$0xff] %v4909_v22 }
  0x1a   : > { %487 = vmatpush1.msra.mxu0 %v4891_v14  ;;  %7480 = vst [vmem:[#allocation16_spill] sm:$0xff] %v4912_v23  ;;  %7481 = vst [vmem:[#allocation17_spill] sm:$0xff] %v4915_v24 }
  0x1b   : > { %488 = vmatprep.subr.mxu0 %v4894_v16 }
  0x1c   : > { %489 = vmatpush1.msra.mxu0 %v4897_v17 }
  0x1d   : > { %490 = vmatprep.subr.mxu0 %v4900_v19 }
  0x1e   : > { %491 = vmatpush1.msra.mxu0 %v4903_v20 }
  0x1f   : > { %492 = vmatprep.subr.mxu0 %v4906_v21 }
  0x20   : > { %493 = vmatpush1.msra.mxu0 %v4909_v22 }
  0x21   : > { %494 = vmatprep.subr.mxu0 %v4912_v23 }
  0x22   : > { %495 = vmatpush1.msra.mxu0 %v4915_v24 }
  0x23   : > { %4251 = vmatmul.mubr.msk.f32.vlgmr.msra.gmra.mxu0 %vm439_vm0, %v4922_v25 }
  0x24   : > { %534 = vmatprep.mubr.f32.mxu0 %v7441_v0 }
  0x27   : > { %4252 = vmatmul.mubr.msk.f32.gmra.mxu0 %vm439_vm0, %v4932_v26 }
  0x28   : > { %540 = vmatprep.mubr.f32.mxu0 %v7441_v0 }
  0x2b   : > { %4253 = vmatmul.mubr.msk.f32.gmra.mxu0 %vm439_vm0, %v4940_v27 }
  0x2c   : > { %546 = vmatprep.mubr.f32.mxu0 %v7441_v0 }
  0x2f   : > { %4254 = vmatmul.mubr.msk.f32.gmra.mxu0 %vm439_vm0, %v4948_v28 }
  0x30   : > { %552 = vmatprep.mubr.f32.mxu0 %v7441_v0 }
  0x33   : > { %4255 = vmatmul.mubr.msk.f32.gmra.mxu0 %vm439_vm0, %v4956_v29 }
  0x34   : > { %558 = vmatprep.mubr.f32.mxu0 %v7441_v0 }
  0x37   : > { %4256 = vmatmul.mubr.msk.f32.gmra.mxu0 %vm439_vm0, %v4964_v30 }
  0x38   : > { %564 = vmatprep.mubr.f32.mxu0 %v7441_v0 }
  0x3b   : > { %4257 = vmatmul.mubr.msk.f32.gmra.mxu0 %vm439_vm0, %v4972_v31 }
  0x3c   : > { %570 = vmatprep.mubr.f32.mxu0 %v7441_v0 }
  0x3f   : > { %4258 = vmatmul.mubr.msk.f32.gmra.mxu0 %vm439_vm0, %v4980_v32 }
  0xe3   : > { %v530_v33 = vpop.f32.mrf.mxu0 }
  0xe5   : > { %v532_v34 = vpop.f32.mrf.mxu0 }
  0xe6   : > { %v577_v53 = vadd.f32 %v532_v34, %v530_v33 }
  0xe7   : > { %v536_v35 = vpop.f32.mrf.mxu0 }
  0xe9   : > { %v538_v36 = vpop.f32.mrf.mxu0 }
  0xea   : > { %v580_v56 = vadd.f32 %v538_v36, %v536_v35 }
  0xeb   : > { %v542_v37 = vpop.f32.mrf.mxu0 }
  0xed   : > { %v544_v38 = vpop.f32.mrf.mxu0 }
  0xee   : > { %v583_v51 = vadd.f32 %v544_v38, %v542_v37 }
  0xef   : > { %v548_v39 = vpop.f32.mrf.mxu0 }
  0xf1   : > { %v550_v40 = vpop.f32.mrf.mxu0 }
  0xf2   : > { %v586_v55 = vadd.f32 %v550_v40, %v548_v39 }
  0xf3   : > { %v554_v41 = vpop.f32.mrf.mxu0 }
  0xf5   : > { %v556_v42 = vpop.f32.mrf.mxu0 }
  0xf6   : > { %v589_v48 = vadd.f32 %v556_v42, %v554_v41 }
  0xf7   : > { %v560_v43 = vpop.f32.mrf.mxu0 }
  0xf9   : > { %v562_v44 = vpop.f32.mrf.mxu0 }
  0xfa   : > { %v592_v45 = vadd.f32 %v562_v44, %v560_v43 }
  0xfb   : > { %v566_v46 = vpop.f32.mrf.mxu0 }
  0xfc   : > { %593 = vadd.xlane.f32.xlu1 %v592_v45 }
  0xfd   : > { %v568_v47 = vpop.f32.mrf.mxu0 }
  0xfe   : > { %v595_v54 = vadd.f32 %v568_v47, %v566_v46 }
  0xff   : > { %v572_v49 = vpop.f32.mrf.mxu0 }
 0x100   : > { %590 = vadd.xlane.f32.xlu1 %v589_v48 }
 0x101   : > { %v574_v50 = vpop.f32.mrf.mxu0 }
 0x102   : > { %v598_v52 = vadd.f32 %v574_v50, %v572_v49 }
 0x104   : > { %584 = vadd.xlane.f32.xlu1 %v583_v51  ;;  %599 = vadd.xlane.f32.xlu0 %v598_v52 }
 0x108   : > { %578 = vadd.xlane.f32.xlu1 %v577_v53  ;;  %596 = vadd.xlane.f32.xlu0 %v595_v54 }
 0x10c   : > { %587 = vadd.xlane.f32.xlu0 %v586_v55 }
 0x110   : > { %581 = vadd.xlane.f32.xlu0 %v580_v56 }
 0x119   : > { %856 = vperm.xlu1 %4465, %v430_v57  }
 0x11d   : > { %907 = vperm.xlu1 %4465, %v437_v60  }
 0x121   : > { %912 = vperm.xlu1 %4465, %v438_v61  }
 0x125   : > { %841 = vperm.xlu1 %4465, %v427_v62  }
 0x126   : > { %851 = vperm.xlu0 %4464, %v429_v59  }
 0x129   : > { %846 = vperm.xlu1 %4465, %v428_v63  }
 0x12d   : > { %897 = vperm.xlu1 %4465, %v435_v1  }
 0x131   : > { %902 = vperm.xlu1 %4465, %v436_v2  }
 0x135   : > { %831 = vperm.xlu1 %4465, %v425_v3  }
 0x185   : > { %v594_v8 = vpop.xlane.xlu1 %593 }
 0x186   : > { %v607_v18 = vmul.f32 0.00390625, %v594_v8 }
 0x188   : > { %v5024_v41 = vsub.f32 %v4882_v10, %v607_v18  ;;  %v5033_v44 = vsub.f32 %v4885_v11, %v607_v18 }
 0x189   : > { %v591_v9 = vpop.xlane.xlu1 %590 }
 0x18a   : > { %v606_v35 = vmul.f32 0.00390625, %v591_v9  ;;  %v637_v54 = vmul.f32 %v5024_v41, %v5024_v41  ;;  %v636_v57 = vmul.f32 %v5033_v44, %v5033_v44 }
 0x18c   : > { %v5036_v45 = vsub.f32 %v4888_v13, %v606_v35  ;;  %v5043_v51 = vsub.f32 %v4891_v14, %v606_v35 }
 0x18d   : > { %v600_v12 = vpop.xlane.xlu0 %599  ;;  %v585_v36 = vpop.xlane.xlu1 %584 }
 0x18e   : > { %v609_v15 = vmul.f32 0.00390625, %v600_v12  ;;  %v604_v47 = vmul.f32 0.00390625, %v585_v36  ;;  %v635_v62 = vmul.f32 %v5036_v45, %v5036_v45  ;;  %v634_v1 = vmul.f32 %v5043_v51, %v5043_v51 }
 0x190   : > { %v5014_v33 = vsub.f32 %v4873_v4, %v609_v15  ;;  %v5017_v34 = vsub.f32 %v4875_v5, %v609_v15  ;;  %v5056_v59 = vsub.f32 %v4900_v19, %v604_v47  ;;  %v5061_v63 = vsub.f32 %v4903_v20, %v604_v47 }
 0x191   : > { %v597_v37 = vpop.xlane.xlu0 %596  ;;  %v579_v52 = vpop.xlane.xlu1 %578 }
 0x192   : > { %v608_v38 = vmul.f32 0.00390625, %v597_v37  ;;  %v641_v39 = vmul.f32 %v5014_v33, %v5014_v33  ;;  %v640_v40 = vmul.f32 %v5017_v34, %v5017_v34  ;;  %v602_v60 = vmul.f32 0.00390625, %v579_v52 }
 0x193   : > { %v631_v15 = vmul.f32 %v5056_v59, %v5056_v59  ;;  %v630_v35 = vmul.f32 %v5061_v63, %v5061_v63 }
 0x194   : > { %v5027_v42 = vsub.f32 %v4879_v7, %v608_v38  ;;  %v5030_v43 = vsub.f32 %v4877_v6, %v608_v38  ;;  %658 = vmatprep.subr.mxu1 %v641_v39  ;;  %v5076_v12 = vsub.f32 %v4912_v23, %v602_v60  ;;  %v5081_v18 = vsub.f32 %v4915_v24, %v602_v60 }
 0x195   : > { %659 = vmatpush1.msra.mxu1 %v640_v40  ;;  %v588_v46 = vpop.xlane.xlu0 %587 }
 0x196   : > { %v605_v48 = vmul.f32 0.00390625, %v588_v46  ;;  %v639_v49 = vmul.f32 %v5030_v43, %v5030_v43  ;;  %v638_v50 = vmul.f32 %v5027_v42, %v5027_v42  ;;  %v627_v38 = vmul.f32 %v5076_v12, %v5076_v12 }
 0x197   : > { %v626_v39 = vmul.f32 %v5081_v18, %v5081_v18 }
 0x198   : > { %v5046_v53 = vsub.f32 %v4894_v16, %v605_v48  ;;  %660 = vmatprep.subr.mxu1 %v639_v49  ;;  %v5051_v55 = vsub.f32 %v4897_v17, %v605_v48 }
 0x199   : > { %661 = vmatpush1.msra.mxu1 %v638_v50  ;;  %v582_v56 = vpop.xlane.xlu0 %581 }
 0x19a   : > { %v603_v61 = vmul.f32 0.00390625, %v582_v56  ;;  %662 = vmatprep.subr.mxu1 %v637_v54  ;;  %v633_v3 = vmul.f32 %v5046_v53, %v5046_v53  ;;  %v632_v9 = vmul.f32 %v5051_v55, %v5051_v55 }
 0x19b   : > { %663 = vmatpush1.msra.mxu1 %v636_v57 }
 0x19c   : > { %v5066_v2 = vsub.f32 %v4906_v21, %v603_v61  ;;  %664 = vmatprep.subr.mxu1 %v635_v62  ;;  %v5071_v8 = vsub.f32 %v4909_v22, %v603_v61 }
 0x19d   : > { %665 = vmatpush1.msra.mxu1 %v634_v1 }
 0x19e   : > { %666 = vmatprep.subr.mxu1 %v633_v3  ;;  %v629_v36 = vmul.f32 %v5066_v2, %v5066_v2  ;;  %v628_v37 = vmul.f32 %v5071_v8, %v5071_v8 }
 0x19f   : > { %667 = vmatpush1.msra.mxu1 %v632_v9 }
 0x1a0   : > { %668 = vmatprep.subr.mxu1 %v631_v15  ;;  %v433_v15 = vld [vmem:[%s7434_s5 + $0x10] sm:$0xff] }
 0x1a1   : > { %669 = vmatpush1.msra.mxu1 %v630_v35  ;;  %v426_v35 = vld [vmem:[%s7433_s4 + $0x18] sm:$0xff] }
 0x1a2   : > { %670 = vmatprep.subr.mxu1 %v629_v36  ;;  %v423_v36 = vld [vmem:[%s7433_s4] sm:$0xff] }
 0x1a3   : > { %671 = vmatpush1.msra.mxu1 %v628_v37  ;;  %v434_v37 = vld [vmem:[%s7434_s5 + $0x18] sm:$0xff] }
 0x1a4   : > { %672 = vmatprep.subr.mxu1 %v627_v38  ;;  %v431_v38 = vld [vmem:[%s7434_s5] sm:$0xff] }
 0x1a5   : > { %673 = vmatpush1.msra.mxu1 %v626_v39  ;;  %v424_v39 = vld [vmem:[%s7433_s4 + $0x8] sm:$0xff] }
 0x1a6   : > { %4259 = vmatmul.mubr.msk.f32.vlgmr.msra.gmra.mxu1 %vm439_vm0, %v4922_v25 }
 0x1a7   : > { %712 = vmatprep.mubr.f32.mxu1 %v7441_v0 }
 0x1aa   : > { %4260 = vmatmul.mubr.msk.f32.gmra.mxu1 %vm439_vm0, %v4932_v26 }
 0x1ab   : > { %718 = vmatprep.mubr.f32.mxu1 %v7441_v0 }
 0x1ae   : > { %4261 = vmatmul.mubr.msk.f32.gmra.mxu1 %vm439_vm0, %v4940_v27 }
 0x1af   : > { %724 = vmatprep.mubr.f32.mxu1 %v7441_v0 }
 0x1b2   : > { %4262 = vmatmul.mubr.msk.f32.gmra.mxu1 %vm439_vm0, %v4948_v28 }
 0x1b3   : > { %730 = vmatprep.mubr.f32.mxu1 %v7441_v0 }
 0x1b6   : > { %4263 = vmatmul.mubr.msk.f32.gmra.mxu1 %vm439_vm0, %v4956_v29 }
 0x1b7   : > { %736 = vmatprep.mubr.f32.mxu1 %v7441_v0 }
 0x1ba   : > { %4264 = vmatmul.mubr.msk.f32.gmra.mxu1 %vm439_vm0, %v4964_v30 }
 0x1bb   : > { %742 = vmatprep.mubr.f32.mxu1 %v7441_v0 }
 0x1be   : > { %4265 = vmatmul.mubr.msk.f32.gmra.mxu1 %vm439_vm0, %v4972_v31 }
 0x1bf   : > { %748 = vmatprep.mubr.f32.mxu1 %v7441_v0 }
 0x1c2   : > { %4266 = vmatmul.mubr.msk.f32.gmra.mxu1 %vm439_vm0, %v4980_v32 }
 0x266   : > { %v708_v25 = vpop.f32.mrf.mxu1 }
 0x268   : > { %v710_v26 = vpop.f32.mrf.mxu1 }
 0x269   : > { %v755_v27 = vadd.f32 %v710_v26, %v708_v25  ;;  %v432_v25 = vld [vmem:[%s7434_s5 + $0x8] sm:$0xff]  ;;  %v5137_v26 = vpop.permute.xlu1 %856 }
 0x26a   : > { %v714_v28 = vpop.f32.mrf.mxu1 }
 0x26b   : > { %756 = vadd.xlane.f32.xlu0 %v755_v27 }
 0x26c   : > { %v716_v29 = vpop.f32.mrf.mxu1 }
 0x26d   : > { %v758_v40 = vadd.f32 %v716_v29, %v714_v28  ;;  %v5139_v27 = vpop.permute.xlu1 %907 }
 0x26e   : > { %v720_v46 = vpop.f32.mrf.mxu1 }
 0x26f   : > { %759 = vadd.xlane.f32.xlu1 %v758_v40 }
 0x270   : > { %v722_v30 = vpop.f32.mrf.mxu1 }
 0x271   : > { %v761_v47 = vadd.f32 %v722_v30, %v720_v46  ;;  %v5141_v28 = vpop.permute.xlu1 %912 }
 0x272   : > { %v726_v48 = vpop.f32.mrf.mxu1 }
 0x273   : > { %762 = vadd.xlane.f32.xlu0 %v761_v47  ;;  %v5151_v47 = vpop.permute.xlu0 %851 }
 0x274   : > { %v728_v49 = vpop.f32.mrf.mxu1 }
 0x275   : > { %v764_v31 = vadd.f32 %v728_v49, %v726_v48  ;;  %v5143_v29 = vpop.permute.xlu1 %841 }
 0x276   : > { %v732_v50 = vpop.f32.mrf.mxu1 }
 0x277   : > { %765 = vadd.xlane.f32.xlu1 %v764_v31 }
 0x278   : > { %v734_v52 = vpop.f32.mrf.mxu1 }
 0x279   : > { %v767_v54 = vadd.f32 %v734_v52, %v732_v50  ;;  %v5145_v40 = vpop.permute.xlu1 %846 }
 0x27a   : > { %v738_v32 = vpop.f32.mrf.mxu1 }
 0x27b   : > { %768 = vadd.xlane.f32.xlu0 %v767_v54 }
 0x27c   : > { %v740_v56 = vpop.f32.mrf.mxu1 }
 0x27d   : > { %v770_v57 = vadd.f32 %v740_v56, %v738_v32  ;;  %v5147_v46 = vpop.permute.xlu1 %897 }
 0x27e   : > { %v744_v60 = vpop.f32.mrf.mxu1 }
 0x27f   : > { %771 = vadd.xlane.f32.xlu1 %v770_v57 }
 0x280   : > { %v746_v61 = vpop.f32.mrf.mxu1 }
 0x281   : > { %v773_v62 = vadd.f32 %v746_v61, %v744_v60  ;;  %v5149_v30 = vpop.permute.xlu1 %902 }
 0x282   : > { %v750_v1 = vpop.f32.mrf.mxu1 }
 0x283   : > { %774 = vadd.xlane.f32.xlu0 %v773_v62 }
 0x284   : > { %v752_v3 = vpop.f32.mrf.mxu1 }
 0x285   : > { %v776_v9 = vadd.f32 %v752_v3, %v750_v1  ;;  %v832_v48 = vpop.permute.xlu1 %831 }
 0x287   : > { %777 = vadd.xlane.f32.xlu1 %v776_v9 }
 0x298   : > { %887 = vperm.xlu1 %4465, %v433_v15  }
 0x299   : > { %836 = vperm.xlu0 %4464, %v426_v35  }
 0x29c   : > { %821 = vperm.xlu1 %4465, %v423_v36  }
 0x29d   : > { %892 = vperm.xlu0 %4464, %v434_v37  }
 0x2a0   : > { %877 = vperm.xlu1 %4465, %v431_v38  }
 0x2a1   : > { %826 = vperm.xlu0 %4464, %v424_v39  }
 0x2a5   : > { %882 = vperm.xlu0 %4464, %v432_v25  }
 0x2f4   : > { %v757_v49 = vpop.xlane.xlu0 %756 }
 0x2f5   : > { %v779_v54 = vmul.f32 0.00390625, %v757_v49 }
 0x2f7   : > { %v787_v61 = vadd.f32 1e-06, %v779_v54 }
 0x2f8   : > { %v760_v31 = vpop.xlane.xlu1 %759 }
 0x2f9   : > { %v780_v56 = vmul.f32 0.00390625, %v760_v31 }
 0x2fb   : > { %v788_v1 = vadd.f32 1e-06, %v780_v56 }
 0x2fc   : > { %v763_v50 = vpop.xlane.xlu0 %762 }
 0x2fd   : > { %v781_v52 = vmul.f32 0.00390625, %v763_v50 }
 0x2ff   : > { %v789_v32 = vadd.f32 1e-06, %v781_v52 }
 0x300   : > { %v766_v57 = vpop.xlane.xlu1 %765 }
 0x301   : > { %4578 = vrsqrt.f32 %v789_v32  ;;  %v782_v60 = vmul.f32 0.00390625, %v766_v57 }
 0x303   : > { %v790_v62 = vadd.f32 1e-06, %v782_v60 }
 0x304   : > { %v769_v3 = vpop.xlane.xlu0 %768 }
 0x305   : > { %4580 = vrsqrt.f32 %v790_v62  ;;  %v783_v9 = vmul.f32 0.00390625, %v769_v3 }
 0x306   : > { %4582 = vrsqrt.f32 %v787_v61 }
 0x307   : > { %v791_v15 = vadd.f32 1e-06, %v783_v9  ;;  %4584 = vrsqrt.f32 %v788_v1 }
 0x308   : > { %v772_v35 = vpop.xlane.xlu1 %771 }
 0x309   : > { %4586 = vrsqrt.f32 %v791_v15  ;;  %v784_v36 = vmul.f32 0.00390625, %v772_v35 }
 0x30b   : > { %v792_v37 = vadd.f32 1e-06, %v784_v36 }
 0x30c   : > { %v775_v38 = vpop.xlane.xlu0 %774 }
 0x30d   : > { %4588 = vrsqrt.f32 %v792_v37  ;;  %v785_v39 = vmul.f32 0.00390625, %v775_v38 }
 0x30e   : > { %v4579_v25 = vpop.eup %4578 }
 0x30f   : > { %v793_v49 = vadd.f32 1e-06, %v785_v39  ;;  %v807_v31 = vmul.f32 %v4579_v25, %v5061_v63  ;;  %v808_v50 = vmul.f32 %v4579_v25, %v5056_v59 }
 0x310   : > { %v778_v52 = vpop.xlane.xlu1 %777 }
 0x311   : > { %4590 = vrsqrt.f32 %v793_v49  ;;  %v786_v54 = vmul.f32 0.00390625, %v778_v52  ;;  %v863_v60 = vmul.f32 %v832_v48, %v807_v31  ;;  %v864_v61 = vmul.f32 %v832_v48, %v808_v50 }
 0x312   : > { %v4581_v32 = vpop.eup %4580 }
 0x313   : > { %v4583_v56 = vpop.eup %4582  ;;  %v794_v57 = vadd.f32 1e-06, %v786_v54  ;;  %v809_v1 = vmul.f32 %v4581_v32, %v5051_v55  ;;  %v810_v3 = vmul.f32 %v4581_v32, %v5046_v53 }
 0x314   : > { %v888_v62 = vpop.permute.xlu1 %887  ;;  %v837_v9 = vpop.permute.xlu0 %836  ;;  %v803_v36 = vmul.f32 %v4583_v56, %v5081_v18  ;;  %v804_v49 = vmul.f32 %v4583_v56, %v5076_v12 }
 0x315   : > { %v4585_v15 = vpop.eup %4584  ;;  %4592 = vrsqrt.f32 %v794_v57  ;;  %v5157_v35 = vadd.f32 %v888_v62, %v863_v60  ;;  %v5159_v63 = vadd.f32 %v888_v62, %v864_v61  ;;  %v865_v39 = vmul.f32 %v837_v9, %v809_v1 }
 0x316   : > { %v4587_v59 = vpop.eup %4586  ;;  %v866_v53 = vmul.f32 %v837_v9, %v810_v3  ;;  %v805_v50 = vmul.f32 %v4585_v15, %v5071_v8  ;;  %v806_v18 = vmul.f32 %v4585_v15, %v5066_v2 }
 0x317   : > { %v935_v37 = vsub.f32 0.0, %v5157_v35  ;;  %v936_v38 = vsub.f32 0.0, %v5159_v63  ;;  %v812_v48 = vmul.f32 %v4587_v59, %v5036_v45  ;;  %v811_v55 = vmul.f32 %v4587_v59, %v5043_v51 }
 0x318   : > { %v822_v25 = vpop.permute.xlu1 %821  ;;  %v893_v31 = vpop.permute.xlu0 %892 }
 0x319   : > { %v955_v52 = vmul.f32 1.442695, %v935_v37  ;;  %v957_v54 = vmul.f32 1.442695, %v936_v38  ;;  %v859_v32 = vmul.f32 %v822_v25, %v803_v36  ;;  %v860_v60 = vmul.f32 %v822_v25, %v804_v49 }
 0x31a   : > { %v4589_v57 = vpop.eup %4588  ;;  %v5169_v61 = vadd.f32 %v893_v31, %v865_v39  ;;  %v5171_v45 = vadd.f32 %v893_v31, %v866_v53  ;;  %v868_v51 = vmul.f32 %v5143_v29, %v812_v48  ;;  %v867_v8 = vmul.f32 %v5143_v29, %v811_v55 }
 0x31b   : > { %4594 = vpow2.f32 %v955_v52  ;;  %v814_v62 = vmul.f32 %v4589_v57, %v5024_v41  ;;  %v813_v12 = vmul.f32 %v4589_v57, %v5033_v44 }
 0x31c   : > { %4596 = vpow2.f32 %v957_v54  ;;  %v937_v56 = vsub.f32 0.0, %v5169_v61  ;;  %v938_v2 = vsub.f32 0.0, %v5171_v45  ;;  %v878_v1 = vpop.permute.xlu1 %877  ;;  %v827_v3 = vpop.permute.xlu0 %826  ;;  %v5180_v9 = vadd.f32 %v5147_v46, %v868_v51 }
 0x31d   : > { %v5182_v15 = vadd.f32 %v878_v1, %v859_v32  ;;  %v5184_v59 = vadd.f32 %v878_v1, %v860_v60  ;;  %v861_v36 = vmul.f32 %v827_v3, %v805_v50  ;;  %v862_v41 = vmul.f32 %v827_v3, %v806_v18 }
 0x31e   : > { %v4591_v37 = vpop.eup %4590  ;;  %v959_v44 = vmul.f32 1.442695, %v937_v56  ;;  %v961_v38 = vmul.f32 1.442695, %v938_v2  ;;  %v870_v29 = vmul.f32 %v5145_v40, %v814_v62  ;;  %v940_v48 = vsub.f32 0.0, %v5180_v9 }
 0x31f   : > { %v931_v55 = vsub.f32 0.0, %v5182_v15  ;;  %v932_v39 = vsub.f32 0.0, %v5184_v59  ;;  %v816_v53 = vmul.f32 %v4591_v37, %v5030_v43  ;;  %v815_v25 = vmul.f32 %v4591_v37, %v5027_v42 }
 0x320   : > { %4598 = vpow2.f32 %v959_v44  ;;  %v883_v49 = vpop.permute.xlu0 %882  ;;  %v5193_v31 = vadd.f32 %v5149_v30, %v870_v29  ;;  %v965_v50 = vmul.f32 1.442695, %v940_v48  ;;  %v869_v52 = vmul.f32 %v5145_v40, %v813_v12 }
 0x321   : > { %4600 = vpow2.f32 %v961_v38  ;;  %v947_v54 = vmul.f32 1.442695, %v931_v55  ;;  %v949_v32 = vmul.f32 1.442695, %v932_v39  ;;  %v5196_v18 = vadd.f32 %v883_v49, %v861_v36 }
 0x322   : > { %v4593_v57 = vpop.eup %4592  ;;  %v5198_v60 = vadd.f32 %v883_v49, %v862_v41  ;;  %v872_v43 = vmul.f32 %v5151_v47, %v816_v53  ;;  %v871_v42 = vmul.f32 %v5151_v47, %v815_v25  ;;  %v942_v51 = vsub.f32 0.0, %v5193_v31 }
 0x323   : > { %4602 = vpow2.f32 %v947_v54  ;;  %v933_v62 = vsub.f32 0.0, %v5196_v18  ;;  %v818_v56 = vmul.f32 %v4593_v57, %v5014_v33  ;;  %v817_v40 = vmul.f32 %v4593_v57, %v5017_v34 }
 0x324   : > { %4604 = vpow2.f32 %v949_v32  ;;  %v934_v12 = vsub.f32 0.0, %v5198_v60  ;;  %v5208_v2 = vadd.f32 %v5139_v27, %v872_v43  ;;  %v5211_v1 = vadd.f32 %v5139_v27, %v871_v42 }
 0x325   : > { %v951_v3 = vmul.f32 1.442695, %v933_v62  ;;  %v874_v47 = vmul.f32 %v5137_v26, %v818_v56  ;;  %v873_v36 = vmul.f32 %v5137_v26, %v817_v40  ;;  %4606 = vpow2.f32 %v965_v50 }
 0x326   : > { %v953_v41 = vmul.f32 1.442695, %v934_v12  ;;  %v944_v33 = vsub.f32 0.0, %v5208_v2  ;;  %v943_v34 = vsub.f32 0.0, %v5211_v1  ;;  %v969_v37 = vmul.f32 1.442695, %v942_v51 }
 0x327   : > { %4608 = vpow2.f32 %v951_v3  ;;  %v5218_v44 = vadd.f32 %v5141_v28, %v874_v47  ;;  %v5221_v38 = vadd.f32 %v5141_v28, %v873_v36  ;;  %v5224_v27 = vadd.f32 %v5147_v46, %v867_v8 }
 0x328   : > { %v4595_v29 = vpop.eup %4594  ;;  %4610 = vpow2.f32 %v953_v41  ;;  %v973_v26 = vmul.f32 1.442695, %v944_v33  ;;  %v971_v48 = vmul.f32 1.442695, %v943_v34  ;;  %v5229_v50 = vadd.f32 %v5149_v30, %v869_v52 }
 0x329   : > { %v4597_v55 = vpop.eup %4596  ;;  %v983_v39 = vadd.f32 1.0, %v4595_v29  ;;  %v946_v53 = vsub.f32 0.0, %v5218_v44  ;;  %v945_v25 = vsub.f32 0.0, %v5221_v38  ;;  %4612 = vpow2.f32 %v969_v37 }
 0x32a   : > { %v984_v49 = vadd.f32 1.0, %v4597_v55  ;;  %4614 = vpow2.f32 %v973_v26  ;;  %v939_v28 = vsub.f32 0.0, %v5224_v27  ;;  %v941_v43 = vsub.f32 0.0, %v5229_v50 }
 0x32b   : > { %4616 = vrcp.f32 %v983_v39  ;;  %v977_v46 = vmul.f32 1.442695, %v946_v53  ;;  %v975_v8 = vmul.f32 1.442695, %v945_v25  ;;  %v1060_v30 = vlaneseq }
 0x32c   : > { %4618 = vrcp.f32 %v984_v49  ;;  %v963_v42 = vmul.f32 1.442695, %v939_v28  ;;  %v967_v3 = vmul.f32 1.442695, %v941_v43  ;;  %v4250_v28 = vld [vmem:[%s7430_s1 + $0x2] sm:$0x3] }
 0x32d   : > { %v4599_v54 = vpop.eup %4598  ;;  %4620 = vpow2.f32 %v977_v46  ;;  %v5233_v41 = vshrl.u32 %v1060_v30, 7 }
 0x32e   : > { %v4601_v32 = vpop.eup %4600  ;;  %v985_v57 = vadd.f32 1.0, %v4599_v54  ;;  %4622 = vpow2.f32 %v971_v48 }
 0x32f   : > { %v986_v51 = vadd.f32 1.0, %v4601_v32  ;;  %4624 = vpow2.f32 %v975_v8  ;;  %v1062_v53 = vsub.s32 0, %v5233_v41  ;;  %v1066_v49 = vsub.s32 1, %v5233_v41 }
 0x330   : > { %v4603_v62 = vpop.eup %4602  ;;  %4626 = vrcp.f32 %v985_v57 }
 0x331   : > { %v4605_v52 = vpop.eup %4604  ;;  %4628 = vrcp.f32 %v986_v51  ;;  %v979_v56 = vadd.f32 1.0, %v4603_v62 }
 0x332   : > { %v4607_v40 = vpop.eup %4606  ;;  %v980_v12 = vadd.f32 1.0, %v4605_v52  ;;  %4630 = vpow2.f32 %v963_v42  ;;  %v5245_v42 = vrot.slane %v4250_v28, %v1062_v53  ;;  %v5252_v52 = vrot.slane %v4250_v28, %v1066_v49 }
 0x333   : > { %4632 = vrcp.f32 %v979_v56  ;;  %v988_v47 = vadd.f32 1.0, %v4607_v40 }
 0x334   : > { %v4609_v36 = vpop.eup %4608  ;;  %4634 = vrcp.f32 %v980_v12 }
 0x335   : > { %v4611_v33 = vpop.eup %4610  ;;  %v981_v34 = vadd.f32 1.0, %v4609_v36  ;;  %4636 = vrcp.f32 %v988_v47 }
 0x336   : > { %v4613_v37 = vpop.eup %4612  ;;  %v982_v29 = vadd.f32 1.0, %v4611_v33  ;;  %4638 = vpow2.f32 %v967_v3 }
 0x337   : > { %v4615_v26 = vpop.eup %4614  ;;  %4640 = vrcp.f32 %v981_v34  ;;  %v990_v48 = vadd.f32 1.0, %v4613_v37 }
 0x338   : > { %v4617_v55 = vpop.eup %4616  ;;  %4642 = vrcp.f32 %v982_v29  ;;  %v992_v39 = vadd.f32 1.0, %v4615_v26 }
 0x339   : > { %v4619_v25 = vpop.eup %4618  ;;  %4644 = vrcp.f32 %v990_v48  ;;  %v5241_v57 = vmul.f32 %v4617_v55, %v5157_v35 }
 0x33a   : > { %v4621_v46 = vpop.eup %4620  ;;  %4646 = vrcp.f32 %v992_v39  ;;  %v5248_v62 = vmul.f32 %v4619_v25, %v5159_v63 }
 0x33b   : > { %v4623_v8 = vpop.eup %4622  ;;  %v994_v54 = vadd.f32 1.0, %v4621_v46  ;;  %v5262_v63 = vmul.f32 %v5245_v42, %v5241_v57 }
 0x33c   : > { %v4625_v32 = vpop.eup %4624  ;;  %v991_v43 = vadd.f32 1.0, %v4623_v8 }
 0x33d   : > { %v4627_v51 = vpop.eup %4626  ;;  %4648 = vrcp.f32 %v994_v54  ;;  %v993_v30 = vadd.f32 1.0, %v4625_v32 }
 0x33e   : > { %v4629_v56 = vpop.eup %4628  ;;  %v5255_v40 = vmul.f32 %v4627_v51, %v5169_v61  ;;  %4650 = vrcp.f32 %v991_v43  ;;  %v5270_v61 = vmul.f32 %v5252_v52, %v5248_v62 }
 0x33f   : > { %v4631_v35 = vpop.eup %4630  ;;  %v5258_v12 = vmul.f32 %v4629_v56, %v5171_v45  ;;  %4652 = vrcp.f32 %v993_v30 }
 0x340   : > { %v4633_v3 = vpop.eup %4632  ;;  %v987_v47 = vadd.f32 1.0, %v4631_v35  ;;  %v5266_v36 = vmul.f32 %v5245_v42, %v5255_v40  ;;  %v412_v35 = vld [vmem:[%s7430_s1] sm:$0x3] }
 0x341   : > { %v4635_v33 = vpop.eup %4634  ;;  %v5274_v45 = vmul.f32 %v5252_v52, %v5258_v12  ;;  %v5284_v28 = vmul.f32 %v4633_v3, %v5182_v15  ;;  %v1054_v37 = vpack.c.bf16 %v5258_v12, %v5248_v62 }
 0x342   : > { %v4637_v34 = vpop.eup %4636  ;;  %4654 = vrcp.f32 %v987_v47  ;;  %v5281_v55 = vmul.f32 %v4635_v33, %v5184_v59 }
 0x343   : > { %v4639_v29 = vpop.eup %4638  ;;  %v5290_v8 = vmul.f32 %v4637_v34, %v5180_v9 }
 0x344   : > { %v4641_v48 = vpop.eup %4640  ;;  %v989_v39 = vadd.f32 1.0, %v4639_v29  ;;  %v5302_v15 = vmul.f32 %v5252_v52, %v5281_v55 }
 0x345   : > { %v4643_v25 = vpop.eup %4642  ;;  %v5287_v46 = vmul.f32 %v4641_v48, %v5196_v18  ;;  %v5310_v18 = vmul.f32 %v5252_v52, %v5290_v8 }
 0x346   : > { %v4645_v54 = vpop.eup %4644  ;;  %v5293_v32 = vmul.f32 %v4643_v25, %v5198_v60  ;;  %4656 = vrcp.f32 %v989_v39 }
 0x347   : > { %v4647_v43 = vpop.eup %4646  ;;  %v1038_v59 = vmul.f32 %v4645_v54, %v5193_v31  ;;  %v5298_v51 = vmul.f32 %v5245_v42, %v5287_v46  ;;  %v5317_v31 = vmul.f32 %v5245_v42, %v5284_v28 }
 0x348   : > { %v5306_v9 = vmul.f32 %v5252_v52, %v5293_v32  ;;  %v5320_v56 = vmul.f32 %v4647_v43, %v5208_v2 }
 0x349   : > { %v5313_v60 = vmul.f32 %v5252_v52, %v1038_v59 }
 0x34a   : > { %v4649_v30 = vpop.eup %4648  ;;  %v5337_v54 = vmul.f32 %v5252_v52, %v5320_v56 }
 0x34b   : > { %v4651_v3 = vpop.eup %4650  ;;  %v1042_v47 = vmul.f32 %v4649_v30, %v5218_v44 }
 0x34c   : > { %v4653_v29 = vpop.eup %4652  ;;  %v1039_v48 = vmul.f32 %v4651_v3, %v5211_v1  ;;  %v1056_v3 = vpack.c.bf16 %v1038_v59, %v5290_v8 }
 0x34d   : > { %v1058_v39 = vpack.c.bf16 %v1042_v47, %v5320_v56  ;;  %v1041_v2 = vmul.f32 %v4653_v29, %v5221_v38  ;;  %v5333_v25 = vmul.f32 %v5252_v52, %v1042_v47 }
 0x34e   : > { %v5341_v30 = vmul.f32 %v5245_v42, %v1039_v48 }
 0x34f   : > { %v4655_v44 = vpop.eup %4654  ;;  %1151 = vrot.lane.b32.xlu0 %v1058_v39, %s4788_s25  ;;  %v1057_v43 = vpack.c.bf16 %v1041_v2, %v1039_v48  ;;  %v5344_v1 = vmul.f32 %v5245_v42, %v1041_v2  ;;  %v1128_v38 = vpack.c.bf16 %v5333_v25, %v5337_v54  ;;  %v7485_v25 = vpack.c.bf16 %v5266_v36, %v5262_v63 }
 0x350   : > { %v1035_v0 = vmul.f32 %v4655_v44, %v5224_v27  ;;  %v5369_v27 = vrot.slane %v412_v35, %v1062_v53  ;;  %v1052_v44 = vpack.c.bf16 %v5293_v32, %v5281_v55 }
 0x351   : > { %1149 = vrot.lane.b32.xlu1 %v1057_v43, %s4788_s25  ;;  %v1127_v29 = vpack.c.bf16 %v5344_v1, %v5341_v30 }
 0x352   : > { %v5361_v26 = vmul.f32 %v5245_v42, %v1035_v0  ;;  %v1072_v41 = vmul.f32 %v5369_v27, %v5287_v46 }
 0x353   : > { %v4657_v39 = vpop.eup %4656  ;;  %1147 = vrot.lane.b32.xlu0 %v1056_v3, %s4788_s25 }
 0x354   : > { %v1037_v34 = vmul.f32 %v4657_v39, %v5229_v50  ;;  %v1053_v39 = vpack.c.bf16 %v5255_v40, %v5241_v57  ;;  %v1051_v50 = vpack.c.bf16 %v5287_v46, %v5284_v28 }
 0x356   : > { %v1055_v43 = vpack.c.bf16 %v1037_v34, %v1035_v0  ;;  %v5364_v33 = vmul.f32 %v5245_v42, %v1037_v34  ;;  %v1080_v3 = vmul.f32 %v5369_v27, %v1037_v34  ;;  %v1074_v34 = vmul.f32 %v5369_v27, %v5241_v57 }
 0x357   : > { %1143 = vrot.lane.b32.xlu0 %v1054_v37, %s4788_s25  ;;  %v1078_v37 = vmul.f32 %v5369_v27, %v1035_v0  ;;  %v5392_v0 = vrot.slane %v412_v35, %v1066_v49 }
 0x358   : > { %1145 = vrot.lane.b32.xlu1 %v1055_v43, %s4788_s25  ;;  %v1076_v43 = vmul.f32 %v5369_v27, %v5255_v40  ;;  %v7483_v30 = vpack.c.bf16 %v5364_v33, %v5361_v26  ;;  %v7487_v26 = vpack.c.bf16 %v5298_v51, %v5317_v31  ;;  %v4508_v33 = vld [vmem:[%s7431_s2 + $0x4] ss:$8 sps:$4 sm:$0xff]  }
 0x359   : > { %v1090_v53 = vpack.c.bf16 %v1080_v3, %v1078_v37  ;;  %v1084_v3 = vmul.f32 %v5369_v27, %v1041_v2  ;;  %v1081_v40 = vmul.f32 %v5392_v0, %v1038_v59  ;;  %v1079_v57 = vmul.f32 %v5392_v0, %v5290_v8  ;;  %4275 = vmatprep.mubr.msk.bf16.mxu0 %vm439_vm0, %v4508_v33 }
 0x35a   : > { %v1085_v35 = vmul.f32 %v5392_v0, %v1042_v47  ;;  %v1070_v59 = vmul.f32 %v5369_v27, %v5284_v28  ;;  %v1077_v8 = vmul.f32 %v5392_v0, %v5258_v12  ;;  %v1075_v46 = vmul.f32 %v5392_v0, %v5248_v62 }
 0x35b   : > { %1139 = vrot.lane.b32.xlu0 %v1052_v44, %s4788_s25  ;;  %v1088_v44 = vpack.c.bf16 %v1076_v43, %v1074_v34  ;;  %v1091_v49 = vpack.c.bf16 %v1081_v40, %v1079_v57  ;;  %v1073_v28 = vmul.f32 %v5392_v0, %v5293_v32 }
 0x35c   : > { %1141 = vrot.lane.b32.xlu1 %v1053_v39, %s4788_s25  ;;  %v1082_v39 = vmul.f32 %v5369_v27, %v1039_v48  ;;  %v1083_v48 = vmul.f32 %v5392_v0, %v5320_v56  ;;  %v1086_v2 = vpack.c.bf16 %v1072_v41, %v1070_v59  ;;  %v1089_v47 = vpack.c.bf16 %v1077_v8, %v1075_v46  ;;  %v1048_v46 = vld [vmem:[%s7432_s3 + $0x28] sm:$0xff] }
 0x35d   : > { %v1071_v56 = vmul.f32 %v5392_v0, %v5281_v55  ;;  %v7488_v8 = vmov 0.0  }
 0x35e   : > { %v1093_v37 = vpack.c.bf16 %v1085_v35, %v1083_v48  ;;  %v4511_v35 = vld [vmem:[%s7431_s2 + $0x44] ss:$8 sps:$4 sm:$0xff]  }
 0x35f   : > { %1177 = vrot.lane.b32.xlu0 %v1090_v53, %s4789_s28  ;;  %v1087_v53 = vpack.c.bf16 %v1073_v28, %v1071_v56  ;;  %4295 = vmatprep.mubr.msk.bf16.mxu1 %vm439_vm0, %v4511_v35  ;;  %v1046_v28 = vld [vmem:[%s7432_s3 + $0x18] sm:$0xff]  ;;  %v1047_v56 = vld [vmem:[%s7432_s3 + $0x20] sm:$0xff] }
 0x360   : > { %1137 = vrot.lane.b32.xlu1 %v1051_v50, %s4788_s25  ;;  %v1092_v50 = vpack.c.bf16 %v1084_v3, %v1082_v39 }
 0x363   : > { %1173 = vrot.lane.b32.xlu0 %v1088_v44, %s4789_s28 }
 0x364   : > { %1171 = vrot.lane.b32.xlu1 %v4787_v58, %s4789_s28 }
 0x367   : > { %1181 = vrot.lane.b32.xlu0 %v1092_v50, %s4789_s28 }
 0x368   : > { %1179 = vrot.lane.b32.xlu1 %v1091_v49, %s4789_s28  ;;  %v7482_v49 = vpack.c.bf16 %v5313_v60, %v5310_v18  ;;  %v7486_v18 = vpack.c.bf16 %v5306_v9, %v5302_v15 }
 0x36b   : > { %1167 = vrot.lane.b32.xlu0 %v1086_v2, %s4789_s28 }
 0x36c   : > { %1183 = vrot.lane.b32.xlu1 %v1093_v37, %s4789_s28  ;;  %v1050_v37 = vld [vmem:[%s7432_s3 + $0x38] sm:$0xff] }
 0x370   : > { %1175 = vrot.lane.b32.xlu1 %v1089_v47, %s4789_s28  ;;  %v1049_v47 = vld [vmem:[%s7432_s3 + $0x30] sm:$0xff] }
 0x374   : > { %1169 = vrot.lane.b32.xlu1 %v1087_v53, %s4789_s28  ;;  %v1045_v53 = vld [vmem:[%s7432_s3 + $0x10] sm:$0xff] }
 0x3c1   : > { %v1152_v12 = vpop.permute.xlu0 %1151 }
 0x3c3   : > { %v1150_v43 = vpop.permute.xlu1 %1149 }
 0x3c4   : > { %v1157_v55 = vsel %vm1153_vm1, %v1150_v43, %v1152_v12 }
 0x3c5   : > { %v1148_v34 = vpop.permute.xlu0 %1147 }
 0x3c9   : > { %v1144_v3 = vpop.permute.xlu0 %1143 }
 0x3ca   : > { %v1146_v44 = vpop.permute.xlu1 %1145 }
 0x3cb   : > { %v1156_v50 = vsel %vm1153_vm1, %v1146_v44, %v1148_v34 }
 0x3cd   : > { %v1140_v62 = vpop.permute.xlu0 %1139 }
 0x3ce   : > { %v1142_v40 = vpop.permute.xlu1 %1141 }
 0x3cf   : > { %1270 = vrot.lane.b32.xlu0 %v1142_v40, %s4790_s29  ;;  %v1155_v39 = vsel %vm1153_vm1, %v1142_v40, %v1144_v3 }
 0x3d1   : > { %v1178_v1 = vpop.permute.xlu0 %1177 }
 0x3d2   : > { %v1138_v32 = vpop.permute.xlu1 %1137 }
 0x3d3   : > { %1272 = vrot.lane.b32.xlu0 %v1155_v39, %s4790_s29  ;;  %v1154_v57 = vsel %vm1153_vm1, %v1138_v32, %v1140_v62 }
 0x3d4   : > { %1266 = vrot.lane.b32.xlu1 %v1154_v57, %s4790_s29 }
 0x3d5   : > { %v1174_v60 = vpop.permute.xlu0 %1173 }
 0x3d6   : > { %v5445_v41 = vpop.permute.xlu1 %1171 }
 0x3d7   : > { %1280 = vrot.lane.b32.xlu0 %v1148_v34, %s4790_s29 }
 0x3d8   : > { %1274 = vrot.lane.b32.xlu1 %v1144_v3, %s4790_s29 }
 0x3d9   : > { %v1182_v15 = vpop.permute.xlu0 %1181 }
 0x3da   : > { %v1180_v54 = vpop.permute.xlu1 %1179 }
 0x3db   : > { %1282 = vrot.lane.b32.xlu0 %v1150_v43, %s4790_s29  ;;  %v1191_v63 = vsel %vm1185_vm2, %v1180_v54, %v5445_v41 }
 0x3dc   : > { %1276 = vrot.lane.b32.xlu1 %v1146_v44, %s4790_s29 }
 0x3dd   : > { %v1168_v59 = vpop.permute.xlu0 %1167 }
 0x3df   : > { %1284 = vrot.lane.b32.xlu0 %v1157_v55, %s4790_s29 }
 0x3e0   : > { %1278 = vrot.lane.b32.xlu1 %v1156_v50, %s4790_s29 }
 0x3e3   : > { %1268 = vrot.lane.b32.xlu0 %v1140_v62, %s4790_s29 }
 0x3e4   : > { %1286 = vrot.lane.b32.xlu1 %v1152_v12, %s4790_s29 }
 0x3e7   : > { %1260 = vrot.lane.b32.xlu0 %v1127_v29, %s4790_s29 }
 0x3e8   : > { %1264 = vrot.lane.b32.xlu1 %v1138_v32, %s4790_s29 }
 0x3eb   : > { %1246 = vrot.lane.b32.xlu0 %v4787_v58, %s4790_s29  ;;  %v7484_v58 = vpack.c.bf16 %v5274_v45, %v5270_v61  ;;  %v1190_v61 = vsel %vm1185_vm2, %v1178_v1, %v1180_v54  ;;  %v1184_v45 = vpop.permute.xlu1 %1183 }
 0x3ec   : > { %1262 = vrot.lane.b32.xlu1 %v1128_v38, %s4790_s29  ;;  %v1193_v36 = vsel %vm1185_vm2, %v1184_v45, %v5445_v41  ;;  %v1192_v9 = vsel %vm1185_vm2, %v1182_v15, %v1184_v45 }
 0x3ef   : > { %1258 = vrot.lane.b32.xlu0 %v7482_v49, %s4790_s29  ;;  %v1176_v51 = vpop.permute.xlu1 %1175 }
 0x3f0   : > { %1256 = vrot.lane.b32.xlu1 %v7483_v30, %s4790_s29  ;;  %v1189_v31 = vsel %vm1185_vm2, %v1176_v51, %v5445_v41  ;;  %v1188_v29 = vsel %vm1185_vm2, %v1174_v60, %v1176_v51 }
 0x3f3   : > { %1254 = vrot.lane.b32.xlu0 %v7484_v58, %s4790_s29  ;;  %v1170_v38 = vpop.permute.xlu1 %1169 }
 0x3f4   : > { %1252 = vrot.lane.b32.xlu1 %v7485_v25, %s4790_s29  ;;  %v1186_v48 = vsel %vm1185_vm2, %v1168_v59, %v1170_v38  ;;  %v1187_v2 = vsel %vm1185_vm2, %v1170_v38, %v5445_v41 }
 0x3f7   : > { %1250 = vrot.lane.b32.xlu0 %v7486_v18, %s4790_s29 }
 0x3f8   : > { %1248 = vrot.lane.b32.xlu1 %v7487_v26, %s4790_s29 }
 0x3fb   : > { %1302 = vrot.lane.b32.xlu0 %v1190_v61, %s4790_s29 }
 0x3fc   : > { %1304 = vrot.lane.b32.xlu1 %v1191_v63, %s4790_s29 }
 0x3ff   : > { %1310 = vrot.lane.b32.xlu0 %v1193_v36, %s4790_s29 }
 0x400   : > { %1306 = vrot.lane.b32.xlu1 %v1182_v15, %s4790_s29 }
 0x403   : > { %1300 = vrot.lane.b32.xlu0 %v1178_v1, %s4790_s29 }
 0x404   : > { %1308 = vrot.lane.b32.xlu1 %v1192_v9, %s4790_s29 }
 0x407   : > { %1298 = vrot.lane.b32.xlu0 %v1189_v31, %s4790_s29 }
 0x408   : > { %1296 = vrot.lane.b32.xlu1 %v1188_v29, %s4790_s29 }
 0x40b   : > { %1290 = vrot.lane.b32.xlu0 %v1186_v48, %s4790_s29 }
 0x40c   : > { %1294 = vrot.lane.b32.xlu1 %v1174_v60, %s4790_s29 }
 0x40f   : > { %1288 = vrot.lane.b32.xlu0 %v1168_v59, %s4790_s29 }
 0x410   : > { %1292 = vrot.lane.b32.xlu1 %v1187_v2, %s4790_s29 }
 0x413   : > { %1832 = vrot.lane.b32.xlu0 %v7488_v8, %s4791_s20 }
 0x414   : > { %1964 = vperm.xlu1 %4465, %v1050_v37  }
 0x417   : > { %1954 = vperm.xlu0 %4464, %v1048_v46  }
 0x418   : > { %1959 = vperm.xlu1 %4465, %v1049_v47  }
 0x41b   : > { %1944 = vperm.xlu0 %4464, %v1046_v28  }
 0x41c   : > { %1949 = vperm.xlu1 %4465, %v1047_v56  }
 0x420   : > { %1939 = vperm.xlu1 %4465, %v1045_v53  }
 0x441   : > { %v1271_v12 = vpop.permute.xlu0 %1270 }
 0x445   : > { %v1273_v43 = vpop.permute.xlu0 %1272 }
 0x446   : > { %v1267_v34 = vpop.permute.xlu1 %1266  ;;  %v5551_v60 = vsel %vm1312_vm3, %v1271_v12, %v1273_v43 }
 0x449   : > { %v1281_v44 = vpop.permute.xlu0 %1280 }
 0x44a   : > { %v1275_v3 = vpop.permute.xlu1 %1274 }
 0x44b   : > { %v5546_v18 = vsel %vm1312_vm3, %v1273_v43, %v1275_v3 }
 0x44d   : > { %v1283_v40 = vpop.permute.xlu0 %1282 }
 0x44e   : > { %v1277_v62 = vpop.permute.xlu1 %1276 }
 0x451   : > { %v1285_v32 = vpop.permute.xlu0 %1284 }
 0x452   : > { %v1279_v39 = vpop.permute.xlu1 %1278  ;;  %v5529_v49 = vsel %vm1312_vm3, %v1283_v40, %v1285_v32 }
 0x453   : > { %v5534_v1 = vsel %vm1312_vm3, %v1279_v39, %v1281_v44  ;;  %v5539_v25 = vsel %vm1312_vm3, %v1277_v62, %v1279_v39 }
 0x455   : > { %v1269_v57 = vpop.permute.xlu0 %1268 }
 0x456   : > { %v1287_v55 = vpop.permute.xlu1 %1286  ;;  %v5556_v45 = vsel %vm1312_vm3, %v1267_v34, %v1269_v57 }
 0x457   : > { %v5524_v50 = vsel %vm1312_vm3, %v1285_v32, %v1287_v55 }
 0x458   : > { %1373 = vmatprep.subr.bf16.mxu0 %v5524_v50  ;;  %1503 = vmatprep.subr.bf16.mxu1 %v5524_v50 }
 0x459   : > { %1374 = vmatpush1.bf16.msra.mxu0 %v5529_v49  ;;  %1504 = vmatpush1.bf16.msra.mxu1 %v5529_v49  ;;  %v1261_v30 = vpop.permute.xlu0 %1260 }
 0x45a   : > { %v1265_v58 = vpop.permute.xlu1 %1264  ;;  %1375 = vmatprep.subr.bf16.mxu0 %v5534_v1  ;;  %1505 = vmatprep.subr.bf16.mxu1 %v5534_v1 }
 0x45b   : > { %v5561_v36 = vsel %vm1312_vm3, %v1265_v58, %v1267_v34 }
 0x45d   : > { %1376 = vmatpush1.bf16.msra.mxu0 %v5539_v25  ;;  %1506 = vmatpush1.bf16.msra.mxu1 %v5539_v25  ;;  %v5543_v54 = vpop.permute.xlu0 %1246 }
 0x45e   : > { %7489 = vst [vmem:[#allocation18_spill] sm:$0xff] %v5543_v54  ;;  %v1263_v26 = vpop.permute.xlu1 %1262  ;;  %1377 = vmatprep.subr.bf16.mxu0 %v5546_v18  ;;  %1507 = vmatprep.subr.bf16.mxu1 %v5546_v18  ;;  %v5572_v31 = vsel %vm1312_vm3, %v5543_v54, %v1261_v30 }
 0x45f   : > { %v5566_v51 = vsel %vm1312_vm3, %v1261_v30, %v1263_v26 }
 0x461   : > { %1378 = vmatpush1.bf16.msra.mxu0 %v5551_v60  ;;  %1508 = vmatpush1.bf16.msra.mxu1 %v5551_v60  ;;  %v1259_v61 = vpop.permute.xlu0 %1258 }
 0x462   : > { %v1257_v63 = vpop.permute.xlu1 %1256  ;;  %1379 = vmatprep.subr.bf16.mxu0 %v5556_v45  ;;  %1509 = vmatprep.subr.bf16.mxu1 %v5556_v45 }
 0x463   : > { %v5577_v38 = vsel %vm1312_vm3, %v1257_v63, %v1259_v61  ;;  %v5583_v35 = vsel %vm1312_vm3, %v5543_v54, %v1257_v63  ;;  %v4506_v63 = vld [vmem:[%s7431_s2] ss:$8 sps:$4 sm:$0xff]  }
 0x465   : > { %1380 = vmatpush1.bf16.msra.mxu0 %v5561_v36  ;;  %1510 = vmatpush1.bf16.msra.mxu1 %v5561_v36  ;;  %v1255_v15 = vpop.permute.xlu0 %1254 }
 0x466   : > { %v1253_v9 = vpop.permute.xlu1 %1252  ;;  %1381 = vmatprep.subr.bf16.mxu0 %v5566_v51  ;;  %1511 = vmatprep.subr.bf16.mxu1 %v5566_v51 }
 0x467   : > { %v5588_v48 = vsel %vm1312_vm3, %v1253_v9, %v1255_v15  ;;  %v5594_v37 = vsel %vm1312_vm3, %v5543_v54, %v1253_v9  ;;  %v4509_v15 = vld [vmem:[%s7431_s2 + $0x40] ss:$8 sps:$4 sm:$0xff]   ;;  %v4512_v9 = vld [vmem:[%s7431_s2 + $0x54] ss:$8 sps:$4 sm:$0xff]  }
 0x469   : > { %1382 = vmatpush1.bf16.msra.mxu0 %v5572_v31  ;;  %1512 = vmatpush1.bf16.msra.mxu1 %v5572_v31  ;;  %v1251_v33 = vpop.permute.xlu0 %1250 }
 0x46a   : > { %v1249_v29 = vpop.permute.xlu1 %1248  ;;  %1383 = vmatprep.subr.bf16.mxu0 %v5577_v38  ;;  %1513 = vmatprep.subr.bf16.mxu1 %v5577_v38 }
 0x46b   : > { %v5599_v47 = vsel %vm1312_vm3, %v1249_v29, %v1251_v33  ;;  %v5605_v56 = vsel %vm1312_vm3, %v5543_v54, %v1249_v29  ;;  %v4518_v33 = vld [vmem:[%s7431_s2 + $0x14] ss:$8 sps:$4 sm:$0xff]   ;;  %v4514_v29 = vld [vmem:[%s7431_s2 + $0x50] ss:$8 sps:$4 sm:$0xff]  }
 0x46d   : > { %1384 = vmatpush1.bf16.msra.mxu0 %v5583_v35  ;;  %1514 = vmatpush1.bf16.msra.mxu1 %v5583_v35  ;;  %v1303_v59 = vpop.permute.xlu0 %1302 }
 0x46e   : > { %v1305_v2 = vpop.permute.xlu1 %1304  ;;  %1385 = vmatprep.subr.bf16.mxu0 %v5588_v48  ;;  %1515 = vmatprep.subr.bf16.mxu1 %v5588_v48 }
 0x46f   : > { %v5620_v3 = vsel %vm1312_vm3, %v1303_v59, %v1305_v2  ;;  %v4538_v2 = vld [vmem:[%s7431_s2 + $0xa0] ss:$8 sps:$4 sm:$0xff]  }
 0x471   : > { %1386 = vmatpush1.bf16.msra.mxu0 %v5594_v37  ;;  %1516 = vmatpush1.bf16.msra.mxu1 %v5594_v37  ;;  %v1311_v46 = vpop.permute.xlu0 %1310 }
 0x472   : > { %v1307_v28 = vpop.permute.xlu1 %1306  ;;  %1387 = vmatprep.subr.bf16.mxu0 %v5599_v47  ;;  %1517 = vmatprep.subr.bf16.mxu1 %v5599_v47 }
 0x475   : > { %1388 = vmatpush1.bf16.msra.mxu0 %v5605_v56  ;;  %1518 = vmatpush1.bf16.msra.mxu1 %v5605_v56  ;;  %v1301_v53 = vpop.permute.xlu0 %1300 }
 0x476   : > { %v1309_v12 = vpop.permute.xlu1 %1308  ;;  %v5625_v62 = vsel %vm1312_vm3, %v1301_v53, %v1303_v59  ;;  %v4535_v59 = vld [vmem:[%s7431_s2 + $0x90] ss:$8 sps:$4 sm:$0xff]  }
 0x477   : > { %v5610_v43 = vsel %vm1312_vm3, %v1309_v12, %v1311_v46  ;;  %v5613_v34 = vsel %vm1312_vm3, %v1307_v28, %v1309_v12  ;;  %v4541_v46 = vld [vmem:[%s7431_s2 + $0xb0] ss:$8 sps:$4 sm:$0xff]  }
 0x478   : > { %1397 = vmatprep.subr.bf16.mxu0 %v5610_v43  ;;  %1527 = vmatprep.subr.bf16.mxu1 %v5610_v43 }
 0x479   : > { %1398 = vmatpush2.bf16.msra.mxu0 %v5613_v34  ;;  %1528 = vmatpush2.bf16.msra.mxu1 %v5613_v34  ;;  %v1299_v44 = vpop.permute.xlu0 %1298 }
 0x47a   : > { %v1297_v40 = vpop.permute.xlu1 %1296  ;;  %1399 = vmatprep.subr.bf16.mxu0 %v5620_v3  ;;  %1529 = vmatprep.subr.bf16.mxu1 %v5620_v3 }
 0x47b   : > { %v5630_v39 = vsel %vm1312_vm3, %v1297_v40, %v1299_v44 }
 0x47d   : > { %1400 = vmatpush2.bf16.msra.mxu0 %v5625_v62  ;;  %1530 = vmatpush2.bf16.msra.mxu1 %v5625_v62  ;;  %v1291_v32 = vpop.permute.xlu0 %1290 }
 0x47e   : > { %v1295_v57 = vpop.permute.xlu1 %1294  ;;  %1401 = vmatprep.subr.bf16.mxu0 %v5630_v39  ;;  %1531 = vmatprep.subr.bf16.mxu1 %v5630_v39 }
 0x47f   : > { %v1331_v55 = vsel %vm1312_vm3, %v1295_v57, %v1297_v40 }
 0x481   : > { %1402 = vmatpush2.bf16.msra.mxu0 %v1331_v55  ;;  %1532 = vmatpush2.bf16.msra.mxu1 %v1331_v55  ;;  %v1289_v30 = vpop.permute.xlu0 %1288 }
 0x482   : > { %v1293_v58 = vpop.permute.xlu1 %1292  ;;  %v1329_v61 = vsel %vm1312_vm3, %v1289_v30, %v1291_v32 }
 0x483   : > { %v1330_v26 = vsel %vm1312_vm3, %v1291_v32, %v1293_v58 }
 0x484   : > { %1403 = vmatprep.subr.bf16.mxu0 %v1330_v26  ;;  %1533 = vmatprep.subr.bf16.mxu1 %v1330_v26 }
 0x485   : > { %1404 = vmatpush2.bf16.msra.mxu0 %v1329_v61  ;;  %1534 = vmatpush2.bf16.msra.mxu1 %v1329_v61 }
 0x486   : > { %1738 = vmatprep.subr.bf16.mxu0 %v5524_v50  ;;  %v4520_v50 = vld [vmem:[%s7431_s2 + $0x10] ss:$8 sps:$4 sm:$0xff]  }
 0x488   : > { %1406 = vmatmul.mubr.bf16.vlgmr.msra.gmra.mxu0 %v4506_v63  ;;  %1536 = vmatmul.mubr.bf16.vlgmr.msra.gmra.mxu1 %v4509_v15 }
 0x489   : > { %1739 = vmatpush1.bf16.msra.mxu0 %v5529_v49  ;;  %4296 = vmatprep.mubr.msk.bf16.mxu1 %vm439_vm0, %v4512_v9  ;;  %v4515_v49 = vld [vmem:[%s7431_s2 + $0x64] ss:$8 sps:$4 sm:$0xff]  }
 0x48a   : > { %1740 = vmatprep.subr.bf16.mxu0 %v5534_v1  ;;  %4276 = vmatprep.mubr.msk.bf16.mxu0 %vm439_vm0, %v4518_v33  ;;  %v4524_v1 = vld [vmem:[%s7431_s2 + $0x24] ss:$8 sps:$4 sm:$0xff]  }
 0x48d   : > { %1741 = vmatpush1.bf16.msra.mxu0 %v5539_v25  ;;  %v4517_v25 = vld [vmem:[%s7431_s2 + $0x60] ss:$8 sps:$4 sm:$0xff]  }
 0x48e   : > { %1742 = vmatprep.subr.bf16.mxu0 %v5546_v18  ;;  %v4526_v18 = vld [vmem:[%s7431_s2 + $0x20] ss:$8 sps:$4 sm:$0xff]  }
 0x490   : > { %1546 = vmatmul.mubr.bf16.gmra.mxu1 %v4514_v29  ;;  %1416 = vmatmul.mubr.bf16.gmra.mxu0 %v4520_v50 }
 0x491   : > { %1743 = vmatpush1.bf16.msra.mxu0 %v5551_v60  ;;  %4297 = vmatprep.mubr.msk.bf16.mxu1 %vm439_vm0, %v4515_v49  ;;  %v4521_v60 = vld [vmem:[%s7431_s2 + $0x74] ss:$8 sps:$4 sm:$0xff]  }
 0x492   : > { %1744 = vmatprep.subr.bf16.mxu0 %v5556_v45  ;;  %4277 = vmatprep.mubr.msk.bf16.mxu0 %vm439_vm0, %v4524_v1  ;;  %v4527_v45 = vld [vmem:[%s7431_s2 + $0x34] ss:$8 sps:$4 sm:$0xff]  }
 0x495   : > { %1745 = vmatpush1.bf16.msra.mxu0 %v5561_v36  ;;  %v4523_v36 = vld [vmem:[%s7431_s2 + $0x70] ss:$8 sps:$4 sm:$0xff]  }
 0x496   : > { %1746 = vmatprep.subr.bf16.mxu0 %v5566_v51  ;;  %v4529_v51 = vld [vmem:[%s7431_s2 + $0x30] ss:$8 sps:$4 sm:$0xff]  }
 0x498   : > { %1556 = vmatmul.mubr.bf16.gmra.mxu1 %v4517_v25  ;;  %1426 = vmatmul.mubr.bf16.gmra.mxu0 %v4526_v18 }
 0x499   : > { %1747 = vmatpush1.bf16.msra.mxu0 %v5572_v31  ;;  %4298 = vmatprep.mubr.msk.bf16.mxu1 %vm439_vm0, %v4521_v60  ;;  %v4532_v31 = vld [vmem:[%s7431_s2 + $0x84] ss:$8 sps:$4 sm:$0xff]  }
 0x49a   : > { %1748 = vmatprep.subr.bf16.mxu0 %v5577_v38  ;;  %4278 = vmatprep.mubr.msk.bf16.mxu0 %vm439_vm0, %v4527_v45  ;;  %v4530_v38 = vld [vmem:[%s7431_s2 + $0x80] ss:$8 sps:$4 sm:$0xff]  }
 0x49d   : > { %1749 = vmatpush1.bf16.msra.mxu0 %v5583_v35  ;;  %v4533_v35 = vld [vmem:[%s7431_s2 + $0x94] ss:$8 sps:$4 sm:$0xff]  }
 0x49e   : > { %1750 = vmatprep.subr.bf16.mxu0 %v5588_v48  ;;  %v4536_v48 = vld [vmem:[%s7431_s2 + $0xa4] ss:$8 sps:$4 sm:$0xff]  }
 0x4a0   : > { %1566 = vmatmul.mubr.bf16.gmra.mxu1 %v4523_v36  ;;  %1436 = vmatmul.mubr.bf16.gmra.mxu0 %v4529_v51 }
 0x4a1   : > { %1751 = vmatpush1.bf16.msra.mxu0 %v5594_v37  ;;  %4315 = vmatprep.mubr.msk.bf16.mxu0 %vm439_vm0, %v4532_v31  ;;  %v4539_v37 = vld [vmem:[%s7431_s2 + $0xb4] ss:$8 sps:$4 sm:$0xff]  }
 0x4a2   : > { %1752 = vmatprep.subr.bf16.mxu0 %v5599_v47  ;;  %2176 = vmatprep.mubr.f32.mxu1 %v7488_v8 }
 0x4a5   : > { %1753 = vmatpush1.bf16.msra.mxu0 %v5605_v56 }
 0x4a6   : > { %1762 = vmatprep.subr.bf16.mxu0 %v5610_v43 }
 0x4a9   : > { %1763 = vmatpush2.bf16.msra.mxu0 %v5613_v34 }
 0x4aa   : > { %1764 = vmatprep.subr.bf16.mxu0 %v5620_v3 }
 0x4ad   : > { %1765 = vmatpush2.bf16.msra.mxu0 %v5625_v62 }
 0x4ae   : > { %1766 = vmatprep.subr.bf16.mxu0 %v5630_v39 }
 0x4b1   : > { %1767 = vmatpush2.bf16.msra.mxu0 %v1331_v55 }
 0x4b2   : > { %1768 = vmatprep.subr.bf16.mxu0 %v1330_v26 }
 0x4b5   : > { %1769 = vmatpush2.bf16.msra.mxu0 %v1329_v61 }
 0x4b8   : > { %1771 = vmatmul.mubr.bf16.vlgmr.msra.gmra.mxu0 %v4530_v38 }
 0x4b9   : > { %4316 = vmatprep.mubr.msk.bf16.mxu0 %vm439_vm0, %v4533_v35 }
 0x4c0   : > { %1781 = vmatmul.mubr.bf16.gmra.mxu0 %v4535_v59 }
 0x4c1   : > { %4317 = vmatprep.mubr.msk.bf16.mxu0 %vm439_vm0, %v4536_v48 }
 0x4c8   : > { %1791 = vmatmul.mubr.bf16.gmra.mxu0 %v4538_v2 }
 0x4c9   : > { %4318 = vmatprep.mubr.msk.bf16.mxu0 %vm439_vm0, %v4539_v37 }
 0x4d0   : > { %1801 = vmatmul.mubr.bf16.gmra.mxu0 %v4541_v46 }
 0x548   : > { %v5735_v47 = vpop.f32.mrf.mxu0  ;;  %v5737_v28 = vpop.f32.mrf.mxu1 }
 0x54a   : > { %v5739_v56 = vpop.f32.mrf.mxu0  ;;  %v5741_v53 = vpop.f32.mrf.mxu1 }
 0x54c   : > { %v5743_v12 = vpop.f32.mrf.mxu0  ;;  %v1541_v43 = vpop.f32.mrf.mxu1 }
 0x54d   : > { %1596 = vrot.lane.b32.xlu0 %v1541_v43, %s4792_s23 }
 0x54e   : > { %v5746_v34 = vpop.f32.mrf.mxu0  ;;  %v1543_v44 = vpop.f32.mrf.mxu1 }
 0x54f   : > { %1598 = vrot.lane.b32.xlu1 %v1543_v44, %s4792_s23 }
 0x550   : > { %v1547_v3 = vpop.f32.mrf.mxu1  ;;  %v5749_v40 = vpop.f32.mrf.mxu0 }
 0x552   : > { %v1549_v62 = vpop.f32.mrf.mxu1  ;;  %v5751_v32 = vpop.f32.mrf.mxu0 }
 0x553   : > { %1600 = vrot.lane.b32.xlu1 %v1547_v3, %s4792_s23  ;;  %1602 = vrot.lane.b32.xlu0 %v1549_v62, %s4792_s23 }
 0x554   : > { %v1551_v39 = vpop.f32.mrf.mxu1  ;;  %v5755_v57 = vpop.f32.mrf.mxu0 }
 0x556   : > { %v1553_v55 = vpop.f32.mrf.mxu1  ;;  %v5757_v30 = vpop.f32.mrf.mxu0 }
 0x557   : > { %1604 = vrot.lane.b32.xlu0 %v1551_v39, %s4792_s23  ;;  %1606 = vrot.lane.b32.xlu1 %v1553_v55, %s4792_s23 }
 0x558   : > { %v1557_v58 = vpop.f32.mrf.mxu1  ;;  %v5761_v61 = vpop.f32.mrf.mxu0 }
 0x55a   : > { %v1559_v26 = vpop.f32.mrf.mxu1  ;;  %v5765_v9 = vpop.f32.mrf.mxu0 }
 0x55b   : > { %1608 = vrot.lane.b32.xlu1 %v1557_v58, %s4792_s23  ;;  %1610 = vrot.lane.b32.xlu0 %v1559_v26, %s4792_s23  ;;  %v1044_v26 = vld [vmem:[%s7432_s3 + $0x8] sm:$0xff] }
 0x55c   : > { %v1561_v63 = vpop.f32.mrf.mxu1  ;;  %v5769_v50 = vpop.f32.mrf.mxu0 }
 0x55e   : > { %v1563_v15 = vpop.f32.mrf.mxu1  ;;  %v5773_v25 = vpop.f32.mrf.mxu0 }
 0x55f   : > { %1612 = vrot.lane.b32.xlu0 %v1561_v63, %s4792_s23  ;;  %1614 = vrot.lane.b32.xlu1 %v1563_v15, %s4792_s23  ;;  %v1043_v63 = vld [vmem:[%s7432_s3] sm:$0xff]  ;;  %v5811_v15 = vpop.permute.xlu1 %1964 }
 0x560   : > { %v1567_v33 = vpop.f32.mrf.mxu1  ;;  %v5777_v18 = vpop.f32.mrf.mxu0 }
 0x562   : > { %v1569_v29 = vpop.f32.mrf.mxu1  ;;  %v5779_v60 = vpop.f32.mrf.mxu0 }
 0x563   : > { %1616 = vrot.lane.b32.xlu0 %v1567_v33, %s4792_s23  ;;  %1618 = vrot.lane.b32.xlu1 %v1569_v29, %s4792_s23  ;;  %v5815_v33 = vpop.permute.xlu1 %1959 }
 0x564   : > { %v1571_v49 = vpop.f32.mrf.mxu1  ;;  %v5781_v45 = vpop.f32.mrf.mxu0 }
 0x566   : > { %v1573_v1 = vpop.f32.mrf.mxu1  ;;  %v5783_v36 = vpop.f32.mrf.mxu0 }
 0x567   : > { %1620 = vrot.lane.b32.xlu1 %v1571_v49, %s4792_s23  ;;  %1622 = vrot.lane.b32.xlu0 %v1573_v1, %s4792_s23 }
 0x578   : > { %v1772_v51 = vpop.f32.mrf.mxu0 }
 0x57a   : > { %v1774_v31 = vpop.f32.mrf.mxu0 }
 0x57c   : > { %v1776_v38 = vpop.f32.mrf.mxu0 }
 0x57e   : > { %v1778_v35 = vpop.f32.mrf.mxu0 }
 0x580   : > { %v1782_v59 = vpop.f32.mrf.mxu0 }
 0x581   : > { %1838 = vrot.lane.b32.xlu0 %v1782_v59, %s4791_s20 }
 0x582   : > { %v1784_v48 = vpop.f32.mrf.mxu0 }
 0x583   : > { %1840 = vrot.lane.b32.xlu1 %v1784_v48, %s4791_s20 }
 0x584   : > { %v1786_v2 = vpop.f32.mrf.mxu0 }
 0x586   : > { %v1788_v37 = vpop.f32.mrf.mxu0 }
 0x587   : > { %1842 = vrot.lane.b32.xlu1 %v1786_v2, %s4791_s20  ;;  %1844 = vrot.lane.b32.xlu0 %v1788_v37, %s4791_s20 }
 0x588   : > { %v1792_v46 = vpop.f32.mrf.mxu0 }
 0x58a   : > { %v1794_v43 = vpop.f32.mrf.mxu0 }
 0x58b   : > { %1846 = vrot.lane.b32.xlu0 %v1792_v46, %s4791_s20  ;;  %1848 = vrot.lane.b32.xlu1 %v1794_v43, %s4791_s20 }
 0x58c   : > { %v1796_v44 = vpop.f32.mrf.mxu0 }
 0x58e   : > { %v1798_v3 = vpop.f32.mrf.mxu0 }
 0x58f   : > { %1850 = vrot.lane.b32.xlu1 %v1796_v44, %s4791_s20  ;;  %1852 = vrot.lane.b32.xlu0 %v1798_v3, %s4791_s20 }
 0x590   : > { %v1802_v62 = vpop.f32.mrf.mxu0 }
 0x592   : > { %v1804_v39 = vpop.f32.mrf.mxu0 }
 0x593   : > { %1854 = vrot.lane.b32.xlu0 %v1802_v62, %s4791_s20  ;;  %1856 = vrot.lane.b32.xlu1 %v1804_v39, %s4791_s20 }
 0x594   : > { %v1806_v55 = vpop.f32.mrf.mxu0 }
 0x596   : > { %v1808_v58 = vpop.f32.mrf.mxu0 }
 0x597   : > { %1858 = vrot.lane.b32.xlu1 %v1806_v55, %s4791_s20  ;;  %1860 = vrot.lane.b32.xlu0 %v1808_v58, %s4791_s20 }
 0x59b   : > { %1592 = vrot.lane.b32.xlu1 %v5737_v28, %s4792_s23  ;;  %1934 = vperm.xlu0 %4464, %v1044_v26   ;;  %v5813_v28 = vpop.permute.xlu0 %1832 }
 0x59c   : > { %7490 = vst [vmem:[#allocation19_spill] sm:$0xff] %v5813_v28 }
 0x59f   : > { %1834 = vrot.lane.b32.xlu1 %v1776_v38, %s4791_s20  ;;  %1594 = vrot.lane.b32.xlu0 %v5741_v53, %s4792_s23  ;;  %v5817_v29 = vpop.permute.xlu0 %1954  ;;  %v5819_v53 = vpop.permute.xlu1 %1949 }
 0x5a3   : > { %1929 = vperm.xlu1 %4465, %v1043_v63   ;;  %1836 = vrot.lane.b32.xlu0 %v1778_v35, %s4791_s20  ;;  %v1945_v49 = vpop.permute.xlu0 %1944  ;;  %v5821_v1 = vpop.permute.xlu1 %1939 }
 0x5a7   : > { %1830 = vrot.lane.b32.xlu1 %v1774_v31, %s4791_s20  ;;  %1828 = vrot.lane.b32.xlu0 %v1772_v51, %s4791_s20 }
 0x5bf   : > { %v5825_v35 = vpop.permute.xlu0 %1596 }
 0x5c1   : > { %v5823_v38 = vpop.permute.xlu1 %1598 }
 0x5c5   : > { %v5827_v31 = vpop.permute.xlu1 %1600  ;;  %v5829_v51 = vpop.permute.xlu0 %1602 }
 0x5c6   : > { %v1627_v55 = vsel %vm1624_vm4, %v5827_v31, %v5829_v51 }
 0x5c7   : > { %v1664_v58 = vadd.f32 %v1627_v55, %v5749_v40 }
 0x5c9   : > { %v1607_v59 = vpop.permute.xlu1 %1606  ;;  %v1605_v48 = vpop.permute.xlu0 %1604 }
 0x5ca   : > { %v1628_v5 = vsel %vm1624_vm4, %v1605_v48, %v1607_v59  ;;  %v1668_v7 = vadd.f32 %v1607_v59, %v5757_v30 }
 0x5cb   : > { %v1667_v40 = vadd.f32 %v1628_v5, %v5755_v57 }
 0x5cd   : > { %v1609_v2 = vpop.permute.xlu1 %1608  ;;  %v1611_v37 = vpop.permute.xlu0 %1610 }
 0x5ce   : > { %v1671_v57 = vadd.f32 %v1611_v37, %v5765_v9 }
 0x5d1   : > { %v1615_v46 = vpop.permute.xlu1 %1614  ;;  %v1613_v43 = vpop.permute.xlu0 %1612 }
 0x5d5   : > { %v5831_v44 = vpop.permute.xlu1 %1618  ;;  %v5833_v3 = vpop.permute.xlu0 %1616 }
 0x5d9   : > { %v5835_v62 = vpop.permute.xlu1 %1620  ;;  %v5837_v39 = vpop.permute.xlu0 %1622 }
 0x5f3   : > { %v5843_v26 = vpop.permute.xlu0 %1838 }
 0x5f5   : > { %v5845_v63 = vpop.permute.xlu1 %1840 }
 0x5f6   : > { %v1867_v4 = vsel %vm1862_vm5, %v5843_v26, %v5845_v63 }
 0x5f7   : > { %v1910_v6 = vadd.f32 %v1867_v4, %v1664_v58  ;;  %v1629_v4 = vsel %vm1624_vm4, %v1609_v2, %v1611_v37 }
 0x5f9   : > { %v5853_v10 = vadd.f32 %v5821_v1, %v1910_v6  ;;  %v1843_v11 = vpop.permute.xlu1 %1842  ;;  %v1845_v13 = vpop.permute.xlu0 %1844 }
 0x5fa   : > { %v1912_v55 = vadd.f32 %v1843_v11, %v1605_v48  ;;  %v1869_v14 = vsel %vm1862_vm5, %v1843_v11, %v1845_v13  ;;  %v1870_v16 = vsel %vm1862_vm5, %v1845_v13, %v5813_v28 }
 0x5fb   : > { %v1914_v17 = vadd.f32 %v1870_v16, %v1668_v7  ;;  %2045 = vrot.lane.b32.xlu1 %v5853_v10, %s4793_s30  ;;  %v1913_v6 = vadd.f32 %v1869_v14, %v1667_v40  ;;  %v1670_v16 = vadd.f32 %v1629_v4, %v5761_v61  ;;  %v1674_v61 = vadd.f32 %v1615_v46, %v5773_v25 }
 0x5fc   : > { %v5862_v30 = vadd.f32 %v1945_v49, %v1912_v55  ;;  %v1630_v55 = vsel %vm1624_vm4, %v1613_v43, %v1615_v46  ;;  %v1631_v25 = vsel %vm1624_vm4, %v5833_v3, %v5831_v44 }
 0x5fd   : > { %v5864_v59 = vadd.f32 %v1945_v49, %v1914_v17  ;;  %v1849_v58 = vpop.permute.xlu1 %1848  ;;  %v1847_v5 = vpop.permute.xlu0 %1846  ;;  %v5875_v14 = vadd.f32 %v1945_v49, %v1913_v6 }
 0x5fe   : > { %v1872_v11 = vsel %vm1862_vm5, %v1849_v58, %v5813_v28  ;;  %v1871_v7 = vsel %vm1862_vm5, %v1847_v5, %v1849_v58  ;;  %v1915_v13 = vadd.f32 %v1847_v5, %v1609_v2  ;;  %2049 = vrot.lane.b32.xlu0 %v5862_v30, %s4793_s30 }
 0x5ff   : > { %2053 = vrot.lane.b32.xlu1 %v5864_v59, %s4793_s30  ;;  %v1917_v17 = vadd.f32 %v1872_v11, %v1671_v57  ;;  %v1916_v9 = vadd.f32 %v1871_v7, %v1670_v16  ;;  %v1673_v11 = vadd.f32 %v1630_v55, %v5769_v50  ;;  %v1677_v16 = vadd.f32 %v5831_v44, %v5779_v60 }
 0x600   : > { %v5878_v48 = vadd.f32 %v5819_v53, %v1915_v13 }
 0x601   : > { %v1851_v37 = vpop.permute.xlu1 %1850  ;;  %v1853_v40 = vpop.permute.xlu0 %1852  ;;  %v5889_v49 = vadd.f32 %v5819_v53, %v1917_v17  ;;  %v5892_v6 = vadd.f32 %v5819_v53, %v1916_v9  ;;  %v1676_v9 = vadd.f32 %v1631_v25, %v5777_v18  ;;  %v1632_v18 = vsel %vm1624_vm4, %v5835_v62, %v5837_v39 }
 0x602   : > { %v1874_v2 = vsel %vm1862_vm5, %v1853_v40, %v5813_v28  ;;  %2051 = vrot.lane.b32.xlu0 %v5875_v14, %s4793_s30  ;;  %v1918_v4 = vadd.f32 %v1851_v37, %v1613_v43  ;;  %v1873_v58 = vsel %vm1862_vm5, %v1851_v37, %v1853_v40  ;;  %v1665_v25 = vadd.f32 %v5829_v51, %v5751_v32 }
 0x603   : > { %2055 = vrot.lane.b32.xlu1 %v5878_v48, %s4793_s30  ;;  %v1920_v5 = vadd.f32 %v1874_v2, %v1674_v61  ;;  %v1919_v46 = vadd.f32 %v1873_v58, %v1673_v11  ;;  %v1679_v11 = vadd.f32 %v1632_v18, %v5781_v45  ;;  %v1626_v32 = vsel %vm1624_vm4, %v5825_v35, %v5823_v38 }
 0x604   : > { %v5904_v53 = vadd.f32 %v5817_v29, %v1918_v4 }
 0x605   : > { %v1855_v57 = vpop.permute.xlu0 %1854  ;;  %v1857_v7 = vpop.permute.xlu1 %1856  ;;  %v5907_v43 = vadd.f32 %v5817_v29, %v1920_v5  ;;  %v5921_v40 = vadd.f32 %v5817_v29, %v1919_v46  ;;  %v1680_v29 = vadd.f32 %v5837_v39, %v5783_v36 }
 0x606   : > { %2059 = vrot.lane.b32.xlu0 %v5889_v49, %s4793_s30  ;;  %v1876_v50 = vsel %vm1862_vm5, %v1857_v7, %v5813_v28  ;;  %v1921_v13 = vadd.f32 %v1855_v57, %v5833_v3  ;;  %v1875_v17 = vsel %vm1862_vm5, %v1855_v57, %v1857_v7 }
 0x607   : > { %2057 = vrot.lane.b32.xlu1 %v5892_v6, %s4793_s30  ;;  %v1923_v2 = vadd.f32 %v1876_v50, %v1677_v16  ;;  %v1922_v61 = vadd.f32 %v1875_v17, %v1676_v9  ;;  %v1661_v16 = vadd.f32 %v1626_v32, %v5743_v12 }
 0x608   : > { %v5924_v3 = vadd.f32 %v5815_v33, %v1921_v13 }
 0x609   : > { %v1861_v37 = vpop.permute.xlu0 %1860  ;;  %v1859_v60 = vpop.permute.xlu1 %1858  ;;  %v5938_v55 = vadd.f32 %v5815_v33, %v1923_v2  ;;  %v5942_v58 = vadd.f32 %v5815_v33, %v1922_v61  ;;  %v1909_v33 = vadd.f32 %v5843_v26, %v5827_v31 }
 0x60a   : > { %2061 = vrot.lane.b32.xlu0 %v5904_v53, %s4793_s30  ;;  %v1878_v44 = vsel %vm1862_vm5, %v1861_v37, %v5813_v28  ;;  %v1924_v4 = vadd.f32 %v1859_v60, %v5835_v62  ;;  %v1877_v5 = vsel %vm1862_vm5, %v1859_v60, %v1861_v37  ;;  %v1868_v62 = vsel %vm1862_vm5, %v5845_v63, %v5813_v28 }
 0x60b   : > { %2065 = vrot.lane.b32.xlu1 %v5907_v43, %s4793_s30  ;;  %v1926_v57 = vadd.f32 %v1878_v44, %v1680_v29  ;;  %v1925_v39 = vadd.f32 %v1877_v5, %v1679_v11  ;;  %v1911_v50 = vadd.f32 %v1868_v62, %v1665_v25  ;;  %v5971_v26 = vadd.f32 %v5821_v1, %v1909_v33 }
 0x60c   : > { %v5951_v36 = vadd.f32 %v5811_v15, %v1924_v4 }
 0x60d   : > { %v1593_v7 = vpop.permute.xlu1 %1592  ;;  %v5959_v45 = vadd.f32 %v5811_v15, %v1926_v57  ;;  %v5968_v31 = vadd.f32 %v5811_v15, %v1925_v39  ;;  %v5981_v51 = vadd.f32 %v5821_v1, %v1911_v50  ;;  %v1662_v15 = vadd.f32 %v5823_v38, %v5746_v34 }
 0x60e   : > { %2063 = vrot.lane.b32.xlu0 %v5921_v40, %s4793_s30 }
 0x60f   : > { %2067 = vrot.lane.b32.xlu1 %v5924_v3, %s4793_s30 }
 0x611   : > { %v1835_v63 = vpop.permute.xlu1 %1834 }
 0x612   : > { %2071 = vrot.lane.b32.xlu0 %v5938_v55, %s4793_s30  ;;  %v1906_v5 = vadd.f32 %v1835_v63, %v5825_v35 }
 0x613   : > { %2069 = vrot.lane.b32.xlu1 %v5942_v58, %s4793_s30 }
 0x616   : > { %2073 = vrot.lane.b32.xlu0 %v5951_v36, %s4793_s30  ;;  %v1935_v46 = vpop.permute.xlu0 %1934 }
 0x617   : > { %2077 = vrot.lane.b32.xlu1 %v5959_v45, %s4793_s30 }
 0x61a   : > { %2075 = vrot.lane.b32.xlu0 %v5968_v31, %s4793_s30  ;;  %v1595_v13 = vpop.permute.xlu0 %1594 }
 0x61b   : > { %2043 = vrot.lane.b32.xlu1 %v5971_v26, %s4793_s30  ;;  %v1625_v37 = vsel %vm1624_vm4, %v1593_v7, %v1595_v13  ;;  %v1659_v57 = vadd.f32 %v1595_v13, %v5739_v56 }
 0x61c   : > { %v1658_v44 = vadd.f32 %v1625_v37, %v5735_v47  ;;  %v6006_v47 = vadd.f32 %v1935_v46, %v1906_v5 }
 0x61e   : > { %v1930_v17 = vpop.permute.xlu1 %1929  ;;  %2047 = vrot.lane.b32.xlu0 %v5981_v51, %s4793_s30  ;;  %v1837_v9 = vpop.permute.xlu0 %1836 }
 0x61f   : > { %v1865_v2 = vsel %vm1862_vm5, %v1835_v63, %v1837_v9  ;;  %v1866_v61 = vsel %vm1862_vm5, %v1837_v9, %v5813_v28 }
 0x620   : > { %v1907_v60 = vadd.f32 %v1865_v2, %v1661_v16  ;;  %v1908_v1 = vadd.f32 %v1866_v61, %v1662_v15 }
 0x622   : > { %v5993_v18 = vadd.f32 %v1935_v46, %v1907_v60  ;;  %v5995_v34 = vadd.f32 %v1935_v46, %v1908_v1  ;;  %v1831_v12 = vpop.permute.xlu1 %1830  ;;  %v1829_v38 = vpop.permute.xlu0 %1828 }
 0x623   : > { %v1864_v29 = vsel %vm1862_vm5, %v1831_v12, %v5813_v28  ;;  %v1863_v4 = vsel %vm1862_vm5, %v1829_v38, %v1831_v12  ;;  %v1903_v33 = vadd.f32 %v1829_v38, %v1593_v7 }
 0x624   : > { %v1904_v11 = vadd.f32 %v1863_v4, %v1658_v44  ;;  %2041 = vrot.lane.b32.xlu1 %v5995_v34, %s4793_s30  ;;  %2039 = vrot.lane.b32.xlu0 %v5993_v18, %s4793_s30  ;;  %v1905_v39 = vadd.f32 %v1864_v29, %v1659_v57 }
 0x625   : > { %v6016_v35 = vadd.f32 %v1930_v17, %v1903_v33 }
 0x626   : > { %v6008_v62 = vadd.f32 %v1930_v17, %v1904_v11  ;;  %v6014_v56 = vadd.f32 %v1930_v17, %v1905_v39 }
 0x628   : > { %2037 = vrot.lane.b32.xlu0 %v6006_v47, %s4793_s30  ;;  %2033 = vrot.lane.b32.xlu1 %v6008_v62, %s4793_s30 }
 0x62c   : > { %2035 = vrot.lane.b32.xlu0 %v6014_v56, %s4793_s30  ;;  %2031 = vrot.lane.b32.xlu1 %v6016_v35, %s4793_s30 }
 0x66d   : > { %v2046_v25 = vpop.permute.xlu1 %2045 }
 0x670   : > { %v2050_v7 = vpop.permute.xlu0 %2049 }
 0x671   : > { %v2054_v46 = vpop.permute.xlu1 %2053 }
 0x674   : > { %v2052_v50 = vpop.permute.xlu0 %2051 }
 0x675   : > { %v2056_v63 = vpop.permute.xlu1 %2055 }
 0x678   : > { %v2060_v13 = vpop.permute.xlu0 %2059 }
 0x679   : > { %v2058_v32 = vpop.permute.xlu1 %2057 }
 0x67a   : > { %v2089_v39 = vsel %vm2079_vm6, %v2058_v32, %v2060_v13  ;;  %v2088_v33 = vsel %vm2079_vm6, %v2056_v63, %v2058_v32 }
 0x67c   : > { %v2062_v15 = vpop.permute.xlu0 %2061 }
 0x67d   : > { %v2066_v16 = vpop.permute.xlu1 %2065 }
 0x680   : > { %v2064_v9 = vpop.permute.xlu0 %2063 }
 0x681   : > { %v2068_v37 = vpop.permute.xlu1 %2067  ;;  %v2091_v4 = vsel %vm2079_vm6, %v2064_v9, %v2066_v16  ;;  %v2090_v11 = vsel %vm2079_vm6, %v2062_v15, %v2064_v9 }
 0x684   : > { %v2072_v2 = vpop.permute.xlu0 %2071 }
 0x685   : > { %v2070_v17 = vpop.permute.xlu1 %2069 }
 0x686   : > { %v2093_v38 = vsel %vm2079_vm6, %v2070_v17, %v2072_v2  ;;  %v2092_v29 = vsel %vm2079_vm6, %v2068_v37, %v2070_v17  ;;  %v2087_v2 = vsel %vm2079_vm6, %v2052_v50, %v2054_v46  ;;  %v2086_v17 = vsel %vm2079_vm6, %v2050_v7, %v2052_v50  ;;  %v6049_v50 = vld [vmem:[%s7439_s10 + $0x8] sm:$0xff] }
 0x688   : > { %v2074_v61 = vpop.permute.xlu0 %2073 }
 0x689   : > { %v2078_v60 = vpop.permute.xlu1 %2077 }
 0x68c   : > { %v2076_v1 = vpop.permute.xlu0 %2075 }
 0x68d   : > { %v2095_v44 = vsel %vm2079_vm6, %v2076_v1, %v2078_v60  ;;  %v2094_v12 = vsel %vm2079_vm6, %v2074_v61, %v2076_v1  ;;  %v2044_v5 = vpop.permute.xlu1 %2043 }
 0x68e   : > { %2128 = vmatprep.subr.mxu1 %v2095_v44  ;;  %v2084_v60 = vsel %vm2079_vm6, %v2044_v5, %v2046_v25  ;;  %v6057_v44 = vld [vmem:[%s7439_s10 + $0x10] sm:$0xff]  ;;  %v6097_v5 = vld [vmem:[%s7439_s10 + $0x38] sm:$0xff] }
 0x68f   : > { %2129 = vmatpush1.msra.mxu1 %v2094_v12  ;;  %v6065_v12 = vld [vmem:[%s7439_s10 + $0x18] sm:$0xff] }
 0x690   : > { %2130 = vmatprep.subr.mxu1 %v2093_v38  ;;  %v2048_v57 = vpop.permute.xlu0 %2047  ;;  %v6073_v38 = vld [vmem:[%s7439_s10 + $0x20] sm:$0xff] }
 0x691   : > { %2131 = vmatpush1.msra.mxu1 %v2092_v29  ;;  %v2085_v16 = vsel %vm2079_vm6, %v2046_v25, %v2048_v57  ;;  %v6041_v25 = vld [vmem:[%s7439_s10] sm:$0xff]  ;;  %v6081_v29 = vld [vmem:[%s7439_s10 + $0x28] sm:$0xff] }
 0x692   : > { %2132 = vmatprep.subr.mxu1 %v2091_v4  ;;  %v6089_v4 = vld [vmem:[%s7439_s10 + $0x30] sm:$0xff] }
 0x693   : > { %2133 = vmatpush1.msra.mxu1 %v2090_v11 }
 0x694   : > { %2134 = vmatprep.subr.mxu1 %v2089_v39 }
 0x695   : > { %2135 = vmatpush1.msra.mxu1 %v2088_v33 }
 0x696   : > { %v2042_v61 = vpop.permute.xlu1 %2041  ;;  %2136 = vmatprep.subr.mxu1 %v2087_v2  ;;  %v2040_v37 = vpop.permute.xlu0 %2039 }
 0x697   : > { %2137 = vmatpush1.msra.mxu1 %v2086_v17  ;;  %v2083_v13 = vsel %vm2079_vm6, %v2040_v37, %v2042_v61 }
 0x698   : > { %2138 = vmatprep.subr.mxu1 %v2085_v16 }
 0x699   : > { %2139 = vmatpush1.msra.mxu1 %v2084_v60 }
 0x69a   : > { %v2034_v15 = vpop.permute.xlu1 %2033  ;;  %2140 = vmatprep.subr.mxu1 %v2083_v13  ;;  %v2038_v63 = vpop.permute.xlu0 %2037 }
 0x69b   : > { %v2082_v32 = vsel %vm2079_vm6, %v2038_v63, %v2040_v37 }
 0x69c   : > { %2141 = vmatpush1.msra.mxu1 %v2082_v32 }
 0x69e   : > { %v2032_v46 = vpop.permute.xlu1 %2031  ;;  %v2036_v9 = vpop.permute.xlu0 %2035 }
 0x69f   : > { %v2080_v1 = vsel %vm2079_vm6, %v2032_v46, %v2034_v15  ;;  %v2081_v7 = vsel %vm2079_vm6, %v2034_v15, %v2036_v9 }
 0x6a0   : > { %2142 = vmatprep.subr.mxu1 %v2081_v7 }
 0x6a1   : > { %2143 = vmatpush1.msra.mxu1 %v2080_v1 }
 0x6a2   : > { %4319 = vmatmul.mubr.msk.f32.vlgmr.msra.gmra.mxu1 %vm439_vm0, %v6041_v25 }
 0x6a3   : > { %2182 = vmatprep.mubr.f32.mxu1 %v7488_v8 }
 0x6a6   : > { %4320 = vmatmul.mubr.msk.f32.gmra.mxu1 %vm439_vm0, %v6049_v50 }
 0x6a7   : > { %2188 = vmatprep.mubr.f32.mxu1 %v7488_v8 }
 0x6aa   : > { %4321 = vmatmul.mubr.msk.f32.gmra.mxu1 %vm439_vm0, %v6057_v44 }
 0x6ab   : > { %2194 = vmatprep.mubr.f32.mxu1 %v7488_v8 }
 0x6ae   : > { %4322 = vmatmul.mubr.msk.f32.gmra.mxu1 %vm439_vm0, %v6065_v12 }
 0x6af   : > { %2200 = vmatprep.mubr.f32.mxu1 %v7488_v8 }
 0x6b2   : > { %4323 = vmatmul.mubr.msk.f32.gmra.mxu1 %vm439_vm0, %v6073_v38 }
 0x6b3   : > { %2206 = vmatprep.mubr.f32.mxu1 %v7488_v8 }
 0x6b6   : > { %4324 = vmatmul.mubr.msk.f32.gmra.mxu1 %vm439_vm0, %v6081_v29 }
 0x6b7   : > { %2212 = vmatprep.mubr.f32.mxu1 %v7488_v8 }
 0x6ba   : > { %4325 = vmatmul.mubr.msk.f32.gmra.mxu1 %vm439_vm0, %v6089_v4 }
 0x6bb   : > { %2218 = vmatprep.mubr.f32.mxu1 %v7488_v8 }
 0x6be   : > { %4326 = vmatmul.mubr.msk.f32.gmra.mxu1 %vm439_vm0, %v6097_v5 }
 0x6bf   : > { %2473 = vmatprep.mubr.f32.mxu1 %v7488_v8 }
 0x762   : > { %v2178_v57 = vpop.f32.mrf.mxu1 }
 0x764   : > { %v2180_v11 = vpop.f32.mrf.mxu1 }
 0x765   : > { %v2225_v23 = vadd.f32 %v2180_v11, %v2178_v57 }
 0x766   : > { %v2184_v39 = vpop.f32.mrf.mxu1 }
 0x768   : > { %v2186_v33 = vpop.f32.mrf.mxu1 }
 0x769   : > { %v2228_v19 = vadd.f32 %v2186_v33, %v2184_v39 }
 0x76a   : > { %v2190_v2 = vpop.f32.mrf.mxu1 }
 0x76c   : > { %v2192_v61 = vpop.f32.mrf.mxu1 }
 0x76d   : > { %v2231_v22 = vadd.f32 %v2192_v61, %v2190_v2 }
 0x76e   : > { %v2196_v37 = vpop.f32.mrf.mxu1 }
 0x770   : > { %v2198_v17 = vpop.f32.mrf.mxu1 }
 0x771   : > { %v2234_v7 = vadd.f32 %v2198_v17, %v2196_v37 }
 0x772   : > { %v2202_v16 = vpop.f32.mrf.mxu1 }
 0x774   : > { %v2204_v60 = vpop.f32.mrf.mxu1 }
 0x775   : > { %v2237_v21 = vadd.f32 %v2204_v60, %v2202_v16 }
 0x776   : > { %v2208_v13 = vpop.f32.mrf.mxu1 }
 0x778   : > { %v2210_v15 = vpop.f32.mrf.mxu1 }
 0x779   : > { %v2240_v20 = vadd.f32 %v2210_v15, %v2208_v13 }
 0x77a   : > { %v2214_v63 = vpop.f32.mrf.mxu1 }
 0x77c   : > { %v2216_v32 = vpop.f32.mrf.mxu1 }
 0x77d   : > { %v2243_v46 = vadd.f32 %v2216_v32, %v2214_v63 }
 0x77e   : > { %v2220_v9 = vpop.f32.mrf.mxu1 }
 0x77f   : > { %2244 = vadd.xlane.f32.xlu1 %v2243_v46 }
 0x780   : > { %v2222_v1 = vpop.f32.mrf.mxu1 }
 0x781   : > { %v2246_v28 = vadd.f32 %v2222_v1, %v2220_v9 }
 0x783   : > { %2235 = vadd.xlane.f32.xlu1 %v2234_v7  ;;  %2247 = vadd.xlane.f32.xlu0 %v2246_v28 }
 0x787   : > { %2229 = vadd.xlane.f32.xlu1 %v2228_v19  ;;  %2241 = vadd.xlane.f32.xlu0 %v2240_v20 }
 0x78b   : > { %2238 = vadd.xlane.f32.xlu0 %v2237_v21 }
 0x78f   : > { %2232 = vadd.xlane.f32.xlu0 %v2231_v22 }
 0x793   : > { %2226 = vadd.xlane.f32.xlu0 %v2225_v23 }
 0x808   : > { %v2245_v24 = vpop.xlane.xlu1 %2244 }
 0x809   : > { %v2255_v33 = vmul.f32 0.00390625, %v2245_v24 }
 0x80b   : > { %v6175_v7 = vsub.f32 %v5942_v58, %v2255_v33 }
 0x80c   : > { %v2236_v54 = vpop.xlane.xlu1 %2235  ;;  %v2248_v63 = vpop.xlane.xlu0 %2247 }
 0x80d   : > { %v2252_v32 = vmul.f32 0.00390625, %v2236_v54  ;;  %v2256_v24 = vmul.f32 0.00390625, %v2248_v63 }
 0x80f   : > { %v6103_v46 = vsub.f32 %v5875_v14, %v2252_v32  ;;  %v6106_v28 = vsub.f32 %v5862_v30, %v2252_v32  ;;  %v6127_v2 = vsub.f32 %v5864_v59, %v2252_v32  ;;  %v6151_v16 = vsub.f32 %v5959_v45, %v2256_v24 }
 0x810   : > { %v2242_v37 = vpop.xlane.xlu0 %2241  ;;  %v2230_v60 = vpop.xlane.xlu1 %2229 }
 0x811   : > { %v2291_v19 = vmul.f32 %v6103_v46, %v6103_v46  ;;  %v2254_v21 = vmul.f32 0.00390625, %v2242_v37  ;;  %v2290_v23 = vmul.f32 %v6106_v28, %v6106_v28  ;;  %v2292_v17 = vmul.f32 %v6127_v2, %v6127_v2 }
 0x812   : > { %v2250_v15 = vmul.f32 0.00390625, %v2230_v60  ;;  %v6187_v37 = vsub.f32 %v5924_v3, %v2255_v33  ;;  %v2006_v60 = vld [vmem:[%s7438_s9 + $0x38] sm:$0xff] }
 0x813   : > { %2349 = vrot.lane.b32.xlu0 %v2291_v19, %s4793_s30  ;;  %v6118_v30 = vsub.f32 %v5921_v40, %v2254_v21  ;;  %v6163_v9 = vsub.f32 %v5907_v43, %v2254_v21 }
 0x814   : > { %v2239_v20 = vpop.xlane.xlu0 %2238  ;;  %v6178_v63 = vsub.f32 %v5993_v18, %v2250_v15  ;;  %v6190_v58 = vsub.f32 %v6006_v47, %v2250_v15 }
 0x815   : > { %v2253_v22 = vmul.f32 0.00390625, %v2239_v20  ;;  %v2297_v40 = vmul.f32 %v6118_v30, %v6118_v30  ;;  %v2300_v20 = vmul.f32 %v6175_v7, %v6175_v7 }
 0x816   : > { %v2285_v18 = vmul.f32 %v6178_v63, %v6178_v63  ;;  %v2284_v47 = vmul.f32 %v6190_v58, %v6190_v58 }
 0x817   : > { %v6114_v54 = vsub.f32 %v5889_v49, %v2253_v22  ;;  %2347 = vrot.lane.b32.xlu0 %v2290_v23, %s4793_s30  ;;  %v6130_v49 = vsub.f32 %v5904_v53, %v2254_v21  ;;  %v6142_v59 = vsub.f32 %v5892_v6, %v2253_v22  ;;  %v6199_v21 = vsub.f32 %v5968_v31, %v2256_v24 }
 0x818   : > { %v2233_v14 = vpop.xlane.xlu0 %2232  ;;  %v6211_v23 = vsub.f32 %v5951_v36, %v2256_v24 }
 0x819   : > { %v2251_v57 = vmul.f32 0.00390625, %v2233_v14  ;;  %v2295_v11 = vmul.f32 %v6114_v54, %v6114_v54  ;;  %v2296_v53 = vmul.f32 %v6130_v49, %v6130_v49  ;;  %v2294_v13 = vmul.f32 %v6142_v59, %v6142_v59  ;;  %v1998_v14 = vld [vmem:[%s7437_s8 + $0x38] sm:$0xff] }
 0x81a   : > { %v2303_v31 = vmul.f32 %v6199_v21, %v6199_v21  ;;  %v2302_v36 = vmul.f32 %v6211_v23, %v6211_v23 }
 0x81b   : > { %v6123_v39 = vsub.f32 %v5853_v10, %v2251_v57  ;;  %2357 = vrot.lane.b32.xlu0 %v2295_v11, %s4793_s30  ;;  %v6139_v10 = vsub.f32 %v5938_v55, %v2255_v33  ;;  %v6154_v55 = vsub.f32 %v5878_v48, %v2253_v22  ;;  %v6166_v45 = vsub.f32 %v5981_v51, %v2251_v57  ;;  %v1995_v33 = vld [vmem:[%s7437_s8 + $0x20] sm:$0xff] }
 0x81c   : > { %v2304_v48 = vmul.f32 %v6151_v16, %v6151_v16  ;;  %v2298_v51 = vmul.f32 %v6163_v9, %v6163_v9  ;;  %v2227_v32 = vpop.xlane.xlu0 %2226  ;;  %v2299_v22 = vmul.f32 %v6187_v37, %v6187_v37  ;;  %v6223_v11 = vsub.f32 %v5971_v26, %v2251_v57  ;;  %v2003_v26 = vld [vmem:[%s7438_s9 + $0x20] sm:$0xff] }
 0x81d   : > { %v2288_v61 = vmul.f32 %v6123_v39, %v6123_v39  ;;  %v2301_v6 = vmul.f32 %v6139_v10, %v6139_v10  ;;  %v2293_v1 = vmul.f32 %v6154_v55, %v6154_v55  ;;  %v2289_v43 = vmul.f32 %v6166_v45, %v6166_v45 }
 0x81e   : > { %v2249_v19 = vmul.f32 0.00390625, %v2227_v32 }
 0x81f   : > { %2361 = vrot.lane.b32.xlu0 %v2297_v40, %s4793_s30  ;;  %2343 = vrot.lane.b32.xlu1 %v2288_v61, %s4793_s30  ;;  %v6232_v40 = vsub.f32 %v5995_v34, %v2250_v15  ;;  %v2287_v61 = vmul.f32 %v6223_v11, %v6223_v11 }
 0x820   : > { %v6202_v3 = vsub.f32 %v6014_v56, %v2249_v19  ;;  %v6241_v57 = vsub.f32 %v6008_v62, %v2249_v19  ;;  %v6247_v34 = vsub.f32 %v6016_v35, %v2249_v19  ;;  %v1997_v62 = vld [vmem:[%s7437_s8 + $0x30] sm:$0xff] }
 0x821   : > { %v2286_v24 = vmul.f32 %v6232_v40, %v6232_v40  ;;  %v2005_v35 = vld [vmem:[%s7438_s9 + $0x30] sm:$0xff] }
 0x822   : > { %v2283_v56 = vmul.f32 %v6202_v3, %v6202_v3 }
 0x823   : > { %2359 = vrot.lane.b32.xlu0 %v2296_v53, %s4793_s30  ;;  %2351 = vrot.lane.b32.xlu1 %v2292_v17, %s4793_s30  ;;  %v2282_v53 = vmul.f32 %v6241_v57, %v6241_v57  ;;  %v2281_v17 = vmul.f32 %v6247_v34, %v6247_v34 }
 0x827   : > { %2369 = vrot.lane.b32.xlu0 %v2301_v6, %s4793_s30  ;;  %2355 = vrot.lane.b32.xlu1 %v2294_v13, %s4793_s30  ;;  %v1996_v6 = vld [vmem:[%s7437_s8 + $0x28] sm:$0xff] }
 0x828   : > { %v2004_v13 = vld [vmem:[%s7438_s9 + $0x28] sm:$0xff] }
 0x82b   : > { %2375 = vrot.lane.b32.xlu0 %v2304_v48, %s4793_s30  ;;  %2353 = vrot.lane.b32.xlu1 %v2293_v1, %s4793_s30 }
 0x82f   : > { %2345 = vrot.lane.b32.xlu0 %v2289_v43, %s4793_s30  ;;  %2363 = vrot.lane.b32.xlu1 %v2298_v51, %s4793_s30 }
 0x833   : > { %2337 = vrot.lane.b32.xlu0 %v2285_v18, %s4793_s30  ;;  %2367 = vrot.lane.b32.xlu1 %v2300_v20, %s4793_s30 }
 0x837   : > { %2335 = vrot.lane.b32.xlu0 %v2284_v47, %s4793_s30  ;;  %2365 = vrot.lane.b32.xlu1 %v2299_v22, %s4793_s30 }
 0x83b   : > { %2373 = vrot.lane.b32.xlu1 %v2303_v31, %s4793_s30  ;;  %2333 = vrot.lane.b32.xlu0 %v2283_v56, %s4793_s30 }
 0x83f   : > { %2371 = vrot.lane.b32.xlu1 %v2302_v36, %s4793_s30  ;;  %2631 = vperm.xlu0 %4464, %v1998_v14  }
 0x843   : > { %2341 = vrot.lane.b32.xlu1 %v2287_v61, %s4793_s30  ;;  %2616 = vperm.xlu0 %4464, %v1995_v33  }
 0x847   : > { %2339 = vrot.lane.b32.xlu1 %v2286_v24, %s4793_s30  ;;  %2680 = vperm.xlu0 %4464, %v2003_v26  }
 0x84b   : > { %2331 = vrot.lane.b32.xlu1 %v2282_v53, %s4793_s30 }
 0x84f   : > { %2329 = vrot.lane.b32.xlu1 %v2281_v17, %s4793_s30 }
 0x853   : > { %2626 = vperm.xlu1 %4465, %v1997_v62  }
 0x857   : > { %2690 = vperm.xlu1 %4465, %v2005_v35  }
 0x85b   : > { %2695 = vperm.xlu1 %4465, %v2006_v60  }
 0x85f   : > { %2621 = vperm.xlu1 %4465, %v1996_v6  }
 0x863   : > { %2685 = vperm.xlu1 %4465, %v2004_v13  }
 0x885   : > { %v2350_v15 = vpop.permute.xlu0 %2349 }
 0x889   : > { %v2348_v48 = vpop.permute.xlu0 %2347 }
 0x88d   : > { %v2358_v1 = vpop.permute.xlu0 %2357 }
 0x891   : > { %v2344_v43 = vpop.permute.xlu1 %2343  ;;  %v2362_v51 = vpop.permute.xlu0 %2361 }
 0x895   : > { %v2352_v32 = vpop.permute.xlu1 %2351  ;;  %v2360_v19 = vpop.permute.xlu0 %2359 }
 0x896   : > { %v2387_v6 = vsel %vm2079_vm6, %v2360_v19, %v2362_v51 }
 0x899   : > { %v2356_v18 = vpop.permute.xlu1 %2355  ;;  %v2370_v47 = vpop.permute.xlu0 %2369 }
 0x89d   : > { %v2354_v20 = vpop.permute.xlu1 %2353  ;;  %v2376_v31 = vpop.permute.xlu0 %2375 }
 0x8a1   : > { %v2364_v22 = vpop.permute.xlu1 %2363  ;;  %v2346_v36 = vpop.permute.xlu0 %2345 }
 0x8a2   : > { %v2388_v60 = vsel %vm2079_vm6, %v2362_v51, %v2364_v22  ;;  %v2382_v22 = vsel %vm2079_vm6, %v2344_v43, %v2346_v36 }
 0x8a5   : > { %v2368_v56 = vpop.permute.xlu1 %2367  ;;  %v2338_v26 = vpop.permute.xlu0 %2337 }
 0x8a6   : > { %v2390_v17 = vsel %vm2079_vm6, %v2368_v56, %v2370_v47  ;;  %v2384_v47 = vsel %vm2079_vm6, %v2350_v15, %v2352_v32 }
 0x8a9   : > { %v2366_v14 = vpop.permute.xlu1 %2365  ;;  %v2336_v13 = vpop.permute.xlu0 %2335 }
 0x8aa   : > { %v2389_v62 = vsel %vm2079_vm6, %v2366_v14, %v2368_v56  ;;  %v2383_v56 = vsel %vm2079_vm6, %v2348_v48, %v2350_v15 }
 0x8ad   : > { %v2374_v33 = vpop.permute.xlu1 %2373  ;;  %v2334_v19 = vpop.permute.xlu0 %2333 }
 0x8ae   : > { %v2392_v61 = vsel %vm2079_vm6, %v2374_v33, %v2376_v31  ;;  %v2386_v31 = vsel %vm2079_vm6, %v2356_v18, %v2358_v1 }
 0x8af   : > { %2425 = vmatprep.subr.mxu1 %v2392_v61  ;;  %v2385_v61 = vsel %vm2079_vm6, %v2354_v20, %v2356_v18  ;;  %v2379_v18 = vsel %vm2079_vm6, %v2336_v13, %v2338_v26 }
 0x8b1   : > { %v2372_v24 = vpop.permute.xlu1 %2371 }
 0x8b2   : > { %v2391_v53 = vsel %vm2079_vm6, %v2372_v24, %v2374_v33 }
 0x8b3   : > { %2426 = vmatpush1.msra.mxu1 %v2391_v53 }
 0x8b4   : > { %2427 = vmatprep.subr.mxu1 %v2390_v17 }
 0x8b5   : > { %v2342_v35 = vpop.permute.xlu1 %2341  ;;  %2428 = vmatpush1.msra.mxu1 %v2389_v62 }
 0x8b6   : > { %2429 = vmatprep.subr.mxu1 %v2388_v60  ;;  %v2381_v51 = vsel %vm2079_vm6, %v2342_v35, %v2344_v43 }
 0x8b7   : > { %2430 = vmatpush1.msra.mxu1 %v2387_v6 }
 0x8b8   : > { %2431 = vmatprep.subr.mxu1 %v2386_v31  ;;  %v1994_v31 = vld [vmem:[%s7437_s8 + $0x18] sm:$0xff] }
 0x8b9   : > { %v2340_v33 = vpop.permute.xlu1 %2339  ;;  %2432 = vmatpush1.msra.mxu1 %v2385_v61  ;;  %v1993_v61 = vld [vmem:[%s7437_s8 + $0x10] sm:$0xff] }
 0x8ba   : > { %2433 = vmatprep.subr.mxu1 %v2384_v47  ;;  %v2380_v1 = vsel %vm2079_vm6, %v2338_v26, %v2340_v33  ;;  %v2001_v33 = vld [vmem:[%s7438_s9 + $0x10] sm:$0xff]  ;;  %v1991_v47 = vld [vmem:[%s7437_s8] sm:$0xff] }
 0x8bb   : > { %2434 = vmatpush1.msra.mxu1 %v2383_v56 }
 0x8bc   : > { %2435 = vmatprep.subr.mxu1 %v2382_v22  ;;  %v1999_v22 = vld [vmem:[%s7438_s9] sm:$0xff] }
 0x8bd   : > { %v2332_v14 = vpop.permute.xlu1 %2331  ;;  %2436 = vmatpush1.msra.mxu1 %v2381_v51 }
 0x8be   : > { %2437 = vmatprep.subr.mxu1 %v2380_v1  ;;  %v2378_v20 = vsel %vm2079_vm6, %v2332_v14, %v2334_v19  ;;  %v1992_v1 = vld [vmem:[%s7437_s8 + $0x8] sm:$0xff] }
 0x8bf   : > { %2438 = vmatpush1.msra.mxu1 %v2379_v18  ;;  %v2000_v18 = vld [vmem:[%s7438_s9 + $0x8] sm:$0xff] }
 0x8c0   : > { %2439 = vmatprep.subr.mxu1 %v2378_v20  ;;  %v6345_v20 = vpop.permute.xlu0 %2631 }
 0x8c1   : > { %v2330_v15 = vpop.permute.xlu1 %2329 }
 0x8c2   : > { %v2377_v48 = vsel %vm2079_vm6, %v2330_v15, %v2332_v14  ;;  %v2002_v14 = vld [vmem:[%s7438_s9 + $0x18] sm:$0xff] }
 0x8c3   : > { %2440 = vmatpush1.msra.mxu1 %v2377_v48 }
 0x8c4   : > { %4327 = vmatmul.mubr.msk.f32.vlgmr.msra.gmra.mxu1 %vm439_vm0, %v6041_v25  ;;  %v6349_v48 = vpop.permute.xlu0 %2616 }
 0x8c5   : > { %2479 = vmatprep.mubr.f32.mxu1 %v7488_v8 }
 0x8c8   : > { %4328 = vmatmul.mubr.msk.f32.gmra.mxu1 %vm439_vm0, %v6049_v50 }
 0x8c9   : > { %2485 = vmatprep.mubr.f32.mxu1 %v7488_v8 }
 0x8cc   : > { %4329 = vmatmul.mubr.msk.f32.gmra.mxu1 %vm439_vm0, %v6057_v44 }
 0x8cd   : > { %2491 = vmatprep.mubr.f32.mxu1 %v7488_v8 }
 0x8d0   : > { %4330 = vmatmul.mubr.msk.f32.gmra.mxu1 %vm439_vm0, %v6065_v12 }
 0x8d1   : > { %2497 = vmatprep.mubr.f32.mxu1 %v7488_v8 }
 0x8d4   : > { %4331 = vmatmul.mubr.msk.f32.gmra.mxu1 %vm439_vm0, %v6073_v38 }
 0x8d5   : > { %2503 = vmatprep.mubr.f32.mxu1 %v7488_v8 }
 0x8d8   : > { %4332 = vmatmul.mubr.msk.f32.gmra.mxu1 %vm439_vm0, %v6081_v29 }
 0x8d9   : > { %2509 = vmatprep.mubr.f32.mxu1 %v7488_v8 }
 0x8dc   : > { %4333 = vmatmul.mubr.msk.f32.gmra.mxu1 %vm439_vm0, %v6089_v4 }
 0x8dd   : > { %2515 = vmatprep.mubr.f32.mxu1 %v7488_v8 }
 0x8e0   : > { %4334 = vmatmul.mubr.msk.f32.gmra.mxu1 %vm439_vm0, %v6097_v5 }
 0x984   : > { %v2475_v25 = vpop.f32.mrf.mxu1 }
 0x986   : > { %v2477_v50 = vpop.f32.mrf.mxu1 }
 0x987   : > { %v2522_v44 = vadd.f32 %v2477_v50, %v2475_v25  ;;  %v6353_v50 = vpop.permute.xlu0 %2680 }
 0x988   : > { %v2481_v12 = vpop.f32.mrf.mxu1 }
 0x989   : > { %2523 = vadd.xlane.f32.xlu1 %v2522_v44 }
 0x98a   : > { %v2483_v38 = vpop.f32.mrf.mxu1 }
 0x98b   : > { %v2525_v43 = vadd.f32 %v2483_v38, %v2481_v12 }
 0x98c   : > { %v2487_v32 = vpop.f32.mrf.mxu1 }
 0x98d   : > { %2526 = vadd.xlane.f32.xlu0 %v2525_v43 }
 0x98e   : > { %v2489_v29 = vpop.f32.mrf.mxu1 }
 0x98f   : > { %v2528_v36 = vadd.f32 %v2489_v29, %v2487_v32 }
 0x990   : > { %v2493_v26 = vpop.f32.mrf.mxu1 }
 0x991   : > { %2529 = vadd.xlane.f32.xlu1 %v2528_v36 }
 0x992   : > { %v2495_v24 = vpop.f32.mrf.mxu1 }
 0x993   : > { %v2531_v4 = vadd.f32 %v2495_v24, %v2493_v26 }
 0x994   : > { %v2499_v53 = vpop.f32.mrf.mxu1 }
 0x995   : > { %2532 = vadd.xlane.f32.xlu0 %v2531_v4 }
 0x996   : > { %v2501_v8 = vpop.f32.mrf.mxu1 }
 0x997   : > { %v2534_v17 = vadd.f32 %v2501_v8, %v2499_v53 }
 0x998   : > { %v2505_v5 = vpop.f32.mrf.mxu1 }
 0x999   : > { %2535 = vadd.xlane.f32.xlu0 %v2534_v17 }
 0x99a   : > { %v2507_v62 = vpop.f32.mrf.mxu1 }
 0x99b   : > { %v2537_v35 = vadd.f32 %v2507_v62, %v2505_v5 }
 0x99c   : > { %v2511_v60 = vpop.f32.mrf.mxu1 }
 0x99d   : > { %2538 = vadd.xlane.f32.xlu0 %v2537_v35 }
 0x99e   : > { %v2513_v6 = vpop.f32.mrf.mxu1 }
 0x99f   : > { %v2540_v13 = vadd.f32 %v2513_v6, %v2511_v60 }
 0x9a0   : > { %v2517_v56 = vpop.f32.mrf.mxu1 }
 0x9a1   : > { %2541 = vadd.xlane.f32.xlu0 %v2540_v13 }
 0x9a2   : > { %2611 = vperm.xlu1 %4465, %v1994_v31   ;;  %v2519_v51 = vpop.f32.mrf.mxu1 }
 0x9a3   : > { %v2543_v19 = vadd.f32 %v2519_v51, %v2517_v56 }
 0x9b7   : > { %2606 = vperm.xlu0 %4464, %v1993_v61  }
 0x9bb   : > { %2670 = vperm.xlu0 %4464, %v2001_v33  }
 0x9bf   : > { %2596 = vperm.xlu0 %4464, %v1991_v47  }
 0x9c3   : > { %2660 = vperm.xlu0 %4464, %v1999_v22  }
 0x9c6   : > { %2544 = vadd.xlane.f32.xlu1 %v2543_v19 }
 0x9c7   : > { %2910 = vrot.lane.b32.xlu0 %v5369_v27, %s4792_s23 }
 0x9cb   : > { %2999 = vrot.lane.b32.xlu0 %v5245_v42, %s4792_s23  ;;  %v6341_v42 = vpop.permute.xlu1 %2626 }
 0x9cf   : > { %v6343_v27 = vpop.permute.xlu1 %2690 }
 0x9d3   : > { %v6347_v15 = vpop.permute.xlu1 %2695 }
 0x9d7   : > { %2675 = vperm.xlu1 %4465, %v2002_v14   ;;  %v6351_v25 = vpop.permute.xlu1 %2621 }
 0x9db   : > { %2601 = vperm.xlu1 %4465, %v1992_v1   ;;  %v6355_v44 = vpop.permute.xlu1 %2685 }
 0x9df   : > { %2665 = vperm.xlu1 %4465, %v2000_v18  }
 0x9e3   : > { %2912 = vrot.lane.b32.xlu1 %v5392_v0, %s4792_s23 }
 0x9e7   : > { %3001 = vrot.lane.b32.xlu1 %v5252_v52, %s4792_s23 }
 0xa12   : > { %v2524_v12 = vpop.xlane.xlu1 %2523 }
 0xa13   : > { %v2546_v53 = vmul.f32 0.00390625, %v2524_v12 }
 0xa15   : > { %v2554_v35 = vadd.f32 1e-06, %v2546_v53 }
 0xa16   : > { %v2527_v0 = vpop.xlane.xlu0 %2526 }
 0xa17   : > { %v2547_v8 = vmul.f32 0.00390625, %v2527_v0 }
 0xa19   : > { %v2555_v60 = vadd.f32 1e-06, %v2547_v8 }
 0xa1a   : > { %v2530_v52 = vpop.xlane.xlu1 %2529 }
 0xa1b   : > { %v2548_v29 = vmul.f32 0.00390625, %v2530_v52 }
 0xa1d   : > { %v2556_v24 = vadd.f32 1e-06, %v2548_v29 }
 0xa1e   : > { %v2533_v38 = vpop.xlane.xlu0 %2532 }
 0xa1f   : > { %v2549_v62 = vmul.f32 0.00390625, %v2533_v38 }
 0xa21   : > { %v2557_v13 = vadd.f32 1e-06, %v2549_v62 }
 0xa22   : > { %v2536_v43 = vpop.xlane.xlu0 %2535 }
 0xa23   : > { %v2550_v32 = vmul.f32 0.00390625, %v2536_v43 }
 0xa25   : > { %v2558_v26 = vadd.f32 1e-06, %v2550_v32 }
 0xa26   : > { %v2539_v36 = vpop.xlane.xlu0 %2538 }
 0xa27   : > { %v2551_v4 = vmul.f32 0.00390625, %v2539_v36  ;;  %4658 = vrsqrt.f32 %v2558_v26 }
 0xa28   : > { %4660 = vrsqrt.f32 %v2556_v24 }
 0xa29   : > { %v2559_v17 = vadd.f32 1e-06, %v2551_v4 }
 0xa2a   : > { %v2542_v5 = vpop.xlane.xlu0 %2541 }
 0xa2b   : > { %4662 = vrsqrt.f32 %v2559_v17  ;;  %v2552_v6 = vmul.f32 0.00390625, %v2542_v5 }
 0xa2c   : > { %4664 = vrsqrt.f32 %v2554_v35 }
 0xa2d   : > { %4666 = vrsqrt.f32 %v2555_v60  ;;  %v2560_v61 = vadd.f32 1e-06, %v2552_v6 }
 0xa2e   : > { %4668 = vrsqrt.f32 %v2557_v13 }
 0xa2f   : > { %4670 = vrsqrt.f32 %v2560_v61 }
 0xa32   : > { %v2607_v31 = vpop.permute.xlu0 %2606 }
 0xa34   : > { %v4659_v33 = vpop.eup %4658 }
 0xa35   : > { %v4661_v47 = vpop.eup %4660  ;;  %v2583_v22 = vmul.f32 %v4659_v33, %v6142_v59  ;;  %v2582_v19 = vmul.f32 %v4659_v33, %v6154_v55 }
 0xa36   : > { %v2671_v56 = vpop.permute.xlu0 %2670  ;;  %v2576_v51 = vmul.f32 %v4661_v47, %v6223_v11  ;;  %v2578_v1 = vmul.f32 %v4661_v47, %v6166_v45  ;;  %v2577_v0 = vmul.f32 %v4661_v47, %v6123_v39 }
 0xa37   : > { %v2647_v38 = vmul.f32 %v6349_v48, %v2583_v22  ;;  %v2646_v11 = vmul.f32 %v6349_v48, %v2582_v19 }
 0xa38   : > { %v4663_v14 = vpop.eup %4662  ;;  %v2640_v18 = vmul.f32 %v2607_v31, %v2576_v51  ;;  %v2642_v52 = vmul.f32 %v2607_v31, %v2578_v1  ;;  %v2641_v29 = vmul.f32 %v2607_v31, %v2577_v0  ;;  %v2584_v1 = vmul.f32 %v4659_v33, %v6114_v54 }
 0xa39   : > { %v4665_v32 = vpop.eup %4664  ;;  %v2586_v59 = vmul.f32 %v4663_v14, %v6118_v30  ;;  %v2585_v45 = vmul.f32 %v4663_v14, %v6130_v49  ;;  %v6375_v39 = vadd.f32 %v6353_v50, %v2647_v38  ;;  %v6387_v62 = vadd.f32 %v6353_v50, %v2646_v11 }
 0xa3a   : > { %v2597_v12 = vpop.permute.xlu0 %2596  ;;  %v6363_v43 = vadd.f32 %v2671_v56, %v2640_v18  ;;  %v6367_v36 = vpop.eup %4666  ;;  %v6369_v55 = vadd.f32 %v2671_v56, %v2642_v52  ;;  %v6372_v26 = vadd.f32 %v2671_v56, %v2641_v29  ;;  %v2570_v53 = vmul.f32 %v4665_v32, %v6247_v34 }
 0xa3b   : > { %v4669_v24 = vpop.eup %4668  ;;  %v2571_v30 = vmul.f32 %v4665_v32, %v6241_v57  ;;  %v2572_v8 = vmul.f32 %v4665_v32, %v6202_v3  ;;  %v6383_v5 = vmul.f32 %v6367_v36, %v6190_v58  ;;  %v2650_v49 = vmul.f32 %v6351_v25, %v2586_v59  ;;  %v2612_v18 = vpop.permute.xlu1 %2611 }
 0xa3c   : > { %v2728_v4 = vsub.f32 0.0, %v6363_v43  ;;  %v4671_v35 = vpop.eup %4670  ;;  %v2730_v60 = vsub.f32 0.0, %v6369_v55  ;;  %v2634_v6 = vmul.f32 %v2597_v12, %v2570_v53  ;;  %v6392_v34 = vmul.f32 %v6367_v36, %v6178_v63 }
 0xa3d   : > { %v2649_v3 = vmul.f32 %v6351_v25, %v2585_v45  ;;  %v2729_v57 = vsub.f32 0.0, %v6372_v26  ;;  %v2579_v58 = vmul.f32 %v4669_v24, %v6106_v28  ;;  %v2580_v13 = vmul.f32 %v4669_v24, %v6103_v46 }
 0xa3e   : > { %v2661_v17 = vpop.permute.xlu0 %2660  ;;  %v2735_v31 = vsub.f32 0.0, %v6375_v39  ;;  %v2758_v61 = vmul.f32 1.442695, %v2728_v4  ;;  %v2635_v47 = vmul.f32 %v2597_v12, %v2571_v30  ;;  %v2636_v56 = vmul.f32 %v2597_v12, %v2572_v8 }
 0xa3f   : > { %v6399_v22 = vadd.f32 %v2661_v17, %v2634_v6  ;;  %v6402_v51 = vadd.f32 %v6355_v44, %v2650_v49  ;;  %v2734_v63 = vsub.f32 0.0, %v6387_v62  ;;  %v2588_v19 = vmul.f32 %v4671_v35, %v6187_v37 }
 0xa40   : > { %v2762_v28 = vmul.f32 1.442695, %v2730_v60  ;;  %v6407_v0 = vadd.f32 %v2661_v17, %v2635_v47  ;;  %v6409_v46 = vadd.f32 %v2661_v17, %v2636_v56  ;;  %v6412_v38 = vadd.f32 %v6355_v44, %v2649_v3 }
 0xa41   : > { %v2581_v12 = vmul.f32 %v4669_v24, %v6127_v2  ;;  %v2643_v52 = vmul.f32 %v2612_v18, %v2579_v58  ;;  %v2772_v32 = vmul.f32 1.442695, %v2735_v31  ;;  %v2587_v29 = vmul.f32 %v4663_v14, %v6163_v9 }
 0xa42   : > { %4672 = vpow2.f32 %v2758_v61  ;;  %v2760_v59 = vmul.f32 1.442695, %v2729_v57  ;;  %v2722_v37 = vsub.f32 0.0, %v6399_v22  ;;  %v2644_v54 = vmul.f32 %v2612_v18, %v2580_v13 }
 0xa43   : > { %v2738_v33 = vsub.f32 0.0, %v6402_v51  ;;  %v2770_v11 = vmul.f32 1.442695, %v2734_v63  ;;  %v2652_v45 = vmul.f32 %v6341_v42, %v2588_v19  ;;  %v2648_v4 = vmul.f32 %v6349_v48, %v2584_v1 }
 0xa44   : > { %4674 = vpow2.f32 %v2762_v28  ;;  %v2723_v53 = vsub.f32 0.0, %v6407_v0  ;;  %v2724_v2 = vsub.f32 0.0, %v6409_v46  ;;  %v2737_v9 = vsub.f32 0.0, %v6412_v38 }
 0xa45   : > { %v2645_v30 = vmul.f32 %v2612_v18, %v2581_v12  ;;  %4676 = vpow2.f32 %v2772_v32  ;;  %v2651_v8 = vmul.f32 %v6351_v25, %v2587_v29  ;;  %v2746_v17 = vmul.f32 1.442695, %v2722_v37 }
 0xa46   : > { %4678 = vpow2.f32 %v2760_v59  ;;  %v2590_v49 = vmul.f32 %v4671_v35, %v6139_v10  ;;  %v2589_v60 = vmul.f32 %v4671_v35, %v6175_v7  ;;  %v2778_v6 = vmul.f32 1.442695, %v2738_v33 }
 0xa47   : > { %4680 = vpow2.f32 %v2770_v11  ;;  %v6427_v3 = vadd.f32 %v6343_v27, %v2652_v45  ;;  %v2748_v57 = vmul.f32 1.442695, %v2723_v53  ;;  %v2750_v58 = vmul.f32 1.442695, %v2724_v2 }
 0xa48   : > { %v2776_v31 = vmul.f32 1.442695, %v2737_v9  ;;  %v6430_v61 = vadd.f32 %v6353_v50, %v2648_v4  ;;  %v6437_v10 = vadd.f32 %v6355_v44, %v2651_v8  ;;  %v2654_v35 = vmul.f32 %v6341_v42, %v2590_v49 }
 0xa49   : > { %v2653_v56 = vmul.f32 %v6341_v42, %v2589_v60  ;;  %v2740_v19 = vsub.f32 0.0, %v6427_v3  ;;  %v2575_v44 = vmul.f32 %v6367_v36, %v6232_v40 }
 0xa4a   : > { %v2736_v28 = vsub.f32 0.0, %v6430_v61  ;;  %v2739_v42 = vsub.f32 0.0, %v6437_v10  ;;  %v6452_v29 = vadd.f32 %v6343_v27, %v2654_v35 }
 0xa4b   : > { %v6455_v59 = vadd.f32 %v6343_v27, %v2653_v56  ;;  %v2782_v36 = vmul.f32 1.442695, %v2740_v19 }
 0xa4c   : > { %v2774_v45 = vmul.f32 1.442695, %v2736_v28 }
 0xa4f   : > { %v2545_v24 = vpop.xlane.xlu1 %2544  ;;  %v4673_v37 = vpop.eup %4672 }
 0xa50   : > { %v2553_v14 = vmul.f32 0.00390625, %v2545_v24  ;;  %v2780_v24 = vmul.f32 1.442695, %v2739_v42  ;;  %v2800_v9 = vadd.f32 1.0, %v4673_v37 }
 0xa51   : > { %v4675_v4 = vpop.eup %4674 }
 0xa52   : > { %v2561_v48 = vadd.f32 1e-06, %v2553_v14  ;;  %v4677_v27 = vpop.eup %4676  ;;  %v2802_v49 = vadd.f32 1.0, %v4675_v4 }
 0xa53   : > { %v2676_v13 = vpop.permute.xlu1 %2675 }
 0xa54   : > { %4682 = vrsqrt.f32 %v2561_v48  ;;  %v6432_v25 = vadd.f32 %v2676_v13, %v2643_v52  ;;  %v6434_v47 = vadd.f32 %v2676_v13, %v2644_v54  ;;  %v6439_v7 = vadd.f32 %v2676_v13, %v2645_v30  ;;  %v4679_v30 = vpop.eup %4678 }
 0xa55   : > { %4684 = vpow2.f32 %v2746_v17  ;;  %v4681_v17 = vpop.eup %4680 }
 0xa56   : > { %v2731_v63 = vsub.f32 0.0, %v6432_v25  ;;  %v2732_v50 = vsub.f32 0.0, %v6434_v47  ;;  %4686 = vpow2.f32 %v2778_v6  ;;  %v2733_v1 = vsub.f32 0.0, %v6439_v7 }
 0xa57   : > { %4688 = vpow2.f32 %v2748_v57  ;;  %v2602_v18 = vpop.permute.xlu1 %2601  ;;  %v2807_v57 = vadd.f32 1.0, %v4677_v27 }
 0xa58   : > { %4690 = vpow2.f32 %v2750_v58  ;;  %v2764_v12 = vmul.f32 1.442695, %v2731_v63  ;;  %v2766_v52 = vmul.f32 1.442695, %v2732_v50  ;;  %v2768_v32 = vmul.f32 1.442695, %v2733_v1 }
 0xa59   : > { %4692 = vpow2.f32 %v2776_v31  ;;  %v2637_v54 = vmul.f32 %v2602_v18, %v6383_v5  ;;  %v2638_v40 = vmul.f32 %v2602_v18, %v6392_v34  ;;  %v2639_v33 = vmul.f32 %v2602_v18, %v2575_v44 }
 0xa5a   : > { %4694 = vpow2.f32 %v2764_v12  ;;  %v2742_v5 = vsub.f32 0.0, %v6452_v29  ;;  %v2741_v34 = vsub.f32 0.0, %v6455_v59 }
 0xa5b   : > { %4696 = vpow2.f32 %v2766_v52  ;;  %v2666_v11 = vpop.permute.xlu1 %2665 }
 0xa5c   : > { %4698 = vpow2.f32 %v2768_v32  ;;  %v6459_v53 = vadd.f32 %v2666_v11, %v2637_v54  ;;  %v6461_v2 = vadd.f32 %v2666_v11, %v2638_v40  ;;  %v6463_v14 = vadd.f32 %v2666_v11, %v2639_v33 }
 0xa5d   : > { %4700 = vpow2.f32 %v2782_v36  ;;  %v2786_v13 = vmul.f32 1.442695, %v2742_v5  ;;  %v2784_v31 = vmul.f32 1.442695, %v2741_v34 }
 0xa5e   : > { %v2725_v8 = vsub.f32 0.0, %v6459_v53  ;;  %v2726_v60 = vsub.f32 0.0, %v6461_v2  ;;  %4702 = vpow2.f32 %v2774_v45  ;;  %v2727_v48 = vsub.f32 0.0, %v6463_v14 }
 0xa5f   : > { %4704 = vpow2.f32 %v2780_v24 }
 0xa60   : > { %v2752_v6 = vmul.f32 1.442695, %v2725_v8  ;;  %4706 = vrcp.f32 %v2800_v9  ;;  %v2754_v1 = vmul.f32 1.442695, %v2726_v60  ;;  %v2756_v44 = vmul.f32 1.442695, %v2727_v48 }
 0xa61   : > { %v4683_v58 = vpop.eup %4682  ;;  %v2801_v60 = vadd.f32 1.0, %v4679_v30 }
 0xa62   : > { %v4685_v35 = vpop.eup %4684  ;;  %4708 = vpow2.f32 %v2752_v6  ;;  %v2591_v56 = vmul.f32 %v4683_v58, %v6211_v23  ;;  %v2593_v63 = vmul.f32 %v4683_v58, %v6151_v16  ;;  %v2592_v50 = vmul.f32 %v4683_v58, %v6199_v21 }
 0xa63   : > { %v4687_v19 = vpop.eup %4686  ;;  %4710 = vrcp.f32 %v2802_v49  ;;  %v2794_v42 = vadd.f32 1.0, %v4685_v35 }
 0xa64   : > { %v4689_v18 = vpop.eup %4688  ;;  %4712 = vrcp.f32 %v2807_v57  ;;  %v2655_v28 = vmul.f32 %v6345_v20, %v2591_v56  ;;  %v2657_v12 = vmul.f32 %v6345_v20, %v2593_v63  ;;  %v2656_v23 = vmul.f32 %v6345_v20, %v2592_v50 }
 0xa65   : > { %v6475_v52 = vpop.eup %4690  ;;  %4714 = vpow2.f32 %v2786_v13  ;;  %v2810_v54 = vadd.f32 1.0, %v4687_v19  ;;  %v2806_v57 = vadd.f32 1.0, %v4681_v17  ;;  %v2795_v56 = vadd.f32 1.0, %v4689_v18  ;;  %v6490_v17 = vpop.permute.xlu1 %2912 }
 0xa66   : > { %v4693_v32 = vpop.eup %4692  ;;  %v6479_v16 = vadd.f32 %v6347_v15, %v2655_v28  ;;  %v6482_v21 = vadd.f32 %v6347_v15, %v2657_v12  ;;  %4716 = vpow2.f32 %v2784_v31  ;;  %v6485_v40 = vadd.f32 %v6347_v15, %v2656_v23 }
 0xa67   : > { %v4695_v37 = vpop.eup %4694  ;;  %4718 = vpow2.f32 %v2754_v1  ;;  %v2809_v31 = vadd.f32 1.0, %v4693_v32 }
 0xa68   : > { %v4697_v36 = vpop.eup %4696  ;;  %v2803_v33 = vadd.f32 1.0, %v4695_v37  ;;  %4720 = vpow2.f32 %v2756_v44  ;;  %v2743_v11 = vsub.f32 0.0, %v6479_v16  ;;  %v2745_v20 = vsub.f32 0.0, %v6482_v21 }
 0xa69   : > { %v4699_v45 = vpop.eup %4698  ;;  %4722 = vrcp.f32 %v2794_v42  ;;  %v2744_v4 = vsub.f32 0.0, %v6485_v40  ;;  %v2804_v8 = vadd.f32 1.0, %v4697_v36 }
 0xa6a   : > { %v2805_v24 = vadd.f32 1.0, %v4699_v45  ;;  %4724 = vrcp.f32 %v2803_v33  ;;  %v2788_v27 = vmul.f32 1.442695, %v2743_v11  ;;  %v2792_v9 = vmul.f32 1.442695, %v2745_v20  ;;  %v4701_v5 = vpop.eup %4700  ;;  %v6499_v45 = vpop.permute.xlu0 %2910 }
 0xa6b   : > { %4726 = vrcp.f32 %v2810_v54  ;;  %v2790_v34 = vmul.f32 1.442695, %v2744_v4  ;;  %v4703_v15 = vpop.eup %4702  ;;  %v2812_v50 = vadd.f32 1.0, %v4701_v5  ;;  %v2796_v20 = vadd.f32 1.0, %v6475_v52  ;;  %v6511_v52 = vpop.permute.xlu1 %3001 }
 0xa6c   : > { %4728 = vrcp.f32 %v2805_v24  ;;  %v4705_v49 = vpop.eup %4704  ;;  %v2808_v1 = vadd.f32 1.0, %v4703_v15 }
 0xa6d   : > { %4730 = vpow2.f32 %v2788_v27  ;;  %v4707_v48 = vpop.eup %4706  ;;  %v2811_v44 = vadd.f32 1.0, %v4705_v49 }
 0xa6e   : > { %4732 = vpow2.f32 %v2792_v9  ;;  %v6493_v23 = vmul.f32 %v4707_v48, %v6363_v43 }
 0xa6f   : > { %v4709_v6 = vpop.eup %4708  ;;  %4734 = vpow2.f32 %v2790_v34 }
 0xa70   : > { %v4711_v58 = vpop.eup %4710  ;;  %4736 = vrcp.f32 %v2804_v8  ;;  %v2797_v13 = vadd.f32 1.0, %v4709_v6  ;;  %v2924_v24 = vmul.f32 %v6499_v45, %v6493_v23 }
 0xa71   : > { %v4713_v35 = vpop.eup %4712  ;;  %4738 = vrcp.f32 %v2801_v60  ;;  %v6509_v9 = vmul.f32 %v4711_v58, %v6369_v55  ;;  %v6523_v55 = vsel %vm1624_vm4, %v6499_v45, %v6490_v17 }
 0xa72   : > { %v4715_v63 = vpop.eup %4714  ;;  %4740 = vrcp.f32 %v2797_v13 }
 0xa73   : > { %v4717_v19 = vpop.eup %4716  ;;  %4742 = vrcp.f32 %v2806_v57  ;;  %v2814_v12 = vadd.f32 1.0, %v4715_v63  ;;  %v2926_v48 = vmul.f32 %v6490_v17, %v6509_v9  ;;  %v6531_v58 = vmul.f32 %v6511_v52, %v6509_v9 }
 0xa74   : > { %v4719_v30 = vpop.eup %4718  ;;  %4744 = vrcp.f32 %v2809_v31  ;;  %v2813_v18 = vadd.f32 1.0, %v4717_v19 }
 0xa75   : > { %v4721_v28 = vpop.eup %4720  ;;  %4746 = vrcp.f32 %v2795_v56  ;;  %v2798_v37 = vadd.f32 1.0, %v4719_v30  ;;  %v6538_v56 = vmul.f32 %v4713_v35, %v6375_v39 }
 0xa76   : > { %v4723_v42 = vpop.eup %4722  ;;  %4748 = vrcp.f32 %v2812_v50  ;;  %v2799_v33 = vadd.f32 1.0, %v4721_v28  ;;  %v6550_v28 = vpop.permute.xlu0 %2999 }
 0xa77   : > { %v4725_v32 = vpop.eup %4724  ;;  %4750 = vrcp.f32 %v2808_v1  ;;  %v6526_v57 = vmul.f32 %v4723_v42, %v6399_v22  ;;  %v2931_v39 = vmul.f32 %v6523_v55, %v6538_v56 }
 0xa78   : > { %v4727_v54 = vpop.eup %4726  ;;  %v6496_v36 = vmul.f32 %v4725_v32, %v6432_v25  ;;  %4752 = vrcp.f32 %v2811_v44 }
 0xa79   : > { %v4729_v11 = vpop.eup %4728  ;;  %4754 = vrcp.f32 %v2814_v12  ;;  %v6514_v5 = vmul.f32 %v4727_v54, %v6402_v51  ;;  %v6561_v12 = vmul.f32 %v6550_v28, %v6526_v57 }
 0xa7a   : > { %v4731_v4 = vpop.eup %4730  ;;  %v6502_v43 = vmul.f32 %v4729_v11, %v6439_v7  ;;  %v2927_v27 = vmul.f32 %v6499_v45, %v6496_v36  ;;  %4756 = vrcp.f32 %v2813_v18 }
 0xa7b   : > { %v4733_v25 = vpop.eup %4732  ;;  %4758 = vrcp.f32 %v2798_v37  ;;  %v2815_v34 = vadd.f32 1.0, %v4731_v4  ;;  %v2934_v63 = vmul.f32 %v6523_v55, %v6514_v5 }
 0xa7c   : > { %v4735_v7 = vpop.eup %4734  ;;  %4760 = vrcp.f32 %v2799_v33  ;;  %v2945_v15 = vpack.c.bf16 %v2927_v27, %v2924_v24  ;;  %v2929_v8 = vmul.f32 %v6490_v17, %v6502_v43  ;;  %v2817_v49 = vadd.f32 1.0, %v4733_v25 }
 0xa7d   : > { %v4737_v60 = vpop.eup %4736  ;;  %4762 = vrcp.f32 %v2815_v34  ;;  %v2816_v51 = vadd.f32 1.0, %v4735_v7  ;;  %v6535_v13 = vmul.f32 %v6511_v52, %v6502_v43  ;;  %v2949_v37 = vpack.c.bf16 %v2934_v63, %v2931_v39 }
 0xa7e   : > { %v4739_v6 = vpop.eup %4738  ;;  %2972 = vrot.lane.b32.xlu0 %v2945_v15, %s4793_s30  ;;  %4764 = vrcp.f32 %v2817_v49  ;;  %v6543_v50 = vmul.f32 %v4737_v60, %v6434_v47  ;;  %v2947_v1 = vpack.c.bf16 %v2929_v8, %v2926_v48  ;;  %v2918_v47 = vmul.f32 %v6499_v45, %v6526_v57 }
 0xa7f   : > { %v4741_v31 = vpop.eup %4740  ;;  %4766 = vrcp.f32 %v2816_v51  ;;  %v3036_v30 = vpack.c.bf16 %v6535_v13, %v6531_v58  ;;  %v6568_v32 = vmul.f32 %v4739_v6, %v6372_v26 }
 0xa80   : > { %v4743_v22 = vpop.eup %4742  ;;  %v6546_v19 = vmul.f32 %v4741_v31, %v6459_v53  ;;  %4768 = vrcp.f32 %v2796_v20  ;;  %v2928_v11 = vmul.f32 %v6523_v55, %v6543_v50 }
 0xa81   : > { %v4745_v44 = vpop.eup %4744  ;;  %v2925_v26 = vmul.f32 %v6523_v55, %v6568_v32  ;;  %v6582_v25 = vmul.f32 %v4743_v22, %v6387_v62 }
 0xa82   : > { %v4747_v35 = vpop.eup %4746  ;;  %2976 = vrot.lane.b32.xlu0 %v2947_v1, %s4793_s30  ;;  %v2921_v53 = vmul.f32 %v6499_v45, %v6546_v19  ;;  %v6565_v42 = vmul.f32 %v6550_v28, %v6546_v19  ;;  %v6573_v20 = vmul.f32 %v4745_v44, %v6412_v38 }
 0xa83   : > { %v4749_v18 = vpop.eup %4748  ;;  %v2946_v15 = vpack.c.bf16 %v2928_v11, %v2925_v26  ;;  %v2930_v62 = vmul.f32 %v6499_v45, %v6582_v25 }
 0xa84   : > { %v4751_v54 = vpop.eup %4750  ;;  %v2942_v33 = vpack.c.bf16 %v2921_v53, %v2918_v47  ;;  %v3031_v4 = vpack.c.bf16 %v6565_v42, %v6561_v12  ;;  %v2933_v38 = vmul.f32 %v6499_v45, %v6573_v20  ;;  %v6590_v60 = vmul.f32 %v4749_v18, %v6427_v3 }
 0xa85   : > { %v4753_v24 = vpop.eup %4752  ;;  %v6596_v51 = vmul.f32 %v4751_v54, %v6430_v61  ;;  %v6633_v54 = vmul.f32 %v4747_v35, %v6407_v0 }
 0xa86   : > { %v4755_v27 = vpop.eup %4754  ;;  %2966 = vrot.lane.b32.xlu1 %v2942_v33, %s4793_s30  ;;  %2980 = vrot.lane.b32.xlu0 %v2949_v37, %s4793_s30  ;;  %v6587_v8 = vmul.f32 %v4753_v24, %v6437_v10  ;;  %v2948_v10 = vpack.c.bf16 %v2933_v38, %v2930_v62  ;;  %v2936_v1 = vmul.f32 %v6499_v45, %v6590_v60 }
 0xa87   : > { %v4757_v34 = vpop.eup %4756  ;;  %v6611_v61 = vmul.f32 %v4755_v27, %v6452_v29  ;;  %v2932_v47 = vmul.f32 %v6490_v17, %v6596_v51  ;;  %v2919_v35 = vmul.f32 %v6523_v55, %v6633_v54  ;;  %v2903_v62 = vpack.c.bf16 %v6502_v43, %v6509_v9 }
 0xa88   : > { %v4759_v7 = vpop.eup %4758  ;;  %v2935_v22 = vmul.f32 %v6490_v17, %v6587_v8  ;;  %v2906_v38 = vpack.c.bf16 %v6587_v8, %v6596_v51  ;;  %v3022_v43 = vmul.f32 %v6550_v28, %v6573_v20  ;;  %v3019_v9 = vmul.f32 %v6550_v28, %v6582_v25 }
 0xa89   : > { %v4761_v49 = vpop.eup %4760  ;;  %v6623_v53 = vmul.f32 %v4759_v7, %v6461_v2 }
 0xa8a   : > { %v4763_v48 = vpop.eup %4762  ;;  %2974 = vrot.lane.b32.xlu1 %v2946_v15, %s4793_s30  ;;  %v2905_v15 = vpack.c.bf16 %v6514_v5, %v6538_v56 }
 0xa8b   : > { %v4765_v6 = vpop.eup %4764  ;;  %v6599_v31 = vmul.f32 %v4763_v48, %v6479_v16  ;;  %v2922_v11 = vmul.f32 %v6523_v55, %v6623_v53  ;;  %v2902_v48 = vpack.c.bf16 %v6543_v50, %v6568_v32 }
 0xa8c   : > { %v4767_v63 = vpop.eup %4766  ;;  %v6604_v3 = vmul.f32 %v4765_v6, %v6482_v21  ;;  %v6620_v21 = vmul.f32 %v4757_v34, %v6455_v59  ;;  %v2938_v59 = vmul.f32 %v6490_v17, %v6611_v61  ;;  %v2898_v6 = vpack.c.bf16 %v6546_v19, %v6526_v57 }
 0xa8d   : > { %v2939_v44 = vmul.f32 %v6499_v45, %v6599_v31  ;;  %v6614_v16 = vmul.f32 %v4767_v63, %v6485_v40  ;;  %v4769_v39 = vpop.eup %4768  ;;  %v6628_v45 = vmul.f32 %v4761_v49, %v6463_v14  ;;  %v2950_v40 = vpack.c.bf16 %v2935_v22, %v2932_v47 }
 0xa8e   : > { %2978 = vrot.lane.b32.xlu1 %v2948_v10, %s4793_s30  ;;  %v2941_v29 = vmul.f32 %v6490_v17, %v6604_v3  ;;  %v6639_v2 = vmul.f32 %v4769_v39, %v6409_v46  ;;  %v2937_v14 = vmul.f32 %v6523_v55, %v6620_v21  ;;  %v2943_v27 = vpack.c.bf16 %v2922_v11, %v2919_v35 }
 0xa8f   : > { %v2951_v18 = vpack.c.bf16 %v2939_v44, %v2936_v1  ;;  %v2940_v37 = vmul.f32 %v6523_v55, %v6614_v16  ;;  %v2923_v0 = vmul.f32 %v6490_v17, %v6628_v45  ;;  %v2907_v34 = vpack.c.bf16 %v6599_v31, %v6590_v60 }
 0xa90   : > { %v2953_v33 = vpack.c.bf16 %v2941_v29, %v2938_v59  ;;  %v2920_v46 = vmul.f32 %v6490_v17, %v6639_v2  ;;  %v2908_v7 = vpack.c.bf16 %v6614_v16, %v6620_v21  ;;  %v2909_v55 = vpack.c.bf16 %v6604_v3, %v6611_v61 }
 0xa91   : > { %2984 = vrot.lane.b32.xlu0 %v2951_v18, %s4793_s30  ;;  %v2952_v24 = vpack.c.bf16 %v2940_v37, %v2937_v14  ;;  %v2904_v17 = vpack.c.bf16 %v6573_v20, %v6582_v25  ;;  %v2901_v49 = vpack.c.bf16 %v6496_v36, %v6493_v23  ;;  %v3003_v63 = vsel %vm1624_vm4, %v6550_v28, %v6511_v52 }
 0xa92   : > { %2982 = vrot.lane.b32.xlu1 %v2950_v40, %s4793_s30  ;;  %v2944_v26 = vpack.c.bf16 %v2923_v0, %v2920_v46  ;;  %v2899_v10 = vpack.c.bf16 %v6623_v53, %v6633_v54  ;;  %v3020_v22 = vmul.f32 %v3003_v63, %v6538_v56  ;;  %v3023_v1 = vmul.f32 %v3003_v63, %v6514_v5 }
 0xa93   : > { %v2900_v44 = vpack.c.bf16 %v6628_v45, %v6639_v2  ;;  %v3016_v19 = vmul.f32 %v6550_v28, %v6496_v36  ;;  %v3037_v39 = vpack.c.bf16 %v3022_v43, %v3019_v9  ;;  %v3021_v56 = vmul.f32 %v6511_v52, %v6596_v51 }
 0xa94   : > { %v3038_v57 = vpack.c.bf16 %v3023_v1, %v3020_v22  ;;  %v3024_v5 = vmul.f32 %v6511_v52, %v6587_v8  ;;  %v3013_v20 = vmul.f32 %v6550_v28, %v6493_v23  ;;  %v3028_v25 = vmul.f32 %v6550_v28, %v6599_v31 }
 0xa95   : > { %2988 = vrot.lane.b32.xlu0 %v2953_v33, %s4793_s30  ;;  %v3017_v36 = vmul.f32 %v3003_v63, %v6543_v50  ;;  %v3025_v51 = vmul.f32 %v6550_v28, %v6590_v60  ;;  %v3014_v8 = vmul.f32 %v3003_v63, %v6568_v32  ;;  %v3030_v23 = vmul.f32 %v6511_v52, %v6604_v3 }
 0xa96   : > { %2986 = vrot.lane.b32.xlu1 %v2952_v24, %s4793_s30  ;;  %v3034_v47 = vpack.c.bf16 %v3016_v19, %v3013_v20  ;;  %v3039_v18 = vpack.c.bf16 %v3024_v5, %v3021_v56  ;;  %v3029_v37 = vmul.f32 %v3003_v63, %v6614_v16  ;;  %v3027_v50 = vmul.f32 %v6511_v52, %v6611_v61 }
 0xa97   : > { %v3040_v29 = vpack.c.bf16 %v3028_v25, %v3025_v51  ;;  %v3035_v40 = vpack.c.bf16 %v3017_v36, %v3014_v8  ;;  %v3026_v28 = vmul.f32 %v3003_v63, %v6620_v21  ;;  %v3011_v32 = vmul.f32 %v3003_v63, %v6623_v53 }
 0xa98   : > { %v3042_v60 = vpack.c.bf16 %v3030_v23, %v3027_v50  ;;  %v3012_v3 = vmul.f32 %v6511_v52, %v6628_v45  ;;  %v3008_v61 = vmul.f32 %v3003_v63, %v6633_v54  ;;  %v3009_v16 = vmul.f32 %v6511_v52, %v6639_v2 }
 0xa99   : > { %2968 = vrot.lane.b32.xlu0 %v2943_v27, %s4793_s30  ;;  %v3041_v31 = vpack.c.bf16 %v3029_v37, %v3026_v28 }
 0xa9a   : > { %2970 = vrot.lane.b32.xlu1 %v2944_v26, %s4793_s30  ;;  %v3032_v21 = vpack.c.bf16 %v3011_v32, %v3008_v61  ;;  %v3033_v53 = vpack.c.bf16 %v3012_v3, %v3009_v16 }
 0xa9d   : > { %3117 = vrot.lane.b32.xlu0 %v2907_v34, %s4794_s16 }
 0xa9e   : > { %3119 = vrot.lane.b32.xlu1 %v2908_v7, %s4794_s16 }
 0xaa1   : > { %3121 = vrot.lane.b32.xlu0 %v2909_v55, %s4794_s16 }
 0xaa2   : > { %3111 = vrot.lane.b32.xlu1 %v2904_v17, %s4794_s16 }
 0xaa5   : > { %3113 = vrot.lane.b32.xlu0 %v2905_v15, %s4794_s16 }
 0xaa6   : > { %3115 = vrot.lane.b32.xlu1 %v2906_v38, %s4794_s16 }
 0xaa9   : > { %3105 = vrot.lane.b32.xlu0 %v2901_v49, %s4794_s16 }
 0xaaa   : > { %3107 = vrot.lane.b32.xlu1 %v2902_v48, %s4794_s16 }
 0xaad   : > { %3109 = vrot.lane.b32.xlu0 %v2903_v62, %s4794_s16 }
 0xaae   : > { %3099 = vrot.lane.b32.xlu1 %v2898_v6, %s4794_s16 }
 0xab1   : > { %3101 = vrot.lane.b32.xlu0 %v2899_v10, %s4794_s16 }
 0xab2   : > { %3103 = vrot.lane.b32.xlu1 %v2900_v44, %s4794_s16  ;;  %s7400_s16 = scalar_lea.vmem %s7440_s11, %s4405_s19 }
 0xab5   : > { %3069 = vrot.lane.b32.xlu0 %v3038_v57, %s4793_s30 }
 0xab6   : > { %3067 = vrot.lane.b32.xlu1 %v3037_v39, %s4793_s30 }
 0xab9   : > { %3061 = vrot.lane.b32.xlu0 %v3034_v47, %s4793_s30 }
 0xaba   : > { %3071 = vrot.lane.b32.xlu1 %v3039_v18, %s4793_s30 }
 0xabd   : > { %3073 = vrot.lane.b32.xlu0 %v3040_v29, %s4793_s30 }
 0xabe   : > { %3063 = vrot.lane.b32.xlu1 %v3035_v40, %s4793_s30 }
 0xac1   : > { %3077 = vrot.lane.b32.xlu0 %v3042_v60, %s4793_s30 }
 0xac2   : > { %3075 = vrot.lane.b32.xlu1 %v3041_v31, %s4793_s30 }
 0xac5   : > { %3065 = vrot.lane.b32.xlu0 %v3036_v30, %s4793_s30 }
 0xac6   : > { %3055 = vrot.lane.b32.xlu1 %v3031_v4, %s4793_s30 }
 0xac9   : > { %3057 = vrot.lane.b32.xlu0 %v3032_v21, %s4793_s30 }
 0xaca   : > { %3059 = vrot.lane.b32.xlu1 %v3033_v53, %s4793_s30 }
 0xaf0   : > { %v2973_v45 = vpop.permute.xlu0 %2972 }
 0xaf4   : > { %v2977_v58 = vpop.permute.xlu0 %2976 }
 0xaf8   : > { %v2967_v59 = vpop.permute.xlu1 %2966  ;;  %v2981_v30 = vpop.permute.xlu0 %2980 }
 0xafc   : > { %v2975_v13 = vpop.permute.xlu1 %2974 }
 0xafd   : > { %v2993_v35 = vsel %vm2079_vm6, %v2973_v45, %v2975_v13  ;;  %v2994_v46 = vsel %vm2079_vm6, %v2975_v13, %v2977_v58 }
 0xb00   : > { %v2979_v54 = vpop.permute.xlu1 %2978 }
 0xb01   : > { %v2995_v14 = vsel %vm2079_vm6, %v2979_v54, %v2981_v30 }
 0xb02   : > { %3140 = vrot.lane.b32.xlu0 %v2995_v14, %s4789_s28 }
 0xb03   : > { %v2985_v12 = vpop.permute.xlu0 %2984 }
 0xb04   : > { %v2983_v42 = vpop.permute.xlu1 %2982 }
 0xb05   : > { %v2996_v52 = vsel %vm2079_vm6, %v2981_v30, %v2983_v42 }
 0xb06   : > { %3142 = vrot.lane.b32.xlu1 %v2996_v52, %s4789_s28  ;;  %v4544_v52 = vld [vmem:[%s7435_s6 + $0x44] ss:$8 sps:$4 sm:$0xff]  }
 0xb07   : > { %v2989_v4 = vpop.permute.xlu0 %2988  ;;  %4363 = vmatprep.mubr.msk.bf16.mxu1 %vm439_vm0, %v4544_v52  ;;  %v7501_v52 = vld [vmem:[#allocation8_spill] sm:$0xff] }
 0xb08   : > { %v2987_v2 = vpop.permute.xlu1 %2986 }
 0xb09   : > { %v2997_v33 = vsel %vm2079_vm6, %v2985_v12, %v2987_v2  ;;  %v2998_v11 = vsel %vm2079_vm6, %v2987_v2, %v2989_v4 }
 0xb0a   : > { %3144 = vrot.lane.b32.xlu0 %v2997_v33, %s4789_s28  ;;  %3146 = vrot.lane.b32.xlu1 %v2998_v11, %s4789_s28  ;;  %v4547_v33 = vld [vmem:[%s7435_s6 + $0x4] ss:$8 sps:$4 sm:$0xff]  }
 0xb0b   : > { %v2969_v24 = vpop.permute.xlu0 %2968  ;;  %4343 = vmatprep.mubr.msk.bf16.mxu0 %vm439_vm0, %v4547_v33  ;;  %v7503_v33 = vld [vmem:[#allocation6_spill] sm:$0xff] }
 0xb0c   : > { %v2971_v0 = vpop.permute.xlu1 %2970  ;;  %v2991_v7 = vsel %vm2079_vm6, %v2967_v59, %v2969_v24 }
 0xb0d   : > { %v2992_v34 = vsel %vm2079_vm6, %v2969_v24, %v2971_v0 }
 0xb0e   : > { %3136 = vrot.lane.b32.xlu0 %v2993_v35, %s4789_s28  ;;  %3138 = vrot.lane.b32.xlu1 %v2994_v46, %s4789_s28 }
 0xb0f   : > { %v3118_v27 = vpop.permute.xlu0 %3117 }
 0xb10   : > { %v3120_v26 = vpop.permute.xlu1 %3119 }
 0xb11   : > { %v3130_v38 = vsel %vm3123_vm7, %v3118_v27, %v3120_v26 }
 0xb12   : > { %3134 = vrot.lane.b32.xlu1 %v2992_v34, %s4789_s28  ;;  %3132 = vrot.lane.b32.xlu0 %v2991_v7, %s4789_s28  ;;  %v2890_v7 = vld [vmem:[%s7436_s7] sm:$0xff] }
 0xb13   : > { %v3122_v55 = vpop.permute.xlu0 %3121 }
 0xb14   : > { %v3112_v17 = vpop.permute.xlu1 %3111  ;;  %v3131_v15 = vsel %vm3123_vm7, %v3120_v26, %v3122_v55  ;;  %v2891_v55 = vld [vmem:[%s7436_s7 + $0x8] sm:$0xff] }
 0xb16   : > { %3236 = vrot.lane.b32.xlu0 %v3130_v38, %s4790_s29  ;;  %3238 = vrot.lane.b32.xlu1 %v3131_v15, %s4790_s29 }
 0xb17   : > { %v3114_v49 = vpop.permute.xlu0 %3113 }
 0xb18   : > { %v3116_v48 = vpop.permute.xlu1 %3115  ;;  %v3128_v62 = vsel %vm3123_vm7, %v3112_v17, %v3114_v49 }
 0xb19   : > { %v3129_v10 = vsel %vm3123_vm7, %v3114_v49, %v3116_v48  ;;  %v2892_v49 = vld [vmem:[%s7436_s7 + $0x10] sm:$0xff]  ;;  %v2893_v48 = vld [vmem:[%s7436_s7 + $0x18] sm:$0xff] }
 0xb1a   : > { %3234 = vrot.lane.b32.xlu0 %v3118_v27, %s4790_s29  ;;  %3230 = vrot.lane.b32.xlu1 %v3128_v62, %s4790_s29 }
 0xb1b   : > { %v3106_v6 = vpop.permute.xlu0 %3105 }
 0xb1c   : > { %v3108_v63 = vpop.permute.xlu1 %3107 }
 0xb1d   : > { %v3126_v43 = vsel %vm3123_vm7, %v3106_v6, %v3108_v63 }
 0xb1e   : > { %3232 = vrot.lane.b32.xlu0 %v3129_v10, %s4790_s29  ;;  %3228 = vrot.lane.b32.xlu1 %v3112_v17, %s4790_s29  ;;  %v2894_v10 = vld [vmem:[%s7436_s7 + $0x20] sm:$0xff] }
 0xb1f   : > { %v3110_v22 = vpop.permute.xlu0 %3109 }
 0xb20   : > { %v3100_v1 = vpop.permute.xlu1 %3099  ;;  %v3127_v44 = vsel %vm3123_vm7, %v3108_v63, %v3110_v22  ;;  %v2895_v22 = vld [vmem:[%s7436_s7 + $0x28] sm:$0xff] }
 0xb22   : > { %3224 = vrot.lane.b32.xlu0 %v3126_v43, %s4790_s29  ;;  %3226 = vrot.lane.b32.xlu1 %v3127_v44, %s4790_s29 }
 0xb23   : > { %v3102_v9 = vpop.permute.xlu0 %3101 }
 0xb24   : > { %v3104_v57 = vpop.permute.xlu1 %3103  ;;  %v3124_v19 = vsel %vm3123_vm7, %v3100_v1, %v3102_v9 }
 0xb25   : > { %v3125_v5 = vsel %vm3123_vm7, %v3102_v9, %v3104_v57  ;;  %v2896_v9 = vld [vmem:[%s7436_s7 + $0x30] sm:$0xff]  ;;  %v2897_v57 = vld [vmem:[%s7436_s7 + $0x38] sm:$0xff] }
 0xb26   : > { %3222 = vrot.lane.b32.xlu0 %v3106_v6, %s4790_s29  ;;  %3218 = vrot.lane.b32.xlu1 %v3124_v19, %s4790_s29 }
 0xb27   : > { %v3070_v39 = vpop.permute.xlu0 %3069 }
 0xb28   : > { %v3068_v56 = vpop.permute.xlu1 %3067 }
 0xb29   : > { %v3083_v25 = vsel %vm2079_vm6, %v3068_v56, %v3070_v39 }
 0xb2a   : > { %3220 = vrot.lane.b32.xlu0 %v3125_v5, %s4790_s29  ;;  %3216 = vrot.lane.b32.xlu1 %v3100_v1, %s4790_s29 }
 0xb2b   : > { %v3062_v20 = vpop.permute.xlu0 %3061 }
 0xb2c   : > { %v3072_v47 = vpop.permute.xlu1 %3071 }
 0xb2d   : > { %v3084_v18 = vsel %vm2079_vm6, %v3070_v39, %v3072_v47 }
 0xb2e   : > { %3210 = vrot.lane.b32.xlu1 %v3084_v18, %s4790_s29  ;;  %3208 = vrot.lane.b32.xlu0 %v3083_v25, %s4790_s29 }
 0xb2f   : > { %v3074_v36 = vpop.permute.xlu0 %3073 }
 0xb30   : > { %v3064_v51 = vpop.permute.xlu1 %3063 }
 0xb31   : > { %v3081_v8 = vsel %vm2079_vm6, %v3062_v20, %v3064_v51 }
 0xb32   : > { %3204 = vrot.lane.b32.xlu0 %v3081_v8, %s4790_s29 }
 0xb33   : > { %v3078_v29 = vpop.permute.xlu0 %3077 }
 0xb34   : > { %v3076_v23 = vpop.permute.xlu1 %3075 }
 0xb35   : > { %v3085_v40 = vsel %vm2079_vm6, %v3074_v36, %v3076_v23  ;;  %v3086_v37 = vsel %vm2079_vm6, %v3076_v23, %v3078_v29 }
 0xb36   : > { %3212 = vrot.lane.b32.xlu0 %v3085_v40, %s4790_s29  ;;  %3214 = vrot.lane.b32.xlu1 %v3086_v37, %s4790_s29 }
 0xb37   : > { %v3066_v50 = vpop.permute.xlu0 %3065 }
 0xb38   : > { %v3056_v28 = vpop.permute.xlu1 %3055  ;;  %v3082_v60 = vsel %vm2079_vm6, %v3064_v51, %v3066_v50  ;;  %v7491_v51 = vld [vmem:[#allocation18_spill] sm:$0xff] }
 0xb3a   : > { %3206 = vrot.lane.b32.xlu1 %v3082_v60, %s4790_s29 }
 0xb3b   : > { %v3058_v31 = vpop.permute.xlu0 %3057 }
 0xb3c   : > { %v3060_v32 = vpop.permute.xlu1 %3059  ;;  %v3079_v3 = vsel %vm2079_vm6, %v3056_v28, %v3058_v31 }
 0xb3d   : > { %v3080_v61 = vsel %vm2079_vm6, %v3058_v31, %v3060_v32  ;;  %3200 = vrot.lane.b32.xlu0 %v3079_v3, %s4790_s29 }
 0xb3e   : > { %3202 = vrot.lane.b32.xlu1 %v3080_v61, %s4790_s29  ;;  %v7492_v61 = vld [vmem:[#allocation17_spill] sm:$0xff] }
 0xb74   : > { %v3141_v16 = vpop.permute.xlu0 %3140 }
 0xb78   : > { %v3143_v21 = vpop.permute.xlu1 %3142 }
 0xb79   : > { %v3153_v53 = vsel %vm1185_vm2, %v3143_v21, %v5445_v41  ;;  %v3152_v45 = vsel %vm1185_vm2, %v3141_v16, %v3143_v21 }
 0xb7a   : > { %3256 = vrot.lane.b32.xlu0 %v3153_v53, %s4790_s29  ;;  %3254 = vrot.lane.b32.xlu1 %v3152_v45, %s4790_s29  ;;  %v7494_v53 = vld [vmem:[#allocation15_spill] sm:$0xff]  ;;  %v7495_v45 = vld [vmem:[#allocation14_spill] sm:$0xff] }
 0xb7c   : > { %v3147_v59 = vpop.permute.xlu1 %3146  ;;  %v3145_v58 = vpop.permute.xlu0 %3144 }
 0xb7d   : > { %v3155_v13 = vsel %vm1185_vm2, %v3147_v59, %v5445_v41  ;;  %v3154_v14 = vsel %vm1185_vm2, %v3145_v58, %v3147_v59  ;;  %v4471_v59 = vpack.i.bf16 %v7495_v45, %v7494_v53 }
 0xb7e   : > { %3262 = vrot.lane.b32.xlu1 %v3155_v13, %s4790_s29  ;;  %3258 = vrot.lane.b32.xlu0 %v3145_v58, %s4790_s29  ;;  %v7496_v58 = vld [vmem:[#allocation13_spill] sm:$0xff]  ;;  %v7497_v13 = vld [vmem:[#allocation12_spill] sm:$0xff] }
 0xb80   : > { %v3139_v30 = vpop.permute.xlu1 %3138  ;;  %v3137_v54 = vpop.permute.xlu0 %3136 }
 0xb81   : > { %v3151_v4 = vsel %vm1185_vm2, %v3139_v30, %v5445_v41  ;;  %v3150_v2 = vsel %vm1185_vm2, %v3137_v54, %v3139_v30  ;;  %v4476_v30 = vpack.i.bf16 %v7497_v13, %v7496_v58 }
 0xb82   : > { %3252 = vrot.lane.b32.xlu1 %v3141_v16, %s4790_s29  ;;  %3260 = vrot.lane.b32.xlu0 %v3154_v14, %s4790_s29  ;;  %v7493_v16 = vld [vmem:[#allocation16_spill] sm:$0xff]  ;;  %v7499_v14 = vld [vmem:[#allocation10_spill] sm:$0xff] }
 0xb83   : > { %v4466_v21 = vpack.i.bf16 %v7493_v16, %v7492_v61 }
 0xb84   : > { %v3135_v12 = vpop.permute.xlu1 %3134  ;;  %v3133_v42 = vpop.permute.xlu0 %3132 }
 0xb85   : > { %v3148_v0 = vsel %vm1185_vm2, %v3133_v42, %v3135_v12  ;;  %v3149_v26 = vsel %vm1185_vm2, %v3135_v12, %v5445_v41 }
 0xb86   : > { %3250 = vrot.lane.b32.xlu1 %v3151_v4, %s4790_s29  ;;  %3248 = vrot.lane.b32.xlu0 %v3150_v2, %s4790_s29  ;;  %v7502_v2 = vld [vmem:[#allocation7_spill] sm:$0xff] }
 0xb88   : > { %v3239_v11 = vpop.permute.xlu1 %3238  ;;  %v3237_v24 = vpop.permute.xlu0 %3236 }
 0xb89   : > { %v6812_v35 = vsel %vm1312_vm3, %v3237_v24, %v3239_v11  ;;  %v4491_v11 = vpack.i.bf16 %v7503_v33, %v7502_v2 }
 0xb8a   : > { %3246 = vrot.lane.b32.xlu0 %v3137_v54, %s4790_s29  ;;  %3242 = vrot.lane.b32.xlu1 %v3148_v0, %s4790_s29  ;;  %v7498_v54 = vld [vmem:[#allocation11_spill] sm:$0xff] }
 0xb8b   : > { %3324 = vmatprep.subr.bf16.mxu0 %v6812_v35  ;;  %3454 = vmatprep.subr.bf16.mxu1 %v6812_v35  ;;  %v4481_v12 = vpack.i.bf16 %v7499_v14, %v7498_v54 }
 0xb8c   : > { %v3231_v46 = vpop.permute.xlu1 %3230  ;;  %v3235_v27 = vpop.permute.xlu0 %3234 }
 0xb8d   : > { %v6821_v34 = vsel %vm1312_vm3, %v3235_v27, %v3237_v24 }
 0xb8e   : > { %3244 = vrot.lane.b32.xlu0 %v3149_v26, %s4790_s29  ;;  %3240 = vrot.lane.b32.xlu1 %v3133_v42, %s4790_s29  ;;  %v7500_v42 = vld [vmem:[#allocation9_spill] sm:$0xff] }
 0xb8f   : > { %3325 = vmatpush1.bf16.msra.mxu0 %v6821_v34  ;;  %3455 = vmatpush1.bf16.msra.mxu1 %v6821_v34  ;;  %v4486_v4 = vpack.i.bf16 %v7501_v52, %v7500_v42 }
 0xb90   : > { %v3229_v41 = vpop.permute.xlu1 %3228  ;;  %v3233_v17 = vpop.permute.xlu0 %3232 }
 0xb91   : > { %v6834_v15 = vsel %vm1312_vm3, %v3229_v41, %v3231_v46  ;;  %v6837_v38 = vsel %vm1312_vm3, %v3231_v46, %v3233_v17 }
 0xb92   : > { %3875 = vperm.xlu0 %4464, %v2890_v7   ;;  %3880 = vperm.xlu1 %4465, %v2891_v55  }
 0xb93   : > { %3326 = vmatprep.subr.bf16.mxu0 %v6837_v38  ;;  %3456 = vmatprep.subr.bf16.mxu1 %v6837_v38 }
 0xb94   : > { %3327 = vmatpush1.bf16.msra.mxu0 %v6834_v15  ;;  %3457 = vmatpush1.bf16.msra.mxu1 %v6834_v15  ;;  %v3227_v62 = vpop.permute.xlu1 %3226  ;;  %v3225_v6 = vpop.permute.xlu0 %3224 }
 0xb95   : > { %v6850_v63 = vsel %vm1312_vm3, %v3225_v6, %v3227_v62 }
 0xb96   : > { %3885 = vperm.xlu0 %4464, %v2892_v49   ;;  %3890 = vperm.xlu1 %4465, %v2893_v48  }
 0xb97   : > { %3328 = vmatprep.subr.bf16.mxu0 %v6850_v63  ;;  %3458 = vmatprep.subr.bf16.mxu1 %v6850_v63 }
 0xb98   : > { %v3219_v1 = vpop.permute.xlu1 %3218  ;;  %v3223_v44 = vpop.permute.xlu0 %3222 }
 0xb99   : > { %v6861_v43 = vsel %vm1312_vm3, %v3223_v44, %v3225_v6 }
 0xb9a   : > { %3895 = vperm.xlu0 %4464, %v2894_v10   ;;  %3900 = vperm.xlu1 %4465, %v2895_v22  }
 0xb9b   : > { %3329 = vmatpush1.bf16.msra.mxu0 %v6861_v43  ;;  %3459 = vmatpush1.bf16.msra.mxu1 %v6861_v43 }
 0xb9c   : > { %v3217_v19 = vpop.permute.xlu1 %3216  ;;  %v3221_v39 = vpop.permute.xlu0 %3220 }
 0xb9d   : > { %v6872_v56 = vsel %vm1312_vm3, %v3217_v19, %v3219_v1  ;;  %v6875_v5 = vsel %vm1312_vm3, %v3219_v1, %v3221_v39  ;;  %v4542_v39 = vld [vmem:[%s7435_s6 + $0x40] ss:$8 sps:$4 sm:$0xff]  }
 0xb9e   : > { %3905 = vperm.xlu0 %4464, %v2896_v9   ;;  %3910 = vperm.xlu1 %4465, %v2897_v57  }
 0xb9f   : > { %3330 = vmatprep.subr.bf16.mxu0 %v6875_v5  ;;  %3460 = vmatprep.subr.bf16.mxu1 %v6875_v5 }
 0xba0   : > { %3331 = vmatpush1.bf16.msra.mxu0 %v6872_v56  ;;  %3461 = vmatpush1.bf16.msra.mxu1 %v6872_v56  ;;  %v3209_v20 = vpop.permute.xlu0 %3208  ;;  %v3211_v47 = vpop.permute.xlu1 %3210 }
 0xba1   : > { %v6891_v23 = vsel %vm1312_vm3, %v3209_v20, %v3211_v47  ;;  %v6899_v37 = vsel %vm1312_vm3, %v7491_v51, %v3209_v20  ;;  %v4545_v20 = vld [vmem:[%s7435_s6] ss:$8 sps:$4 sm:$0xff]   ;;  %v4548_v47 = vld [vmem:[%s7435_s6 + $0x54] ss:$8 sps:$4 sm:$0xff]  }
 0xba2   : > { %4467 = vrot.lane.b32.xlu0 %v4466_v21, %s4792_s23  ;;  %4472 = vrot.lane.b32.xlu1 %v4471_v59, %s4792_s23 }
 0xba4   : > { %v3205_v25 = vpop.permute.xlu0 %3204 }
 0xba5   : > { %v6910_v60 = vsel %vm1312_vm3, %v7491_v51, %v3205_v25 }
 0xba6   : > { %4477 = vrot.lane.b32.xlu0 %v4476_v30, %s4792_s23  ;;  %4482 = vrot.lane.b32.xlu1 %v4481_v12, %s4792_s23 }
 0xba8   : > { %v3215_v18 = vpop.permute.xlu1 %3214  ;;  %v3213_v36 = vpop.permute.xlu0 %3212 }
 0xba9   : > { %v6883_v8 = vsel %vm1312_vm3, %v7491_v51, %v3213_v36  ;;  %v6886_v29 = vsel %vm1312_vm3, %v3213_v36, %v3215_v18  ;;  %v4558_v18 = vld [vmem:[%s7435_s6 + $0x10] ss:$8 sps:$4 sm:$0xff]  }
 0xbaa   : > { %3332 = vmatprep.subr.bf16.mxu0 %v6886_v29  ;;  %3462 = vmatprep.subr.bf16.mxu1 %v6886_v29  ;;  %v4565_v36 = vld [vmem:[%s7435_s6 + $0x30] ss:$8 sps:$4 sm:$0xff]  }
 0xbab   : > { %3333 = vmatpush1.bf16.msra.mxu0 %v6883_v8  ;;  %3463 = vmatpush1.bf16.msra.mxu1 %v6883_v8 }
 0xbac   : > { %v3207_v40 = vpop.permute.xlu1 %3206  ;;  %3334 = vmatprep.subr.bf16.mxu0 %v6891_v23  ;;  %3464 = vmatprep.subr.bf16.mxu1 %v6891_v23 }
 0xbad   : > { %v6902_v50 = vsel %vm1312_vm3, %v3205_v25, %v3207_v40  ;;  %4487 = vrot.lane.b32.xlu0 %v4486_v4, %s4792_s23  ;;  %4492 = vrot.lane.b32.xlu1 %v4491_v11, %s4792_s23  ;;  %v4554_v25 = vld [vmem:[%s7435_s6 + $0x14] ss:$8 sps:$4 sm:$0xff]  }
 0xbae   : > { %v4572_v40 = vld [vmem:[%s7435_s6 + $0x94] ss:$8 sps:$4 sm:$0xff]  }
 0xbaf   : > { %3335 = vmatpush1.bf16.msra.mxu0 %v6899_v37  ;;  %3465 = vmatpush1.bf16.msra.mxu1 %v6899_v37  ;;  %v3201_v31 = vpop.permute.xlu0 %3200 }
 0xbb0   : > { %v3203_v28 = vpop.permute.xlu1 %3202  ;;  %3336 = vmatprep.subr.bf16.mxu0 %v6902_v50  ;;  %3466 = vmatprep.subr.bf16.mxu1 %v6902_v50  ;;  %v6921_v3 = vsel %vm1312_vm3, %v7491_v51, %v3201_v31  ;;  %v4568_v51 = vld [vmem:[%s7435_s6 + $0x84] ss:$8 sps:$4 sm:$0xff]  }
 0xbb1   : > { %v6913_v32 = vsel %vm1312_vm3, %v3201_v31, %v3203_v28  ;;  %v4577_v28 = vld [vmem:[%s7435_s6 + $0xa0] ss:$8 sps:$4 sm:$0xff]  }
 0xbb3   : > { %3337 = vmatpush1.bf16.msra.mxu0 %v6910_v60  ;;  %3467 = vmatpush1.bf16.msra.mxu1 %v6910_v60 }
 0xbb4   : > { %3338 = vmatprep.subr.bf16.mxu0 %v6913_v32  ;;  %3468 = vmatprep.subr.bf16.mxu1 %v6913_v32 }
 0xbb7   : > { %3339 = vmatpush1.bf16.msra.mxu0 %v6921_v3  ;;  %3469 = vmatpush1.bf16.msra.mxu1 %v6921_v3 }
 0xbec   : > { %v3255_v24 = vpop.permute.xlu1 %3254  ;;  %v3257_v0 = vpop.permute.xlu0 %3256 }
 0xbed   : > { %v6952_v17 = vsel %vm1312_vm3, %v3255_v24, %v3257_v0 }
 0xbf0   : > { %v3263_v46 = vpop.permute.xlu1 %3262  ;;  %v3259_v27 = vpop.permute.xlu0 %3258 }
 0xbf4   : > { %v3253_v26 = vpop.permute.xlu1 %3252  ;;  %v3261_v7 = vpop.permute.xlu0 %3260 }
 0xbf5   : > { %v6944_v55 = vsel %vm1312_vm3, %v3259_v27, %v3261_v7  ;;  %v6947_v41 = vsel %vm1312_vm3, %v3261_v7, %v3263_v46  ;;  %v6959_v62 = vsel %vm1312_vm3, %v3253_v26, %v3255_v24 }
 0xbf6   : > { %3348 = vmatprep.subr.bf16.mxu0 %v6947_v41  ;;  %3478 = vmatprep.subr.bf16.mxu1 %v6947_v41 }
 0xbf7   : > { %3349 = vmatpush2.bf16.msra.mxu0 %v6944_v55  ;;  %3479 = vmatpush2.bf16.msra.mxu1 %v6944_v55 }
 0xbf8   : > { %v3251_v49 = vpop.permute.xlu1 %3250  ;;  %3350 = vmatprep.subr.bf16.mxu0 %v6952_v17  ;;  %3480 = vmatprep.subr.bf16.mxu1 %v6952_v17  ;;  %v3249_v48 = vpop.permute.xlu0 %3248 }
 0xbf9   : > { %v6962_v6 = vsel %vm1312_vm3, %v3249_v48, %v3251_v49 }
 0xbfb   : > { %3351 = vmatpush2.bf16.msra.mxu0 %v6959_v62  ;;  %3481 = vmatpush2.bf16.msra.mxu1 %v6959_v62 }
 0xbfc   : > { %v3243_v10 = vpop.permute.xlu1 %3242  ;;  %3352 = vmatprep.subr.bf16.mxu0 %v6962_v6  ;;  %3482 = vmatprep.subr.bf16.mxu1 %v6962_v6  ;;  %v3247_v22 = vpop.permute.xlu0 %3246 }
 0xbfd   : > { %v6969_v1 = vsel %vm1312_vm3, %v3247_v22, %v3249_v48 }
 0xbff   : > { %3353 = vmatpush2.bf16.msra.mxu0 %v6969_v1  ;;  %3483 = vmatpush2.bf16.msra.mxu1 %v6969_v1 }
 0xc00   : > { %v3241_v44 = vpop.permute.xlu1 %3240  ;;  %v3245_v9 = vpop.permute.xlu0 %3244 }
 0xc01   : > { %v6974_v57 = vsel %vm1312_vm3, %v3241_v44, %v3243_v10  ;;  %v6977_v19 = vsel %vm1312_vm3, %v3243_v10, %v3245_v9 }
 0xc02   : > { %3354 = vmatprep.subr.bf16.mxu0 %v6977_v19  ;;  %3484 = vmatprep.subr.bf16.mxu1 %v6977_v19 }
 0xc03   : > { %3355 = vmatpush2.bf16.msra.mxu0 %v6974_v57  ;;  %3485 = vmatpush2.bf16.msra.mxu1 %v6974_v57 }
 0xc04   : > { %3688 = vmatprep.subr.bf16.mxu0 %v6812_v35  ;;  %4423 = vmatprep.subr.bf16.mxu1 %v6812_v35  ;;  %v4550_v35 = vld [vmem:[%s7435_s6 + $0x50] ss:$8 sps:$4 sm:$0xff]  }
 0xc06   : > { %3487 = vmatmul.mubr.bf16.vlgmr.msra.gmra.mxu1 %v4542_v39  ;;  %3357 = vmatmul.mubr.bf16.vlgmr.msra.gmra.mxu0 %v4545_v20 }
 0xc07   : > { %3689 = vmatpush1.bf16.msra.mxu0 %v6821_v34  ;;  %4435 = vmatpush1.bf16.msra.mxu1 %v6821_v34  ;;  %v4551_v34 = vld [vmem:[%s7435_s6 + $0x64] ss:$8 sps:$4 sm:$0xff]  }
 0xc08   : > { %3690 = vmatprep.subr.bf16.mxu0 %v6837_v38  ;;  %4424 = vmatprep.subr.bf16.mxu1 %v6837_v38  ;;  %v4560_v38 = vld [vmem:[%s7435_s6 + $0x24] ss:$8 sps:$4 sm:$0xff]  }
 0xc09   : > { %4364 = vmatprep.mubr.msk.bf16.mxu1 %vm439_vm0, %v4548_v47  ;;  %4344 = vmatprep.mubr.msk.bf16.mxu0 %vm439_vm0, %v4554_v25 }
 0xc0b   : > { %3691 = vmatpush1.bf16.msra.mxu0 %v6834_v15  ;;  %4436 = vmatpush1.bf16.msra.mxu1 %v6834_v15  ;;  %v4553_v15 = vld [vmem:[%s7435_s6 + $0x60] ss:$8 sps:$4 sm:$0xff]  }
 0xc0c   : > { %3692 = vmatprep.subr.bf16.mxu0 %v6850_v63  ;;  %4425 = vmatprep.subr.bf16.mxu1 %v6850_v63  ;;  %v4562_v63 = vld [vmem:[%s7435_s6 + $0x20] ss:$8 sps:$4 sm:$0xff]  }
 0xc0e   : > { %3497 = vmatmul.mubr.bf16.gmra.mxu1 %v4550_v35  ;;  %3367 = vmatmul.mubr.bf16.gmra.mxu0 %v4558_v18  ;;  %v3876_v18 = vpop.permute.xlu0 %3875 }
 0xc0f   : > { %3693 = vmatpush1.bf16.msra.mxu0 %v6861_v43  ;;  %4437 = vmatpush1.bf16.msra.mxu1 %v6861_v43  ;;  %v4556_v43 = vld [vmem:[%s7435_s6 + $0x74] ss:$8 sps:$4 sm:$0xff]  }
 0xc10   : > { %3694 = vmatprep.subr.bf16.mxu0 %v6875_v5  ;;  %4426 = vmatprep.subr.bf16.mxu1 %v6875_v5  ;;  %v4563_v5 = vld [vmem:[%s7435_s6 + $0x34] ss:$8 sps:$4 sm:$0xff]  }
 0xc11   : > { %4365 = vmatprep.mubr.msk.bf16.mxu1 %vm439_vm0, %v4551_v34  ;;  %4345 = vmatprep.mubr.msk.bf16.mxu0 %vm439_vm0, %v4560_v38  ;;  %v7505_v34 = vld [vmem:[#allocation5_spill] sm:$0xff]  ;;  %v7506_v38 = vld [vmem:[#allocation4_spill] sm:$0xff] }
 0xc13   : > { %3695 = vmatpush1.bf16.msra.mxu0 %v6872_v56  ;;  %4438 = vmatpush1.bf16.msra.mxu1 %v6872_v56  ;;  %v4559_v56 = vld [vmem:[%s7435_s6 + $0x70] ss:$8 sps:$4 sm:$0xff]  }
 0xc14   : > { %3696 = vmatprep.subr.bf16.mxu0 %v6886_v29  ;;  %4427 = vmatprep.subr.bf16.mxu1 %v6886_v29  ;;  %v4566_v29 = vld [vmem:[%s7435_s6 + $0x80] ss:$8 sps:$4 sm:$0xff]  }
 0xc16   : > { %3507 = vmatmul.mubr.bf16.gmra.mxu1 %v4553_v15  ;;  %3377 = vmatmul.mubr.bf16.gmra.mxu0 %v4562_v63  ;;  %v4496_v15 = vpack.i.bf16 %v7506_v38, %v7505_v34 }
 0xc17   : > { %3697 = vmatpush1.bf16.msra.mxu0 %v6883_v8  ;;  %4439 = vmatpush1.bf16.msra.mxu1 %v6883_v8  ;;  %v4571_v8 = vld [vmem:[%s7435_s6 + $0xb4] ss:$8 sps:$4 sm:$0xff]  }
 0xc18   : > { %3698 = vmatprep.subr.bf16.mxu0 %v6891_v23  ;;  %4428 = vmatprep.subr.bf16.mxu1 %v6891_v23  ;;  %v4569_v23 = vld [vmem:[%s7435_s6 + $0xb0] ss:$8 sps:$4 sm:$0xff]  }
 0xc19   : > { %4366 = vmatprep.mubr.msk.bf16.mxu1 %vm439_vm0, %v4556_v43  ;;  %4346 = vmatprep.mubr.msk.bf16.mxu0 %vm439_vm0, %v4563_v5  ;;  %v7172_v43 = vpop.permute.xlu1 %3880  ;;  %v7507_v5 = vld [vmem:[#allocation3_spill] sm:$0xff] }
 0xc1b   : > { %3699 = vmatpush1.bf16.msra.mxu0 %v6899_v37  ;;  %4440 = vmatpush1.bf16.msra.mxu1 %v6899_v37  ;;  %v4574_v37 = vld [vmem:[%s7435_s6 + $0x90] ss:$8 sps:$4 sm:$0xff]  }
 0xc1c   : > { %3700 = vmatprep.subr.bf16.mxu0 %v6902_v50  ;;  %4429 = vmatprep.subr.bf16.mxu1 %v6902_v50  ;;  %v4575_v50 = vld [vmem:[%s7435_s6 + $0xa4] ss:$8 sps:$4 sm:$0xff]  }
 0xc1e   : > { %3517 = vmatmul.mubr.bf16.gmra.mxu1 %v4559_v56  ;;  %3387 = vmatmul.mubr.bf16.gmra.mxu0 %v4565_v36  ;;  %v7508_v56 = vld [vmem:[#allocation2_spill] sm:$0xff] }
 0xc1f   : > { %3701 = vmatpush1.bf16.msra.mxu0 %v6910_v60  ;;  %4441 = vmatpush1.bf16.msra.mxu1 %v6910_v60  ;;  %v4501_v36 = vpack.i.bf16 %v7508_v56, %v7507_v5 }
 0xc20   : > { %3702 = vmatprep.subr.bf16.mxu0 %v6913_v32  ;;  %4430 = vmatprep.subr.bf16.mxu1 %v6913_v32 }
 0xc21   : > { %4383 = vmatprep.mubr.msk.bf16.mxu0 %vm439_vm0, %v4568_v51  ;;  %4386 = vmatprep.mubr.msk.bf16.mxu1 %vm439_vm0, %v4571_v8  ;;  %v7178_v51 = vpop.permute.xlu0 %3885  ;;  %v7181_v8 = vpop.permute.xlu1 %3890 }
 0xc23   : > { %3703 = vmatpush1.bf16.msra.mxu0 %v6921_v3  ;;  %4442 = vmatpush1.bf16.msra.mxu1 %v6921_v3 }
 0xc24   : > { %3712 = vmatprep.subr.bf16.mxu0 %v6947_v41  ;;  %4431 = vmatprep.subr.bf16.mxu1 %v6947_v41 }
 0xc27   : > { %3713 = vmatpush2.bf16.msra.mxu0 %v6944_v55  ;;  %4443 = vmatpush2.bf16.msra.mxu1 %v6944_v55 }
 0xc28   : > { %3714 = vmatprep.subr.bf16.mxu0 %v6952_v17  ;;  %4432 = vmatprep.subr.bf16.mxu1 %v6952_v17 }
 0xc2b   : > { %3715 = vmatpush2.bf16.msra.mxu0 %v6959_v62  ;;  %4444 = vmatpush2.bf16.msra.mxu1 %v6959_v62 }
 0xc2c   : > { %3716 = vmatprep.subr.bf16.mxu0 %v6962_v6  ;;  %4433 = vmatprep.subr.bf16.mxu1 %v6962_v6 }
 0xc2f   : > { %3717 = vmatpush2.bf16.msra.mxu0 %v6969_v1  ;;  %4445 = vmatpush2.bf16.msra.mxu1 %v6969_v1 }
 0xc30   : > { %3718 = vmatprep.subr.bf16.mxu0 %v6977_v19  ;;  %4434 = vmatprep.subr.bf16.mxu1 %v6977_v19 }
 0xc33   : > { %3719 = vmatpush2.bf16.msra.mxu0 %v6974_v57  ;;  %4446 = vmatpush2.bf16.msra.mxu1 %v6974_v57 }
 0xc36   : > { %3721 = vmatmul.mubr.bf16.vlgmr.msra.gmra.mxu0 %v4566_v29  ;;  %3751 = vmatmul.mubr.bf16.vlgmr.msra.gmra.mxu1 %v4569_v23  ;;  %v7183_v29 = vpop.permute.xlu0 %3895  ;;  %v7185_v23 = vpop.permute.xlu1 %3900 }
 0xc37   : > { %4384 = vmatprep.mubr.msk.bf16.mxu0 %vm439_vm0, %v4572_v40  ;;  %7509 = vst [vmem:[#allocation17_spill] sm:$0xff] %v7185_v23 }
 0xc3a   : > { %v7187_v40 = vpop.permute.xlu0 %3905 }
 0xc3e   : > { %3731 = vmatmul.mubr.bf16.gmra.mxu0 %v4574_v37  ;;  %v7189_v37 = vpop.permute.xlu1 %3910 }
 0xc3f   : > { %4385 = vmatprep.mubr.msk.bf16.mxu0 %vm439_vm0, %v4575_v50  ;;  %7510 = vst [vmem:[#allocation16_spill] sm:$0xff] %v7189_v37  ;;  %v4468_v50 = vpop.permute.xlu0 %4467 }
 0xc46   : > { %3741 = vmatmul.mubr.bf16.gmra.mxu0 %v4577_v28  ;;  %v7191_v28 = vpop.permute.xlu1 %4472 }
 0xcc6   : > { %v3488_v60 = vpop.f32.mrf.mxu1  ;;  %v7107_v31 = vpop.f32.mrf.mxu0 }
 0xcc7   : > { %3543 = vrot.lane.b32.xlu0 %v3488_v60, %s4792_s23  ;;  %v7193_v60 = vpop.permute.xlu0 %4477 }
 0xcc8   : > { %v3490_v32 = vpop.f32.mrf.mxu1  ;;  %v7110_v3 = vpop.f32.mrf.mxu0  ;;  %v7515_v23 = vunpack.i.l.bf16 %v7193_v60 }
 0xcc9   : > { %3545 = vrot.lane.b32.xlu1 %v3490_v32, %s4792_s23  ;;  %v7195_v32 = vpop.permute.xlu1 %4482 }
 0xcca   : > { %v3492_v61 = vpop.f32.mrf.mxu1  ;;  %v7113_v16 = vpop.f32.mrf.mxu0 }
 0xccb   : > { %3547 = vrot.lane.b32.xlu0 %v3492_v61, %s4792_s23  ;;  %v7197_v61 = vpop.permute.xlu0 %4487 }
 0xccc   : > { %v3494_v21 = vpop.f32.mrf.mxu1  ;;  %v7116_v53 = vpop.f32.mrf.mxu0 }
 0xccd   : > { %3549 = vrot.lane.b32.xlu1 %v3494_v21, %s4792_s23  ;;  %v7199_v21 = vpop.permute.xlu1 %4492 }
 0xcce   : > { %v3498_v45 = vpop.f32.mrf.mxu1  ;;  %v7119_v59 = vpop.f32.mrf.mxu0 }
 0xccf   : > { %3551 = vrot.lane.b32.xlu0 %v3498_v45, %s4792_s23 }
 0xcd0   : > { %v3500_v58 = vpop.f32.mrf.mxu1  ;;  %v7122_v13 = vpop.f32.mrf.mxu0 }
 0xcd1   : > { %3553 = vrot.lane.b32.xlu1 %v3500_v58, %s4792_s23 }
 0xcd2   : > { %v3502_v30 = vpop.f32.mrf.mxu1  ;;  %v7125_v54 = vpop.f32.mrf.mxu0 }
 0xcd3   : > { %3555 = vrot.lane.b32.xlu0 %v3502_v30, %s4792_s23 }
 0xcd4   : > { %v3504_v14 = vpop.f32.mrf.mxu1  ;;  %v7128_v12 = vpop.f32.mrf.mxu0 }
 0xcd5   : > { %3557 = vrot.lane.b32.xlu1 %v3504_v14, %s4792_s23 }
 0xcd6   : > { %v3508_v42 = vpop.f32.mrf.mxu1  ;;  %v7132_v4 = vpop.f32.mrf.mxu0 }
 0xcd7   : > { %3559 = vrot.lane.b32.xlu0 %v3508_v42, %s4792_s23 }
 0xcd8   : > { %v3510_v52 = vpop.f32.mrf.mxu1  ;;  %v7136_v11 = vpop.f32.mrf.mxu0 }
 0xcd9   : > { %3561 = vrot.lane.b32.xlu1 %v3510_v52, %s4792_s23 }
 0xcda   : > { %v3512_v2 = vpop.f32.mrf.mxu1  ;;  %v7140_v46 = vpop.f32.mrf.mxu0 }
 0xcdb   : > { %3563 = vrot.lane.b32.xlu0 %v3512_v2, %s4792_s23 }
 0xcdc   : > { %v3514_v33 = vpop.f32.mrf.mxu1  ;;  %v7144_v7 = vpop.f32.mrf.mxu0 }
 0xcdd   : > { %3565 = vrot.lane.b32.xlu1 %v3514_v33, %s4792_s23 }
 0xcde   : > { %v3518_v24 = vpop.f32.mrf.mxu1  ;;  %v7147_v55 = vpop.f32.mrf.mxu0 }
 0xcdf   : > { %3567 = vrot.lane.b32.xlu0 %v3518_v24, %s4792_s23 }
 0xce0   : > { %v3520_v0 = vpop.f32.mrf.mxu1  ;;  %v7149_v41 = vpop.f32.mrf.mxu0 }
 0xce1   : > { %3569 = vrot.lane.b32.xlu1 %v3520_v0, %s4792_s23 }
 0xce2   : > { %v3522_v27 = vpop.f32.mrf.mxu1  ;;  %v7151_v17 = vpop.f32.mrf.mxu0 }
 0xce3   : > { %3571 = vrot.lane.b32.xlu0 %v3522_v27, %s4792_s23  ;;  %7504 = vst [vmem:[#allocation18_spill] sm:$0xff] %v7151_v17 }
 0xce4   : > { %v3524_v26 = vpop.f32.mrf.mxu1  ;;  %v7153_v49 = vpop.f32.mrf.mxu0 }
 0xce5   : > { %3573 = vrot.lane.b32.xlu1 %v3524_v26, %s4792_s23 }
 0xcf6   : > { %v3722_v48 = vpop.f32.mrf.mxu0  ;;  %v3752_v6 = vpop.f32.mrf.mxu1 }
 0xcf7   : > { %3777 = vrot.lane.b32.xlu0 %v3722_v48, %s4791_s20 }
 0xcf8   : > { %v3724_v62 = vpop.f32.mrf.mxu0  ;;  %v3754_v22 = vpop.f32.mrf.mxu1 }
 0xcf9   : > { %3779 = vrot.lane.b32.xlu1 %v3724_v62, %s4791_s20 }
 0xcfa   : > { %v3726_v10 = vpop.f32.mrf.mxu0  ;;  %v3756_v9 = vpop.f32.mrf.mxu1 }
 0xcfb   : > { %3801 = vrot.lane.b32.xlu0 %v3752_v6, %s4791_s20 }
 0xcfc   : > { %v3728_v1 = vpop.f32.mrf.mxu0  ;;  %v3758_v39 = vpop.f32.mrf.mxu1 }
 0xcfd   : > { %3803 = vrot.lane.b32.xlu1 %v3754_v22, %s4791_s20 }
 0xcfe   : > { %v3732_v44 = vpop.f32.mrf.mxu0 }
 0xcff   : > { %3781 = vrot.lane.b32.xlu0 %v3726_v10, %s4791_s20 }
 0xd00   : > { %v3734_v57 = vpop.f32.mrf.mxu0 }
 0xd01   : > { %3783 = vrot.lane.b32.xlu1 %v3728_v1, %s4791_s20 }
 0xd02   : > { %v3736_v19 = vpop.f32.mrf.mxu0 }
 0xd03   : > { %3805 = vrot.lane.b32.xlu0 %v3756_v9, %s4791_s20 }
 0xd04   : > { %v3738_v20 = vpop.f32.mrf.mxu0 }
 0xd05   : > { %3807 = vrot.lane.b32.xlu1 %v3758_v39, %s4791_s20  ;;  %v4470_v39 = vunpack.i.h.bf16 %v4468_v50 }
 0xd06   : > { %v3742_v47 = vpop.f32.mrf.mxu0 }
 0xd07   : > { %3785 = vrot.lane.b32.xlu0 %v3732_v44, %s4791_s20 }
 0xd08   : > { %v3744_v25 = vpop.f32.mrf.mxu0 }
 0xd09   : > { %3787 = vrot.lane.b32.xlu1 %v3734_v57, %s4791_s20 }
 0xd0a   : > { %v3746_v35 = vpop.f32.mrf.mxu0 }
 0xd0b   : > { %3789 = vrot.lane.b32.xlu0 %v3736_v19, %s4791_s20 }
 0xd0c   : > { %v3748_v63 = vpop.f32.mrf.mxu0 }
 0xd0d   : > { %3791 = vrot.lane.b32.xlu1 %v3738_v20, %s4791_s20  ;;  %v4469_v20 = vunpack.i.l.bf16 %v4468_v50 }
 0xd0f   : > { %3793 = vrot.lane.b32.xlu0 %v3742_v47, %s4791_s20 }
 0xd11   : > { %3795 = vrot.lane.b32.xlu1 %v3744_v25, %s4791_s20  ;;  %v7511_v25 = vld [vmem:[#allocation19_spill] sm:$0xff] }
 0xd13   : > { %3797 = vrot.lane.b32.xlu0 %v3746_v35, %s4791_s20 }
 0xd15   : > { %3799 = vrot.lane.b32.xlu1 %v3748_v63, %s4791_s20 }
 0xd17   : > { %4497 = vrot.lane.b32.xlu0 %v4496_v15, %s4792_s23 }
 0xd19   : > { %4502 = vrot.lane.b32.xlu1 %v4501_v36, %s4792_s23 }
 0xd39   : > { %v3544_v45 = vpop.permute.xlu0 %3543 }
 0xd3b   : > { %v3546_v58 = vpop.permute.xlu1 %3545 }
 0xd3c   : > { %v3575_v22 = vsel %vm1624_vm4, %v3544_v45, %v3546_v58  ;;  %v3609_v9 = vadd.f32 %v3546_v58, %v7110_v3 }
 0xd3d   : > { %v7201_v30 = vpop.permute.xlu0 %3547  ;;  %v3608_v57 = vadd.f32 %v3575_v22, %v7107_v31 }
 0xd3f   : > { %v3550_v14 = vpop.permute.xlu1 %3549 }
 0xd41   : > { %v7203_v42 = vpop.permute.xlu0 %3551 }
 0xd43   : > { %v7205_v52 = vpop.permute.xlu1 %3553 }
 0xd45   : > { %v7207_v2 = vpop.permute.xlu0 %3555 }
 0xd47   : > { %v7209_v33 = vpop.permute.xlu1 %3557 }
 0xd49   : > { %v7211_v24 = vpop.permute.xlu0 %3559 }
 0xd4b   : > { %v7213_v0 = vpop.permute.xlu1 %3561 }
 0xd4d   : > { %v7215_v27 = vpop.permute.xlu0 %3563 }
 0xd4f   : > { %v7217_v26 = vpop.permute.xlu1 %3565 }
 0xd51   : > { %v3568_v48 = vpop.permute.xlu0 %3567 }
 0xd53   : > { %v3570_v62 = vpop.permute.xlu1 %3569 }
 0xd55   : > { %v7219_v6 = vpop.permute.xlu0 %3571 }
 0xd57   : > { %v7221_v10 = vpop.permute.xlu1 %3573 }
 0xd69   : > { %v3778_v1 = vpop.permute.xlu0 %3777 }
 0xd6a   : > { %v3849_v44 = vadd.f32 %v3778_v1, %v3544_v45  ;;  %v3985_v45 = vsel %vm1624_vm4, %v4469_v20, %v4470_v39 }
 0xd6b   : > { %v3780_v19 = vpop.permute.xlu1 %3779 }
 0xd6c   : > { %v3809_v47 = vsel %vm1862_vm5, %v3778_v1, %v3780_v19  ;;  %v3810_v35 = vsel %vm1862_vm5, %v3780_v19, %v7511_v25  ;;  %v3913_v34 = vadd.f32 %v3876_v18, %v3849_v44  ;;  %v4475_v19 = vunpack.i.h.bf16 %v7191_v28 }
 0xd6d   : > { %v3850_v38 = vadd.f32 %v3809_v47, %v3608_v57  ;;  %v3851_v15 = vadd.f32 %v3810_v35, %v3609_v9  ;;  %v3802_v63 = vpop.permute.xlu0 %3801 }
 0xd6e   : > { %v4017_v3 = vadd.f32 %v4469_v20, %v3913_v34  ;;  %v3577_v34 = vsel %vm1624_vm4, %v7203_v42, %v7205_v52 }
 0xd6f   : > { %v3914_v5 = vadd.f32 %v3876_v18, %v3850_v38  ;;  %v3915_v56 = vadd.f32 %v3876_v18, %v3851_v15  ;;  %v3804_v36 = vpop.permute.xlu1 %3803  ;;  %v3581_v38 = vsel %vm1624_vm4, %v3568_v48, %v3570_v62 }
 0xd70   : > { %v3822_v15 = vsel %vm1862_vm5, %v3804_v36, %v7511_v25  ;;  %v3821_v35 = vsel %vm1862_vm5, %v3802_v63, %v3804_v36  ;;  %v3626_v20 = vadd.f32 %v3581_v38, %v7147_v55  ;;  %v3578_v55 = vsel %vm1624_vm4, %v7207_v2, %v7209_v33 }
 0xd71   : > { %v4018_v58 = vadd.f32 %v3985_v45, %v3914_v5  ;;  %v4019_v31 = vadd.f32 %v4470_v39, %v3915_v56  ;;  %v3782_v22 = vpop.permute.xlu0 %3781  ;;  %v7464_v39 = vunpack.i.l.bf16 %v7191_v28  ;;  %v3612_v56 = vadd.f32 %v3550_v14, %v7116_v53 }
 0xd72   : > { %v3627_v45 = vadd.f32 %v3570_v62, %v7149_v41  ;;  %v3867_v53 = vadd.f32 %v3802_v63, %v3568_v48  ;;  %v4495_v63 = vunpack.i.h.bf16 %v7199_v21  ;;  %v3868_v38 = vadd.f32 %v3821_v35, %v3626_v20 }
 0xd73   : > { %v4408_v37 = vpack.c.bf16 %v4019_v31, %v4019_v31  ;;  %v3784_v50 = vpop.permute.xlu1 %3783  ;;  %v4407_v17 = vpack.c.bf16 %v4018_v58, %v4017_v3  ;;  %v3986_v58 = vsel %vm1624_vm4, %v7464_v39, %v4475_v19  ;;  %v7513_v39 = vunpack.i.l.bf16 %v7195_v32 }
 0xd74   : > { %v3812_v5 = vsel %vm1862_vm5, %v3784_v50, %v7511_v25  ;;  %v3811_v3 = vsel %vm1862_vm5, %v3782_v22, %v3784_v50  ;;  %v7512_v50 = vunpack.i.h.bf16 %v7195_v32 }
 0xd75   : > { %v7230_v1 = vpop.permute.xlu0 %3805  ;;  %4107 = vrot.lane.b32.xlu1 %v4408_v37, %s4793_s30  ;;  %4105 = vrot.lane.b32.xlu0 %v4407_v17, %s4793_s30  ;;  %v3576_v37 = vsel %vm1624_vm4, %v7201_v30, %v3550_v14  ;;  %v3869_v14 = vadd.f32 %v3822_v15, %v3627_v45  ;;  %v3854_v41 = vadd.f32 %v3812_v5, %v3612_v56 }
 0xd76   : > { %v3611_v31 = vadd.f32 %v3576_v37, %v7113_v16  ;;  %v7272_v16 = vsel %vm1624_vm4, %v7513_v39, %v7512_v50  ;;  %v7514_v37 = vunpack.i.h.bf16 %v7193_v60  ;;  %v3852_v15 = vadd.f32 %v3782_v22, %v7201_v30 }
 0xd77   : > { %v7234_v44 = vpop.permute.xlu1 %3807  ;;  %v3615_v5 = vadd.f32 %v7205_v52, %v7122_v13  ;;  %v3614_v56 = vadd.f32 %v3577_v34, %v7119_v59  ;;  %v3933_v20 = vadd.f32 %v7187_v40, %v3869_v14  ;;  %v3918_v30 = vadd.f32 %v7172_v43, %v3854_v41 }
 0xd78   : > { %v3987_v36 = vsel %vm1624_vm4, %v7515_v23, %v7514_v37  ;;  %v3853_v48 = vadd.f32 %v3811_v3, %v3611_v31  ;;  %v3618_v23 = vadd.f32 %v7209_v33, %v7128_v12  ;;  %v3617_v3 = vadd.f32 %v3578_v55, %v7125_v54 }
 0xd79   : > { %v3786_v9 = vpop.permute.xlu0 %3785  ;;  %v3931_v31 = vadd.f32 %v7187_v40, %v3867_v53  ;;  %v3932_v34 = vadd.f32 %v7187_v40, %v3868_v38  ;;  %v3916_v12 = vadd.f32 %v7172_v43, %v3852_v15  ;;  %v3579_v37 = vsel %vm1624_vm4, %v7211_v24, %v7213_v0 }
 0xd7a   : > { %v3917_v35 = vadd.f32 %v7172_v43, %v3853_v48  ;;  %v4022_v55 = vadd.f32 %v4475_v19, %v3918_v30  ;;  %v3855_v40 = vadd.f32 %v3786_v9, %v7203_v42  ;;  %v3620_v19 = vadd.f32 %v3579_v37, %v7132_v4 }
 0xd7b   : > { %v3788_v57 = vpop.permute.xlu1 %3787  ;;  %v7516_v42 = vunpack.i.l.bf16 %v7191_v28  ;;  %v7517_v4 = vunpack.i.h.bf16 %v7193_v60 }
 0xd7c   : > { %v3814_v39 = vsel %vm1862_vm5, %v3788_v57, %v7511_v25  ;;  %v3813_v45 = vsel %vm1862_vm5, %v3786_v9, %v3788_v57  ;;  %v4021_v43 = vadd.f32 %v3986_v58, %v3917_v35  ;;  %v3919_v30 = vadd.f32 %v7178_v51, %v3855_v40 }
 0xd7d   : > { %v7236_v18 = vpop.permute.xlu0 %3789  ;;  %v3857_v50 = vadd.f32 %v3814_v39, %v3615_v5  ;;  %v3856_v33 = vadd.f32 %v3813_v45, %v3614_v56  ;;  %v4020_v9 = vadd.f32 %v7516_v42, %v3916_v12  ;;  %v7518_v12 = vunpack.i.l.bf16 %v7193_v60 }
 0xd7e   : > { %v7520_v40 = vunpack.i.l.bf16 %v7195_v32 }
 0xd7f   : > { %v3792_v47 = vpop.permute.xlu1 %3791  ;;  %v3921_v38 = vadd.f32 %v7178_v51, %v3857_v50  ;;  %v3920_v5 = vadd.f32 %v7178_v51, %v3856_v33  ;;  %v4409_v35 = vpack.c.bf16 %v4021_v43, %v4020_v9  ;;  %v4490_v51 = vunpack.i.h.bf16 %v7197_v61 }
 0xd80   : > { %v3816_v54 = vsel %vm1862_vm5, %v3792_v47, %v7511_v25  ;;  %v3815_v57 = vsel %vm1862_vm5, %v7236_v18, %v3792_v47  ;;  %v4023_v33 = vadd.f32 %v7518_v12, %v3919_v30 }
 0xd81   : > { %v7245_v17 = vpop.permute.xlu0 %3793  ;;  %v3860_v15 = vadd.f32 %v3816_v54, %v3618_v23  ;;  %v3859_v47 = vadd.f32 %v3815_v57, %v3617_v3  ;;  %v3580_v3 = vsel %vm1624_vm4, %v7215_v27, %v7217_v26  ;;  %v4025_v28 = vadd.f32 %v7517_v4, %v3921_v38 }
 0xd82   : > { %v4024_v50 = vadd.f32 %v3987_v36, %v3920_v5  ;;  %v3623_v36 = vadd.f32 %v3580_v3, %v7140_v46  ;;  %v3861_v57 = vadd.f32 %v7245_v17, %v7211_v24  ;;  %v3630_v24 = vadd.f32 %v7221_v10, %v7153_v49  ;;  %v7521_v5 = vld [vmem:[#allocation17_spill] sm:$0xff] }
 0xd83   : > { %v3796_v13 = vpop.permute.xlu1 %3795  ;;  %v3823_v49 = vsel %vm1862_vm5, %v7230_v1, %v7234_v44 }
 0xd84   : > { %v3818_v56 = vsel %vm1862_vm5, %v3796_v13, %v7511_v25  ;;  %v3817_v58 = vsel %vm1862_vm5, %v7245_v17, %v3796_v13  ;;  %v3923_v13 = vadd.f32 %v7181_v8, %v3859_v47  ;;  %v4411_v37 = vpack.c.bf16 %v4024_v50, %v4023_v33 }
 0xd85   : > { %v7265_v62 = vpop.permute.xlu0 %3797  ;;  %v3582_v17 = vsel %vm1624_vm4, %v7219_v6, %v7221_v10  ;;  %v3925_v43 = vadd.f32 %v7183_v29, %v3861_v57 }
 0xd86   : > { %v3864_v38 = vadd.f32 %v7265_v62, %v7215_v27 }
 0xd87   : > { %v3800_v23 = vpop.permute.xlu1 %3799 }
 0xd88   : > { %v3928_v9 = vadd.f32 %v7521_v5, %v3864_v38 }
 0xd89   : > { %v4498_v22 = vpop.permute.xlu0 %4497 }
 0xd8a   : > { %v4500_v52 = vunpack.i.h.bf16 %v4498_v22  ;;  %v4499_v59 = vunpack.i.l.bf16 %v4498_v22 }
 0xd8c   : > { %v4037_v53 = vadd.f32 %v4500_v52, %v3933_v20  ;;  %v3991_v14 = vsel %vm1624_vm4, %v4499_v59, %v4500_v52  ;;  %v4035_v41 = vadd.f32 %v4499_v59, %v3931_v31  ;;  %v3621_v31 = vadd.f32 %v7213_v0, %v7136_v11 }
 0xd8d   : > { %v4036_v48 = vadd.f32 %v3991_v14, %v3932_v34  ;;  %v4410_v20 = vpack.c.bf16 %v4022_v55, %v4022_v55  ;;  %v3858_v11 = vadd.f32 %v7236_v18, %v7207_v2  ;;  %v3924_v0 = vadd.f32 %v7181_v8, %v3860_v15  ;;  %v4503_v15 = vpop.permute.xlu1 %4502 }
 0xd8e   : > { %v4420_v39 = vpack.c.bf16 %v4037_v53, %v4037_v53  ;;  %v3863_v22 = vadd.f32 %v3818_v56, %v3621_v31  ;;  %v3862_v52 = vadd.f32 %v3817_v58, %v3620_v19  ;;  %v3820_v59 = vsel %vm1862_vm5, %v3800_v23, %v7511_v25 }
 0xd8f   : > { %v4419_v45 = vpack.c.bf16 %v4036_v48, %v4035_v41  ;;  %v4489_v2 = vunpack.i.l.bf16 %v7197_v61  ;;  %v3624_v18 = vadd.f32 %v7217_v26, %v7144_v7  ;;  %v3819_v34 = vsel %vm1862_vm5, %v7265_v62, %v3800_v23 }
 0xd90   : > { %4131 = vrot.lane.b32.xlu1 %v4420_v39, %s4793_s30  ;;  %v3922_v54 = vadd.f32 %v7181_v8, %v3858_v11  ;;  %v4412_v61 = vpack.c.bf16 %v4025_v28, %v4025_v28  ;;  %v7519_v7 = vunpack.i.h.bf16 %v7195_v32  ;;  %v3927_v53 = vadd.f32 %v7183_v29, %v3863_v22  ;;  %v7523_v11 = vld [vmem:[#allocation16_spill] sm:$0xff] }
 0xd91   : > { %4129 = vrot.lane.b32.xlu0 %v4419_v45, %s4793_s30  ;;  %v3866_v14 = vadd.f32 %v3820_v59, %v3624_v18  ;;  %v4027_v41 = vadd.f32 %v7272_v16, %v3923_v13  ;;  %v3926_v46 = vadd.f32 %v7183_v29, %v3862_v52  ;;  %v3865_v60 = vadd.f32 %v3819_v34, %v3623_v36 }
 0xd92   : > { %v4028_v26 = vadd.f32 %v7519_v7, %v3924_v0  ;;  %v4494_v8 = vunpack.i.l.bf16 %v7199_v21  ;;  %v3989_v55 = vsel %vm1624_vm4, %v4489_v2, %v4490_v51  ;;  %v3824_v16 = vsel %vm1862_vm5, %v7234_v44, %v7511_v25  ;;  %v7522_v25 = vld [vmem:[#allocation18_spill] sm:$0xff] }
 0xd93   : > { %v4026_v48 = vadd.f32 %v7520_v40, %v3922_v54  ;;  %v4031_v39 = vadd.f32 %v4490_v51, %v3927_v53  ;;  %v3930_v47 = vadd.f32 %v7521_v5, %v3866_v14  ;;  %v3629_v56 = vadd.f32 %v3582_v17, %v7522_v25 }
 0xd94   : > { %4111 = vrot.lane.b32.xlu1 %v4410_v20, %s4793_s30  ;;  %v4414_v10 = vpack.c.bf16 %v4028_v26, %v4028_v26  ;;  %v4030_v32 = vadd.f32 %v3989_v55, %v3926_v46  ;;  %v3929_v45 = vadd.f32 %v7521_v5, %v3865_v60  ;;  %v3872_v31 = vadd.f32 %v3824_v16, %v3630_v24 }
 0xd95   : > { %4109 = vrot.lane.b32.xlu0 %v4409_v35, %s4793_s30  ;;  %v4413_v29 = vpack.c.bf16 %v4027_v41, %v4026_v48  ;;  %v4505_v19 = vunpack.i.h.bf16 %v4503_v15  ;;  %v4504_v27 = vunpack.i.l.bf16 %v4503_v15  ;;  %v3870_v62 = vadd.f32 %v7230_v1, %v7219_v6 }
 0xd96   : > { %v3871_v42 = vadd.f32 %v3823_v49, %v3629_v56  ;;  %v4029_v44 = vadd.f32 %v4489_v2, %v3925_v43  ;;  %v3990_v58 = vsel %vm1624_vm4, %v4494_v8, %v4495_v63  ;;  %v4416_v23 = vpack.c.bf16 %v4031_v39, %v4031_v39 }
 0xd97   : > { %v4034_v3 = vadd.f32 %v4495_v63, %v3930_v47  ;;  %v4033_v20 = vadd.f32 %v3990_v58, %v3929_v45  ;;  %v3936_v4 = vadd.f32 %v7523_v11, %v3872_v31  ;;  %v3992_v6 = vsel %vm1624_vm4, %v4504_v27, %v4505_v19 }
 0xd98   : > { %4115 = vrot.lane.b32.xlu1 %v4412_v61, %s4793_s30  ;;  %v4415_v30 = vpack.c.bf16 %v4030_v32, %v4029_v44  ;;  %v3934_v1 = vadd.f32 %v7523_v11, %v3870_v62  ;;  %v3935_v28 = vadd.f32 %v7523_v11, %v3871_v42  ;;  %v4032_v0 = vadd.f32 %v4494_v8, %v3928_v9 }
 0xd99   : > { %4113 = vrot.lane.b32.xlu0 %v4411_v37, %s4793_s30  ;;  %v4418_v22 = vpack.c.bf16 %v4034_v3, %v4034_v3  ;;  %v4040_v35 = vadd.f32 %v4505_v19, %v3936_v4 }
 0xd9a   : > { %v4038_v21 = vadd.f32 %v4504_v27, %v3934_v1  ;;  %v4039_v63 = vadd.f32 %v3992_v6, %v3935_v28  ;;  %v4417_v50 = vpack.c.bf16 %v4033_v20, %v4032_v0 }
 0xd9b   : > { %v4422_v13 = vpack.c.bf16 %v4040_v35, %v4040_v35 }
 0xd9c   : > { %4119 = vrot.lane.b32.xlu1 %v4414_v10, %s4793_s30  ;;  %v4421_v52 = vpack.c.bf16 %v4039_v63, %v4038_v21 }
 0xd9d   : > { %4117 = vrot.lane.b32.xlu0 %v4413_v29, %s4793_s30 }
 0xda0   : > { %4123 = vrot.lane.b32.xlu1 %v4416_v23, %s4793_s30 }
 0xda1   : > { %4121 = vrot.lane.b32.xlu0 %v4415_v30, %s4793_s30 }
 0xda4   : > { %4127 = vrot.lane.b32.xlu1 %v4418_v22, %s4793_s30 }
 0xda5   : > { %4125 = vrot.lane.b32.xlu0 %v4417_v50, %s4793_s30 }
 0xda8   : > { %4135 = vrot.lane.b32.xlu1 %v4422_v13, %s4793_s30 }
 0xda9   : > { %4133 = vrot.lane.b32.xlu0 %v4421_v52, %s4793_s30 }
 0xde7   : > { %v4108_v59 = vpop.permute.xlu1 %4107  ;;  %v4106_v51 = vpop.permute.xlu0 %4105 }
 0xde8   : > { %v4138_v2 = vrot.slane %v4108_v59, 4  ;;  %v4137_v18 = vrot.slane %v4106_v51, 4 }
 0xdea   : > { %v4154_v34 = vsel %vm4153_vm8, %v4137_v18, %v4138_v2 }
 0xdeb   : > { %v4155_v36 = vsel %vm2079_vm6, %v4106_v51, %v4154_v34 }
 0xdec   : > { %4178 = vst [vmem:[%s7400_s16] sm:$0xff] %v4155_v36 }
 0xe02   : > { %v4132_v12 = vpop.permute.xlu1 %4131 }
 0xe03   : > { %v4150_v33 = vrot.slane %v4132_v12, 4  ;;  %v4130_v54 = vpop.permute.xlu0 %4129 }
 0xe04   : > { %v4149_v57 = vrot.slane %v4130_v54, 4 }
 0xe06   : > { %v4166_v61 = vsel %vm4153_vm8, %v4149_v57, %v4150_v33  ;;  %v4112_v7 = vpop.permute.xlu1 %4111 }
 0xe07   : > { %v4167_v26 = vsel %vm2079_vm6, %v4130_v54, %v4166_v61  ;;  %v4140_v53 = vrot.slane %v4112_v7, 4  ;;  %v4110_v14 = vpop.permute.xlu0 %4109 }
 0xe08   : > { %4184 = vst [vmem:[%s7400_s16 + $0x30] sm:$0xff] %v4167_v26  ;;  %v4139_v41 = vrot.slane %v4110_v14, 4 }
 0xe0a   : > { %v4156_v46 = vsel %vm4153_vm8, %v4139_v41, %v4140_v53  ;;  %v4116_v60 = vpop.permute.xlu1 %4115 }
 0xe0b   : > { %v4157_v37 = vsel %vm2079_vm6, %v4110_v14, %v4156_v46  ;;  %v4142_v8 = vrot.slane %v4116_v60, 4  ;;  %v4114_v55 = vpop.permute.xlu0 %4113 }
 0xe0c   : > { %4179 = vst [vmem:[%s7400_s16 + $0x8] sm:$0xff] %v4157_v37  ;;  %v4141_v24 = vrot.slane %v4114_v55, 4 }
 0xe0e   : > { %v4158_v17 = vsel %vm4153_vm8, %v4141_v24, %v4142_v8  ;;  %v4120_v16 = vpop.permute.xlu1 %4119 }
 0xe0f   : > { %v4159_v40 = vsel %vm2079_vm6, %v4114_v55, %v4158_v17  ;;  %v4144_v48 = vrot.slane %v4120_v16, 4  ;;  %v4118_v43 = vpop.permute.xlu0 %4117 }
 0xe10   : > { %4180 = vst [vmem:[%s7400_s16 + $0x10] sm:$0xff] %v4159_v40  ;;  %v4143_v38 = vrot.slane %v4118_v43, 4 }
 0xe12   : > { %v4160_v15 = vsel %vm4153_vm8, %v4143_v38, %v4144_v48  ;;  %v4124_v49 = vpop.permute.xlu1 %4123 }
 0xe13   : > { %v4161_v10 = vsel %vm2079_vm6, %v4118_v43, %v4160_v15  ;;  %v4146_v39 = vrot.slane %v4124_v49, 4  ;;  %v4122_v5 = vpop.permute.xlu0 %4121 }
 0xe14   : > { %4181 = vst [vmem:[%s7400_s16 + $0x18] sm:$0xff] %v4161_v10  ;;  %v4145_v47 = vrot.slane %v4122_v5, 4 }
 0xe16   : > { %v4162_v25 = vsel %vm4153_vm8, %v4145_v47, %v4146_v39  ;;  %v4128_v56 = vpop.permute.xlu1 %4127 }
 0xe17   : > { %v4163_v32 = vsel %vm2079_vm6, %v4122_v5, %v4162_v25  ;;  %v4148_v45 = vrot.slane %v4128_v56, 4  ;;  %v4126_v29 = vpop.permute.xlu0 %4125 }
 0xe18   : > { %4182 = vst [vmem:[%s7400_s16 + $0x20] sm:$0xff] %v4163_v32  ;;  %v4147_v31 = vrot.slane %v4126_v29, 4 }
 0xe1a   : > { %v4164_v19 = vsel %vm4153_vm8, %v4147_v31, %v4148_v45  ;;  %v4136_v27 = vpop.permute.xlu1 %4135 }
 0xe1b   : > { %v4165_v62 = vsel %vm2079_vm6, %v4126_v29, %v4164_v19  ;;  %v4152_v42 = vrot.slane %v4136_v27, 4  ;;  %v4134_v44 = vpop.permute.xlu0 %4133 }
 0xe1c   : > { %4183 = vst [vmem:[%s7400_s16 + $0x28] sm:$0xff] %v4165_v62  ;;  %v4151_v9 = vrot.slane %v4134_v44, 4 }
 0xe1e   : > { %v4168_v58 = vsel %vm4153_vm8, %v4151_v9, %v4152_v42 }
 0xe1f   : > { %v4169_v23 = vsel %vm2079_vm6, %v4134_v44, %v4168_v58 }
 0xe20   : > { %4185 = vst [vmem:[%s7400_s16 + $0x38] sm:$0xff] %v4169_v23 }
 0xe21 PF: > { %s21_s17 = sadd.s32 1, %s4784_s17  }
 0xe22   : > { %p18_p4 = scmp.ge.s32.totalorder %s21_s17, 4  }
 0xe24   :  { %20 = sbr.rel (!%p18_p4) target bundleno = 1 (0x1), region = 99 }

</bundles_post_ra>
